<compile_context>
chip_gen: v5e
topology: v5e:2x2
jax: 0.10.0
libtpu: 0.0.40
codegen_flags: <defaults>
</compile_context>

<pallas_src>
import numpy as np
import jax
import jax.numpy as jnp
from jax.experimental import pallas as pl
from jax.experimental.pallas import tpu as pltpu


# ----------------------------------------------------------------------------
# Architecture constants (scaled-down Sei): 17 conv layers, (K, dilation, padding).
# ----------------------------------------------------------------------------
CONV_CFG = (
    (9, 1, 4), (9, 1, 4), (9, 1, 4), (9, 1, 4),                    # lconv1_0/1, conv1_0/1
    (9, 1, 4), (9, 1, 4), (9, 1, 4), (9, 1, 4),                    # lconv2_0/1, conv2_0/1
    (9, 1, 4), (9, 1, 4), (9, 1, 4), (9, 1, 4),                    # lconv3_0/1, conv3_0/1
    (5, 2, 4), (5, 4, 8), (5, 8, 16), (5, 16, 32), (5, 25, 50),    # dconv1..5
)
NCONV = len(CONV_CFG)
CIN_PAD = 8   # network input channels (4) zero-padded to one sublane tile

CONV_NAMES = (
    ('lconv1_w0', 'lconv1_b0'), ('lconv1_w1', 'lconv1_b1'),
    ('conv1_w0', 'conv1_b0'), ('conv1_w1', 'conv1_b1'),
    ('lconv2_w0', 'lconv2_b0'), ('lconv2_w1', 'lconv2_b1'),
    ('conv2_w0', 'conv2_b0'), ('conv2_w1', 'conv2_b1'),
    ('lconv3_w0', 'lconv3_b0'), ('lconv3_w1', 'lconv3_b1'),
    ('conv3_w0', 'conv3_b0'), ('conv3_w1', 'conv3_b1'),
    ('dconv1_w', 'dconv1_b'), ('dconv2_w', 'dconv2_b'), ('dconv3_w', 'dconv3_b'),
    ('dconv4_w', 'dconv4_b'), ('dconv5_w', 'dconv5_b'),
)


# ----------------------------------------------------------------------------
# Deterministic parameter construction (synthetic init; shapes follow Sei.__init__,
# scaled down so the example runs at small sizes).
# ----------------------------------------------------------------------------
def _bspline_basis(x, knots, degree):
    """Cox–de Boor B-spline basis (replaces scipy.interpolate.splev used by `bs`)."""
    x = np.asarray(x, dtype=np.float64)
    knots = np.asarray(knots, dtype=np.float64)
    n_basis = len(knots) - degree - 1
    B = np.zeros((len(x), len(knots) - 1))
    for i in range(len(knots) - 1):
        B[:, i] = ((x >= knots[i]) & (x < knots[i + 1])).astype(np.float64)
    xmax = knots.max()
    for i in range(len(knots) - 2, -1, -1):
        if knots[i] < knots[i + 1]:
            B[x == xmax, i] = 1.0
            break
    for d in range(1, degree + 1):
        Bn = np.zeros((len(x), len(knots) - d - 1))
        for i in range(len(knots) - d - 1):
            term = np.zeros(len(x))
            if knots[i + d] != knots[i]:
                term += (x - knots[i]) / (knots[i + d] - knots[i]) * B[:, i]
            if knots[i + d + 1] != knots[i + 1]:
                term += (knots[i + d + 1] - x) / (knots[i + d + 1] - knots[i + 1]) * B[:, i + 1]
            Bn[:, i] = term
        B = Bn
    return B[:, :n_basis]


def spline_basis(n, df, degree=3):
    """Equivalent of spline_factory(n, df, log=False) with intercept=True."""
    order = degree + 1
    x = np.arange(n, dtype=np.float64)
    n_inner = df - order  # intercept=True
    inner = (np.percentile(x, 100 * np.linspace(0, 1, n_inner + 2)[1:-1])
             if n_inner > 0 else np.array([]))
    all_knots = np.concatenate(([x.min(), x.max()] * order, inner))
    all_knots.sort()
    return _bspline_basis(x, all_knots, degree).astype(np.float32)


def init_params(key, cin=4, c1=16, c2=24, c3=32, spline_df=8, l_pooled=16, n_feat=48):
    keys = iter(jax.random.split(key, 40))

    def conv_p(ci, co, k):
        w = jax.random.normal(next(keys), (k, ci, co), jnp.float32) / np.sqrt(ci * k)
        b = jax.random.normal(next(keys), (co,), jnp.float32) * 0.01
        return w, b

    p = {}
    p['lconv1_w0'], p['lconv1_b0'] = conv_p(cin, c1, 9)
    p['lconv1_w1'], p['lconv1_b1'] = conv_p(c1, c1, 9)
    p['conv1_w0'], p['conv1_b0'] = conv_p(c1, c1, 9)
    p['conv1_w1'], p['conv1_b1'] = conv_p(c1, c1, 9)
    p['lconv2_w0'], p['lconv2_b0'] = conv_p(c1, c2, 9)
    p['lconv2_w1'], p['lconv2_b1'] = conv_p(c2, c2, 9)
    p['conv2_w0'], p['conv2_b0'] = conv_p(c2, c2, 9)
    p['conv2_w1'], p['conv2_b1'] = conv_p(c2, c2, 9)
    p['lconv3_w0'], p['lconv3_b0'] = conv_p(c2, c3, 9)
    p['lconv3_w1'], p['lconv3_b1'] = conv_p(c3, c3, 9)
    p['conv3_w0'], p['conv3_b0'] = conv_p(c3, c3, 9)
    p['conv3_w1'], p['conv3_b1'] = conv_p(c3, c3, 9)
    for i in range(1, 6):
        p[f'dconv{i}_w'], p[f'dconv{i}_b'] = conv_p(c3, c3, 5)
    p['spline'] = jnp.asarray(spline_basis(l_pooled, spline_df))
    din = c3 * spline_df
    p['fc1_w'] = jax.random.normal(next(keys), (din, n_feat), jnp.float32) / np.sqrt(din)
    p['fc1_b'] = jax.random.normal(next(keys), (n_feat,), jnp.float32) * 0.01
    p['fc2_w'] = jax.random.normal(next(keys), (n_feat, n_feat), jnp.float32) / np.sqrt(n_feat)
    p['fc2_b'] = jax.random.normal(next(keys), (n_feat,), jnp.float32) * 0.01
    return p


# ----------------------------------------------------------------------------
# One-time host-side packing of the params into the fused-kernel layout.
# ----------------------------------------------------------------------------
def _pool_select(n):
    """(n, n//4) 0/1 matrix selecting every 4th column: S[4j, j] = 1."""
    s = np.zeros((n, n // 4), np.float32)
    s[np.arange(0, n, 4), np.arange(n // 4)] = 1.0
    return jnp.asarray(s)


def pack_params(p, seq_len):
    conv_w, conv_b = [], []
    for idx, (wn, bn) in enumerate(CONV_NAMES):
        w = np.asarray(p[wn])                              # (K, Cin, Cout)
        if idx == 0:                                       # pad Cin 4 -> 8 (sublane tile)
            w = np.pad(w, ((0, 0), (0, CIN_PAD - w.shape[1]), (0, 0)))
        k_sz, ci, co = w.shape
        conv_w.append(jnp.asarray(w.transpose(2, 0, 1).reshape(co, k_sz * ci)))  # (Cout, K*Cin)
        conv_b.append(jnp.asarray(np.asarray(p[bn]).reshape(co, 1)))
    c3 = conv_w[-1].shape[0]
    spline = np.asarray(p['spline'])                       # (Lf, df)
    df = spline.shape[1]
    fc1_w = np.asarray(p['fc1_w'])                         # (c3*df, nf)
    nf = fc1_w.shape[1]
    return dict(
        conv_w=conv_w, conv_b=conv_b,
        pool1=_pool_select(seq_len), pool2=_pool_select(seq_len // 4),
        spline=jnp.asarray(spline),
        fc1_w=jnp.asarray(fc1_w.reshape(c3, df, nf).transpose(1, 0, 2)),  # (df, c3, nf)
        fc1_b=jnp.asarray(np.asarray(p['fc1_b']).reshape(1, nf)),
        fc2_w=jnp.asarray(p['fc2_w']),
        fc2_b=jnp.asarray(np.asarray(p['fc2_b']).reshape(1, nf)),
    )


# ----------------------------------------------------------------------------
# Fused Pallas kernel: one grid step = full Sei forward for one batch element.
# ----------------------------------------------------------------------------
def _sei_kernel(*refs):
    x_ref = refs[0]
    conv_refs = refs[1:1 + 2 * NCONV]
    p1_ref, p2_ref, spl_ref, w1_ref, b1_ref, w2_ref, b2_ref = refs[1 + 2 * NCONV:-1]
    o_ref = refs[-1]

    def conv(x, i, relu=False):
        """One Conv1d as a single MXU matmul (im2col over the K dilated taps)."""
        k_sz, dil, pad = CONV_CFG[i]
        w_ref, b_ref = conv_refs[2 * i], conv_refs[2 * i + 1]
        c_in, length = x.shape
        zpad = jnp.zeros((c_in, pad), jnp.float32)
        xp = jnp.concatenate([zpad, x, zpad], axis=1)                 # (Cin, L + 2*pad)
        taps = [xp[:, k * dil:k * dil + length] for k in range(k_sz)]
        rhs = jnp.concatenate(taps, axis=0)                           # (K*Cin, L)
        y = jax.lax.dot_general(w_ref[...], rhs, (((1,), (0,)), ((), ())),
                                preferred_element_type=jnp.float32)
        y = y + b_ref[...]                                            # (Cout, 1) bias bcast
        return jnp.maximum(y, 0.0) if relu else y

    def maxpool4(x, sel_ref):
        """MaxPool1d(kernel=4, stride=4) along the lane (length) axis."""
        m1 = jnp.maximum(x, jnp.concatenate([x[:, 1:], x[:, :1]], axis=1))
        m2 = jnp.maximum(m1, jnp.concatenate([m1[:, 2:], m1[:, :2]], axis=1))
        # exact 0/1 selection matmul keeps every 4th lane -> (C, L//4)
        return jax.lax.dot_general(m2, sel_ref[...], (((1,), (0,)), ((), ())),
                                   preferred_element_type=jnp.float32)

    x = x_ref[0]                                                      # (8, 256) zero-padded channels

    lout1 = conv(conv(x, 0), 1)
    out1 = conv(conv(lout1, 2, relu=True), 3, relu=True)
    q1 = maxpool4(out1 + lout1, p1_ref)                               # (16, 64)

    lout2 = conv(conv(q1, 4), 5)
    out2 = conv(conv(lout2, 6, relu=True), 7, relu=True)
    q2 = maxpool4(out2 + lout2, p2_ref)                               # (24, 16)

    lout3 = conv(conv(q2, 8), 9)
    out3 = conv(conv(lout3, 10, relu=True), 11, relu=True)

    cat1 = out3 + conv(out3 + lout3, 12, relu=True)
    cat2 = cat1 + conv(cat1, 13, relu=True)
    cat3 = cat2 + conv(cat2, 14, relu=True)
    cat4 = cat3 + conv(cat3, 15, relu=True)
    out = cat4 + conv(cat4, 16, relu=True)                            # (C3, Lf)

    # spline transform: (C3, Lf) @ (Lf, df)  (matches torch.matmul(out_ncl, spline))
    sp = jax.lax.dot_general(out, spl_ref[...], (((1,), (0,)), ((), ())),
                             preferred_element_type=jnp.float32)      # (C3, df)

    # classifier fc1 on the implicitly flattened (C3*df) vector, without any
    # cross-lane reshape:  h[f] = sum_c sum_j sp[c, j] * fc1_w[c*df + j, f]
    df = spl_ref.shape[1]
    c3, nf = w1_ref.shape[1], w1_ref.shape[2]
    g = jnp.zeros((c3, nf), jnp.float32)
    for j in range(df):                                               # static unroll (df=8)
        g = g + sp[:, j:j + 1] * w1_ref[j]                            # (C3,1) * (C3,NF)
    h = jnp.sum(g, axis=0, keepdims=True) + b1_ref[...]               # (1, NF)
    h = jnp.maximum(h, 0.0)
    y = jnp.dot(h, w2_ref[...], preferred_element_type=jnp.float32) + b2_ref[...]
    o_ref[0] = 1.0 / (1.0 + jnp.exp(-y))                              # sigmoid


# ----------------------------------------------------------------------------
# Wrapper: one pallas_call for the whole network.
# ----------------------------------------------------------------------------
def sei_forward(x_ncl, packed):
    """x_ncl: PyTorch-layout (B, 4, L) input.  packed: output of pack_params()."""
    B, c_in, L = x_ncl.shape
    nf = packed['fc2_w'].shape[1]

    # pad channels 4 -> 8 once (zero channels; layer-0 weight is zero-padded to match)
    x_p = jnp.pad(x_ncl, ((0, 0), (0, CIN_PAD - c_in), (0, 0)))

    args = [x_p]
    for w, b in zip(packed['conv_w'], packed['conv_b']):
        args += [w, b]
    args += [packed['pool1'], packed['pool2'], packed['spline'],
             packed['fc1_w'], packed['fc1_b'], packed['fc2_w'], packed['fc2_b']]

    def _bcast_spec(a):
        nd = a.ndim
        return pl.BlockSpec(a.shape, lambda i, _nd=nd: (0,) * _nd)

    in_specs = [pl.BlockSpec((1, CIN_PAD, L), lambda i: (i, 0, 0))]
    in_specs += [_bcast_spec(a) for a in args[1:]]

    out = pl.pallas_call(
        _sei_kernel,
        out_shape=jax.ShapeDtypeStruct((B, 1, nf), jnp.float32),
        grid=(B,),
        in_specs=in_specs,
        out_specs=pl.BlockSpec((1, 1, nf), lambda i: (i, 0, 0)),
        compiler_params=pltpu.CompilerParams(dimension_semantics=("parallel",)),
    )(*args)
    return out[:, 0, :]


# ----------------------------------------------------------------------------
# Pure-JAX reference (for correctness check)
# ----------------------------------------------------------------------------
def ref_forward(x_ncl, p):
    x = jnp.transpose(x_ncl, (0, 2, 1))

    def conv(x, w, b, pad, dil=1, relu=False):
        y = jax.lax.conv_general_dilated(x, w, (1,), [(pad, pad)], rhs_dilation=(dil,),
                                         dimension_numbers=('NWC', 'WIO', 'NWC')) + b
        return jnp.maximum(y, 0.0) if relu else y

    def pool(x):
        B, L, C = x.shape
        return jnp.max(x.reshape(B, L // 4, 4, C), axis=2)

    lout1 = conv(conv(x, p['lconv1_w0'], p['lconv1_b0'], 4), p['lconv1_w1'], p['lconv1_b1'], 4)
    out1 = conv(conv(lout1, p['conv1_w0'], p['conv1_b0'], 4, relu=True),
                p['conv1_w1'], p['conv1_b1'], 4, relu=True)
    lout2 = conv(conv(pool(out1 + lout1), p['lconv2_w0'], p['lconv2_b0'], 4),
                 p['lconv2_w1'], p['lconv2_b1'], 4)
    out2 = conv(conv(lout2, p['conv2_w0'], p['conv2_b0'], 4, relu=True),
                p['conv2_w1'], p['conv2_b1'], 4, relu=True)
    lout3 = conv(conv(pool(out2 + lout2), p['lconv3_w0'], p['lconv3_b0'], 4),
                 p['lconv3_w1'], p['lconv3_b1'], 4)
    out3 = conv(conv(lout3, p['conv3_w0'], p['conv3_b0'], 4, relu=True),
                p['conv3_w1'], p['conv3_b1'], 4, relu=True)
    cat1 = out3 + conv(out3 + lout3, p['dconv1_w'], p['dconv1_b'], 4, dil=2, relu=True)
    cat2 = cat1 + conv(cat1, p['dconv2_w'], p['dconv2_b'], 8, dil=4, relu=True)
    cat3 = cat2 + conv(cat2, p['dconv3_w'], p['dconv3_b'], 16, dil=8, relu=True)
    cat4 = cat3 + conv(cat3, p['dconv4_w'], p['dconv4_b'], 32, dil=16, relu=True)
    out = cat4 + conv(cat4, p['dconv5_w'], p['dconv5_b'], 50, dil=25, relu=True)
    sp = jnp.einsum('blc,lj->bcj', out, p['spline'])
    flat = sp.reshape(sp.shape[0], -1)
    h = jnp.maximum(flat @ p['fc1_w'] + p['fc1_b'], 0.0)
    return jax.nn.sigmoid(h @ p['fc2_w'] + p['fc2_b'])


# ----------------------------------------------------------------------------
if __name__ == "__main__":
    # Small, consistent shapes: seq=256 -> two MaxPool(4) -> pooled length 16 (spline basis len),
    # channels 4 -> 16 -> 24 -> 32, spline_df=8, n_genomic_features=48, batch=2.
    B, Cin, L = 2, 4, 256
    key = jax.random.PRNGKey(0)
    k_x, k_p = jax.random.split(key)
    x = jax.random.normal(k_x, (B, Cin, L), jnp.float32)      # PyTorch NCL input
    params = init_params(k_p, cin=Cin, c1=16, c2=24, c3=32,
                         spline_df=8, l_pooled=L // 16, n_feat=48)
    packed = pack_params(params, L)

    fwd = jax.jit(sei_forward)
    y = jax.block_until_ready(fwd(x, packed))

    y_ref = ref_forward(x, params)
    assert y.shape == (B, 48), y.shape
    assert bool(jnp.all(jnp.isfinite(y)))
    np.testing.assert_allclose(np.asarray(y), np.asarray(y_ref), rtol=2e-3, atol=2e-3)

    print("KERNEL_OK")
</pallas_src>

<mosaic_0001>
module attributes {stable_mosaic.version = 11 : i64} {
  func.func @_sei_kernel(%arg0: i32, %arg1: memref<1x8x256xf32, #tpu.memory_space<vmem>>, %arg2: memref<16x72xf32, #tpu.memory_space<vmem>>, %arg3: memref<16x1xf32, #tpu.memory_space<vmem>>, %arg4: memref<16x144xf32, #tpu.memory_space<vmem>>, %arg5: memref<16x1xf32, #tpu.memory_space<vmem>>, %arg6: memref<16x144xf32, #tpu.memory_space<vmem>>, %arg7: memref<16x1xf32, #tpu.memory_space<vmem>>, %arg8: memref<16x144xf32, #tpu.memory_space<vmem>>, %arg9: memref<16x1xf32, #tpu.memory_space<vmem>>, %arg10: memref<24x144xf32, #tpu.memory_space<vmem>>, %arg11: memref<24x1xf32, #tpu.memory_space<vmem>>, %arg12: memref<24x216xf32, #tpu.memory_space<vmem>>, %arg13: memref<24x1xf32, #tpu.memory_space<vmem>>, %arg14: memref<24x216xf32, #tpu.memory_space<vmem>>, %arg15: memref<24x1xf32, #tpu.memory_space<vmem>>, %arg16: memref<24x216xf32, #tpu.memory_space<vmem>>, %arg17: memref<24x1xf32, #tpu.memory_space<vmem>>, %arg18: memref<32x216xf32, #tpu.memory_space<vmem>>, %arg19: memref<32x1xf32, #tpu.memory_space<vmem>>, %arg20: memref<32x288xf32, #tpu.memory_space<vmem>>, %arg21: memref<32x1xf32, #tpu.memory_space<vmem>>, %arg22: memref<32x288xf32, #tpu.memory_space<vmem>>, %arg23: memref<32x1xf32, #tpu.memory_space<vmem>>, %arg24: memref<32x288xf32, #tpu.memory_space<vmem>>, %arg25: memref<32x1xf32, #tpu.memory_space<vmem>>, %arg26: memref<32x160xf32, #tpu.memory_space<vmem>>, %arg27: memref<32x1xf32, #tpu.memory_space<vmem>>, %arg28: memref<32x160xf32, #tpu.memory_space<vmem>>, %arg29: memref<32x1xf32, #tpu.memory_space<vmem>>, %arg30: memref<32x160xf32, #tpu.memory_space<vmem>>, %arg31: memref<32x1xf32, #tpu.memory_space<vmem>>, %arg32: memref<32x160xf32, #tpu.memory_space<vmem>>, %arg33: memref<32x1xf32, #tpu.memory_space<vmem>>, %arg34: memref<32x160xf32, #tpu.memory_space<vmem>>, %arg35: memref<32x1xf32, #tpu.memory_space<vmem>>, %arg36: memref<256x64xf32, #tpu.memory_space<vmem>>, %arg37: memref<64x16xf32, #tpu.memory_space<vmem>>, %arg38: memref<16x8xf32, #tpu.memory_space<vmem>>, %arg39: memref<8x32x48xf32, #tpu.memory_space<vmem>>, %arg40: memref<1x48xf32, #tpu.memory_space<vmem>>, %arg41: memref<48x48xf32, #tpu.memory_space<vmem>>, %arg42: memref<1x48xf32, #tpu.memory_space<vmem>>, %arg43: memref<1x1x48xf32, #tpu.memory_space<vmem>>) attributes {dimension_semantics = [#tpu.dimension_semantics<parallel>], iteration_bounds = array<i64: 2>, scalar_prefetch = 0 : i64, scratch_operands = 0 : i64, tpu.core_type = #tpu.core_type<tc>, window_params = [{transform_indices = @transform_0, window_bounds = array<i64: 1, 8, 256>}, {pipeline_mode = #tpu.pipeline_mode<synchronous>, transform_indices = @transform_1, window_bounds = array<i64: 16, 72>}, {pipeline_mode = #tpu.pipeline_mode<synchronous>, transform_indices = @transform_2, window_bounds = array<i64: 16, 1>}, {pipeline_mode = #tpu.pipeline_mode<synchronous>, transform_indices = @transform_3, window_bounds = array<i64: 16, 144>}, {pipeline_mode = #tpu.pipeline_mode<synchronous>, transform_indices = @transform_4, window_bounds = array<i64: 16, 1>}, {pipeline_mode = #tpu.pipeline_mode<synchronous>, transform_indices = @transform_5, window_bounds = array<i64: 16, 144>}, {pipeline_mode = #tpu.pipeline_mode<synchronous>, transform_indices = @transform_6, window_bounds = array<i64: 16, 1>}, {pipeline_mode = #tpu.pipeline_mode<synchronous>, transform_indices = @transform_7, window_bounds = array<i64: 16, 144>}, {pipeline_mode = #tpu.pipeline_mode<synchronous>, transform_indices = @transform_8, window_bounds = array<i64: 16, 1>}, {pipeline_mode = #tpu.pipeline_mode<synchronous>, transform_indices = @transform_9, window_bounds = array<i64: 24, 144>}, {pipeline_mode = #tpu.pipeline_mode<synchronous>, transform_indices = @transform_10, window_bounds = array<i64: 24, 1>}, {pipeline_mode = #tpu.pipeline_mode<synchronous>, transform_indices = @transform_11, window_bounds = array<i64: 24, 216>}, {pipeline_mode = #tpu.pipeline_mode<synchronous>, transform_indices = @transform_12, window_bounds = array<i64: 24, 1>}, {pipeline_mode = #tpu.pipeline_mode<synchronous>, transform_indices = @transform_13, window_bounds = array<i64: 24, 216>}, {pipeline_mode = #tpu.pipeline_mode<synchronous>, transform_indices = @transform_14, window_bounds = array<i64: 24, 1>}, {pipeline_mode = #tpu.pipeline_mode<synchronous>, transform_indices = @transform_15, window_bounds = array<i64: 24, 216>}, {pipeline_mode = #tpu.pipeline_mode<synchronous>, transform_indices = @transform_16, window_bounds = array<i64: 24, 1>}, {pipeline_mode = #tpu.pipeline_mode<synchronous>, transform_indices = @transform_17, window_bounds = array<i64: 32, 216>}, {pipeline_mode = #tpu.pipeline_mode<synchronous>, transform_indices = @transform_18, window_bounds = array<i64: 32, 1>}, {pipeline_mode = #tpu.pipeline_mode<synchronous>, transform_indices = @transform_19, window_bounds = array<i64: 32, 288>}, {pipeline_mode = #tpu.pipeline_mode<synchronous>, transform_indices = @transform_20, window_bounds = array<i64: 32, 1>}, {pipeline_mode = #tpu.pipeline_mode<synchronous>, transform_indices = @transform_21, window_bounds = array<i64: 32, 288>}, {pipeline_mode = #tpu.pipeline_mode<synchronous>, transform_indices = @transform_22, window_bounds = array<i64: 32, 1>}, {pipeline_mode = #tpu.pipeline_mode<synchronous>, transform_indices = @transform_23, window_bounds = array<i64: 32, 288>}, {pipeline_mode = #tpu.pipeline_mode<synchronous>, transform_indices = @transform_24, window_bounds = array<i64: 32, 1>}, {pipeline_mode = #tpu.pipeline_mode<synchronous>, transform_indices = @transform_25, window_bounds = array<i64: 32, 160>}, {pipeline_mode = #tpu.pipeline_mode<synchronous>, transform_indices = @transform_26, window_bounds = array<i64: 32, 1>}, {pipeline_mode = #tpu.pipeline_mode<synchronous>, transform_indices = @transform_27, window_bounds = array<i64: 32, 160>}, {pipeline_mode = #tpu.pipeline_mode<synchronous>, transform_indices = @transform_28, window_bounds = array<i64: 32, 1>}, {pipeline_mode = #tpu.pipeline_mode<synchronous>, transform_indices = @transform_29, window_bounds = array<i64: 32, 160>}, {pipeline_mode = #tpu.pipeline_mode<synchronous>, transform_indices = @transform_30, window_bounds = array<i64: 32, 1>}, {pipeline_mode = #tpu.pipeline_mode<synchronous>, transform_indices = @transform_31, window_bounds = array<i64: 32, 160>}, {pipeline_mode = #tpu.pipeline_mode<synchronous>, transform_indices = @transform_32, window_bounds = array<i64: 32, 1>}, {pipeline_mode = #tpu.pipeline_mode<synchronous>, transform_indices = @transform_33, window_bounds = array<i64: 32, 160>}, {pipeline_mode = #tpu.pipeline_mode<synchronous>, transform_indices = @transform_34, window_bounds = array<i64: 32, 1>}, {pipeline_mode = #tpu.pipeline_mode<synchronous>, transform_indices = @transform_35, window_bounds = array<i64: 256, 64>}, {pipeline_mode = #tpu.pipeline_mode<synchronous>, transform_indices = @transform_36, window_bounds = array<i64: 64, 16>}, {pipeline_mode = #tpu.pipeline_mode<synchronous>, transform_indices = @transform_37, window_bounds = array<i64: 16, 8>}, {pipeline_mode = #tpu.pipeline_mode<synchronous>, transform_indices = @transform_38, window_bounds = array<i64: 8, 32, 48>}, {pipeline_mode = #tpu.pipeline_mode<synchronous>, transform_indices = @transform_39, window_bounds = array<i64: 1, 48>}, {pipeline_mode = #tpu.pipeline_mode<synchronous>, transform_indices = @transform_40, window_bounds = array<i64: 48, 48>}, {pipeline_mode = #tpu.pipeline_mode<synchronous>, transform_indices = @transform_41, window_bounds = array<i64: 1, 48>}, {transform_indices = @transform_42, window_bounds = array<i64: 1, 1, 48>}]} {
    %c0 = arith.constant 0 : index
    %c0_0 = arith.constant 0 : index
    %c0_1 = arith.constant 0 : index
    %0 = vector.load %arg1[%c0, %c0_0, %c0_1] : memref<1x8x256xf32, #tpu.memory_space<vmem>>, vector<1x8x256xf32>
    %1 = vector.shape_cast %0 : vector<1x8x256xf32> to vector<8x256xf32>
    %cst = arith.constant 0.000000e+00 : f32
    %2 = vector.broadcast %cst : f32 to vector<8x4xf32>
    %3 = tpu.concatenate %2, %1, %2 in 1 : vector<8x4xf32>, vector<8x256xf32>, vector<8x4xf32> -> vector<8x264xf32>
    %4 = vector.extract_strided_slice %3 {offsets = [0, 0], sizes = [8, 256], strides = [1, 1]} : vector<8x264xf32> to vector<8x256xf32>
    %5 = vector.extract_strided_slice %3 {offsets = [0, 1], sizes = [8, 256], strides = [1, 1]} : vector<8x264xf32> to vector<8x256xf32>
    %6 = vector.extract_strided_slice %3 {offsets = [0, 2], sizes = [8, 256], strides = [1, 1]} : vector<8x264xf32> to vector<8x256xf32>
    %7 = vector.extract_strided_slice %3 {offsets = [0, 3], sizes = [8, 256], strides = [1, 1]} : vector<8x264xf32> to vector<8x256xf32>
    %8 = vector.extract_strided_slice %3 {offsets = [0, 4], sizes = [8, 256], strides = [1, 1]} : vector<8x264xf32> to vector<8x256xf32>
    %9 = vector.extract_strided_slice %3 {offsets = [0, 5], sizes = [8, 256], strides = [1, 1]} : vector<8x264xf32> to vector<8x256xf32>
    %10 = vector.extract_strided_slice %3 {offsets = [0, 6], sizes = [8, 256], strides = [1, 1]} : vector<8x264xf32> to vector<8x256xf32>
    %11 = vector.extract_strided_slice %3 {offsets = [0, 7], sizes = [8, 256], strides = [1, 1]} : vector<8x264xf32> to vector<8x256xf32>
    %12 = vector.extract_strided_slice %3 {offsets = [0, 8], sizes = [8, 256], strides = [1, 1]} : vector<8x264xf32> to vector<8x256xf32>
    %13 = tpu.concatenate %4, %5, %6, %7, %8, %9, %10, %11, %12 in 0 : vector<8x256xf32>, vector<8x256xf32>, vector<8x256xf32>, vector<8x256xf32>, vector<8x256xf32>, vector<8x256xf32>, vector<8x256xf32>, vector<8x256xf32>, vector<8x256xf32> -> vector<72x256xf32>
    %c0_2 = arith.constant 0 : index
    %c0_3 = arith.constant 0 : index
    %14 = vector.load %arg2[%c0_2, %c0_3] : memref<16x72xf32, #tpu.memory_space<vmem>>, vector<16x72xf32>
    %cst_4 = arith.constant dense<0.000000e+00> : vector<16x256xf32>
    %15 = tpu.matmul %14, %13, %cst_4 {dimension_numbers = #tpu.dot_dimension_numbers<[1], [0], [0], [1], [0, 0, 1, 1], [], []>} : vector<16x72xf32>, vector<72x256xf32>, vector<16x256xf32> -> vector<16x256xf32>
    %c0_5 = arith.constant 0 : index
    %c0_6 = arith.constant 0 : index
    %16 = vector.load %arg3[%c0_5, %c0_6] : memref<16x1xf32, #tpu.memory_space<vmem>>, vector<16x1xf32>
    %17 = vector.broadcast %16 : vector<16x1xf32> to vector<16x256xf32>
    %18 = arith.addf %15, %17 : vector<16x256xf32>
    %cst_7 = arith.constant 0.000000e+00 : f32
    %19 = vector.broadcast %cst_7 : f32 to vector<16x4xf32>
    %20 = tpu.concatenate %19, %18, %19 in 1 : vector<16x4xf32>, vector<16x256xf32>, vector<16x4xf32> -> vector<16x264xf32>
    %21 = vector.extract_strided_slice %20 {offsets = [0, 0], sizes = [16, 256], strides = [1, 1]} : vector<16x264xf32> to vector<16x256xf32>
    %22 = vector.extract_strided_slice %20 {offsets = [0, 1], sizes = [16, 256], strides = [1, 1]} : vector<16x264xf32> to vector<16x256xf32>
    %23 = vector.extract_strided_slice %20 {offsets = [0, 2], sizes = [16, 256], strides = [1, 1]} : vector<16x264xf32> to vector<16x256xf32>
    %24 = vector.extract_strided_slice %20 {offsets = [0, 3], sizes = [16, 256], strides = [1, 1]} : vector<16x264xf32> to vector<16x256xf32>
    %25 = vector.extract_strided_slice %20 {offsets = [0, 4], sizes = [16, 256], strides = [1, 1]} : vector<16x264xf32> to vector<16x256xf32>
    %26 = vector.extract_strided_slice %20 {offsets = [0, 5], sizes = [16, 256], strides = [1, 1]} : vector<16x264xf32> to vector<16x256xf32>
    %27 = vector.extract_strided_slice %20 {offsets = [0, 6], sizes = [16, 256], strides = [1, 1]} : vector<16x264xf32> to vector<16x256xf32>
    %28 = vector.extract_strided_slice %20 {offsets = [0, 7], sizes = [16, 256], strides = [1, 1]} : vector<16x264xf32> to vector<16x256xf32>
    %29 = vector.extract_strided_slice %20 {offsets = [0, 8], sizes = [16, 256], strides = [1, 1]} : vector<16x264xf32> to vector<16x256xf32>
    %30 = tpu.concatenate %21, %22, %23, %24, %25, %26, %27, %28, %29 in 0 : vector<16x256xf32>, vector<16x256xf32>, vector<16x256xf32>, vector<16x256xf32>, vector<16x256xf32>, vector<16x256xf32>, vector<16x256xf32>, vector<16x256xf32>, vector<16x256xf32> -> vector<144x256xf32>
    %c0_8 = arith.constant 0 : index
    %c0_9 = arith.constant 0 : index
    %31 = vector.load %arg4[%c0_8, %c0_9] : memref<16x144xf32, #tpu.memory_space<vmem>>, vector<16x144xf32>
    %cst_10 = arith.constant dense<0.000000e+00> : vector<16x256xf32>
    %32 = tpu.matmul %31, %30, %cst_10 {dimension_numbers = #tpu.dot_dimension_numbers<[1], [0], [0], [1], [0, 0, 1, 1], [], []>} : vector<16x144xf32>, vector<144x256xf32>, vector<16x256xf32> -> vector<16x256xf32>
    %c0_11 = arith.constant 0 : index
    %c0_12 = arith.constant 0 : index
    %33 = vector.load %arg5[%c0_11, %c0_12] : memref<16x1xf32, #tpu.memory_space<vmem>>, vector<16x1xf32>
    %34 = vector.broadcast %33 : vector<16x1xf32> to vector<16x256xf32>
    %35 = arith.addf %32, %34 : vector<16x256xf32>
    %cst_13 = arith.constant 0.000000e+00 : f32
    %36 = vector.broadcast %cst_13 : f32 to vector<16x4xf32>
    %37 = tpu.concatenate %36, %35, %36 in 1 : vector<16x4xf32>, vector<16x256xf32>, vector<16x4xf32> -> vector<16x264xf32>
    %38 = vector.extract_strided_slice %37 {offsets = [0, 0], sizes = [16, 256], strides = [1, 1]} : vector<16x264xf32> to vector<16x256xf32>
    %39 = vector.extract_strided_slice %37 {offsets = [0, 1], sizes = [16, 256], strides = [1, 1]} : vector<16x264xf32> to vector<16x256xf32>
    %40 = vector.extract_strided_slice %37 {offsets = [0, 2], sizes = [16, 256], strides = [1, 1]} : vector<16x264xf32> to vector<16x256xf32>
    %41 = vector.extract_strided_slice %37 {offsets = [0, 3], sizes = [16, 256], strides = [1, 1]} : vector<16x264xf32> to vector<16x256xf32>
    %42 = vector.extract_strided_slice %37 {offsets = [0, 4], sizes = [16, 256], strides = [1, 1]} : vector<16x264xf32> to vector<16x256xf32>
    %43 = vector.extract_strided_slice %37 {offsets = [0, 5], sizes = [16, 256], strides = [1, 1]} : vector<16x264xf32> to vector<16x256xf32>
    %44 = vector.extract_strided_slice %37 {offsets = [0, 6], sizes = [16, 256], strides = [1, 1]} : vector<16x264xf32> to vector<16x256xf32>
    %45 = vector.extract_strided_slice %37 {offsets = [0, 7], sizes = [16, 256], strides = [1, 1]} : vector<16x264xf32> to vector<16x256xf32>
    %46 = vector.extract_strided_slice %37 {offsets = [0, 8], sizes = [16, 256], strides = [1, 1]} : vector<16x264xf32> to vector<16x256xf32>
    %47 = tpu.concatenate %38, %39, %40, %41, %42, %43, %44, %45, %46 in 0 : vector<16x256xf32>, vector<16x256xf32>, vector<16x256xf32>, vector<16x256xf32>, vector<16x256xf32>, vector<16x256xf32>, vector<16x256xf32>, vector<16x256xf32>, vector<16x256xf32> -> vector<144x256xf32>
    %c0_14 = arith.constant 0 : index
    %c0_15 = arith.constant 0 : index
    %48 = vector.load %arg6[%c0_14, %c0_15] : memref<16x144xf32, #tpu.memory_space<vmem>>, vector<16x144xf32>
    %cst_16 = arith.constant dense<0.000000e+00> : vector<16x256xf32>
    %49 = tpu.matmul %48, %47, %cst_16 {dimension_numbers = #tpu.dot_dimension_numbers<[1], [0], [0], [1], [0, 0, 1, 1], [], []>} : vector<16x144xf32>, vector<144x256xf32>, vector<16x256xf32> -> vector<16x256xf32>
    %c0_17 = arith.constant 0 : index
    %c0_18 = arith.constant 0 : index
    %50 = vector.load %arg7[%c0_17, %c0_18] : memref<16x1xf32, #tpu.memory_space<vmem>>, vector<16x1xf32>
    %51 = vector.broadcast %50 : vector<16x1xf32> to vector<16x256xf32>
    %52 = arith.addf %49, %51 : vector<16x256xf32>
    %cst_19 = arith.constant 0.000000e+00 : f32
    %53 = vector.broadcast %cst_19 : f32 to vector<16x256xf32>
    %54 = arith.maximumf %52, %53 : vector<16x256xf32>
    %cst_20 = arith.constant 0.000000e+00 : f32
    %55 = vector.broadcast %cst_20 : f32 to vector<16x4xf32>
    %56 = tpu.concatenate %55, %54, %55 in 1 : vector<16x4xf32>, vector<16x256xf32>, vector<16x4xf32> -> vector<16x264xf32>
    %57 = vector.extract_strided_slice %56 {offsets = [0, 0], sizes = [16, 256], strides = [1, 1]} : vector<16x264xf32> to vector<16x256xf32>
    %58 = vector.extract_strided_slice %56 {offsets = [0, 1], sizes = [16, 256], strides = [1, 1]} : vector<16x264xf32> to vector<16x256xf32>
    %59 = vector.extract_strided_slice %56 {offsets = [0, 2], sizes = [16, 256], strides = [1, 1]} : vector<16x264xf32> to vector<16x256xf32>
    %60 = vector.extract_strided_slice %56 {offsets = [0, 3], sizes = [16, 256], strides = [1, 1]} : vector<16x264xf32> to vector<16x256xf32>
    %61 = vector.extract_strided_slice %56 {offsets = [0, 4], sizes = [16, 256], strides = [1, 1]} : vector<16x264xf32> to vector<16x256xf32>
    %62 = vector.extract_strided_slice %56 {offsets = [0, 5], sizes = [16, 256], strides = [1, 1]} : vector<16x264xf32> to vector<16x256xf32>
    %63 = vector.extract_strided_slice %56 {offsets = [0, 6], sizes = [16, 256], strides = [1, 1]} : vector<16x264xf32> to vector<16x256xf32>
    %64 = vector.extract_strided_slice %56 {offsets = [0, 7], sizes = [16, 256], strides = [1, 1]} : vector<16x264xf32> to vector<16x256xf32>
    %65 = vector.extract_strided_slice %56 {offsets = [0, 8], sizes = [16, 256], strides = [1, 1]} : vector<16x264xf32> to vector<16x256xf32>
    %66 = tpu.concatenate %57, %58, %59, %60, %61, %62, %63, %64, %65 in 0 : vector<16x256xf32>, vector<16x256xf32>, vector<16x256xf32>, vector<16x256xf32>, vector<16x256xf32>, vector<16x256xf32>, vector<16x256xf32>, vector<16x256xf32>, vector<16x256xf32> -> vector<144x256xf32>
    %c0_21 = arith.constant 0 : index
    %c0_22 = arith.constant 0 : index
    %67 = vector.load %arg8[%c0_21, %c0_22] : memref<16x144xf32, #tpu.memory_space<vmem>>, vector<16x144xf32>
    %cst_23 = arith.constant dense<0.000000e+00> : vector<16x256xf32>
    %68 = tpu.matmul %67, %66, %cst_23 {dimension_numbers = #tpu.dot_dimension_numbers<[1], [0], [0], [1], [0, 0, 1, 1], [], []>} : vector<16x144xf32>, vector<144x256xf32>, vector<16x256xf32> -> vector<16x256xf32>
    %c0_24 = arith.constant 0 : index
    %c0_25 = arith.constant 0 : index
    %69 = vector.load %arg9[%c0_24, %c0_25] : memref<16x1xf32, #tpu.memory_space<vmem>>, vector<16x1xf32>
    %70 = vector.broadcast %69 : vector<16x1xf32> to vector<16x256xf32>
    %71 = arith.addf %68, %70 : vector<16x256xf32>
    %cst_26 = arith.constant 0.000000e+00 : f32
    %72 = vector.broadcast %cst_26 : f32 to vector<16x256xf32>
    %73 = arith.maximumf %71, %72 : vector<16x256xf32>
    %74 = arith.addf %73, %35 : vector<16x256xf32>
    %75 = vector.extract_strided_slice %74 {offsets = [0, 1], sizes = [16, 255], strides = [1, 1]} : vector<16x256xf32> to vector<16x255xf32>
    %76 = vector.extract_strided_slice %74 {offsets = [0, 0], sizes = [16, 1], strides = [1, 1]} : vector<16x256xf32> to vector<16x1xf32>
    %77 = tpu.concatenate %75, %76 in 1 : vector<16x255xf32>, vector<16x1xf32> -> vector<16x256xf32>
    %78 = arith.maximumf %74, %77 : vector<16x256xf32>
    %79 = vector.extract_strided_slice %78 {offsets = [0, 2], sizes = [16, 254], strides = [1, 1]} : vector<16x256xf32> to vector<16x254xf32>
    %80 = vector.extract_strided_slice %78 {offsets = [0, 0], sizes = [16, 2], strides = [1, 1]} : vector<16x256xf32> to vector<16x2xf32>
    %81 = tpu.concatenate %79, %80 in 1 : vector<16x254xf32>, vector<16x2xf32> -> vector<16x256xf32>
    %82 = arith.maximumf %78, %81 : vector<16x256xf32>
    %c0_27 = arith.constant 0 : index
    %c0_28 = arith.constant 0 : index
    %83 = vector.load %arg36[%c0_27, %c0_28] : memref<256x64xf32, #tpu.memory_space<vmem>>, vector<256x64xf32>
    %cst_29 = arith.constant dense<0.000000e+00> : vector<16x64xf32>
    %84 = tpu.matmul %82, %83, %cst_29 {dimension_numbers = #tpu.dot_dimension_numbers<[1], [0], [0], [1], [0, 0, 1, 1], [], []>} : vector<16x256xf32>, vector<256x64xf32>, vector<16x64xf32> -> vector<16x64xf32>
    %cst_30 = arith.constant 0.000000e+00 : f32
    %85 = vector.broadcast %cst_30 : f32 to vector<16x4xf32>
    %86 = tpu.concatenate %85, %84, %85 in 1 : vector<16x4xf32>, vector<16x64xf32>, vector<16x4xf32> -> vector<16x72xf32>
    %87 = vector.extract_strided_slice %86 {offsets = [0, 0], sizes = [16, 64], strides = [1, 1]} : vector<16x72xf32> to vector<16x64xf32>
    %88 = vector.extract_strided_slice %86 {offsets = [0, 1], sizes = [16, 64], strides = [1, 1]} : vector<16x72xf32> to vector<16x64xf32>
    %89 = vector.extract_strided_slice %86 {offsets = [0, 2], sizes = [16, 64], strides = [1, 1]} : vector<16x72xf32> to vector<16x64xf32>
    %90 = vector.extract_strided_slice %86 {offsets = [0, 3], sizes = [16, 64], strides = [1, 1]} : vector<16x72xf32> to vector<16x64xf32>
    %91 = vector.extract_strided_slice %86 {offsets = [0, 4], sizes = [16, 64], strides = [1, 1]} : vector<16x72xf32> to vector<16x64xf32>
    %92 = vector.extract_strided_slice %86 {offsets = [0, 5], sizes = [16, 64], strides = [1, 1]} : vector<16x72xf32> to vector<16x64xf32>
    %93 = vector.extract_strided_slice %86 {offsets = [0, 6], sizes = [16, 64], strides = [1, 1]} : vector<16x72xf32> to vector<16x64xf32>
    %94 = vector.extract_strided_slice %86 {offsets = [0, 7], sizes = [16, 64], strides = [1, 1]} : vector<16x72xf32> to vector<16x64xf32>
    %95 = vector.extract_strided_slice %86 {offsets = [0, 8], sizes = [16, 64], strides = [1, 1]} : vector<16x72xf32> to vector<16x64xf32>
    %96 = tpu.concatenate %87, %88, %89, %90, %91, %92, %93, %94, %95 in 0 : vector<16x64xf32>, vector<16x64xf32>, vector<16x64xf32>, vector<16x64xf32>, vector<16x64xf32>, vector<16x64xf32>, vector<16x64xf32>, vector<16x64xf32>, vector<16x64xf32> -> vector<144x64xf32>
    %c0_31 = arith.constant 0 : index
    %c0_32 = arith.constant 0 : index
    %97 = vector.load %arg10[%c0_31, %c0_32] : memref<24x144xf32, #tpu.memory_space<vmem>>, vector<24x144xf32>
    %cst_33 = arith.constant dense<0.000000e+00> : vector<24x64xf32>
    %98 = tpu.matmul %97, %96, %cst_33 {dimension_numbers = #tpu.dot_dimension_numbers<[1], [0], [0], [1], [0, 0, 1, 1], [], []>} : vector<24x144xf32>, vector<144x64xf32>, vector<24x64xf32> -> vector<24x64xf32>
    %c0_34 = arith.constant 0 : index
    %c0_35 = arith.constant 0 : index
    %99 = vector.load %arg11[%c0_34, %c0_35] : memref<24x1xf32, #tpu.memory_space<vmem>>, vector<24x1xf32>
    %100 = vector.broadcast %99 : vector<24x1xf32> to vector<24x64xf32>
    %101 = arith.addf %98, %100 : vector<24x64xf32>
    %cst_36 = arith.constant 0.000000e+00 : f32
    %102 = vector.broadcast %cst_36 : f32 to vector<24x4xf32>
    %103 = tpu.concatenate %102, %101, %102 in 1 : vector<24x4xf32>, vector<24x64xf32>, vector<24x4xf32> -> vector<24x72xf32>
    %104 = vector.extract_strided_slice %103 {offsets = [0, 0], sizes = [24, 64], strides = [1, 1]} : vector<24x72xf32> to vector<24x64xf32>
    %105 = vector.extract_strided_slice %103 {offsets = [0, 1], sizes = [24, 64], strides = [1, 1]} : vector<24x72xf32> to vector<24x64xf32>
    %106 = vector.extract_strided_slice %103 {offsets = [0, 2], sizes = [24, 64], strides = [1, 1]} : vector<24x72xf32> to vector<24x64xf32>
    %107 = vector.extract_strided_slice %103 {offsets = [0, 3], sizes = [24, 64], strides = [1, 1]} : vector<24x72xf32> to vector<24x64xf32>
    %108 = vector.extract_strided_slice %103 {offsets = [0, 4], sizes = [24, 64], strides = [1, 1]} : vector<24x72xf32> to vector<24x64xf32>
    %109 = vector.extract_strided_slice %103 {offsets = [0, 5], sizes = [24, 64], strides = [1, 1]} : vector<24x72xf32> to vector<24x64xf32>
    %110 = vector.extract_strided_slice %103 {offsets = [0, 6], sizes = [24, 64], strides = [1, 1]} : vector<24x72xf32> to vector<24x64xf32>
    %111 = vector.extract_strided_slice %103 {offsets = [0, 7], sizes = [24, 64], strides = [1, 1]} : vector<24x72xf32> to vector<24x64xf32>
    %112 = vector.extract_strided_slice %103 {offsets = [0, 8], sizes = [24, 64], strides = [1, 1]} : vector<24x72xf32> to vector<24x64xf32>
    %113 = tpu.concatenate %104, %105, %106, %107, %108, %109, %110, %111, %112 in 0 : vector<24x64xf32>, vector<24x64xf32>, vector<24x64xf32>, vector<24x64xf32>, vector<24x64xf32>, vector<24x64xf32>, vector<24x64xf32>, vector<24x64xf32>, vector<24x64xf32> -> vector<216x64xf32>
    %c0_37 = arith.constant 0 : index
    %c0_38 = arith.constant 0 : index
    %114 = vector.load %arg12[%c0_37, %c0_38] : memref<24x216xf32, #tpu.memory_space<vmem>>, vector<24x216xf32>
    %cst_39 = arith.constant dense<0.000000e+00> : vector<24x64xf32>
    %115 = tpu.matmul %114, %113, %cst_39 {dimension_numbers = #tpu.dot_dimension_numbers<[1], [0], [0], [1], [0, 0, 1, 1], [], []>} : vector<24x216xf32>, vector<216x64xf32>, vector<24x64xf32> -> vector<24x64xf32>
    %c0_40 = arith.constant 0 : index
    %c0_41 = arith.constant 0 : index
    %116 = vector.load %arg13[%c0_40, %c0_41] : memref<24x1xf32, #tpu.memory_space<vmem>>, vector<24x1xf32>
    %117 = vector.broadcast %116 : vector<24x1xf32> to vector<24x64xf32>
    %118 = arith.addf %115, %117 : vector<24x64xf32>
    %cst_42 = arith.constant 0.000000e+00 : f32
    %119 = vector.broadcast %cst_42 : f32 to vector<24x4xf32>
    %120 = tpu.concatenate %119, %118, %119 in 1 : vector<24x4xf32>, vector<24x64xf32>, vector<24x4xf32> -> vector<24x72xf32>
    %121 = vector.extract_strided_slice %120 {offsets = [0, 0], sizes = [24, 64], strides = [1, 1]} : vector<24x72xf32> to vector<24x64xf32>
    %122 = vector.extract_strided_slice %120 {offsets = [0, 1], sizes = [24, 64], strides = [1, 1]} : vector<24x72xf32> to vector<24x64xf32>
    %123 = vector.extract_strided_slice %120 {offsets = [0, 2], sizes = [24, 64], strides = [1, 1]} : vector<24x72xf32> to vector<24x64xf32>
    %124 = vector.extract_strided_slice %120 {offsets = [0, 3], sizes = [24, 64], strides = [1, 1]} : vector<24x72xf32> to vector<24x64xf32>
    %125 = vector.extract_strided_slice %120 {offsets = [0, 4], sizes = [24, 64], strides = [1, 1]} : vector<24x72xf32> to vector<24x64xf32>
    %126 = vector.extract_strided_slice %120 {offsets = [0, 5], sizes = [24, 64], strides = [1, 1]} : vector<24x72xf32> to vector<24x64xf32>
    %127 = vector.extract_strided_slice %120 {offsets = [0, 6], sizes = [24, 64], strides = [1, 1]} : vector<24x72xf32> to vector<24x64xf32>
    %128 = vector.extract_strided_slice %120 {offsets = [0, 7], sizes = [24, 64], strides = [1, 1]} : vector<24x72xf32> to vector<24x64xf32>
    %129 = vector.extract_strided_slice %120 {offsets = [0, 8], sizes = [24, 64], strides = [1, 1]} : vector<24x72xf32> to vector<24x64xf32>
    %130 = tpu.concatenate %121, %122, %123, %124, %125, %126, %127, %128, %129 in 0 : vector<24x64xf32>, vector<24x64xf32>, vector<24x64xf32>, vector<24x64xf32>, vector<24x64xf32>, vector<24x64xf32>, vector<24x64xf32>, vector<24x64xf32>, vector<24x64xf32> -> vector<216x64xf32>
    %c0_43 = arith.constant 0 : index
    %c0_44 = arith.constant 0 : index
    %131 = vector.load %arg14[%c0_43, %c0_44] : memref<24x216xf32, #tpu.memory_space<vmem>>, vector<24x216xf32>
    %cst_45 = arith.constant dense<0.000000e+00> : vector<24x64xf32>
    %132 = tpu.matmul %131, %130, %cst_45 {dimension_numbers = #tpu.dot_dimension_numbers<[1], [0], [0], [1], [0, 0, 1, 1], [], []>} : vector<24x216xf32>, vector<216x64xf32>, vector<24x64xf32> -> vector<24x64xf32>
    %c0_46 = arith.constant 0 : index
    %c0_47 = arith.constant 0 : index
    %133 = vector.load %arg15[%c0_46, %c0_47] : memref<24x1xf32, #tpu.memory_space<vmem>>, vector<24x1xf32>
    %134 = vector.broadcast %133 : vector<24x1xf32> to vector<24x64xf32>
    %135 = arith.addf %132, %134 : vector<24x64xf32>
    %cst_48 = arith.constant 0.000000e+00 : f32
    %136 = vector.broadcast %cst_48 : f32 to vector<24x64xf32>
    %137 = arith.maximumf %135, %136 : vector<24x64xf32>
    %cst_49 = arith.constant 0.000000e+00 : f32
    %138 = vector.broadcast %cst_49 : f32 to vector<24x4xf32>
    %139 = tpu.concatenate %138, %137, %138 in 1 : vector<24x4xf32>, vector<24x64xf32>, vector<24x4xf32> -> vector<24x72xf32>
    %140 = vector.extract_strided_slice %139 {offsets = [0, 0], sizes = [24, 64], strides = [1, 1]} : vector<24x72xf32> to vector<24x64xf32>
    %141 = vector.extract_strided_slice %139 {offsets = [0, 1], sizes = [24, 64], strides = [1, 1]} : vector<24x72xf32> to vector<24x64xf32>
    %142 = vector.extract_strided_slice %139 {offsets = [0, 2], sizes = [24, 64], strides = [1, 1]} : vector<24x72xf32> to vector<24x64xf32>
    %143 = vector.extract_strided_slice %139 {offsets = [0, 3], sizes = [24, 64], strides = [1, 1]} : vector<24x72xf32> to vector<24x64xf32>
    %144 = vector.extract_strided_slice %139 {offsets = [0, 4], sizes = [24, 64], strides = [1, 1]} : vector<24x72xf32> to vector<24x64xf32>
    %145 = vector.extract_strided_slice %139 {offsets = [0, 5], sizes = [24, 64], strides = [1, 1]} : vector<24x72xf32> to vector<24x64xf32>
    %146 = vector.extract_strided_slice %139 {offsets = [0, 6], sizes = [24, 64], strides = [1, 1]} : vector<24x72xf32> to vector<24x64xf32>
    %147 = vector.extract_strided_slice %139 {offsets = [0, 7], sizes = [24, 64], strides = [1, 1]} : vector<24x72xf32> to vector<24x64xf32>
    %148 = vector.extract_strided_slice %139 {offsets = [0, 8], sizes = [24, 64], strides = [1, 1]} : vector<24x72xf32> to vector<24x64xf32>
    %149 = tpu.concatenate %140, %141, %142, %143, %144, %145, %146, %147, %148 in 0 : vector<24x64xf32>, vector<24x64xf32>, vector<24x64xf32>, vector<24x64xf32>, vector<24x64xf32>, vector<24x64xf32>, vector<24x64xf32>, vector<24x64xf32>, vector<24x64xf32> -> vector<216x64xf32>
    %c0_50 = arith.constant 0 : index
    %c0_51 = arith.constant 0 : index
    %150 = vector.load %arg16[%c0_50, %c0_51] : memref<24x216xf32, #tpu.memory_space<vmem>>, vector<24x216xf32>
    %cst_52 = arith.constant dense<0.000000e+00> : vector<24x64xf32>
    %151 = tpu.matmul %150, %149, %cst_52 {dimension_numbers = #tpu.dot_dimension_numbers<[1], [0], [0], [1], [0, 0, 1, 1], [], []>} : vector<24x216xf32>, vector<216x64xf32>, vector<24x64xf32> -> vector<24x64xf32>
    %c0_53 = arith.constant 0 : index
    %c0_54 = arith.constant 0 : index
    %152 = vector.load %arg17[%c0_53, %c0_54] : memref<24x1xf32, #tpu.memory_space<vmem>>, vector<24x1xf32>
    %153 = vector.broadcast %152 : vector<24x1xf32> to vector<24x64xf32>
    %154 = arith.addf %151, %153 : vector<24x64xf32>
    %cst_55 = arith.constant 0.000000e+00 : f32
    %155 = vector.broadcast %cst_55 : f32 to vector<24x64xf32>
    %156 = arith.maximumf %154, %155 : vector<24x64xf32>
    %157 = arith.addf %156, %118 : vector<24x64xf32>
    %158 = vector.extract_strided_slice %157 {offsets = [0, 1], sizes = [24, 63], strides = [1, 1]} : vector<24x64xf32> to vector<24x63xf32>
    %159 = vector.extract_strided_slice %157 {offsets = [0, 0], sizes = [24, 1], strides = [1, 1]} : vector<24x64xf32> to vector<24x1xf32>
    %160 = tpu.concatenate %158, %159 in 1 : vector<24x63xf32>, vector<24x1xf32> -> vector<24x64xf32>
    %161 = arith.maximumf %157, %160 : vector<24x64xf32>
    %162 = vector.extract_strided_slice %161 {offsets = [0, 2], sizes = [24, 62], strides = [1, 1]} : vector<24x64xf32> to vector<24x62xf32>
    %163 = vector.extract_strided_slice %161 {offsets = [0, 0], sizes = [24, 2], strides = [1, 1]} : vector<24x64xf32> to vector<24x2xf32>
    %164 = tpu.concatenate %162, %163 in 1 : vector<24x62xf32>, vector<24x2xf32> -> vector<24x64xf32>
    %165 = arith.maximumf %161, %164 : vector<24x64xf32>
    %c0_56 = arith.constant 0 : index
    %c0_57 = arith.constant 0 : index
    %166 = vector.load %arg37[%c0_56, %c0_57] : memref<64x16xf32, #tpu.memory_space<vmem>>, vector<64x16xf32>
    %cst_58 = arith.constant dense<0.000000e+00> : vector<24x16xf32>
    %167 = tpu.matmul %165, %166, %cst_58 {dimension_numbers = #tpu.dot_dimension_numbers<[1], [0], [0], [1], [0, 0, 1, 1], [], []>} : vector<24x64xf32>, vector<64x16xf32>, vector<24x16xf32> -> vector<24x16xf32>
    %cst_59 = arith.constant 0.000000e+00 : f32
    %168 = vector.broadcast %cst_59 : f32 to vector<24x4xf32>
    %169 = tpu.concatenate %168, %167, %168 in 1 : vector<24x4xf32>, vector<24x16xf32>, vector<24x4xf32> -> vector<24x24xf32>
    %170 = vector.extract_strided_slice %169 {offsets = [0, 0], sizes = [24, 16], strides = [1, 1]} : vector<24x24xf32> to vector<24x16xf32>
    %171 = vector.extract_strided_slice %169 {offsets = [0, 1], sizes = [24, 16], strides = [1, 1]} : vector<24x24xf32> to vector<24x16xf32>
    %172 = vector.extract_strided_slice %169 {offsets = [0, 2], sizes = [24, 16], strides = [1, 1]} : vector<24x24xf32> to vector<24x16xf32>
    %173 = vector.extract_strided_slice %169 {offsets = [0, 3], sizes = [24, 16], strides = [1, 1]} : vector<24x24xf32> to vector<24x16xf32>
    %174 = vector.extract_strided_slice %169 {offsets = [0, 4], sizes = [24, 16], strides = [1, 1]} : vector<24x24xf32> to vector<24x16xf32>
    %175 = vector.extract_strided_slice %169 {offsets = [0, 5], sizes = [24, 16], strides = [1, 1]} : vector<24x24xf32> to vector<24x16xf32>
    %176 = vector.extract_strided_slice %169 {offsets = [0, 6], sizes = [24, 16], strides = [1, 1]} : vector<24x24xf32> to vector<24x16xf32>
    %177 = vector.extract_strided_slice %169 {offsets = [0, 7], sizes = [24, 16], strides = [1, 1]} : vector<24x24xf32> to vector<24x16xf32>
    %178 = vector.extract_strided_slice %169 {offsets = [0, 8], sizes = [24, 16], strides = [1, 1]} : vector<24x24xf32> to vector<24x16xf32>
    %179 = tpu.concatenate %170, %171, %172, %173, %174, %175, %176, %177, %178 in 0 : vector<24x16xf32>, vector<24x16xf32>, vector<24x16xf32>, vector<24x16xf32>, vector<24x16xf32>, vector<24x16xf32>, vector<24x16xf32>, vector<24x16xf32>, vector<24x16xf32> -> vector<216x16xf32>
    %c0_60 = arith.constant 0 : index
    %c0_61 = arith.constant 0 : index
    %180 = vector.load %arg18[%c0_60, %c0_61] : memref<32x216xf32, #tpu.memory_space<vmem>>, vector<32x216xf32>
    %cst_62 = arith.constant dense<0.000000e+00> : vector<32x16xf32>
    %181 = tpu.matmul %180, %179, %cst_62 {dimension_numbers = #tpu.dot_dimension_numbers<[1], [0], [0], [1], [0, 0, 1, 1], [], []>} : vector<32x216xf32>, vector<216x16xf32>, vector<32x16xf32> -> vector<32x16xf32>
    %c0_63 = arith.constant 0 : index
    %c0_64 = arith.constant 0 : index
    %182 = vector.load %arg19[%c0_63, %c0_64] : memref<32x1xf32, #tpu.memory_space<vmem>>, vector<32x1xf32>
    %183 = vector.broadcast %182 : vector<32x1xf32> to vector<32x16xf32>
    %184 = arith.addf %181, %183 : vector<32x16xf32>
    %cst_65 = arith.constant 0.000000e+00 : f32
    %185 = vector.broadcast %cst_65 : f32 to vector<32x4xf32>
    %186 = tpu.concatenate %185, %184, %185 in 1 : vector<32x4xf32>, vector<32x16xf32>, vector<32x4xf32> -> vector<32x24xf32>
    %187 = vector.extract_strided_slice %186 {offsets = [0, 0], sizes = [32, 16], strides = [1, 1]} : vector<32x24xf32> to vector<32x16xf32>
    %188 = vector.extract_strided_slice %186 {offsets = [0, 1], sizes = [32, 16], strides = [1, 1]} : vector<32x24xf32> to vector<32x16xf32>
    %189 = vector.extract_strided_slice %186 {offsets = [0, 2], sizes = [32, 16], strides = [1, 1]} : vector<32x24xf32> to vector<32x16xf32>
    %190 = vector.extract_strided_slice %186 {offsets = [0, 3], sizes = [32, 16], strides = [1, 1]} : vector<32x24xf32> to vector<32x16xf32>
    %191 = vector.extract_strided_slice %186 {offsets = [0, 4], sizes = [32, 16], strides = [1, 1]} : vector<32x24xf32> to vector<32x16xf32>
    %192 = vector.extract_strided_slice %186 {offsets = [0, 5], sizes = [32, 16], strides = [1, 1]} : vector<32x24xf32> to vector<32x16xf32>
    %193 = vector.extract_strided_slice %186 {offsets = [0, 6], sizes = [32, 16], strides = [1, 1]} : vector<32x24xf32> to vector<32x16xf32>
    %194 = vector.extract_strided_slice %186 {offsets = [0, 7], sizes = [32, 16], strides = [1, 1]} : vector<32x24xf32> to vector<32x16xf32>
    %195 = vector.extract_strided_slice %186 {offsets = [0, 8], sizes = [32, 16], strides = [1, 1]} : vector<32x24xf32> to vector<32x16xf32>
    %196 = tpu.concatenate %187, %188, %189, %190, %191, %192, %193, %194, %195 in 0 : vector<32x16xf32>, vector<32x16xf32>, vector<32x16xf32>, vector<32x16xf32>, vector<32x16xf32>, vector<32x16xf32>, vector<32x16xf32>, vector<32x16xf32>, vector<32x16xf32> -> vector<288x16xf32>
    %c0_66 = arith.constant 0 : index
    %c0_67 = arith.constant 0 : index
    %197 = vector.load %arg20[%c0_66, %c0_67] : memref<32x288xf32, #tpu.memory_space<vmem>>, vector<32x288xf32>
    %cst_68 = arith.constant dense<0.000000e+00> : vector<32x16xf32>
    %198 = tpu.matmul %197, %196, %cst_68 {dimension_numbers = #tpu.dot_dimension_numbers<[1], [0], [0], [1], [0, 0, 1, 1], [], []>} : vector<32x288xf32>, vector<288x16xf32>, vector<32x16xf32> -> vector<32x16xf32>
    %c0_69 = arith.constant 0 : index
    %c0_70 = arith.constant 0 : index
    %199 = vector.load %arg21[%c0_69, %c0_70] : memref<32x1xf32, #tpu.memory_space<vmem>>, vector<32x1xf32>
    %200 = vector.broadcast %199 : vector<32x1xf32> to vector<32x16xf32>
    %201 = arith.addf %198, %200 : vector<32x16xf32>
    %cst_71 = arith.constant 0.000000e+00 : f32
    %202 = vector.broadcast %cst_71 : f32 to vector<32x4xf32>
    %203 = tpu.concatenate %202, %201, %202 in 1 : vector<32x4xf32>, vector<32x16xf32>, vector<32x4xf32> -> vector<32x24xf32>
    %204 = vector.extract_strided_slice %203 {offsets = [0, 0], sizes = [32, 16], strides = [1, 1]} : vector<32x24xf32> to vector<32x16xf32>
    %205 = vector.extract_strided_slice %203 {offsets = [0, 1], sizes = [32, 16], strides = [1, 1]} : vector<32x24xf32> to vector<32x16xf32>
    %206 = vector.extract_strided_slice %203 {offsets = [0, 2], sizes = [32, 16], strides = [1, 1]} : vector<32x24xf32> to vector<32x16xf32>
    %207 = vector.extract_strided_slice %203 {offsets = [0, 3], sizes = [32, 16], strides = [1, 1]} : vector<32x24xf32> to vector<32x16xf32>
    %208 = vector.extract_strided_slice %203 {offsets = [0, 4], sizes = [32, 16], strides = [1, 1]} : vector<32x24xf32> to vector<32x16xf32>
    %209 = vector.extract_strided_slice %203 {offsets = [0, 5], sizes = [32, 16], strides = [1, 1]} : vector<32x24xf32> to vector<32x16xf32>
    %210 = vector.extract_strided_slice %203 {offsets = [0, 6], sizes = [32, 16], strides = [1, 1]} : vector<32x24xf32> to vector<32x16xf32>
    %211 = vector.extract_strided_slice %203 {offsets = [0, 7], sizes = [32, 16], strides = [1, 1]} : vector<32x24xf32> to vector<32x16xf32>
    %212 = vector.extract_strided_slice %203 {offsets = [0, 8], sizes = [32, 16], strides = [1, 1]} : vector<32x24xf32> to vector<32x16xf32>
    %213 = tpu.concatenate %204, %205, %206, %207, %208, %209, %210, %211, %212 in 0 : vector<32x16xf32>, vector<32x16xf32>, vector<32x16xf32>, vector<32x16xf32>, vector<32x16xf32>, vector<32x16xf32>, vector<32x16xf32>, vector<32x16xf32>, vector<32x16xf32> -> vector<288x16xf32>
    %c0_72 = arith.constant 0 : index
    %c0_73 = arith.constant 0 : index
    %214 = vector.load %arg22[%c0_72, %c0_73] : memref<32x288xf32, #tpu.memory_space<vmem>>, vector<32x288xf32>
    %cst_74 = arith.constant dense<0.000000e+00> : vector<32x16xf32>
    %215 = tpu.matmul %214, %213, %cst_74 {dimension_numbers = #tpu.dot_dimension_numbers<[1], [0], [0], [1], [0, 0, 1, 1], [], []>} : vector<32x288xf32>, vector<288x16xf32>, vector<32x16xf32> -> vector<32x16xf32>
    %c0_75 = arith.constant 0 : index
    %c0_76 = arith.constant 0 : index
    %216 = vector.load %arg23[%c0_75, %c0_76] : memref<32x1xf32, #tpu.memory_space<vmem>>, vector<32x1xf32>
    %217 = vector.broadcast %216 : vector<32x1xf32> to vector<32x16xf32>
    %218 = arith.addf %215, %217 : vector<32x16xf32>
    %cst_77 = arith.constant 0.000000e+00 : f32
    %219 = vector.broadcast %cst_77 : f32 to vector<32x16xf32>
    %220 = arith.maximumf %218, %219 : vector<32x16xf32>
    %cst_78 = arith.constant 0.000000e+00 : f32
    %221 = vector.broadcast %cst_78 : f32 to vector<32x4xf32>
    %222 = tpu.concatenate %221, %220, %221 in 1 : vector<32x4xf32>, vector<32x16xf32>, vector<32x4xf32> -> vector<32x24xf32>
    %223 = vector.extract_strided_slice %222 {offsets = [0, 0], sizes = [32, 16], strides = [1, 1]} : vector<32x24xf32> to vector<32x16xf32>
    %224 = vector.extract_strided_slice %222 {offsets = [0, 1], sizes = [32, 16], strides = [1, 1]} : vector<32x24xf32> to vector<32x16xf32>
    %225 = vector.extract_strided_slice %222 {offsets = [0, 2], sizes = [32, 16], strides = [1, 1]} : vector<32x24xf32> to vector<32x16xf32>
    %226 = vector.extract_strided_slice %222 {offsets = [0, 3], sizes = [32, 16], strides = [1, 1]} : vector<32x24xf32> to vector<32x16xf32>
    %227 = vector.extract_strided_slice %222 {offsets = [0, 4], sizes = [32, 16], strides = [1, 1]} : vector<32x24xf32> to vector<32x16xf32>
    %228 = vector.extract_strided_slice %222 {offsets = [0, 5], sizes = [32, 16], strides = [1, 1]} : vector<32x24xf32> to vector<32x16xf32>
    %229 = vector.extract_strided_slice %222 {offsets = [0, 6], sizes = [32, 16], strides = [1, 1]} : vector<32x24xf32> to vector<32x16xf32>
    %230 = vector.extract_strided_slice %222 {offsets = [0, 7], sizes = [32, 16], strides = [1, 1]} : vector<32x24xf32> to vector<32x16xf32>
    %231 = vector.extract_strided_slice %222 {offsets = [0, 8], sizes = [32, 16], strides = [1, 1]} : vector<32x24xf32> to vector<32x16xf32>
    %232 = tpu.concatenate %223, %224, %225, %226, %227, %228, %229, %230, %231 in 0 : vector<32x16xf32>, vector<32x16xf32>, vector<32x16xf32>, vector<32x16xf32>, vector<32x16xf32>, vector<32x16xf32>, vector<32x16xf32>, vector<32x16xf32>, vector<32x16xf32> -> vector<288x16xf32>
    %c0_79 = arith.constant 0 : index
    %c0_80 = arith.constant 0 : index
    %233 = vector.load %arg24[%c0_79, %c0_80] : memref<32x288xf32, #tpu.memory_space<vmem>>, vector<32x288xf32>
    %cst_81 = arith.constant dense<0.000000e+00> : vector<32x16xf32>
    %234 = tpu.matmul %233, %232, %cst_81 {dimension_numbers = #tpu.dot_dimension_numbers<[1], [0], [0], [1], [0, 0, 1, 1], [], []>} : vector<32x288xf32>, vector<288x16xf32>, vector<32x16xf32> -> vector<32x16xf32>
    %c0_82 = arith.constant 0 : index
    %c0_83 = arith.constant 0 : index
    %235 = vector.load %arg25[%c0_82, %c0_83] : memref<32x1xf32, #tpu.memory_space<vmem>>, vector<32x1xf32>
    %236 = vector.broadcast %235 : vector<32x1xf32> to vector<32x16xf32>
    %237 = arith.addf %234, %236 : vector<32x16xf32>
    %cst_84 = arith.constant 0.000000e+00 : f32
    %238 = vector.broadcast %cst_84 : f32 to vector<32x16xf32>
    %239 = arith.maximumf %237, %238 : vector<32x16xf32>
    %240 = arith.addf %239, %201 : vector<32x16xf32>
    %cst_85 = arith.constant 0.000000e+00 : f32
    %241 = vector.broadcast %cst_85 : f32 to vector<32x4xf32>
    %242 = tpu.concatenate %241, %240, %241 in 1 : vector<32x4xf32>, vector<32x16xf32>, vector<32x4xf32> -> vector<32x24xf32>
    %243 = vector.extract_strided_slice %242 {offsets = [0, 0], sizes = [32, 16], strides = [1, 1]} : vector<32x24xf32> to vector<32x16xf32>
    %244 = vector.extract_strided_slice %242 {offsets = [0, 2], sizes = [32, 16], strides = [1, 1]} : vector<32x24xf32> to vector<32x16xf32>
    %245 = vector.extract_strided_slice %242 {offsets = [0, 4], sizes = [32, 16], strides = [1, 1]} : vector<32x24xf32> to vector<32x16xf32>
    %246 = vector.extract_strided_slice %242 {offsets = [0, 6], sizes = [32, 16], strides = [1, 1]} : vector<32x24xf32> to vector<32x16xf32>
    %247 = vector.extract_strided_slice %242 {offsets = [0, 8], sizes = [32, 16], strides = [1, 1]} : vector<32x24xf32> to vector<32x16xf32>
    %248 = tpu.concatenate %243, %244, %245, %246, %247 in 0 : vector<32x16xf32>, vector<32x16xf32>, vector<32x16xf32>, vector<32x16xf32>, vector<32x16xf32> -> vector<160x16xf32>
    %c0_86 = arith.constant 0 : index
    %c0_87 = arith.constant 0 : index
    %249 = vector.load %arg26[%c0_86, %c0_87] : memref<32x160xf32, #tpu.memory_space<vmem>>, vector<32x160xf32>
    %cst_88 = arith.constant dense<0.000000e+00> : vector<32x16xf32>
    %250 = tpu.matmul %249, %248, %cst_88 {dimension_numbers = #tpu.dot_dimension_numbers<[1], [0], [0], [1], [0, 0, 1, 1], [], []>} : vector<32x160xf32>, vector<160x16xf32>, vector<32x16xf32> -> vector<32x16xf32>
    %c0_89 = arith.constant 0 : index
    %c0_90 = arith.constant 0 : index
    %251 = vector.load %arg27[%c0_89, %c0_90] : memref<32x1xf32, #tpu.memory_space<vmem>>, vector<32x1xf32>
    %252 = vector.broadcast %251 : vector<32x1xf32> to vector<32x16xf32>
    %253 = arith.addf %250, %252 : vector<32x16xf32>
    %cst_91 = arith.constant 0.000000e+00 : f32
    %254 = vector.broadcast %cst_91 : f32 to vector<32x16xf32>
    %255 = arith.maximumf %253, %254 : vector<32x16xf32>
    %256 = arith.addf %239, %255 : vector<32x16xf32>
    %cst_92 = arith.constant 0.000000e+00 : f32
    %257 = vector.broadcast %cst_92 : f32 to vector<32x8xf32>
    %258 = tpu.concatenate %257, %256, %257 in 1 : vector<32x8xf32>, vector<32x16xf32>, vector<32x8xf32> -> vector<32x32xf32>
    %259 = vector.extract_strided_slice %258 {offsets = [0, 0], sizes = [32, 16], strides = [1, 1]} : vector<32x32xf32> to vector<32x16xf32>
    %260 = vector.extract_strided_slice %258 {offsets = [0, 4], sizes = [32, 16], strides = [1, 1]} : vector<32x32xf32> to vector<32x16xf32>
    %261 = vector.extract_strided_slice %258 {offsets = [0, 8], sizes = [32, 16], strides = [1, 1]} : vector<32x32xf32> to vector<32x16xf32>
    %262 = vector.extract_strided_slice %258 {offsets = [0, 12], sizes = [32, 16], strides = [1, 1]} : vector<32x32xf32> to vector<32x16xf32>
    %263 = vector.extract_strided_slice %258 {offsets = [0, 16], sizes = [32, 16], strides = [1, 1]} : vector<32x32xf32> to vector<32x16xf32>
    %264 = tpu.concatenate %259, %260, %261, %262, %263 in 0 : vector<32x16xf32>, vector<32x16xf32>, vector<32x16xf32>, vector<32x16xf32>, vector<32x16xf32> -> vector<160x16xf32>
    %c0_93 = arith.constant 0 : index
    %c0_94 = arith.constant 0 : index
    %265 = vector.load %arg28[%c0_93, %c0_94] : memref<32x160xf32, #tpu.memory_space<vmem>>, vector<32x160xf32>
    %cst_95 = arith.constant dense<0.000000e+00> : vector<32x16xf32>
    %266 = tpu.matmul %265, %264, %cst_95 {dimension_numbers = #tpu.dot_dimension_numbers<[1], [0], [0], [1], [0, 0, 1, 1], [], []>} : vector<32x160xf32>, vector<160x16xf32>, vector<32x16xf32> -> vector<32x16xf32>
    %c0_96 = arith.constant 0 : index
    %c0_97 = arith.constant 0 : index
    %267 = vector.load %arg29[%c0_96, %c0_97] : memref<32x1xf32, #tpu.memory_space<vmem>>, vector<32x1xf32>
    %268 = vector.broadcast %267 : vector<32x1xf32> to vector<32x16xf32>
    %269 = arith.addf %266, %268 : vector<32x16xf32>
    %cst_98 = arith.constant 0.000000e+00 : f32
    %270 = vector.broadcast %cst_98 : f32 to vector<32x16xf32>
    %271 = arith.maximumf %269, %270 : vector<32x16xf32>
    %272 = arith.addf %256, %271 : vector<32x16xf32>
    %cst_99 = arith.constant 0.000000e+00 : f32
    %273 = vector.broadcast %cst_99 : f32 to vector<32x16xf32>
    %274 = tpu.concatenate %273, %272, %273 in 1 : vector<32x16xf32>, vector<32x16xf32>, vector<32x16xf32> -> vector<32x48xf32>
    %275 = vector.extract_strided_slice %274 {offsets = [0, 0], sizes = [32, 16], strides = [1, 1]} : vector<32x48xf32> to vector<32x16xf32>
    %276 = vector.extract_strided_slice %274 {offsets = [0, 8], sizes = [32, 16], strides = [1, 1]} : vector<32x48xf32> to vector<32x16xf32>
    %277 = vector.extract_strided_slice %274 {offsets = [0, 16], sizes = [32, 16], strides = [1, 1]} : vector<32x48xf32> to vector<32x16xf32>
    %278 = vector.extract_strided_slice %274 {offsets = [0, 24], sizes = [32, 16], strides = [1, 1]} : vector<32x48xf32> to vector<32x16xf32>
    %279 = vector.extract_strided_slice %274 {offsets = [0, 32], sizes = [32, 16], strides = [1, 1]} : vector<32x48xf32> to vector<32x16xf32>
    %280 = tpu.concatenate %275, %276, %277, %278, %279 in 0 : vector<32x16xf32>, vector<32x16xf32>, vector<32x16xf32>, vector<32x16xf32>, vector<32x16xf32> -> vector<160x16xf32>
    %c0_100 = arith.constant 0 : index
    %c0_101 = arith.constant 0 : index
    %281 = vector.load %arg30[%c0_100, %c0_101] : memref<32x160xf32, #tpu.memory_space<vmem>>, vector<32x160xf32>
    %cst_102 = arith.constant dense<0.000000e+00> : vector<32x16xf32>
    %282 = tpu.matmul %281, %280, %cst_102 {dimension_numbers = #tpu.dot_dimension_numbers<[1], [0], [0], [1], [0, 0, 1, 1], [], []>} : vector<32x160xf32>, vector<160x16xf32>, vector<32x16xf32> -> vector<32x16xf32>
    %c0_103 = arith.constant 0 : index
    %c0_104 = arith.constant 0 : index
    %283 = vector.load %arg31[%c0_103, %c0_104] : memref<32x1xf32, #tpu.memory_space<vmem>>, vector<32x1xf32>
    %284 = vector.broadcast %283 : vector<32x1xf32> to vector<32x16xf32>
    %285 = arith.addf %282, %284 : vector<32x16xf32>
    %cst_105 = arith.constant 0.000000e+00 : f32
    %286 = vector.broadcast %cst_105 : f32 to vector<32x16xf32>
    %287 = arith.maximumf %285, %286 : vector<32x16xf32>
    %288 = arith.addf %272, %287 : vector<32x16xf32>
    %cst_106 = arith.constant 0.000000e+00 : f32
    %289 = vector.broadcast %cst_106 : f32 to vector<32x32xf32>
    %290 = tpu.concatenate %289, %288, %289 in 1 : vector<32x32xf32>, vector<32x16xf32>, vector<32x32xf32> -> vector<32x80xf32>
    %291 = vector.extract_strided_slice %290 {offsets = [0, 0], sizes = [32, 16], strides = [1, 1]} : vector<32x80xf32> to vector<32x16xf32>
    %292 = vector.extract_strided_slice %290 {offsets = [0, 16], sizes = [32, 16], strides = [1, 1]} : vector<32x80xf32> to vector<32x16xf32>
    %293 = vector.extract_strided_slice %290 {offsets = [0, 32], sizes = [32, 16], strides = [1, 1]} : vector<32x80xf32> to vector<32x16xf32>
    %294 = vector.extract_strided_slice %290 {offsets = [0, 48], sizes = [32, 16], strides = [1, 1]} : vector<32x80xf32> to vector<32x16xf32>
    %295 = vector.extract_strided_slice %290 {offsets = [0, 64], sizes = [32, 16], strides = [1, 1]} : vector<32x80xf32> to vector<32x16xf32>
    %296 = tpu.concatenate %291, %292, %293, %294, %295 in 0 : vector<32x16xf32>, vector<32x16xf32>, vector<32x16xf32>, vector<32x16xf32>, vector<32x16xf32> -> vector<160x16xf32>
    %c0_107 = arith.constant 0 : index
    %c0_108 = arith.constant 0 : index
    %297 = vector.load %arg32[%c0_107, %c0_108] : memref<32x160xf32, #tpu.memory_space<vmem>>, vector<32x160xf32>
    %cst_109 = arith.constant dense<0.000000e+00> : vector<32x16xf32>
    %298 = tpu.matmul %297, %296, %cst_109 {dimension_numbers = #tpu.dot_dimension_numbers<[1], [0], [0], [1], [0, 0, 1, 1], [], []>} : vector<32x160xf32>, vector<160x16xf32>, vector<32x16xf32> -> vector<32x16xf32>
    %c0_110 = arith.constant 0 : index
    %c0_111 = arith.constant 0 : index
    %299 = vector.load %arg33[%c0_110, %c0_111] : memref<32x1xf32, #tpu.memory_space<vmem>>, vector<32x1xf32>
    %300 = vector.broadcast %299 : vector<32x1xf32> to vector<32x16xf32>
    %301 = arith.addf %298, %300 : vector<32x16xf32>
    %cst_112 = arith.constant 0.000000e+00 : f32
    %302 = vector.broadcast %cst_112 : f32 to vector<32x16xf32>
    %303 = arith.maximumf %301, %302 : vector<32x16xf32>
    %304 = arith.addf %288, %303 : vector<32x16xf32>
    %cst_113 = arith.constant 0.000000e+00 : f32
    %305 = vector.broadcast %cst_113 : f32 to vector<32x50xf32>
    %306 = tpu.concatenate %305, %304, %305 in 1 : vector<32x50xf32>, vector<32x16xf32>, vector<32x50xf32> -> vector<32x116xf32>
    %307 = vector.extract_strided_slice %306 {offsets = [0, 0], sizes = [32, 16], strides = [1, 1]} : vector<32x116xf32> to vector<32x16xf32>
    %308 = vector.extract_strided_slice %306 {offsets = [0, 25], sizes = [32, 16], strides = [1, 1]} : vector<32x116xf32> to vector<32x16xf32>
    %309 = vector.extract_strided_slice %306 {offsets = [0, 50], sizes = [32, 16], strides = [1, 1]} : vector<32x116xf32> to vector<32x16xf32>
    %310 = vector.extract_strided_slice %306 {offsets = [0, 75], sizes = [32, 16], strides = [1, 1]} : vector<32x116xf32> to vector<32x16xf32>
    %311 = vector.extract_strided_slice %306 {offsets = [0, 100], sizes = [32, 16], strides = [1, 1]} : vector<32x116xf32> to vector<32x16xf32>
    %312 = tpu.concatenate %307, %308, %309, %310, %311 in 0 : vector<32x16xf32>, vector<32x16xf32>, vector<32x16xf32>, vector<32x16xf32>, vector<32x16xf32> -> vector<160x16xf32>
    %c0_114 = arith.constant 0 : index
    %c0_115 = arith.constant 0 : index
    %313 = vector.load %arg34[%c0_114, %c0_115] : memref<32x160xf32, #tpu.memory_space<vmem>>, vector<32x160xf32>
    %cst_116 = arith.constant dense<0.000000e+00> : vector<32x16xf32>
    %314 = tpu.matmul %313, %312, %cst_116 {dimension_numbers = #tpu.dot_dimension_numbers<[1], [0], [0], [1], [0, 0, 1, 1], [], []>} : vector<32x160xf32>, vector<160x16xf32>, vector<32x16xf32> -> vector<32x16xf32>
    %c0_117 = arith.constant 0 : index
    %c0_118 = arith.constant 0 : index
    %315 = vector.load %arg35[%c0_117, %c0_118] : memref<32x1xf32, #tpu.memory_space<vmem>>, vector<32x1xf32>
    %316 = vector.broadcast %315 : vector<32x1xf32> to vector<32x16xf32>
    %317 = arith.addf %314, %316 : vector<32x16xf32>
    %cst_119 = arith.constant 0.000000e+00 : f32
    %318 = vector.broadcast %cst_119 : f32 to vector<32x16xf32>
    %319 = arith.maximumf %317, %318 : vector<32x16xf32>
    %320 = arith.addf %304, %319 : vector<32x16xf32>
    %c0_120 = arith.constant 0 : index
    %c0_121 = arith.constant 0 : index
    %321 = vector.load %arg38[%c0_120, %c0_121] : memref<16x8xf32, #tpu.memory_space<vmem>>, vector<16x8xf32>
    %cst_122 = arith.constant dense<0.000000e+00> : vector<32x8xf32>
    %322 = tpu.matmul %320, %321, %cst_122 {dimension_numbers = #tpu.dot_dimension_numbers<[1], [0], [0], [1], [0, 0, 1, 1], [], []>} : vector<32x16xf32>, vector<16x8xf32>, vector<32x8xf32> -> vector<32x8xf32>
    %cst_123 = arith.constant 0.000000e+00 : f32
    %323 = vector.broadcast %cst_123 : f32 to vector<32x48xf32>
    %324 = vector.extract_strided_slice %322 {offsets = [0, 0], sizes = [32, 1], strides = [1, 1]} : vector<32x8xf32> to vector<32x1xf32>
    %c0_124 = arith.constant 0 : index
    %c0_125 = arith.constant 0 : index
    %c0_126 = arith.constant 0 : index
    %325 = vector.load %arg39[%c0_124, %c0_125, %c0_126] : memref<8x32x48xf32, #tpu.memory_space<vmem>>, vector<1x32x48xf32>
    %326 = vector.shape_cast %325 : vector<1x32x48xf32> to vector<32x48xf32>
    %327 = vector.broadcast %324 : vector<32x1xf32> to vector<32x48xf32>
    %328 = arith.mulf %327, %326 : vector<32x48xf32>
    %329 = arith.addf %323, %328 : vector<32x48xf32>
    %330 = vector.extract_strided_slice %322 {offsets = [0, 1], sizes = [32, 1], strides = [1, 1]} : vector<32x8xf32> to vector<32x1xf32>
    %c1 = arith.constant 1 : index
    %c0_127 = arith.constant 0 : index
    %c0_128 = arith.constant 0 : index
    %331 = vector.load %arg39[%c1, %c0_127, %c0_128] : memref<8x32x48xf32, #tpu.memory_space<vmem>>, vector<1x32x48xf32>
    %332 = vector.shape_cast %331 : vector<1x32x48xf32> to vector<32x48xf32>
    %333 = vector.broadcast %330 : vector<32x1xf32> to vector<32x48xf32>
    %334 = arith.mulf %333, %332 : vector<32x48xf32>
    %335 = arith.addf %329, %334 : vector<32x48xf32>
    %336 = vector.extract_strided_slice %322 {offsets = [0, 2], sizes = [32, 1], strides = [1, 1]} : vector<32x8xf32> to vector<32x1xf32>
    %c2 = arith.constant 2 : index
    %c0_129 = arith.constant 0 : index
    %c0_130 = arith.constant 0 : index
    %337 = vector.load %arg39[%c2, %c0_129, %c0_130] : memref<8x32x48xf32, #tpu.memory_space<vmem>>, vector<1x32x48xf32>
    %338 = vector.shape_cast %337 : vector<1x32x48xf32> to vector<32x48xf32>
    %339 = vector.broadcast %336 : vector<32x1xf32> to vector<32x48xf32>
    %340 = arith.mulf %339, %338 : vector<32x48xf32>
    %341 = arith.addf %335, %340 : vector<32x48xf32>
    %342 = vector.extract_strided_slice %322 {offsets = [0, 3], sizes = [32, 1], strides = [1, 1]} : vector<32x8xf32> to vector<32x1xf32>
    %c3 = arith.constant 3 : index
    %c0_131 = arith.constant 0 : index
    %c0_132 = arith.constant 0 : index
    %343 = vector.load %arg39[%c3, %c0_131, %c0_132] : memref<8x32x48xf32, #tpu.memory_space<vmem>>, vector<1x32x48xf32>
    %344 = vector.shape_cast %343 : vector<1x32x48xf32> to vector<32x48xf32>
    %345 = vector.broadcast %342 : vector<32x1xf32> to vector<32x48xf32>
    %346 = arith.mulf %345, %344 : vector<32x48xf32>
    %347 = arith.addf %341, %346 : vector<32x48xf32>
    %348 = vector.extract_strided_slice %322 {offsets = [0, 4], sizes = [32, 1], strides = [1, 1]} : vector<32x8xf32> to vector<32x1xf32>
    %c4 = arith.constant 4 : index
    %c0_133 = arith.constant 0 : index
    %c0_134 = arith.constant 0 : index
    %349 = vector.load %arg39[%c4, %c0_133, %c0_134] : memref<8x32x48xf32, #tpu.memory_space<vmem>>, vector<1x32x48xf32>
    %350 = vector.shape_cast %349 : vector<1x32x48xf32> to vector<32x48xf32>
    %351 = vector.broadcast %348 : vector<32x1xf32> to vector<32x48xf32>
    %352 = arith.mulf %351, %350 : vector<32x48xf32>
    %353 = arith.addf %347, %352 : vector<32x48xf32>
    %354 = vector.extract_strided_slice %322 {offsets = [0, 5], sizes = [32, 1], strides = [1, 1]} : vector<32x8xf32> to vector<32x1xf32>
    %c5 = arith.constant 5 : index
    %c0_135 = arith.constant 0 : index
    %c0_136 = arith.constant 0 : index
    %355 = vector.load %arg39[%c5, %c0_135, %c0_136] : memref<8x32x48xf32, #tpu.memory_space<vmem>>, vector<1x32x48xf32>
    %356 = vector.shape_cast %355 : vector<1x32x48xf32> to vector<32x48xf32>
    %357 = vector.broadcast %354 : vector<32x1xf32> to vector<32x48xf32>
    %358 = arith.mulf %357, %356 : vector<32x48xf32>
    %359 = arith.addf %353, %358 : vector<32x48xf32>
    %360 = vector.extract_strided_slice %322 {offsets = [0, 6], sizes = [32, 1], strides = [1, 1]} : vector<32x8xf32> to vector<32x1xf32>
    %c6 = arith.constant 6 : index
    %c0_137 = arith.constant 0 : index
    %c0_138 = arith.constant 0 : index
    %361 = vector.load %arg39[%c6, %c0_137, %c0_138] : memref<8x32x48xf32, #tpu.memory_space<vmem>>, vector<1x32x48xf32>
    %362 = vector.shape_cast %361 : vector<1x32x48xf32> to vector<32x48xf32>
    %363 = vector.broadcast %360 : vector<32x1xf32> to vector<32x48xf32>
    %364 = arith.mulf %363, %362 : vector<32x48xf32>
    %365 = arith.addf %359, %364 : vector<32x48xf32>
    %366 = vector.extract_strided_slice %322 {offsets = [0, 7], sizes = [32, 1], strides = [1, 1]} : vector<32x8xf32> to vector<32x1xf32>
    %c7 = arith.constant 7 : index
    %c0_139 = arith.constant 0 : index
    %c0_140 = arith.constant 0 : index
    %367 = vector.load %arg39[%c7, %c0_139, %c0_140] : memref<8x32x48xf32, #tpu.memory_space<vmem>>, vector<1x32x48xf32>
    %368 = vector.shape_cast %367 : vector<1x32x48xf32> to vector<32x48xf32>
    %369 = vector.broadcast %366 : vector<32x1xf32> to vector<32x48xf32>
    %370 = arith.mulf %369, %368 : vector<32x48xf32>
    %371 = arith.addf %365, %370 : vector<32x48xf32>
    %cst_141 = arith.constant dense<0.000000e+00> : vector<48xf32>
    %372 = vector.multi_reduction <add>, %371, %cst_141 [0] : vector<32x48xf32> to vector<48xf32>
    %373 = vector.shape_cast %372 : vector<48xf32> to vector<1x48xf32>
    %c0_142 = arith.constant 0 : index
    %c0_143 = arith.constant 0 : index
    %374 = vector.load %arg40[%c0_142, %c0_143] : memref<1x48xf32, #tpu.memory_space<vmem>>, vector<1x48xf32>
    %375 = arith.addf %373, %374 : vector<1x48xf32>
    %cst_144 = arith.constant 0.000000e+00 : f32
    %376 = vector.broadcast %cst_144 : f32 to vector<1x48xf32>
    %377 = arith.maximumf %375, %376 : vector<1x48xf32>
    %c0_145 = arith.constant 0 : index
    %c0_146 = arith.constant 0 : index
    %378 = vector.load %arg41[%c0_145, %c0_146] : memref<48x48xf32, #tpu.memory_space<vmem>>, vector<48x48xf32>
    %cst_147 = arith.constant dense<0.000000e+00> : vector<1x48xf32>
    %379 = tpu.matmul %377, %378, %cst_147 {dimension_numbers = #tpu.dot_dimension_numbers<[1], [0], [0], [1], [0, 0, 1, 1], [], []>} : vector<1x48xf32>, vector<48x48xf32>, vector<1x48xf32> -> vector<1x48xf32>
    %c0_148 = arith.constant 0 : index
    %c0_149 = arith.constant 0 : index
    %380 = vector.load %arg42[%c0_148, %c0_149] : memref<1x48xf32, #tpu.memory_space<vmem>>, vector<1x48xf32>
    %381 = arith.addf %379, %380 : vector<1x48xf32>
    %cst_150 = arith.constant 0.000000e+00 : f32
    %382 = vector.broadcast %cst_150 : f32 to vector<1x48xf32>
    %383 = arith.subf %382, %381 : vector<1x48xf32>
    %384 = math.exp %383 : vector<1x48xf32>
    %cst_151 = arith.constant 1.000000e+00 : f32
    %385 = vector.broadcast %cst_151 : f32 to vector<1x48xf32>
    %386 = arith.addf %385, %384 : vector<1x48xf32>
    %cst_152 = arith.constant 1.000000e+00 : f32
    %387 = vector.broadcast %cst_152 : f32 to vector<1x48xf32>
    %388 = arith.divf %387, %386 : vector<1x48xf32>
    %c0_153 = arith.constant 0 : index
    %c0_154 = arith.constant 0 : index
    %c0_155 = arith.constant 0 : index
    %389 = vector.load %arg43[%c0_153, %c0_154, %c0_155] : memref<1x1x48xf32, #tpu.memory_space<vmem>>, vector<1x1x48xf32>
    %390 = vector.shape_cast %389 : vector<1x1x48xf32> to vector<1x48xf32>
    %391 = vector.shape_cast %388 : vector<1x48xf32> to vector<1x1x48xf32>
    tpu.vector_store %arg43[%c0_153, %c0_154, %c0_155], %391 {strides = array<i32>} : memref<1x1x48xf32, #tpu.memory_space<vmem>>, vector<1x1x48xf32>,
    return
  }
  func.func @transform_0(%arg0: i32) -> (i32, i32, i32) {
    %c0_i32 = arith.constant 0 : i32
    %c0_i32_0 = arith.constant 0 : i32
    %c0_i32_1 = arith.constant 0 : i32
    return %arg0, %c0_i32, %c0_i32_0 : i32, i32, i32
  }
  func.func @transform_1(%arg0: i32) -> (i32, i32) {
    %c0_i32 = arith.constant 0 : i32
    %c0_i32_0 = arith.constant 0 : i32
    %c0_i32_1 = arith.constant 0 : i32
    return %c0_i32, %c0_i32_0 : i32, i32
  }
  func.func @transform_2(%arg0: i32) -> (i32, i32) {
    %c0_i32 = arith.constant 0 : i32
    %c0_i32_0 = arith.constant 0 : i32
    %c0_i32_1 = arith.constant 0 : i32
    return %c0_i32, %c0_i32_0 : i32, i32
  }
  func.func @transform_3(%arg0: i32) -> (i32, i32) {
    %c0_i32 = arith.constant 0 : i32
    %c0_i32_0 = arith.constant 0 : i32
    %c0_i32_1 = arith.constant 0 : i32
    return %c0_i32, %c0_i32_0 : i32, i32
  }
  func.func @transform_4(%arg0: i32) -> (i32, i32) {
    %c0_i32 = arith.constant 0 : i32
    %c0_i32_0 = arith.constant 0 : i32
    %c0_i32_1 = arith.constant 0 : i32
    return %c0_i32, %c0_i32_0 : i32, i32
  }
  func.func @transform_5(%arg0: i32) -> (i32, i32) {
    %c0_i32 = arith.constant 0 : i32
    %c0_i32_0 = arith.constant 0 : i32
    %c0_i32_1 = arith.constant 0 : i32
    return %c0_i32, %c0_i32_0 : i32, i32
  }
  func.func @transform_6(%arg0: i32) -> (i32, i32) {
    %c0_i32 = arith.constant 0 : i32
    %c0_i32_0 = arith.constant 0 : i32
    %c0_i32_1 = arith.constant 0 : i32
    return %c0_i32, %c0_i32_0 : i32, i32
  }
  func.func @transform_7(%arg0: i32) -> (i32, i32) {
    %c0_i32 = arith.constant 0 : i32
    %c0_i32_0 = arith.constant 0 : i32
    %c0_i32_1 = arith.constant 0 : i32
    return %c0_i32, %c0_i32_0 : i32, i32
  }
  func.func @transform_8(%arg0: i32) -> (i32, i32) {
    %c0_i32 = arith.constant 0 : i32
    %c0_i32_0 = arith.constant 0 : i32
    %c0_i32_1 = arith.constant 0 : i32
    return %c0_i32, %c0_i32_0 : i32, i32
  }
  func.func @transform_9(%arg0: i32) -> (i32, i32) {
    %c0_i32 = arith.constant 0 : i32
    %c0_i32_0 = arith.constant 0 : i32
    %c0_i32_1 = arith.constant 0 : i32
    return %c0_i32, %c0_i32_0 : i32, i32
  }
  func.func @transform_10(%arg0: i32) -> (i32, i32) {
    %c0_i32 = arith.constant 0 : i32
    %c0_i32_0 = arith.constant 0 : i32
    %c0_i32_1 = arith.constant 0 : i32
    return %c0_i32, %c0_i32_0 : i32, i32
  }
  func.func @transform_11(%arg0: i32) -> (i32, i32) {
    %c0_i32 = arith.constant 0 : i32
    %c0_i32_0 = arith.constant 0 : i32
    %c0_i32_1 = arith.constant 0 : i32
    return %c0_i32, %c0_i32_0 : i32, i32
  }
  func.func @transform_12(%arg0: i32) -> (i32, i32) {
    %c0_i32 = arith.constant 0 : i32
    %c0_i32_0 = arith.constant 0 : i32
    %c0_i32_1 = arith.constant 0 : i32
    return %c0_i32, %c0_i32_0 : i32, i32
  }
  func.func @transform_13(%arg0: i32) -> (i32, i32) {
    %c0_i32 = arith.constant 0 : i32
    %c0_i32_0 = arith.constant 0 : i32
    %c0_i32_1 = arith.constant 0 : i32
    return %c0_i32, %c0_i32_0 : i32, i32
  }
  func.func @transform_14(%arg0: i32) -> (i32, i32) {
    %c0_i32 = arith.constant 0 : i32
    %c0_i32_0 = arith.constant 0 : i32
    %c0_i32_1 = arith.constant 0 : i32
    return %c0_i32, %c0_i32_0 : i32, i32
  }
  func.func @transform_15(%arg0: i32) -> (i32, i32) {
    %c0_i32 = arith.constant 0 : i32
    %c0_i32_0 = arith.constant 0 : i32
    %c0_i32_1 = arith.constant 0 : i32
    return %c0_i32, %c0_i32_0 : i32, i32
  }
  func.func @transform_16(%arg0: i32) -> (i32, i32) {
    %c0_i32 = arith.constant 0 : i32
    %c0_i32_0 = arith.constant 0 : i32
    %c0_i32_1 = arith.constant 0 : i32
    return %c0_i32, %c0_i32_0 : i32, i32
  }
  func.func @transform_17(%arg0: i32) -> (i32, i32) {
    %c0_i32 = arith.constant 0 : i32
    %c0_i32_0 = arith.constant 0 : i32
    %c0_i32_1 = arith.constant 0 : i32
    return %c0_i32, %c0_i32_0 : i32, i32
  }
  func.func @transform_18(%arg0: i32) -> (i32, i32) {
    %c0_i32 = arith.constant 0 : i32
    %c0_i32_0 = arith.constant 0 : i32
    %c0_i32_1 = arith.constant 0 : i32
    return %c0_i32, %c0_i32_0 : i32, i32
  }
  func.func @transform_19(%arg0: i32) -> (i32, i32) {
    %c0_i32 = arith.constant 0 : i32
    %c0_i32_0 = arith.constant 0 : i32
    %c0_i32_1 = arith.constant 0 : i32
    return %c0_i32, %c0_i32_0 : i32, i32
  }
  func.func @transform_20(%arg0: i32) -> (i32, i32) {
    %c0_i32 = arith.constant 0 : i32
    %c0_i32_0 = arith.constant 0 : i32
    %c0_i32_1 = arith.constant 0 : i32
    return %c0_i32, %c0_i32_0 : i32, i32
  }
  func.func @transform_21(%arg0: i32) -> (i32, i32) {
    %c0_i32 = arith.constant 0 : i32
    %c0_i32_0 = arith.constant 0 : i32
    %c0_i32_1 = arith.constant 0 : i32
    return %c0_i32, %c0_i32_0 : i32, i32
  }
  func.func @transform_22(%arg0: i32) -> (i32, i32) {
    %c0_i32 = arith.constant 0 : i32
    %c0_i32_0 = arith.constant 0 : i32
    %c0_i32_1 = arith.constant 0 : i32
    return %c0_i32, %c0_i32_0 : i32, i32
  }
  func.func @transform_23(%arg0: i32) -> (i32, i32) {
    %c0_i32 = arith.constant 0 : i32
    %c0_i32_0 = arith.constant 0 : i32
    %c0_i32_1 = arith.constant 0 : i32
    return %c0_i32, %c0_i32_0 : i32, i32
  }
  func.func @transform_24(%arg0: i32) -> (i32, i32) {
    %c0_i32 = arith.constant 0 : i32
    %c0_i32_0 = arith.constant 0 : i32
    %c0_i32_1 = arith.constant 0 : i32
    return %c0_i32, %c0_i32_0 : i32, i32
  }
  func.func @transform_25(%arg0: i32) -> (i32, i32) {
    %c0_i32 = arith.constant 0 : i32
    %c0_i32_0 = arith.constant 0 : i32
    %c0_i32_1 = arith.constant 0 : i32
    return %c0_i32, %c0_i32_0 : i32, i32
  }
  func.func @transform_26(%arg0: i32) -> (i32, i32) {
    %c0_i32 = arith.constant 0 : i32
    %c0_i32_0 = arith.constant 0 : i32
    %c0_i32_1 = arith.constant 0 : i32
    return %c0_i32, %c0_i32_0 : i32, i32
  }
  func.func @transform_27(%arg0: i32) -> (i32, i32) {
    %c0_i32 = arith.constant 0 : i32
    %c0_i32_0 = arith.constant 0 : i32
    %c0_i32_1 = arith.constant 0 : i32
    return %c0_i32, %c0_i32_0 : i32, i32
  }
  func.func @transform_28(%arg0: i32) -> (i32, i32) {
    %c0_i32 = arith.constant 0 : i32
    %c0_i32_0 = arith.constant 0 : i32
    %c0_i32_1 = arith.constant 0 : i32
    return %c0_i32, %c0_i32_0 : i32, i32
  }
  func.func @transform_29(%arg0: i32) -> (i32, i32) {
    %c0_i32 = arith.constant 0 : i32
    %c0_i32_0 = arith.constant 0 : i32
    %c0_i32_1 = arith.constant 0 : i32
    return %c0_i32, %c0_i32_0 : i32, i32
  }
  func.func @transform_30(%arg0: i32) -> (i32, i32) {
    %c0_i32 = arith.constant 0 : i32
    %c0_i32_0 = arith.constant 0 : i32
    %c0_i32_1 = arith.constant 0 : i32
    return %c0_i32, %c0_i32_0 : i32, i32
  }
  func.func @transform_31(%arg0: i32) -> (i32, i32) {
    %c0_i32 = arith.constant 0 : i32
    %c0_i32_0 = arith.constant 0 : i32
    %c0_i32_1 = arith.constant 0 : i32
    return %c0_i32, %c0_i32_0 : i32, i32
  }
  func.func @transform_32(%arg0: i32) -> (i32, i32) {
    %c0_i32 = arith.constant 0 : i32
    %c0_i32_0 = arith.constant 0 : i32
    %c0_i32_1 = arith.constant 0 : i32
    return %c0_i32, %c0_i32_0 : i32, i32
  }
  func.func @transform_33(%arg0: i32) -> (i32, i32) {
    %c0_i32 = arith.constant 0 : i32
    %c0_i32_0 = arith.constant 0 : i32
    %c0_i32_1 = arith.constant 0 : i32
    return %c0_i32, %c0_i32_0 : i32, i32
  }
  func.func @transform_34(%arg0: i32) -> (i32, i32) {
    %c0_i32 = arith.constant 0 : i32
    %c0_i32_0 = arith.constant 0 : i32
    %c0_i32_1 = arith.constant 0 : i32
    return %c0_i32, %c0_i32_0 : i32, i32
  }
  func.func @transform_35(%arg0: i32) -> (i32, i32) {
    %c0_i32 = arith.constant 0 : i32
    %c0_i32_0 = arith.constant 0 : i32
    %c0_i32_1 = arith.constant 0 : i32
    return %c0_i32, %c0_i32_0 : i32, i32
  }
  func.func @transform_36(%arg0: i32) -> (i32, i32) {
    %c0_i32 = arith.constant 0 : i32
    %c0_i32_0 = arith.constant 0 : i32
    %c0_i32_1 = arith.constant 0 : i32
    return %c0_i32, %c0_i32_0 : i32, i32
  }
  func.func @transform_37(%arg0: i32) -> (i32, i32) {
    %c0_i32 = arith.constant 0 : i32
    %c0_i32_0 = arith.constant 0 : i32
    %c0_i32_1 = arith.constant 0 : i32
    return %c0_i32, %c0_i32_0 : i32, i32
  }
  func.func @transform_38(%arg0: i32) -> (i32, i32, i32) {
    %c0_i32 = arith.constant 0 : i32
    %c0_i32_0 = arith.constant 0 : i32
    %c0_i32_1 = arith.constant 0 : i32
    %c0_i32_2 = arith.constant 0 : i32
    return %c0_i32, %c0_i32_0, %c0_i32_1 : i32, i32, i32
  }
  func.func @transform_39(%arg0: i32) -> (i32, i32) {
    %c0_i32 = arith.constant 0 : i32
    %c0_i32_0 = arith.constant 0 : i32
    %c0_i32_1 = arith.constant 0 : i32
    return %c0_i32, %c0_i32_0 : i32, i32
  }
  func.func @transform_40(%arg0: i32) -> (i32, i32) {
    %c0_i32 = arith.constant 0 : i32
    %c0_i32_0 = arith.constant 0 : i32
    %c0_i32_1 = arith.constant 0 : i32
    return %c0_i32, %c0_i32_0 : i32, i32
  }
  func.func @transform_41(%arg0: i32) -> (i32, i32) {
    %c0_i32 = arith.constant 0 : i32
    %c0_i32_0 = arith.constant 0 : i32
    %c0_i32_1 = arith.constant 0 : i32
    return %c0_i32, %c0_i32_0 : i32, i32
  }
  func.func @transform_42(%arg0: i32) -> (i32, i32, i32) {
    %c0_i32 = arith.constant 0 : i32
    %c0_i32_0 = arith.constant 0 : i32
    %c0_i32_1 = arith.constant 0 : i32
    return %arg0, %c0_i32, %c0_i32_0 : i32, i32, i32
  }
}

</mosaic_0001>

<bundles_post_ra>
// kernel: sei_forward.1
= control target key start
LH: loop header
LB: loop body
LE: loop exit
PB: predicated region body
PF: predicated region fallthrough
CT: control target
= control target key end

     0   :  { %s7757_s6 = smov 1   ;;  %s7758_s10 = smov 2   ;;  %s9590_s0 = inlined_call_operand.smem [shape: u32[43], index: -1, kind: input, shape index: {}] }
   0x1   :  { %s7855_s5 = sld [smem:[%s9590_s0]]   ;;  %s7759_s14 = smov 3  }
   0x2   :  { %s7860_s9 = sld [smem:[%s9590_s0 + %s7757_s6]]   ;;  %s7760_s18 = smov 4  }
   0x3   :  { %s7865_s13 = sld [smem:[%s9590_s0 + %s7758_s10]]   ;;  %s7761_s22 = smov 5  }
   0x4   :  { %s7870_s17 = sld [smem:[%s9590_s0 + %s7759_s14]]   ;;  %s7762_s26 = smov 6  }
   0x5   :  { %s7875_s21 = sld [smem:[%s9590_s0 + %s7760_s18]]   ;;  %s7763_s30 = smov 7  }
   0x6   :  { %s7880_s25 = sld [smem:[%s9590_s0 + %s7761_s22]]   ;;  %s7764_s4 = smov 8  }
   0x7   :  { %9672 = sst [smem:[#allocation24_spill]] %s7855_s5  ;;  %s7765_s10 = smov 9  }
   0x8   :  { %9673 = sst [smem:[#allocation25_spill]] %s7860_s9  ;;  %s7766_s15 = smov 10  }
   0x9   :  { %s7885_s29 = sld [smem:[%s9590_s0 + %s7762_s26]]   ;;  %s7767_s20 = smov 11  }
   0xa   :  { %s7890_s3 = sld [smem:[%s9590_s0 + %s7763_s30]]   ;;  %s7768_s26 = smov 12  }
   0xb   :  { %s7895_s8 = sld [smem:[%s9590_s0 + %s7764_s4]]   ;;  %s7769_s1 = smov 13  }
   0xc   :  { %9674 = sst [smem:[#allocation26_spill]] %s7880_s25  ;;  %s7770_s7 = smov 14  }
   0xd   :  { %s7900_s14 = sld [smem:[%s9590_s0 + %s7765_s10]]   ;;  %s7772_s22 = smov 16  }
   0xe   :  { %s7905_s19 = sld [smem:[%s9590_s0 + %s7766_s15]]   ;;  %s7771_s15 = smov 15  }
   0xf   :  { %s7910_s24 = sld [smem:[%s9590_s0 + %s7767_s20]]   ;;  %s7773_s28 = smov 17  }
  0x10   :  { %9675 = sst [smem:[#allocation27_spill]] %s7890_s3 }
  0x11   :  { %9676 = sst [smem:[#allocation28_spill]] %s7895_s8 }
  0x12   :  { %s7915_s30 = sld [smem:[%s9590_s0 + %s7768_s26]]  }
  0x13   :  { %9677 = sst [smem:[#allocation29_spill]] %s7900_s14 }
  0x14   :  { %9678 = sst [smem:[#allocation30_spill]] %s7905_s19 }
  0x15   :  { %s7920_s6 = sld [smem:[%s9590_s0 + %s7769_s1]]  }
  0x16   :  { %s7925_s12 = sld [smem:[%s9590_s0 + %s7770_s7]]   ;;  %s7774_s7 = smov 18  }
  0x17   :  { %s7930_s20 = sld [smem:[%s9590_s0 + %s7771_s15]]   ;;  %s7775_s15 = smov 19  }
  0x18   :  { %9679 = sst [smem:[#allocation31_spill]] %s7915_s30 }
  0x19   :  { %s7935_s27 = sld [smem:[%s9590_s0 + %s7772_s22]]   ;;  %s7776_s22 = smov 20  }
  0x1a   :  { %s7940_s4 = sld [smem:[%s9590_s0 + %s7773_s28]]   ;;  %s7777_s28 = smov 21  }
  0x1b   :  { %9680 = sst [smem:[#allocation32_spill]] %s7920_s6 }
  0x1c   :  { %9681 = sst [smem:[#allocation33_spill]] %s7925_s12 }
  0x1d   :  { %s7945_s12 = sld [smem:[%s9590_s0 + %s7774_s7]]   ;;  %s7778_s7 = smov 22  }
  0x1e   :  { %s7950_s30 = sld [smem:[%s9590_s0 + %s7775_s15]]   ;;  %s7779_s15 = smov 23  }
  0x1f   :  { %9682 = sst [smem:[#allocation34_spill]] %s7935_s27 }
  0x20   :  { %9683 = sst [smem:[#allocation35_spill]] %s7940_s4 }
  0x21   :  { %s7955_s27 = sld [smem:[%s9590_s0 + %s7776_s22]]   ;;  %s7780_s22 = smov 24  }
  0x22   :  { %s7960_s4 = sld [smem:[%s9590_s0 + %s7777_s28]]   ;;  %s7781_s28 = smov 25  }
  0x23   :  { %9684 = sst [smem:[#allocation36_spill]] %s7945_s12 }
  0x24   :  { %9685 = sst [smem:[#allocation37_spill]] %s7950_s30 }
  0x25   :  { %s7965_s12 = sld [smem:[%s9590_s0 + %s7778_s7]]   ;;  %s7782_s7 = smov 26  }
  0x26   :  { %s7970_s30 = sld [smem:[%s9590_s0 + %s7779_s15]]   ;;  %s7783_s15 = smov 27  }
  0x27   :  { %9686 = sst [smem:[#allocation38_spill]] %s7955_s27 }
  0x28   :  { %9687 = sst [smem:[#allocation39_spill]] %s7960_s4 }
  0x29   :  { %s7975_s27 = sld [smem:[%s9590_s0 + %s7780_s22]]   ;;  %s7784_s22 = smov 28  }
  0x2a   :  { %s7980_s4 = sld [smem:[%s9590_s0 + %s7781_s28]]   ;;  %s7785_s28 = smov 29  }
  0x2b   :  { %9688 = sst [smem:[#allocation40_spill]] %s7965_s12 }
  0x2c   :  { %s7985_s12 = sld [smem:[%s9590_s0 + %s7782_s7]]   ;;  %s7786_s7 = smov 30  }
  0x2d   :  { %s7990_s14 = sld [smem:[%s9590_s0 + %s7783_s15]]   ;;  %s7787_s15 = smov 31  }
  0x2e   :  { %s8010_s19 = sld [smem:[%s9590_s0 + %s7787_s15]]   ;;  %s7791_s15 = smov 35  }
  0x2f   :  { %9689 = sst [smem:[#allocation41_spill]] %s7975_s27 }
  0x30   :  { %9690 = sst [smem:[#allocation42_spill]] %s7980_s4 }
  0x31   :  { %s7995_s27 = sld [smem:[%s9590_s0 + %s7784_s22]]   ;;  %s7788_s22 = smov 32  }
  0x32   :  { %9691 = sst [smem:[#allocation43_spill]] %s7985_s12 }
  0x33   :  { %s8000_s4 = sld [smem:[%s9590_s0 + %s7785_s28]]   ;;  %s7789_s28 = smov 33  }
  0x34   :  { %s8005_s12 = sld [smem:[%s9590_s0 + %s7786_s7]]   ;;  %s7790_s7 = smov 34  }
  0x35   :  { %s8020_s3 = sld [smem:[%s9590_s0 + %s7789_s28]]   ;;  %s7793_s28 = smov 37  }
  0x36   :  { %s8030_s8 = sld [smem:[%s9590_s0 + %s7791_s15]]   ;;  %s7795_s15 = smov 39  }
  0x37   :  { %9692 = sst [smem:[#allocation44_spill]] %s7995_s27 }
  0x38   :  { %s8015_s27 = sld [smem:[%s9590_s0 + %s7788_s22]]   ;;  %s7792_s22 = smov 36  }
  0x39   :  { %9693 = sst [smem:[#allocation45_spill]] %s8000_s4 }
  0x3a   :  { %9694 = sst [smem:[#allocation46_spill]] %s8005_s12 }
  0x3b   :  { %9696 = sst [smem:[#allocation48_spill]] %s8020_s3 }
  0x3c   :  { %s8025_s12 = sld [smem:[%s9590_s0 + %s7790_s7]]   ;;  %s7794_s7 = smov 38  }
  0x3d   :  { %9698 = sst [smem:[#allocation50_spill]] %s8030_s8 }
  0x3e   :  { %9695 = sst [smem:[#allocation47_spill]] %s8015_s27 }
  0x3f   :  { %s8035_s27 = sld [smem:[%s9590_s0 + %s7792_s22]]   ;;  %s7796_s22 = smov 40  }
  0x40   :  { %s8040_s25 = sld [smem:[%s9590_s0 + %s7793_s28]]   ;;  %s7797_s28 = smov 41  }
  0x41   :  { %s8050_s8 = sld [smem:[%s9590_s0 + %s7795_s15]]  }
  0x42   :  { %9697 = sst [smem:[#allocation49_spill]] %s8025_s12 }
  0x43   :  { %s8045_s12 = sld [smem:[%s9590_s0 + %s7794_s7]]   ;;  %s7798_s7 = smov 42  }
  0x45   :  { %9699 = sst [smem:[#allocation51_spill]] %s8035_s27 }
  0x46   :  { %9700 = sst [smem:[#allocation52_spill]] %s8040_s25 }
  0x47   :  { %9702 = sst [smem:[#allocation54_spill]] %s8050_s8 }
  0x48   :  { %s8055_s27 = sld [smem:[%s9590_s0 + %s7796_s22]]  }
  0x49   :  { %9701 = sst [smem:[#allocation53_spill]] %s8045_s12 }
  0x4a   :  { %s8060_s25 = sld [smem:[%s9590_s0 + %s7797_s28]]  }
  0x4b   :  { %s8065_s12 = sld [smem:[%s9590_s0 + %s7798_s7]]  }
  0x51   :  { %9703 = sst [smem:[#allocation55_spill]] %s8065_s12 }
  0x52   :  { %90 = vsyncpa [#allocation3], 0 }
  0x53   :  { %91 = vsyncpa [#allocation6], 0 }
  0x54   :  { %92 = vsyncpa [#allocation9], 0 }
  0x55   :  { %93 = vsyncpa [#allocation12], 0 }
  0x56   :  { %94 = vsyncpa [#allocation15], 0 }
  0x57   :  { %95 = vsyncpa [#allocation4], 0 }
  0x58   :  { %97 = vsyncpa [#allocation4 + $0x1], 0  ;;  %s8067_s15 = smov 0   ;;  %s8069_s16 = smov 0  }
  0x59   :  { %s8071_s18 = smov 0   ;;  %s8073_s22 = smov 0  }
  0x5a LB: > { %s9704_s9 = sld [smem:[#allocation25_spill]]  ;;  %s8088_s0 = sadd.s32 4294967295, %s7755_s22   ;;  %s7755_s22 = sphi %s8073_s22, %s9778_s22   ;;  %s7751_s18 = sphi %s8071_s18, %s9781_s18   ;;  %s7747_s16 = sphi %s8069_s16, %s9780_s16   ;;  %s7743_s15 = sphi %s8067_s15, %s9779_s15  }
  0x5b   : > { %s9705_s4 = sld [smem:[#allocation45_spill]]  ;;  %s5890_s23 = sadd.s32 4294967294, %s7755_s22  }
  0x5c   : > { %s9706_s3 = sld [smem:[#allocation48_spill]]  ;;  %s8092_s26 = sadd.s32 1, %s7755_s22  }
  0x5d   : > { %s9707_s6 = sld [smem:[#allocation32_spill]]  ;;  %s997_s28 = sadd.s32 1, %s7751_s18 }
  0x5e   : > { %9708 = sst [smem:[#allocation56_spill]] %s7743_s15  ;;  %s994_s1 = ssub.s32 %s7755_s22, %s8092_s26 }
  0x5f   : > { %9709 = sst [smem:[#allocation57_spill]] %s7747_s16  ;;  %p1007_p0 = scmp.ne.s32.totalorder %s7751_s18, %s7747_s16 }
  0x60   : > { %9710 = sst [smem:[#allocation58_spill]] %s7751_s18  ;;  %p995_p1 = scmp.eq.s32.totalorder %s994_s1, 0 }
  0x61   : > { %9711 = sst [smem:[#allocation59_spill]] %s7755_s22  ;;  %p1008_p2 = scmp.eq.s32.totalorder %s8088_s0, 1 }
  0x62   : > { %9712 = sst [smem:[#allocation60_spill]] %s8092_s26  ;;  %p1013_p3 = scmp.ne.s32.totalorder %s7747_s16, %s7743_s15 }
  0x63   : > { %p1014_p4 = scmp.eq.s32.totalorder %s5890_s23, 1  ;;  %p8105_p5 = por %p1008_p2, %p1007_p0 }
  0x64   : > { %s8103_s2 = scalar_select %p995_p1, %s7751_s18, %s997_s28  }
  0x65   : > { %s9714_s7 = scalar_select %p8105_p5, 1, 0 }
  0x66   : > { %9713 = sst [smem:[#allocation61_spill]] %s8103_s2  ;;  %p8109_p6 = por %p1014_p4, %p1013_p3 }
  0x67   : > { %9715 = sst [smem:[#allocation62_spill]] %s9714_s7  ;;  %p5891_p7 = scmp.ge.s32.totalorder %s7755_s22, 1 }
  0x68   : > { %s9716_s10 = scalar_select %p8109_p6, 1, 0 }
  0x69   : > { %p1021_p8 = scmp.lt.s32.totalorder %s7755_s22, 3  ;;  %p6149_p9 = scmp.eq.s32.totalorder %s8088_s0, 0 }
  0x6a   : > { %9717 = sst [smem:[#allocation63_spill]] %s9716_s10  ;;  %s1079_s1 = sshll.u32 %s9707_s6, 4  ;;  %s1080_s1 = int_to_ptr.hbm [resolvable:$true] %s1079_s1 }
  0x6b   : > { %p8116_p10 = pnand %p5891_p7, %p1021_p8  ;;  %s1131_s23 = sshll.u32 %s7970_s30, 4  ;;  %s8130_s23 = int_to_ptr.hbm [resolvable:$true] %s1131_s23 }
  0x6c   : > { %s7799_s2 = smov [#allocation5]   ;;  %s7403_s26 = sshra.s32 %s1080_s1, 4  ;;  %s7404_s26 = int_to_ptr.hbm [resolvable:$true] %s7403_s26 }
  0x6d   : > { %p6117_p11 = pneg %p8116_p10  ;;  %s1081_s18 = sshll.u32 %s7799_s2, 4  ;;  %s1082_s18 = int_to_ptr.vmem [resolvable:$true] %s1081_s18 }
  0x6e   : > { %s7405_s10 = scalar_lea.hbm %s7404_s26, 48  ;;  %s7410_s22 = scalar_lea.hbm %s9707_s6, 48 }
  0x6f   : > { %p8126_p12 = pnand %p6149_p9, %p6117_p11  ;;  %p7406_p13 = scmp.ne.s32.totalorder %s7404_s26, %s7405_s10 }
  0x70   : > { %p7411_p3 = scmp.lt.s32.totalorder %s7404_s26, %s9707_s6  ;;  %p7412_p4 = scmp.lt.s32.totalorder %s7410_s22, %s7405_s10 }
  0x71   : > { %p8134_p0 = pneg %p8126_p12 }
  0x72   : > { %p7413_p7 = por %p7412_p4, %p7411_p3 }
  0x73   : > { %p7408_p1 = pnand %p8134_p0, %p7406_p13 }
  0x75   : > { %p7409_p2 = pneg %p7408_p1 }
  0x77   : > { %p7414_p8 = pnand %p7413_p7, %p7409_p2 }
  0x79   : > { %7417 = shalt.err (!%p7414_p8)
}
  0x7a   : > { %s9627_s2 = smov 256   ;;  %s9629_s7 = smov 16  }
  0x7b   : > { %6123 = dma.hbm_to_vmem [thread:$0]  (!%p8126_p12), %s1080_s1, 768, %s1082_s18, [#allocation6], %s9627_s2, %s9627_s2, %s9629_s7  }
  0x7c   : > { %s7802_s12 = smov [#allocation8]   ;;  %s7433_s26 = sshra.s32 %s8130_s23, 4  ;;  %s7434_s26 = int_to_ptr.hbm [resolvable:$true] %s7433_s26 }
  0x7d   : > { %s1133_s16 = sshll.u32 %s7802_s12, 4  ;;  %s7435_s22 = scalar_lea.hbm %s7434_s26, 96  ;;  %s1134_s16 = int_to_ptr.vmem [resolvable:$true] %s1133_s16 }
  0x7e   : > { %p7436_p11 = scmp.ne.s32.totalorder %s7434_s26, %s7435_s22  ;;  %s7440_s10 = scalar_lea.hbm %s7970_s30, 96 }
  0x7f   : > { %p7441_p2 = scmp.lt.s32.totalorder %s7434_s26, %s7970_s30  ;;  %p7442_p3 = scmp.lt.s32.totalorder %s7440_s10, %s7435_s22 }
  0x80   : > { %p7438_p13 = pnand %p7436_p11, %p8134_p0 }
  0x81   : > { %p7443_p4 = por %p7442_p3, %p7441_p2 }
  0x82   : > { %p7439_p1 = pneg %p7438_p13 }
  0x84   : > { %p7444_p7 = pnand %p7443_p4, %p7439_p1 }
  0x86   : > { %7447 = shalt.err (!%p7444_p7)
}
  0x87   : > { %s7803_s6 = smov 384   ;;  %s7804_s12 = smov 24  }
  0x88   : > { %6129 = dma.hbm_to_vmem [thread:$0]  (!%p8126_p12), %s8130_s23, 1536, %s1134_s16, [#allocation9], %s7803_s6, %s7803_s6, %s7804_s12  }
  0x89   : > { %s1171_s18 = sshll.u32 %s9705_s4, 4  ;;  %s7805_s1 = smov [#allocation11]   ;;  %s1172_s18 = int_to_ptr.hbm [resolvable:$true] %s1171_s18 }
  0x8a   : > { %s1173_s2 = sshll.u32 %s7805_s1, 4  ;;  %s1205_s26 = sshll.u32 %s9706_s3, 4  ;;  %s1174_s2 = int_to_ptr.vmem [resolvable:$true] %s1173_s2  ;;  %s1206_s26 = int_to_ptr.hbm [resolvable:$true] %s1205_s26 }
  0x8b   : > { %s7463_s22 = sshra.s32 %s1172_s18, 4  ;;  %s7470_s7 = scalar_lea.hbm %s9705_s4, 64  ;;  %s7464_s22 = int_to_ptr.hbm [resolvable:$true] %s7463_s22 }
  0x8c   : > { %s7465_s10 = scalar_lea.hbm %s7464_s22, 64  ;;  %p7471_p1 = scmp.lt.s32.totalorder %s7464_s22, %s9705_s4 }
  0x8d   : > { %p7466_p8 = scmp.ne.s32.totalorder %s7464_s22, %s7465_s10  ;;  %p7472_p2 = scmp.lt.s32.totalorder %s7470_s7, %s7465_s10 }
  0x8f   : > { %p7468_p11 = pnand %p7466_p8, %p8134_p0  ;;  %p7473_p3 = por %p7472_p2, %p7471_p1 }
  0x91   : > { %p7469_p13 = pneg %p7468_p11 }
  0x93   : > { %p7474_p4 = pnand %p7473_p3, %p7469_p13 }
  0x95   : > { %7477 = shalt.err (!%p7474_p4)
}
  0x96   : > { %s9721_s6 = smov 16   ;;  %s9722_s16 = smov 256  }
  0x97   : > { %6135 = dma.hbm_to_vmem [thread:$0]  (!%p8126_p12), %s1172_s18, 1024, %s1174_s2, [#allocation12], %s9722_s16, %s9722_s16, %s9721_s6  }
  0x98   : > { %s7806_s23 = smov [#allocation14]   ;;  %s1062_s1 = sshll.u32 %s7910_s24, 4  ;;  %s8167_s1 = int_to_ptr.hbm [resolvable:$true] %s1062_s1 }
  0x99   : > { %s1207_s12 = sshll.u32 %s7806_s23, 4  ;;  %s7493_s7 = sshra.s32 %s1206_s26, 4  ;;  %s1208_s12 = int_to_ptr.vmem [resolvable:$true] %s1207_s12  ;;  %s7494_s7 = int_to_ptr.hbm [resolvable:$true] %s7493_s7 }
  0x9a   : > { %s7495_s22 = scalar_lea.hbm %s7494_s7, 64  ;;  %s7500_s10 = scalar_lea.hbm %s9706_s3, 64 }
  0x9b   : > { %p7496_p7 = scmp.ne.s32.totalorder %s7494_s7, %s7495_s22  ;;  %p7501_p13 = scmp.lt.s32.totalorder %s7494_s7, %s9706_s3 }
  0x9c   : > { %p7502_p1 = scmp.lt.s32.totalorder %s7500_s10, %s7495_s22 }
  0x9d   : > { %p7498_p8 = pnand %p7496_p7, %p8134_p0 }
  0x9e   : > { %p7503_p2 = por %p7502_p1, %p7501_p13 }
  0x9f   : > { %p7499_p11 = pneg %p7498_p8 }
  0xa1   : > { %p7504_p3 = pnand %p7503_p2, %p7499_p11 }
  0xa3   : > { %7507 = shalt.err (!%p7504_p3)
}
  0xa4   : > { %6141 = dma.hbm_to_vmem [thread:$0]  (!%p8126_p12), %s1206_s26, 1024, %s1208_s12, [#allocation15], %s9722_s16, %s9722_s16, %s9721_s6  }
  0xa5   : > { %s1096_s2 = sshll.u32 %s7930_s20, 4  ;;  %s7807_s18 = smov [#allocation2]   ;;  %s8179_s2 = int_to_ptr.hbm [resolvable:$true] %s1096_s2 }
  0xa6   : > { %s1064_s23 = sshll.u32 %s7807_s18, 4  ;;  %s7523_s7 = sshra.s32 %s8167_s1, 4  ;;  %s1065_s23 = int_to_ptr.vmem [resolvable:$true] %s1064_s23  ;;  %s7524_s7 = int_to_ptr.hbm [resolvable:$true] %s7523_s7 }
  0xa7   : > { %s7525_s22 = scalar_lea.hbm %s7524_s7, 48  ;;  %s7530_s10 = scalar_lea.hbm %s7910_s24, 48 }
  0xa8   : > { %p7526_p4 = scmp.ne.s32.totalorder %s7524_s7, %s7525_s22  ;;  %p7531_p11 = scmp.lt.s32.totalorder %s7524_s7, %s7910_s24 }
  0xa9   : > { %p7532_p13 = scmp.lt.s32.totalorder %s7530_s10, %s7525_s22 }
  0xaa   : > { %p7528_p7 = pnand %p7526_p4, %p8134_p0 }
  0xab   : > { %p7533_p1 = por %p7532_p13, %p7531_p11 }
  0xac   : > { %p7529_p8 = pneg %p7528_p7 }
  0xae   : > { %p7534_p2 = pnand %p7533_p1, %p7529_p8 }
  0xb0   : > { %7537 = shalt.err (!%p7534_p2)
}
  0xb1   : > { %6120 = dma.hbm_to_vmem [thread:$0]  (!%p8126_p12), %s8167_s1, 768, %s1065_s23, [#allocation3], %s9722_s16, %s9722_s16, %s9721_s6  }
  0xb2   : > { %s7808_s26 = smov [#allocation7]   ;;  %s1154_s18 = sshll.u32 %s7990_s14, 4  ;;  %s8193_s18 = int_to_ptr.hbm [resolvable:$true] %s1154_s18 }
  0xb3   : > { %s1098_s12 = sshll.u32 %s7808_s26, 4  ;;  %s7553_s7 = sshra.s32 %s8179_s2, 4  ;;  %s1099_s12 = int_to_ptr.vmem [resolvable:$true] %s1098_s12  ;;  %s7554_s7 = int_to_ptr.hbm [resolvable:$true] %s7553_s7 }
  0xb4   : > { %s7555_s22 = scalar_lea.hbm %s7554_s7, 48  ;;  %s7560_s10 = scalar_lea.hbm %s7930_s20, 48 }
  0xb5   : > { %p7556_p3 = scmp.ne.s32.totalorder %s7554_s7, %s7555_s22  ;;  %p7561_p8 = scmp.lt.s32.totalorder %s7554_s7, %s7930_s20 }
  0xb6   : > { %p7562_p11 = scmp.lt.s32.totalorder %s7560_s10, %s7555_s22 }
  0xb7   : > { %p7558_p4 = pnand %p7556_p3, %p8134_p0 }
  0xb8   : > { %p7563_p13 = por %p7562_p11, %p7561_p8 }
  0xb9   : > { %p7559_p7 = pneg %p7558_p4 }
  0xbb   : > { %p7564_p1 = pnand %p7563_p13, %p7559_p7 }
  0xbd   : > { %7567 = shalt.err (!%p7564_p1)
}
  0xbe   : > { %6126 = dma.hbm_to_vmem [thread:$0]  (!%p8126_p12), %s8179_s2, 768, %s1099_s12, [#allocation6], %s9722_s16, %s9722_s16, %s9721_s6  }
  0xbf   : > { %s1188_s1 = sshll.u32 %s8010_s19, 4  ;;  %s7809_s23 = smov [#allocation10]   ;;  %s8207_s1 = int_to_ptr.hbm [resolvable:$true] %s1188_s1 }
  0xc0   : > { %s1156_s26 = sshll.u32 %s7809_s23, 4  ;;  %s7583_s7 = sshra.s32 %s8193_s18, 4  ;;  %s1157_s26 = int_to_ptr.vmem [resolvable:$true] %s1156_s26  ;;  %s7584_s7 = int_to_ptr.hbm [resolvable:$true] %s7583_s7 }
  0xc1   : > { %s7585_s22 = scalar_lea.hbm %s7584_s7, 64  ;;  %s7590_s10 = scalar_lea.hbm %s7990_s14, 64 }
  0xc2   : > { %p7586_p2 = scmp.ne.s32.totalorder %s7584_s7, %s7585_s22  ;;  %p7591_p7 = scmp.lt.s32.totalorder %s7584_s7, %s7990_s14 }
  0xc3   : > { %p7592_p8 = scmp.lt.s32.totalorder %s7590_s10, %s7585_s22 }
  0xc4   : > { %p7588_p3 = pnand %p7586_p2, %p8134_p0 }
  0xc5   : > { %p7593_p11 = por %p7592_p8, %p7591_p7 }
  0xc6   : > { %p7589_p4 = pneg %p7588_p3 }
  0xc8   : > { %p7594_p13 = pnand %p7593_p11, %p7589_p4 }
  0xca   : > { %7597 = shalt.err (!%p7594_p13)
}
  0xcb   : > { %6132 = dma.hbm_to_vmem [thread:$0]  (!%p8126_p12), %s8193_s18, 1024, %s1157_s26, [#allocation9], %s9722_s16, %s9722_s16, %s9721_s6  }
  0xcc   : > { %s7810_s2 = smov [#allocation13]   ;;  %s1237_s23 = sshll.u32 %s8055_s27, 4  ;;  %s8221_s23 = int_to_ptr.hbm [resolvable:$true] %s1237_s23 }
  0xcd   : > { %s1190_s12 = sshll.u32 %s7810_s2, 4  ;;  %s7613_s7 = sshra.s32 %s8207_s1, 4  ;;  %s1191_s12 = int_to_ptr.vmem [resolvable:$true] %s1190_s12  ;;  %s7614_s7 = int_to_ptr.hbm [resolvable:$true] %s7613_s7 }
  0xce   : > { %s7615_s22 = scalar_lea.hbm %s7614_s7, 64  ;;  %s7620_s10 = scalar_lea.hbm %s8010_s19, 64 }
  0xcf   : > { %p7616_p1 = scmp.ne.s32.totalorder %s7614_s7, %s7615_s22  ;;  %p7621_p4 = scmp.lt.s32.totalorder %s7614_s7, %s8010_s19 }
  0xd0   : > { %p7622_p7 = scmp.lt.s32.totalorder %s7620_s10, %s7615_s22 }
  0xd1   : > { %p7618_p2 = pnand %p7616_p1, %p8134_p0 }
  0xd2   : > { %p7623_p8 = por %p7622_p7, %p7621_p4 }
  0xd3   : > { %p7619_p3 = pneg %p7618_p2 }
  0xd5   : > { %p7624_p11 = pnand %p7623_p8, %p7619_p3 }
  0xd7   : > { %7627 = shalt.err (!%p7624_p11)
}
  0xd8   : > { %6138 = dma.hbm_to_vmem [thread:$0]  (!%p8126_p12), %s8207_s1, 1024, %s1191_s12, [#allocation12], %s9722_s16, %s9722_s16, %s9721_s6  }
  0xd9   : > { %s7811_s18 = smov [#allocation16]   ;;  %s7643_s2 = sshra.s32 %s8221_s23, 4  ;;  %s7644_s2 = int_to_ptr.hbm [resolvable:$true] %s7643_s2 }
  0xda   : > { %s1239_s26 = sshll.u32 %s7811_s18, 4  ;;  %s7645_s7 = scalar_lea.hbm %s7644_s2, 48  ;;  %s1240_s26 = int_to_ptr.vmem [resolvable:$true] %s1239_s26 }
  0xdb   : > { %p7646_p13 = scmp.ne.s32.totalorder %s7644_s2, %s7645_s7  ;;  %s7650_s22 = scalar_lea.hbm %s8055_s27, 48 }
  0xdc   : > { %p7651_p3 = scmp.lt.s32.totalorder %s7644_s2, %s8055_s27  ;;  %p7652_p4 = scmp.lt.s32.totalorder %s7650_s22, %s7645_s7 }
  0xdd   : > { %p7648_p1 = pnand %p7646_p13, %p8134_p0 }
  0xde   : > { %p7653_p7 = por %p7652_p4, %p7651_p3 }
  0xdf   : > { %p7649_p2 = pneg %p7648_p1 }
  0xe1   : > { %p7654_p8 = pnand %p7653_p7, %p7649_p2 }
  0xe3   : > { %7657 = shalt.err (!%p7654_p8)
}
  0xe4   : > { %s7812_s10 = smov 128   ;;  %s7813_s6 = smov 8  }
  0xe5   : > { %6144 = dma.hbm_to_vmem [thread:$0]  (!%p8126_p12), %s8221_s23, 768, %s1240_s26, [#allocation15], %s7812_s10, %s7812_s10, %s7813_s6  }
  0xe6   : > { %1266 = sbr.rel (%p8116_p10) target bundleno = 8798 (0x225e), region = 188 }
  0xeb   : > { %7718 = dma.done.wait (%p6149_p9), [#allocation3], 768  }
  0xec   : > { %7720 = vsyncadd (%p6149_p9), [#allocation3], 4294966528 }
  0xed   : > { %7722 = dma.done.wait (%p6149_p9), [#allocation6], 1536  }
  0xee   : > { %7724 = vsyncadd (%p6149_p9), [#allocation6], 4294965760 }
  0xef   : > { %7726 = dma.done.wait (%p6149_p9), [#allocation9], 2560  }
  0xf0   : > { %7728 = vsyncadd (%p6149_p9), [#allocation9], 4294964736 }
  0xf1   : > { %7730 = dma.done.wait (%p6149_p9), [#allocation12], 2048  }
  0xf2   : > { %7732 = vsyncadd (%p6149_p9), [#allocation12], 4294965248 }
  0xf3   : > { %7734 = dma.done.wait (%p6149_p9), [#allocation15], 1792  }
  0xf4   : > { %7736 = vsyncadd (%p6149_p9), [#allocation15], 4294965504  ;;  %s9723_s5 = sld [smem:[#allocation24_spill]]  ;;  %p1408_p10 = scmp.lt.s32.totalorder %s8088_s0, 1  ;;  %vm1421_vm0 = vcmask 31744   ;;  %vm1513_vm1 = vcmask 982016  }
  0xf5   : > { %s9633_s16 = smov 4   ;;  %s9639_s1 = smov 122   ;;  %vm1502_vm2 = vcmask 990208   ;;  %vm1491_vm3 = vcmask 998400   ;;  %vm1480_vm4 = vcmask 1006592   ;;  %v1520_v34 = vld [vmem:[%s7865_s13] sm:$0xff]  ;;  %vm8317_vm9 = vmneg %vm1421_vm0 }
  0xf6   : > { %s1409_s15 = scalar_select %p1408_p10, %s8088_s0, 1  ;;  %v1521_v35 = vld [vmem:[%s7865_s13 + $0x8] sm:$0xff]  ;;  %vm1469_vm5 = vcmask 1014784   ;;  %v7823_v38 = vmov 0   ;;  %vm1458_vm6 = vcmask 1022976   ;;  %vm1447_vm7 = vcmask 1031168  }
  0xf7   : > { %s9635_s12 = smov 121   ;;  %s9631_s23 = smov 120   ;;  %6331 = vset.pattern.permute.xlu1 %v7823_v38  ;;  %6330 = vset.pattern.permute.xlu0 %v7823_v38  ;;  %vm1436_vm8 = vcmask 1039360   ;;  %v1518_v60 = vld [vmem:[%s9704_s9] sm:$0xff]  ;;  %vm1532_vm10 = vcmask 588800   ;;  %v1519_v61 = vld [vmem:[%s9704_s9 + $0x8] sm:$0xff] }
  0xf8   : > { %s6076_s11 = sshll.u32 %s1409_s15, 4  ;;  %s9641_s18 = smov 123   ;;  %6582 = vset.pattern.permute.xlu2 %v7823_v38  ;;  %vm1789_vm11 = vcmask 130048   ;;  %vm2644_vm12 = vcmask 556032   ;;  %vm2899_vm13 = vcmask 719872   ;;  %vm3347_vm14 = vcmask 515072  }
  0xf9   : > { %s9647_s26 = smov 125   ;;  %s9650_s2 = smov 126   ;;  %vm3375_vm15 = vcmask 506880  }
  0xfa   : > { %s1412_s28 = scalar_lea.vmem %s9723_s5, %s6076_s11  ;;  %s9645_s7 = smov 124  }
  0xfb   : > { %v1413_v0 = vld [vmem:[%s1412_s28] sm:$0xff]  ;;  %v1414_v1 = vld [vmem:[%s1412_s28 + $0x8] sm:$0xff]  ;;  %s9637_s22 = smov 127   ;;  %s9726_s10 = sld [smem:[#allocation26_spill]] }
  0xfc   : > { %1417 = vrot.lane.b32.xlu0 %v1413_v0, %s9633_s16  ;;  %s9727_s6 = sld [smem:[#allocation28_spill]]  ;;  %s9740_s3 = smov 121  }
  0xfd   : > { %s9728_s15 = sld [smem:[#allocation27_spill]]  ;;  %s9741_s4 = smov 127  }
  0xfe   : > { %s9730_s28 = sld [smem:[#allocation50_spill]]  ;;  %s9747_s5 = smov 126  }
  0xff   : > { %s7825_s9 = smov 62   ;;  %s9770_s8 = sld [smem:[#allocation54_spill]] }
 0x103   : > { %s9729_s11 = smov %s9728_s15 }
 0x104   : > { %1419 = vrot.lane.b32.xlu0 %v1414_v1, %s9633_s16  ;;  %v2384_v59 = vld [vmem:[%s9729_s11 + $0x10] sm:$0xff] }
 0x16e   : > { %v8269_v2 = vpop.permute.xlu0 %1417 }
 0x16f   : > { %v1426_v4 = vsel %vm1421_vm0, 0.0, %v8269_v2 }
 0x176   : > { %v1420_v3 = vpop.permute.xlu0 %1419 }
 0x177   : > { %v8275_v5 = vsel %vm1421_vm0, %v8269_v2, %v1420_v3  ;;  %v1427_v7 = vsel %vm1421_vm0, %v1420_v3, 0.0 }
 0x178   : > { %v6300_v6 = vpack.i.bf16 %v8275_v5, %v1426_v4 }
 0x17a   : > { %6301 = vrot.lane.b32.xlu0 %v6300_v6, %s9639_s1  ;;  %6296 = vrot.lane.b32.xlu2 %v6300_v6, %s9635_s12 }
 0x17b   : > { %6291 = vrot.lane.b32.xlu1 %v6300_v6, %s9631_s23 }
 0x182   : > { %1478 = vrot.lane.b32.xlu0 %v1427_v7, %s9641_s18  ;;  %1500 = vrot.lane.b32.xlu2 %v1427_v7, %s9635_s12 }
 0x183   : > { %1511 = vrot.lane.b32.xlu1 %v1427_v7, %s9631_s23 }
 0x18a   : > { %6316 = vrot.lane.b32.xlu0 %v6300_v6, %s9647_s26  ;;  %6306 = vrot.lane.b32.xlu2 %v6300_v6, %s9641_s18 }
 0x18b   : > { %1489 = vrot.lane.b32.xlu1 %v1427_v7, %s9639_s1 }
 0x192   : > { %1445 = vrot.lane.b32.xlu0 %v1427_v7, %s9650_s2  ;;  %1467 = vrot.lane.b32.xlu2 %v1427_v7, %s9645_s7 }
 0x193   : > { %6311 = vrot.lane.b32.xlu1 %v6300_v6, %s9645_s7 }
 0x19a   : > { %6321 = vrot.lane.b32.xlu2 %v6300_v6, %s9650_s2  ;;  %1529 = vperm.xlu0 %6330, %v1521_v35  }
 0x19b   : > { %1456 = vrot.lane.b32.xlu1 %v1427_v7, %s9647_s26 }
 0x1a2   : > { %1434 = vrot.lane.b32.xlu2 %v1427_v7, %s9637_s22 }
 0x1a3   : > { %6326 = vrot.lane.b32.xlu1 %v6300_v6, %s9637_s22 }
 0x1ab   : > { %1524 = vperm.xlu1 %6331, %v1520_v34  }
 0x1d4   : > { %v6297_v8 = vpop.permute.xlu2 %6296 }
 0x1d5   : > { %v6299_v12 = vunpack.i.h.bf16 %v6297_v8  ;;  %v6298_v13 = vunpack.i.l.bf16 %v6297_v8 }
 0x1d7   : > { %v1503_v22 = vsel %vm1502_vm2, %v6298_v13, %v6299_v12 }
 0x1dc   : > { %v1501_v9 = vpop.permute.xlu2 %1500 }
 0x1dd   : > { %v1504_v27 = vsel %vm1502_vm2, %v6299_v12, %v1501_v9 }
 0x1e4   : > { %v6307_v16 = vpop.permute.xlu2 %6306 }
 0x1e5   : > { %v6309_v20 = vunpack.i.h.bf16 %v6307_v16  ;;  %v6308_v21 = vunpack.i.l.bf16 %v6307_v16 }
 0x1e7   : > { %v1481_v25 = vsel %vm1480_vm4, %v6308_v21, %v6309_v20 }
 0x1ec   : > { %v6302_v10 = vpop.permute.xlu0 %6301  ;;  %v1468_v29 = vpop.permute.xlu2 %1467 }
 0x1ed   : > { %v6292_v11 = vpop.permute.xlu1 %6291  ;;  %v6304_v17 = vunpack.i.h.bf16 %v6302_v10  ;;  %v6303_v18 = vunpack.i.l.bf16 %v6302_v10 }
 0x1ee   : > { %v6294_v14 = vunpack.i.h.bf16 %v6292_v11  ;;  %v6293_v15 = vunpack.i.l.bf16 %v6292_v11 }
 0x1ef   : > { %v1492_v23 = vsel %vm1491_vm3, %v6303_v18, %v6304_v17 }
 0x1f0   : > { %v1514_v19 = vsel %vm1513_vm1, %v6293_v15, %v6294_v14 }
 0x1f1   : > { %1546 = vmatpush.msra.mxu0 %v1514_v19 }
 0x1f3   : > { %1547 = vmatpush.msra.mxu0 %v1503_v22 }
 0x1f4   : > { %v1479_v28 = vpop.permute.xlu0 %1478  ;;  %v6322_v36 = vpop.permute.xlu2 %6321 }
 0x1f5   : > { %v1512_v24 = vpop.permute.xlu1 %1511  ;;  %1548 = vmatpush.msra.mxu0 %v1492_v23  ;;  %v1482_v32 = vsel %vm1480_vm4, %v6309_v20, %v1479_v28  ;;  %v6324_v43 = vunpack.i.h.bf16 %v6322_v36  ;;  %v6323_v44 = vunpack.i.l.bf16 %v6322_v36 }
 0x1f6   : > { %v1515_v26 = vsel %vm1513_vm1, %v6294_v14, %v1512_v24 }
 0x1f7   : > { %1549 = vmatpush.msra.mxu0 %v1481_v25  ;;  %1569 = vmatpush.msra.mxu1 %v1515_v26  ;;  %v1448_v48 = vsel %vm1447_vm7, %v6323_v44, %v6324_v43  ;;  %v1777_v25 = vld [vmem:[%s7875_s21] sm:$0xff]  ;;  %v1778_v26 = vld [vmem:[%s7875_s21 + $0x8] sm:$0xff] }
 0x1f9   : > { %1570 = vmatpush.msra.mxu1 %v1504_v27 }
 0x1fc   : > { %v6317_v33 = vpop.permute.xlu0 %6316  ;;  %v1435_v56 = vpop.permute.xlu2 %1434 }
 0x1fd   : > { %v1490_v30 = vpop.permute.xlu1 %1489  ;;  %v6319_v39 = vunpack.i.h.bf16 %v6317_v33  ;;  %v6318_v40 = vunpack.i.l.bf16 %v6317_v33 }
 0x1fe   : > { %v1493_v31 = vsel %vm1491_vm3, %v6304_v17, %v1490_v30 }
 0x1ff   : > { %1571 = vmatpush.msra.mxu1 %v1493_v31  ;;  %v1459_v47 = vsel %vm1458_vm6, %v6318_v40, %v6319_v39 }
 0x201   : > { %1572 = vmatpush.msra.mxu1 %v1482_v32 }
 0x204   : > { %v1446_v49 = vpop.permute.xlu0 %1445 }
 0x205   : > { %v6312_v37 = vpop.permute.xlu1 %6311  ;;  %v1449_v52 = vsel %vm1447_vm7, %v6324_v43, %v1446_v49 }
 0x206   : > { %v6314_v41 = vunpack.i.h.bf16 %v6312_v37  ;;  %v6313_v42 = vunpack.i.l.bf16 %v6312_v37 }
 0x208   : > { %v1470_v45 = vsel %vm1469_vm5, %v6313_v42, %v6314_v41  ;;  %v1471_v46 = vsel %vm1469_vm5, %v6314_v41, %v1468_v29 }
 0x209   : > { %1550 = vmatpush.msra.mxu0 %v1470_v45  ;;  %1573 = vmatpush.msra.mxu1 %v1471_v46 }
 0x20b   : > { %1551 = vmatpush.msra.mxu0 %v1459_v47 }
 0x20c   : > { %v1530_v1 = vpop.permute.xlu0 %1529 }
 0x20d   : > { %v1457_v50 = vpop.permute.xlu1 %1456  ;;  %1552 = vmatpush.msra.mxu0 %v1448_v48 }
 0x20e   : > { %v1460_v51 = vsel %vm1458_vm6, %v6319_v39, %v1457_v50 }
 0x20f   : > { %1574 = vmatpush.msra.mxu1 %v1460_v51 }
 0x211   : > { %1575 = vmatpush.msra.mxu1 %v1449_v52 }
 0x215   : > { %v6327_v53 = vpop.permute.xlu1 %6326 }
 0x216   : > { %v6329_v54 = vunpack.i.h.bf16 %v6327_v53  ;;  %v6328_v55 = vunpack.i.l.bf16 %v6327_v53 }
 0x218   : > { %v1437_v57 = vsel %vm1436_vm8, %v6328_v55, %v6329_v54  ;;  %v1438_v58 = vsel %vm1436_vm8, %v6329_v54, %v1435_v56  ;;  %v1774_v55 = vld [vmem:[%s7870_s17 + $0x8] sm:$0xff] }
 0x219   : > { %1553 = vmatpush.msra.mxu0 %v1437_v57  ;;  %1576 = vmatpush.msra.mxu1 %v1438_v58 }
 0x21b   : > { %5915 = vmatpush.msk.msra.mxu0 %vm8317_vm9, %v8269_v2  ;;  %1577 = vmatpush.msra.mxu1 %v8275_v5 }
 0x21c   : > { %5916 = vmatmul.msk.f32.vlgmr.msra.gmra.mxu0 %vm1532_vm10, %v1518_v60  ;;  %5918 = vmatmul.msk.f32.vlgmr.msra.gmra.mxu1 %vm1532_vm10, %v1518_v60 }
 0x21d   : > { %v1525_v0 = vpop.permute.xlu1 %1524 }
 0x224   : > { %5917 = vmatmul.msk.f32.gmra.mxu0 %vm1532_vm10, %v1519_v61  ;;  %5919 = vmatmul.msk.f32.gmra.mxu1 %vm1532_vm10, %v1519_v61 }
 0x299   : > { %v1556_v62 = vpop.f32.mrf.mxu0  ;;  %v1579_v63 = vpop.f32.mrf.mxu1 }
 0x29a   : > { %v1580_v6 = vadd.f32 %v1579_v63, %v1525_v0  ;;  %v1557_v2 = vadd.f32 %v1556_v62, %v1525_v0 }
 0x2a1   : > { %v1559_v3 = vpop.f32.mrf.mxu0  ;;  %v1582_v4 = vpop.f32.mrf.mxu1 }
 0x2a2   : > { %v1560_v7 = vadd.f32 %v1559_v3, %v1530_v1  ;;  %v1583_v8 = vadd.f32 %v1582_v4, %v1530_v1 }
 0x2a4   : > { %v6332_v9 = vpack.i.bf16 %v1580_v6, %v1583_v8  ;;  %1593 = vrot.lane.b32.xlu2 %v1560_v7, %s9633_s16  ;;  %v8411_v8 = vld [vmem:[%s7870_s17 + $0x18] sm:$0xff] }
 0x2a6   : > { %6333 = vrot.lane.b32.xlu1 %v6332_v9, %s9633_s16 }
 0x2ac   : > { %1589 = vrot.lane.b32.xlu2 %v1557_v2, %s9633_s16 }
 0x2fe   : > { %v8330_v5 = vpop.permute.xlu2 %1593 }
 0x2ff   : > { %v1606_v20 = vsel %vm1421_vm0, 0.0, %v8330_v5 }
 0x306   : > { %v8332_v10 = vpop.permute.xlu2 %1589 }
 0x307   : > { %v1605_v13 = vsel %vm1421_vm0, 0.0, %v8332_v10 }
 0x318   : > { %v6334_v11 = vpop.permute.xlu1 %6333 }
 0x319   : > { %v6336_v12 = vunpack.i.h.bf16 %v6334_v11  ;;  %v6335_v18 = vunpack.i.l.bf16 %v6334_v11 }
 0x31b   : > { %v1607_v14 = vsel %vm1421_vm0, %v6336_v12, 0.0  ;;  %v8339_v15 = vsel %vm1421_vm0, %v8332_v10, %v6336_v12  ;;  %v8348_v19 = vsel %vm1421_vm0, %v8330_v5, %v6335_v18  ;;  %v1608_v22 = vsel %vm1421_vm0, %v6335_v18, 0.0 }
 0x31c   : > { %v6357_v16 = vpack.i.bf16 %v8339_v15, %v1605_v13  ;;  %v6352_v17 = vpack.i.bf16 %v1607_v14, %v8339_v15  ;;  %v6367_v21 = vpack.i.bf16 %v8348_v19, %v1606_v20  ;;  %v6372_v23 = vpack.i.bf16 %v1605_v13, %v1608_v22 }
 0x31d   : > { %v6452_v24 = vpack.i.bf16 %v1607_v14, %v1608_v22 }
 0x31e   : > { %6358 = vrot.lane.b32.xlu1 %v6357_v16, %s9631_s23  ;;  %6353 = vrot.lane.b32.xlu0 %v6352_v17, %s9645_s7 }
 0x31f   : > { %6338 = vrot.lane.b32.xlu2 %v6352_v17, %s9635_s12 }
 0x326   : > { %6363 = vrot.lane.b32.xlu1 %v6352_v17, %s9647_s26  ;;  %6368 = vrot.lane.b32.xlu0 %v6367_v21, %s9635_s12 }
 0x327   : > { %6343 = vrot.lane.b32.xlu2 %v6352_v17, %s9639_s1 }
 0x32e   : > { %6373 = vrot.lane.b32.xlu1 %v6372_v23, %s9635_s12  ;;  %6378 = vrot.lane.b32.xlu0 %v6367_v21, %s9639_s1 }
 0x32f   : > { %6348 = vrot.lane.b32.xlu2 %v6352_v17, %s9641_s18 }
 0x336   : > { %6383 = vrot.lane.b32.xlu1 %v6372_v23, %s9639_s1  ;;  %6388 = vrot.lane.b32.xlu0 %v6367_v21, %s9641_s18 }
 0x337   : > { %6413 = vrot.lane.b32.xlu2 %v6367_v21, %s9631_s23 }
 0x33e   : > { %6393 = vrot.lane.b32.xlu1 %v6372_v23, %s9641_s18  ;;  %6398 = vrot.lane.b32.xlu0 %v6367_v21, %s9645_s7 }
 0x33f   : > { %6418 = vrot.lane.b32.xlu2 %v6367_v21, %s9647_s26 }
 0x346   : > { %6403 = vrot.lane.b32.xlu1 %v6372_v23, %s9645_s7  ;;  %6423 = vrot.lane.b32.xlu0 %v6372_v23, %s9647_s26 }
 0x347   : > { %6428 = vrot.lane.b32.xlu2 %v6367_v21, %s9650_s2 }
 0x34e   : > { %6408 = vrot.lane.b32.xlu1 %v6352_v17, %s9650_s2  ;;  %6433 = vrot.lane.b32.xlu0 %v6372_v23, %s9650_s2 }
 0x34f   : > { %6438 = vrot.lane.b32.xlu2 %v6367_v21, %s9637_s22 }
 0x356   : > { %6448 = vrot.lane.b32.xlu1 %v6352_v17, %s9637_s22  ;;  %6443 = vrot.lane.b32.xlu0 %v6372_v23, %s9637_s22 }
 0x357   : > { %6453 = vrot.lane.b32.xlu2 %v6452_v24, %s9631_s23 }
 0x35e   : > { %1781 = vperm.xlu1 %6331, %v1777_v25   ;;  %1786 = vperm.xlu0 %6330, %v1778_v26  }
 0x379   : > { %v6339_v27 = vpop.permute.xlu2 %6338 }
 0x37a   : > { %v6341_v46 = vunpack.i.h.bf16 %v6339_v27  ;;  %v6340_v47 = vunpack.i.l.bf16 %v6339_v27 }
 0x37c   : > { %v1746_v60 = vsel %vm1502_vm2, %v6340_v47, %v6341_v46 }
 0x381   : > { %v6344_v28 = vpop.permute.xlu2 %6343 }
 0x382   : > { %v6346_v61 = vunpack.i.h.bf16 %v6344_v28  ;;  %v6345_v62 = vunpack.i.l.bf16 %v6344_v28 }
 0x384   : > { %v1726_v12 = vsel %vm1491_vm3, %v6345_v62, %v6346_v61 }
 0x389   : > { %v8377_v29 = vpop.permute.xlu2 %6348 }
 0x38a   : > { %v6351_v13 = vunpack.i.h.bf16 %v8377_v29  ;;  %v6350_v14 = vunpack.i.l.bf16 %v8377_v29 }
 0x390   : > { %v8379_v30 = vpop.permute.xlu1 %6358  ;;  %v8381_v31 = vpop.permute.xlu0 %6353 }
 0x391   : > { %v8383_v32 = vpop.permute.xlu2 %6413  ;;  %v6361_v33 = vunpack.i.h.bf16 %v8379_v30  ;;  %v6360_v34 = vunpack.i.l.bf16 %v8379_v30 }
 0x392   : > { %v6416_v35 = vunpack.i.h.bf16 %v8383_v32  ;;  %v6415_v36 = vunpack.i.l.bf16 %v8383_v32 }
 0x393   : > { %v1765_v39 = vsel %vm1513_vm1, %v6360_v34, %v6361_v33  ;;  %v1706_v34 = vsel %vm1480_vm4, %v6350_v14, %v6351_v13 }
 0x394   : > { %v1767_v37 = vsel %vm1513_vm1, %v6415_v36, %v6416_v35 }
 0x395   : > { %1833 = vmatpush.msra.mxu3 %v1767_v37  ;;  %v6356_v37 = vunpack.i.h.bf16 %v8381_v31 }
 0x397   : > { %1834 = vmatpush.msra.mxu3 %v1765_v39  ;;  %v6355_v39 = vunpack.i.l.bf16 %v8381_v31 }
 0x398   : > { %v8395_v40 = vpop.permute.xlu1 %6363  ;;  %v6369_v41 = vpop.permute.xlu0 %6368  ;;  %5924 = vmatmul.msk.f32.vlgmr.msra.gmra.mxu3 %vm1789_vm11, %v1774_v55 }
 0x399   : > { %v6371_v42 = vunpack.i.h.bf16 %v6369_v41  ;;  %v6370_v43 = vunpack.i.l.bf16 %v6369_v41  ;;  %v8397_v44 = vpop.permute.xlu2 %6418  ;;  %v6365_v31 = vunpack.i.l.bf16 %v8395_v40 }
 0x39b   : > { %v1747_v45 = vsel %vm1502_vm2, %v6370_v43, %v6371_v42 }
 0x39c   : > { %1796 = vmatpush.msra.mxu2 %v1747_v45 }
 0x3a0   : > { %v6374_v48 = vpop.permute.xlu1 %6373  ;;  %v6379_v49 = vpop.permute.xlu0 %6378  ;;  %5925 = vmatmul.msk.f32.gmra.mxu3 %vm1789_vm11, %v8411_v8 }
 0x3a1   : > { %v6376_v50 = vunpack.i.h.bf16 %v6374_v48  ;;  %v6375_v51 = vunpack.i.l.bf16 %v6374_v48  ;;  %v6381_v52 = vunpack.i.h.bf16 %v6379_v49  ;;  %v6380_v53 = vunpack.i.l.bf16 %v6379_v49  ;;  %v8400_v54 = vpop.permute.xlu2 %6428 }
 0x3a2   : > { %v6366_v48 = vunpack.i.h.bf16 %v8395_v40  ;;  %v6431_v49 = vunpack.i.h.bf16 %v8400_v54 }
 0x3a3   : > { %v1745_v56 = vsel %vm1502_vm2, %v6376_v50, %v6340_v47  ;;  %v1748_v57 = vsel %vm1502_vm2, %v6371_v42, %v6375_v51  ;;  %v1727_v58 = vsel %vm1491_vm3, %v6380_v53, %v6381_v52  ;;  %v6420_v42 = vunpack.i.l.bf16 %v8397_v44 }
 0x3a4   : > { %1797 = vmatpush.msra.mxu2 %v1745_v56  ;;  %1842 = vmatpush.msrb.mxu3 %v1748_v57  ;;  %v6430_v50 = vunpack.i.l.bf16 %v8400_v54  ;;  %v1686_v51 = vsel %vm1469_vm5, %v6355_v39, %v6356_v37 }
 0x3a6   : > { %1798 = vmatpush.msra.mxu2 %v1727_v58  ;;  %1843 = vmatpush.msrb.mxu3 %v1746_v60  ;;  %v1647_v54 = vsel %vm1447_vm7, %v6430_v50, %v6431_v49  ;;  %v1666_v58 = vsel %vm1458_vm6, %v6365_v31, %v6366_v48 }
 0x3a8   : > { %v6384_v63 = vpop.permute.xlu1 %6383  ;;  %v6389_v0 = vpop.permute.xlu0 %6388 }
 0x3a9   : > { %v6386_v1 = vunpack.i.h.bf16 %v6384_v63  ;;  %v6385_v3 = vunpack.i.l.bf16 %v6384_v63  ;;  %v6391_v4 = vunpack.i.h.bf16 %v6389_v0  ;;  %v6390_v6 = vunpack.i.l.bf16 %v6389_v0  ;;  %v8408_v7 = vpop.permute.xlu2 %6438 }
 0x3aa   : > { %v6440_v40 = vunpack.i.l.bf16 %v8408_v7 }
 0x3ab   : > { %v1725_v9 = vsel %vm1491_vm3, %v6386_v1, %v6345_v62  ;;  %v1728_v2 = vsel %vm1491_vm3, %v6381_v52, %v6385_v3  ;;  %v1707_v11 = vsel %vm1480_vm4, %v6390_v6, %v6391_v4 }
 0x3ac   : > { %1799 = vmatpush.msra.mxu2 %v1725_v9  ;;  %1844 = vmatpush.msrb.mxu3 %v1728_v2 }
 0x3ae   : > { %1800 = vmatpush.msra.mxu2 %v1707_v11  ;;  %1845 = vmatpush.msrb.mxu3 %v1726_v12 }
 0x3b0   : > { %v6394_v16 = vpop.permute.xlu1 %6393  ;;  %v6399_v17 = vpop.permute.xlu0 %6398 }
 0x3b1   : > { %v6396_v18 = vunpack.i.h.bf16 %v6394_v16  ;;  %v6395_v20 = vunpack.i.l.bf16 %v6394_v16  ;;  %v6401_v21 = vunpack.i.h.bf16 %v6399_v17  ;;  %v6400_v22 = vunpack.i.l.bf16 %v6399_v17  ;;  %v6454_v23 = vpop.permute.xlu2 %6453  ;;  %v1773_v16 = vld [vmem:[%s7870_s17] sm:$0xff]  ;;  %v1775_v17 = vld [vmem:[%s7870_s17 + $0x10] sm:$0xff] }
 0x3b2   : > { %v6456_v24 = vunpack.i.h.bf16 %v6454_v23  ;;  %v6455_v25 = vunpack.i.l.bf16 %v6454_v23 }
 0x3b3   : > { %v1705_v26 = vsel %vm1480_vm4, %v6396_v18, %v6350_v14  ;;  %v1708_v27 = vsel %vm1480_vm4, %v6391_v4, %v6395_v20  ;;  %v1687_v29 = vsel %vm1469_vm5, %v6400_v22, %v6401_v21 }
 0x3b4   : > { %1801 = vmatpush.msra.mxu2 %v1705_v26  ;;  %1846 = vmatpush.msrb.mxu3 %v1708_v27  ;;  %v1768_v28 = vsel %vm1513_vm1, %v6416_v35, %v6455_v25  ;;  %v1766_v36 = vsel %vm1513_vm1, %v6361_v33, %v6456_v24  ;;  %v6421_v35 = vunpack.i.h.bf16 %v8397_v44 }
 0x3b5   : > { %1879 = vmatpush.msrb.mxu0 %v1768_v28 }
 0x3b6   : > { %1802 = vmatpush.msra.mxu2 %v1687_v29  ;;  %1847 = vmatpush.msrb.mxu3 %v1706_v34  ;;  %v1667_v44 = vsel %vm1458_vm6, %v6420_v42, %v6421_v35 }
 0x3b7   : > { %1880 = vmatpush.msrb.mxu0 %v1766_v36 }
 0x3b8   : > { %v6404_v41 = vpop.permute.xlu1 %6403  ;;  %v6424_v32 = vpop.permute.xlu0 %6423  ;;  %5926 = vmatmul.msk.f32.vlgmr.msrb.gmra.mxu0 %vm1789_vm11, %v1774_v55  ;;  %v6441_v55 = vunpack.i.h.bf16 %v8408_v7 }
 0x3b9   : > { %v6406_v43 = vunpack.i.h.bf16 %v6404_v41  ;;  %v6405_v45 = vunpack.i.l.bf16 %v6404_v41  ;;  %v6426_v46 = vunpack.i.h.bf16 %v6424_v32  ;;  %v6425_v47 = vunpack.i.l.bf16 %v6424_v32 }
 0x3ba   : > { %v1627_v3 = vsel %vm1436_vm8, %v6440_v40, %v6441_v55 }
 0x3bb   : > { %v1685_v30 = vsel %vm1469_vm5, %v6406_v43, %v6355_v39  ;;  %v1688_v33 = vsel %vm1469_vm5, %v6401_v21, %v6405_v45  ;;  %v1665_v52 = vsel %vm1458_vm6, %v6426_v46, %v6365_v31  ;;  %v1668_v53 = vsel %vm1458_vm6, %v6421_v35, %v6425_v47 }
 0x3bc   : > { %1803 = vmatpush.msra.mxu2 %v1685_v30  ;;  %1848 = vmatpush.msrb.mxu3 %v1688_v33 }
 0x3be   : > { %1804 = vmatpush.msra.mxu2 %v1667_v44  ;;  %1849 = vmatpush.msrb.mxu3 %v1686_v51  ;;  %v2080_v44 = vld [vmem:[%s7885_s29] sm:$0xff] }
 0x3c0   : > { %v6409_v56 = vpop.permute.xlu1 %6408  ;;  %v6434_v57 = vpop.permute.xlu0 %6433  ;;  %1805 = vmatpush.msra.mxu2 %v1665_v52  ;;  %1850 = vmatpush.msrb.mxu3 %v1668_v53 }
 0x3c1   : > { %v6411_v60 = vunpack.i.h.bf16 %v6409_v56  ;;  %v6410_v61 = vunpack.i.l.bf16 %v6409_v56  ;;  %v6436_v62 = vunpack.i.h.bf16 %v6434_v57  ;;  %v6435_v63 = vunpack.i.l.bf16 %v6434_v57  ;;  %5927 = vmatmul.msk.f32.gmra.mxu0 %vm1789_vm11, %v8411_v8 }
 0x3c2   : > { %1806 = vmatpush.msra.mxu2 %v1647_v54  ;;  %1851 = vmatpush.msrb.mxu3 %v1666_v58 }
 0x3c3   : > { %v1645_v0 = vsel %vm1447_vm7, %v6436_v62, %v6410_v61  ;;  %v1648_v1 = vsel %vm1447_vm7, %v6431_v49, %v6435_v63  ;;  %v1646_v4 = vsel %vm1447_vm7, %v6410_v61, %v6411_v60 }
 0x3c4   : > { %1807 = vmatpush.msra.mxu2 %v1645_v0  ;;  %1852 = vmatpush.msrb.mxu3 %v1648_v1 }
 0x3c6   : > { %1808 = vmatpush.msra.mxu2 %v1627_v3  ;;  %1853 = vmatpush.msrb.mxu3 %v1646_v4 }
 0x3c8   : > { %v6449_v6 = vpop.permute.xlu1 %6448  ;;  %v6444_v7 = vpop.permute.xlu0 %6443 }
 0x3c9   : > { %v6451_v9 = vunpack.i.h.bf16 %v6449_v6  ;;  %v6450_v2 = vunpack.i.l.bf16 %v6449_v6  ;;  %v6446_v8 = vunpack.i.h.bf16 %v6444_v7  ;;  %v6445_v11 = vunpack.i.l.bf16 %v6444_v7 }
 0x3cb   : > { %v1625_v12 = vsel %vm1436_vm8, %v6446_v8, %v6450_v2  ;;  %v1628_v13 = vsel %vm1436_vm8, %v6441_v55, %v6445_v11  ;;  %v1626_v14 = vsel %vm1436_vm8, %v6450_v2, %v6451_v9 }
 0x3cc   : > { %1809 = vmatpush.msra.mxu2 %v1625_v12  ;;  %1854 = vmatpush.msrb.mxu3 %v1628_v13 }
 0x3ce   : > { %5921 = vmatpush.msk.msra.mxu2 %vm8317_vm9, %v8330_v5  ;;  %1855 = vmatpush.msrb.mxu3 %v1626_v14 }
 0x3d0   : > { %5923 = vmatpush.msk.msra.mxu2 %vm8317_vm9, %v8332_v10  ;;  %1856 = vmatpush.msrb.mxu3 %v8348_v19  ;;  %v1782_v21 = vpop.permute.xlu1 %1781  ;;  %v1787_v10 = vpop.permute.xlu0 %1786 }
 0x3d1   : > { %1812 = vmatmul.f32.vlgmr.msra.gmra.mxu2 %v1773_v16 }
 0x3d2   : > { %1857 = vmatpush.msrb.mxu3 %v8339_v15 }
 0x3d3   : > { %1858 = vmatmul.f32.vlgmr.msrb.gmra.mxu3 %v1773_v16 }
 0x3d9   : > { %1815 = vmatmul.f32.gmra.mxu2 %v1775_v17 }
 0x3db   : > { %1861 = vmatmul.f32.gmra.mxu3 %v1775_v17 }
 0x41b   : > { %v1836_v18 = vpop.f32.mrf.mxu3 }
 0x423   : > { %v1839_v20 = vpop.f32.mrf.mxu3 }
 0x435   : > { %v1882_v5 = vpop.f32.mrf.mxu0 }
 0x43e   : > { %v1885_v28 = vpop.f32.mrf.mxu0 }
 0x454   : > { %v1813_v22 = vpop.f32.mrf.mxu2 }
 0x455   : > { %v1814_v23 = vadd.f32 %v1813_v22, %v1782_v21 }
 0x456   : > { %v1859_v24 = vpop.f32.mrf.mxu3 }
 0x457   : > { %v8469_v25 = vadd.f32 %v1836_v18, %v1814_v23  ;;  %v1860_v26 = vadd.f32 %v1859_v24, %v1782_v21 }
 0x459   : > { %1892 = vrot.lane.b32.xlu1 %v8469_v25, %s9633_s16  ;;  %v8475_v36 = vadd.f32 %v1882_v5, %v1860_v26 }
 0x45c   : > { %v1816_v19 = vpop.f32.mrf.mxu2 }
 0x45d   : > { %v1817_v15 = vadd.f32 %v1816_v19, %v1787_v10 }
 0x45e   : > { %v1862_v27 = vpop.f32.mrf.mxu3 }
 0x45f   : > { %v8473_v29 = vadd.f32 %v1839_v20, %v1817_v15  ;;  %v1863_v34 = vadd.f32 %v1862_v27, %v1787_v10 }
 0x461   : > { %v8477_v37 = vadd.f32 %v1885_v28, %v1863_v34  ;;  %1896 = vrot.lane.b32.xlu2 %v8473_v29, %s9633_s16 }
 0x463   : > { %v6457_v39 = vpack.i.bf16 %v8475_v36, %v8477_v37 }
 0x465   : > { %6458 = vrot.lane.b32.xlu0 %v6457_v39, %s9633_s16 }
 0x4bb   : > { %v8484_v41 = vpop.permute.xlu2 %1896 }
 0x4bc   : > { %v1909_v45 = vsel %vm1421_vm0, 0.0, %v8484_v41 }
 0x4cb   : > { %v8486_v32 = vpop.permute.xlu1 %1892 }
 0x4cc   : > { %v1908_v46 = vsel %vm1421_vm0, 0.0, %v8486_v32 }
 0x4d7   : > { %v6459_v35 = vpop.permute.xlu0 %6458 }
 0x4d8   : > { %v6461_v42 = vunpack.i.h.bf16 %v6459_v35  ;;  %v6460_v43 = vunpack.i.l.bf16 %v6459_v35 }
 0x4da   : > { %v1910_v47 = vsel %vm1421_vm0, %v6461_v42, 0.0  ;;  %v8495_v30 = vsel %vm1421_vm0, %v8486_v32, %v6461_v42  ;;  %v8499_v33 = vsel %vm1421_vm0, %v8484_v41, %v6460_v43  ;;  %v1911_v48 = vsel %vm1421_vm0, %v6460_v43, 0.0 }
 0x4db   : > { %v6492_v31 = vpack.i.bf16 %v8499_v33, %v1909_v45  ;;  %v6497_v49 = vpack.i.bf16 %v1908_v46, %v1911_v48  ;;  %v6462_v50 = vpack.i.bf16 %v1910_v47, %v8495_v30 }
 0x4dd   : > { %6493 = vrot.lane.b32.xlu2 %v6492_v31, %s9635_s12  ;;  %6498 = vrot.lane.b32.xlu0 %v6497_v49, %s9635_s12 }
 0x4de   : > { %6463 = vrot.lane.b32.xlu1 %v6462_v50, %s9635_s12 }
 0x4e5   : > { %6503 = vrot.lane.b32.xlu2 %v6492_v31, %s9639_s1  ;;  %6508 = vrot.lane.b32.xlu0 %v6497_v49, %s9639_s1 }
 0x4e6   : > { %6468 = vrot.lane.b32.xlu1 %v6462_v50, %s9639_s1 }
 0x4ed   : > { %6513 = vrot.lane.b32.xlu2 %v6492_v31, %s9641_s18  ;;  %6518 = vrot.lane.b32.xlu0 %v6497_v49, %s9641_s18 }
 0x4ee   : > { %6473 = vrot.lane.b32.xlu1 %v6462_v50, %s9641_s18 }
 0x4f5   : > { %6523 = vrot.lane.b32.xlu2 %v6492_v31, %s9645_s7  ;;  %6528 = vrot.lane.b32.xlu0 %v6497_v49, %s9645_s7 }
 0x4f6   : > { %6478 = vrot.lane.b32.xlu1 %v6462_v50, %s9645_s7 }
 0x4fd   : > { %6533 = vrot.lane.b32.xlu2 %v6492_v31, %s9647_s26  ;;  %6538 = vrot.lane.b32.xlu0 %v6497_v49, %s9647_s26 }
 0x4fe   : > { %6483 = vrot.lane.b32.xlu1 %v6462_v50, %s9647_s26 }
 0x505   : > { %6543 = vrot.lane.b32.xlu2 %v6492_v31, %s9650_s2  ;;  %6548 = vrot.lane.b32.xlu0 %v6497_v49, %s9650_s2 }
 0x506   : > { %6488 = vrot.lane.b32.xlu1 %v6462_v50, %s9650_s2 }
 0x50d   : > { %6553 = vrot.lane.b32.xlu2 %v6492_v31, %s9637_s22  ;;  %6558 = vrot.lane.b32.xlu0 %v6497_v49, %s9637_s22 }
 0x50e   : > { %6563 = vrot.lane.b32.xlu1 %v6492_v31, %s9631_s23 }
 0x515   : > { %6568 = vrot.lane.b32.xlu2 %v6497_v49, %s9631_s23  ;;  %6573 = vrot.lane.b32.xlu0 %v6462_v50, %s9637_s22 }
 0x516   : > { %6578 = vrot.lane.b32.xlu1 %v6462_v50, %s9631_s23 }
 0x51d   : > { %2084 = vperm.xlu0 %6330, %v2080_v44  }
 0x537   : > { %v6494_v51 = vpop.permute.xlu2 %6493 }
 0x538   : > { %v6496_v52 = vunpack.i.h.bf16 %v6494_v51  ;;  %v6495_v53 = vunpack.i.l.bf16 %v6494_v51 }
 0x53a   : > { %v2050_v55 = vsel %vm1502_vm2, %v6495_v53, %v6496_v52 }
 0x53b   : > { %2098 = vmatpush.msrb.mxu1 %v2050_v55 }
 0x53f   : > { %v6504_v40 = vpop.permute.xlu2 %6503 }
 0x540   : > { %v6506_v61 = vunpack.i.h.bf16 %v6504_v40  ;;  %v6505_v62 = vunpack.i.l.bf16 %v6504_v40 }
 0x542   : > { %v2030_v6 = vsel %vm1491_vm3, %v6505_v62, %v6506_v61 }
 0x547   : > { %v6514_v56 = vpop.permute.xlu2 %6513 }
 0x548   : > { %v6516_v12 = vunpack.i.h.bf16 %v6514_v56  ;;  %v6515_v13 = vunpack.i.l.bf16 %v6514_v56 }
 0x54a   : > { %v2010_v21 = vsel %vm1480_vm4, %v6515_v13, %v6516_v12  ;;  %v2081_v13 = vld [vmem:[%s7885_s29 + $0x8] sm:$0xff] }
 0x54b   : > { %2089 = vperm.xlu2 %6582, %v2081_v13  }
 0x54f   : > { %v6499_v57 = vpop.permute.xlu0 %6498  ;;  %v6524_v7 = vpop.permute.xlu2 %6523 }
 0x550   : > { %v6501_v54 = vunpack.i.h.bf16 %v6499_v57  ;;  %v6500_v58 = vunpack.i.l.bf16 %v6499_v57  ;;  %v6464_v60 = vpop.permute.xlu1 %6463  ;;  %v6526_v19 = vunpack.i.h.bf16 %v6524_v7  ;;  %v6525_v26 = vunpack.i.l.bf16 %v6524_v7 }
 0x551   : > { %v6466_v63 = vunpack.i.h.bf16 %v6464_v60  ;;  %v6465_v0 = vunpack.i.l.bf16 %v6464_v60 }
 0x552   : > { %v2051_v1 = vsel %vm1502_vm2, %v6496_v52, %v6500_v58  ;;  %v1990_v35 = vsel %vm1469_vm5, %v6525_v26, %v6526_v19 }
 0x553   : > { %v2048_v3 = vsel %vm1502_vm2, %v6501_v54, %v6465_v0  ;;  %2144 = vmatpush.msra.mxu0 %v2051_v1  ;;  %v2049_v4 = vsel %vm1502_vm2, %v6465_v0, %v6466_v63 }
 0x554   : > { %2099 = vmatpush.msrb.mxu1 %v2048_v3 }
 0x555   : > { %2145 = vmatpush.msra.mxu0 %v2049_v4 }
 0x556   : > { %2100 = vmatpush.msrb.mxu1 %v2030_v6 }
 0x557   : > { %v6509_v9 = vpop.permute.xlu0 %6508  ;;  %v6534_v5 = vpop.permute.xlu2 %6533 }
 0x558   : > { %v6511_v2 = vunpack.i.h.bf16 %v6509_v9  ;;  %v6510_v8 = vunpack.i.l.bf16 %v6509_v9  ;;  %v6469_v11 = vpop.permute.xlu1 %6468  ;;  %v6536_v47 = vunpack.i.h.bf16 %v6534_v5  ;;  %v6535_v48 = vunpack.i.l.bf16 %v6534_v5 }
 0x559   : > { %v6471_v14 = vunpack.i.h.bf16 %v6469_v11  ;;  %v6470_v16 = vunpack.i.l.bf16 %v6469_v11 }
 0x55a   : > { %v2031_v17 = vsel %vm1491_vm3, %v6506_v61, %v6510_v8  ;;  %v1970_v53 = vsel %vm1458_vm6, %v6535_v48, %v6536_v47  ;;  %v2077_v48 = vld [vmem:[%s9726_s10 + $0x8] sm:$0xff] }
 0x55b   : > { %v2028_v18 = vsel %vm1491_vm3, %v6511_v2, %v6470_v16  ;;  %2146 = vmatpush.msra.mxu0 %v2031_v17  ;;  %v2029_v20 = vsel %vm1491_vm3, %v6470_v16, %v6471_v14 }
 0x55c   : > { %2101 = vmatpush.msrb.mxu1 %v2028_v18 }
 0x55d   : > { %2147 = vmatpush.msra.mxu0 %v2029_v20 }
 0x55e   : > { %2102 = vmatpush.msrb.mxu1 %v2010_v21 }
 0x55f   : > { %v6519_v22 = vpop.permute.xlu0 %6518  ;;  %v6544_v50 = vpop.permute.xlu2 %6543 }
 0x560   : > { %v6521_v23 = vunpack.i.h.bf16 %v6519_v22  ;;  %v6520_v24 = vunpack.i.l.bf16 %v6519_v22  ;;  %v6474_v10 = vpop.permute.xlu1 %6473  ;;  %v6546_v54 = vunpack.i.h.bf16 %v6544_v50  ;;  %v6545_v58 = vunpack.i.l.bf16 %v6544_v50  ;;  %v2076_v50 = vld [vmem:[%s9726_s10] sm:$0xff] }
 0x561   : > { %v6476_v15 = vunpack.i.h.bf16 %v6474_v10  ;;  %v6475_v27 = vunpack.i.l.bf16 %v6474_v10 }
 0x562   : > { %v2011_v28 = vsel %vm1480_vm4, %v6516_v12, %v6520_v24  ;;  %v1950_v3 = vsel %vm1447_vm7, %v6545_v58, %v6546_v54 }
 0x563   : > { %v2008_v34 = vsel %vm1480_vm4, %v6521_v23, %v6475_v27  ;;  %2148 = vmatpush.msra.mxu0 %v2011_v28  ;;  %v2009_v39 = vsel %vm1480_vm4, %v6475_v27, %v6476_v15 }
 0x564   : > { %2103 = vmatpush.msrb.mxu1 %v2008_v34 }
 0x565   : > { %2149 = vmatpush.msra.mxu0 %v2009_v39 }
 0x566   : > { %2104 = vmatpush.msrb.mxu1 %v1990_v35 }
 0x567   : > { %v6529_v42 = vpop.permute.xlu0 %6528  ;;  %v6554_v0 = vpop.permute.xlu2 %6553 }
 0x568   : > { %v6531_v43 = vunpack.i.h.bf16 %v6529_v42  ;;  %v6530_v45 = vunpack.i.l.bf16 %v6529_v42  ;;  %v6479_v46 = vpop.permute.xlu1 %6478  ;;  %v6556_v2 = vunpack.i.h.bf16 %v6554_v0  ;;  %v6555_v8 = vunpack.i.l.bf16 %v6554_v0 }
 0x569   : > { %v6481_v31 = vunpack.i.h.bf16 %v6479_v46  ;;  %v6480_v49 = vunpack.i.l.bf16 %v6479_v46 }
 0x56a   : > { %v1991_v44 = vsel %vm1469_vm5, %v6526_v19, %v6530_v45  ;;  %v1930_v18 = vsel %vm1436_vm8, %v6555_v8, %v6556_v2 }
 0x56b   : > { %v1988_v51 = vsel %vm1469_vm5, %v6531_v43, %v6480_v49  ;;  %2150 = vmatpush.msra.mxu0 %v1991_v44  ;;  %v1989_v52 = vsel %vm1469_vm5, %v6480_v49, %v6481_v31  ;;  %v2079_v44 = vld [vmem:[%s9726_s10 + $0x18] sm:$0xff] }
 0x56c   : > { %2105 = vmatpush.msrb.mxu1 %v1988_v51  ;;  %v2078_v51 = vld [vmem:[%s9726_s10 + $0x10] sm:$0xff] }
 0x56d   : > { %2151 = vmatpush.msra.mxu0 %v1989_v52 }
 0x56e   : > { %2106 = vmatpush.msrb.mxu1 %v1970_v53 }
 0x56f   : > { %v6539_v55 = vpop.permute.xlu0 %6538  ;;  %v6569_v20 = vpop.permute.xlu2 %6568 }
 0x570   : > { %v6541_v40 = vunpack.i.h.bf16 %v6539_v55  ;;  %v6540_v56 = vunpack.i.l.bf16 %v6539_v55  ;;  %v6484_v57 = vpop.permute.xlu1 %6483  ;;  %v6570_v23 = vunpack.i.l.bf16 %v6569_v20  ;;  %v6571_v42 = vunpack.i.h.bf16 %v6569_v20 }
 0x571   : > { %v6486_v60 = vunpack.i.h.bf16 %v6484_v57  ;;  %v6485_v61 = vunpack.i.l.bf16 %v6484_v57 }
 0x572   : > { %v1971_v62 = vsel %vm1458_vm6, %v6536_v47, %v6540_v56 }
 0x573   : > { %v1968_v63 = vsel %vm1458_vm6, %v6541_v40, %v6485_v61  ;;  %2152 = vmatpush.msra.mxu0 %v1971_v62  ;;  %v1969_v1 = vsel %vm1458_vm6, %v6485_v61, %v6486_v60 }
 0x574   : > { %2107 = vmatpush.msrb.mxu1 %v1968_v63 }
 0x575   : > { %2153 = vmatpush.msra.mxu0 %v1969_v1 }
 0x576   : > { %2108 = vmatpush.msrb.mxu1 %v1950_v3 }
 0x577   : > { %v6549_v4 = vpop.permute.xlu0 %6548 }
 0x578   : > { %v6551_v6 = vunpack.i.h.bf16 %v6549_v4  ;;  %v6550_v7 = vunpack.i.l.bf16 %v6549_v4  ;;  %v6489_v9 = vpop.permute.xlu1 %6488 }
 0x579   : > { %v6491_v11 = vunpack.i.h.bf16 %v6489_v9  ;;  %v6490_v12 = vunpack.i.l.bf16 %v6489_v9 }
 0x57a   : > { %v1951_v14 = vsel %vm1447_vm7, %v6546_v54, %v6550_v7 }
 0x57b   : > { %v1948_v16 = vsel %vm1447_vm7, %v6551_v6, %v6490_v12  ;;  %2154 = vmatpush.msra.mxu0 %v1951_v14  ;;  %v1949_v17 = vsel %vm1447_vm7, %v6490_v12, %v6491_v11 }
 0x57c   : > { %2109 = vmatpush.msrb.mxu1 %v1948_v16 }
 0x57d   : > { %2155 = vmatpush.msra.mxu0 %v1949_v17 }
 0x57e   : > { %2110 = vmatpush.msrb.mxu1 %v1930_v18 }
 0x57f   : > { %v6559_v21 = vpop.permute.xlu0 %6558 }
 0x580   : > { %v6560_v22 = vunpack.i.l.bf16 %v6559_v21  ;;  %v6564_v5 = vpop.permute.xlu1 %6563  ;;  %v6561_v28 = vunpack.i.h.bf16 %v6559_v21 }
 0x581   : > { %v6566_v24 = vunpack.i.h.bf16 %v6564_v5  ;;  %v6565_v10 = vunpack.i.l.bf16 %v6564_v5 }
 0x582   : > { %v1931_v19 = vsel %vm1436_vm8, %v6556_v2, %v6560_v22 }
 0x583   : > { %v2070_v26 = vsel %vm1513_vm1, %v6565_v10, %v6566_v24  ;;  %2156 = vmatpush.msra.mxu0 %v1931_v19  ;;  %v2071_v15 = vsel %vm1513_vm1, %v6566_v24, %v6570_v23  ;;  %v2387_v24 = vld [vmem:[%s9727_s6 + $0x8] sm:$0xff]  ;;  %v2386_v10 = vld [vmem:[%s9727_s6] sm:$0xff]  ;;  %s9748_s6 = sld [smem:[#allocation51_spill]] }
 0x584   : > { %2135 = vmatpush.msrb.mxu2 %v2070_v26  ;;  %2181 = vmatpush.msra.mxu3 %v2071_v15 }
 0x587   : > { %v6574_v27 = vpop.permute.xlu0 %6573 }
 0x588   : > { %v6576_v34 = vunpack.i.h.bf16 %v6574_v27  ;;  %v6575_v39 = vunpack.i.l.bf16 %v6574_v27  ;;  %v6579_v35 = vpop.permute.xlu1 %6578 }
 0x589   : > { %v6581_v43 = vunpack.i.h.bf16 %v6579_v35  ;;  %v6580_v45 = vunpack.i.l.bf16 %v6579_v35 }
 0x58a   : > { %v1928_v46 = vsel %vm1436_vm8, %v6561_v28, %v6575_v39  ;;  %v1929_v47 = vsel %vm1436_vm8, %v6575_v39, %v6576_v34 }
 0x58b   : > { %2111 = vmatpush.msrb.mxu1 %v1928_v46  ;;  %v2068_v31 = vsel %vm1513_vm1, %v6571_v42, %v6580_v45  ;;  %2157 = vmatpush.msra.mxu0 %v1929_v47  ;;  %v2069_v49 = vsel %vm1513_vm1, %v6580_v45, %v6581_v43 }
 0x58c   : > { %2136 = vmatpush.msrb.mxu2 %v2068_v31  ;;  %2182 = vmatpush.msra.mxu3 %v2069_v49 }
 0x58d   : > { %5932 = vmatmul.msk.f32.vlgmr.msrb.gmra.mxu2 %vm1789_vm11, %v2077_v48  ;;  %5934 = vmatmul.msk.f32.vlgmr.msra.gmra.mxu3 %vm1789_vm11, %v2077_v48 }
 0x58e   : > { %5929 = vmatpush.msk.msrb.mxu1 %vm8317_vm9, %v8484_v41  ;;  %2158 = vmatpush.msra.mxu0 %v8499_v33 }
 0x58f   : > { %v2085_v41 = vpop.permute.xlu0 %2084 }
 0x590   : > { %5931 = vmatpush.msk.msrb.mxu1 %vm8317_vm9, %v8486_v32  ;;  %2159 = vmatpush.msra.mxu0 %v8495_v30 }
 0x591   : > { %2114 = vmatmul.f32.vlgmr.msrb.gmra.mxu1 %v2076_v50  ;;  %2160 = vmatmul.f32.vlgmr.msra.gmra.mxu0 %v2076_v50 }
 0x595   : > { %5933 = vmatmul.msk.f32.gmra.mxu2 %vm1789_vm11, %v2079_v44  ;;  %5935 = vmatmul.msk.f32.gmra.mxu3 %vm1789_vm11, %v2079_v44 }
 0x599   : > { %2117 = vmatmul.f32.gmra.mxu1 %v2078_v51  ;;  %2163 = vmatmul.f32.gmra.mxu0 %v2078_v51 }
 0x5a5   : > { %v2090_v30 = vpop.permute.xlu2 %2089 }
 0x60e   : > { %v2115_v52 = vpop.f32.mrf.mxu1  ;;  %v2161_v33 = vpop.f32.mrf.mxu0 }
 0x60f   : > { %v2116_v53 = vadd.f32 %v2115_v52, %v2085_v41  ;;  %v2162_v32 = vadd.f32 %v2161_v33, %v2085_v41 }
 0x610   : > { %v2138_v55 = vpop.f32.mrf.mxu2  ;;  %v2184_v40 = vpop.f32.mrf.mxu3 }
 0x611   : > { %v2139_v56 = vadd.f32 %v2138_v55, %v2116_v53  ;;  %v2185_v60 = vadd.f32 %v2184_v40, %v2162_v32 }
 0x613   : > { %v2190_v57 = vmax.f32 %v2139_v56, 0.0  ;;  %v2191_v4 = vmax.f32 %v2185_v60, 0.0 }
 0x615   : > { %2198 = vrot.lane.b32.xlu0 %v2190_v57, %s9633_s16 }
 0x616   : > { %v2118_v54 = vpop.f32.mrf.mxu1  ;;  %v2164_v58 = vpop.f32.mrf.mxu0 }
 0x617   : > { %v2119_v61 = vadd.f32 %v2118_v54, %v2090_v30  ;;  %v2165_v62 = vadd.f32 %v2164_v58, %v2090_v30 }
 0x618   : > { %v2141_v63 = vpop.f32.mrf.mxu2  ;;  %v2187_v0 = vpop.f32.mrf.mxu3 }
 0x619   : > { %v2142_v1 = vadd.f32 %v2141_v63, %v2119_v61  ;;  %v2188_v3 = vadd.f32 %v2187_v0, %v2165_v62 }
 0x61b   : > { %v2192_v6 = vmax.f32 %v2142_v1, 0.0  ;;  %v2193_v7 = vmax.f32 %v2188_v3, 0.0 }
 0x61d   : > { %2202 = vrot.lane.b32.xlu1 %v2192_v6, %s9633_s16  ;;  %v6583_v9 = vpack.i.bf16 %v2191_v4, %v2193_v7 }
 0x61f   : > { %6584 = vrot.lane.b32.xlu2 %v6583_v9, %s9633_s16 }
 0x679   : > { %v6585_v2 = vpop.permute.xlu2 %6584 }
 0x67a   : > { %v6587_v8 = vunpack.i.h.bf16 %v6585_v2  ;;  %v6586_v11 = vunpack.i.l.bf16 %v6585_v2 }
 0x67c   : > { %v2216_v13 = vsel %vm1421_vm0, %v6587_v8, 0.0  ;;  %v2217_v14 = vsel %vm1421_vm0, %v6586_v11, 0.0 }
 0x687   : > { %v8581_v12 = vpop.permute.xlu0 %2198 }
 0x688   : > { %v8587_v16 = vsel %vm1421_vm0, %v8581_v12, %v6587_v8  ;;  %v2214_v17 = vsel %vm1421_vm0, 0.0, %v8581_v12 }
 0x689   : > { %v6623_v18 = vpack.i.bf16 %v2214_v17, %v2217_v14  ;;  %v6588_v20 = vpack.i.bf16 %v2216_v13, %v8587_v16 }
 0x68b   : > { %6624 = vrot.lane.b32.xlu2 %v6623_v18, %s9635_s12  ;;  %6589 = vrot.lane.b32.xlu0 %v6588_v20, %s9635_s12 }
 0x68f   : > { %v8594_v21 = vpop.permute.xlu1 %2202 }
 0x690   : > { %v8598_v22 = vsel %vm1421_vm0, %v8594_v21, %v6586_v11  ;;  %v2215_v5 = vsel %vm1421_vm0, 0.0, %v8594_v21 }
 0x691   : > { %v6618_v23 = vpack.i.bf16 %v8598_v22, %v2215_v5 }
 0x693   : > { %6619 = vrot.lane.b32.xlu1 %v6618_v23, %s9635_s12  ;;  %6634 = vrot.lane.b32.xlu2 %v6623_v18, %s9639_s1 }
 0x694   : > { %6594 = vrot.lane.b32.xlu0 %v6588_v20, %s9639_s1 }
 0x69b   : > { %6629 = vrot.lane.b32.xlu1 %v6618_v23, %s9639_s1  ;;  %6644 = vrot.lane.b32.xlu2 %v6623_v18, %s9641_s18 }
 0x69c   : > { %6599 = vrot.lane.b32.xlu0 %v6588_v20, %s9641_s18 }
 0x6a3   : > { %6639 = vrot.lane.b32.xlu1 %v6618_v23, %s9641_s18  ;;  %6654 = vrot.lane.b32.xlu2 %v6623_v18, %s9645_s7 }
 0x6a4   : > { %6604 = vrot.lane.b32.xlu0 %v6588_v20, %s9645_s7 }
 0x6ab   : > { %6649 = vrot.lane.b32.xlu1 %v6618_v23, %s9645_s7  ;;  %6664 = vrot.lane.b32.xlu2 %v6623_v18, %s9647_s26 }
 0x6ac   : > { %6609 = vrot.lane.b32.xlu0 %v6588_v20, %s9647_s26 }
 0x6b3   : > { %6659 = vrot.lane.b32.xlu1 %v6618_v23, %s9647_s26  ;;  %6674 = vrot.lane.b32.xlu2 %v6623_v18, %s9650_s2 }
 0x6b4   : > { %6614 = vrot.lane.b32.xlu0 %v6588_v20, %s9650_s2 }
 0x6bb   : > { %6669 = vrot.lane.b32.xlu1 %v6618_v23, %s9650_s2  ;;  %6684 = vrot.lane.b32.xlu2 %v6623_v18, %s9637_s22 }
 0x6bc   : > { %6689 = vrot.lane.b32.xlu0 %v6588_v20, %s9637_s22 }
 0x6c3   : > { %6679 = vrot.lane.b32.xlu1 %v6618_v23, %s9637_s22  ;;  %6699 = vrot.lane.b32.xlu2 %v6623_v18, %s9631_s23 }
 0x6c4   : > { %6704 = vrot.lane.b32.xlu0 %v6588_v20, %s9631_s23 }
 0x6cb   : > { %6694 = vrot.lane.b32.xlu1 %v6618_v23, %s9631_s23  ;;  %2395 = vperm.xlu2 %6582, %v2387_v24  }
 0x6d3   : > { %2390 = vperm.xlu1 %6331, %v2386_v10  }
 0x6e5   : > { %v6625_v19 = vpop.permute.xlu2 %6624 }
 0x6e6   : > { %v6626_v27 = vunpack.i.l.bf16 %v6625_v19  ;;  %v6627_v45 = vunpack.i.h.bf16 %v6625_v19 }
 0x6ed   : > { %v6635_v15 = vpop.permute.xlu2 %6634 }
 0x6ee   : > { %v6636_v50 = vunpack.i.l.bf16 %v6635_v15  ;;  %v6637_v55 = vunpack.i.h.bf16 %v6635_v15 }
 0x6f5   : > { %v6645_v46 = vpop.permute.xlu2 %6644 }
 0x6f6   : > { %v6646_v54 = vunpack.i.l.bf16 %v6645_v46  ;;  %v6647_v1 = vunpack.i.h.bf16 %v6645_v46 }
 0x6fd   : > { %v6590_v26 = vpop.permute.xlu0 %6589  ;;  %v6655_v32 = vpop.permute.xlu2 %6654 }
 0x6fe   : > { %v6592_v34 = vunpack.i.h.bf16 %v6590_v26  ;;  %v6591_v39 = vunpack.i.l.bf16 %v6590_v26  ;;  %v6656_v2 = vunpack.i.l.bf16 %v6655_v32  ;;  %v6657_v20 = vunpack.i.h.bf16 %v6655_v32 }
 0x700   : > { %v2354_v31 = vsel %vm1502_vm2, %v6627_v45, %v6591_v39  ;;  %v2355_v49 = vsel %vm1502_vm2, %v6591_v39, %v6592_v34 }
 0x705   : > { %v6620_v28 = vpop.permute.xlu1 %6619  ;;  %v6665_v9 = vpop.permute.xlu2 %6664 }
 0x706   : > { %v6622_v35 = vunpack.i.h.bf16 %v6620_v28  ;;  %v6621_v42 = vunpack.i.l.bf16 %v6620_v28  ;;  %v6595_v43 = vpop.permute.xlu0 %6594  ;;  %v6666_v19 = vunpack.i.l.bf16 %v6665_v9 }
 0x707   : > { %v6597_v51 = vunpack.i.h.bf16 %v6595_v43  ;;  %v6596_v41 = vunpack.i.l.bf16 %v6595_v43 }
 0x708   : > { %v2356_v47 = vsel %vm1502_vm2, %v6621_v42, %v6622_v35  ;;  %v2357_v48 = vsel %vm1502_vm2, %v6622_v35, %v6626_v27  ;;  %v6667_v42 = vunpack.i.h.bf16 %v6665_v9  ;;  %v2382_v9 = vld [vmem:[%s9728_s15] sm:$0xff]  ;;  %s9731_s15 = sld [smem:[#allocation30_spill]]  ;;  %vm3441_vm2 = vcmask 162816  }
 0x709   : > { %2404 = vmatpush.msra.mxu2 %v2356_v47  ;;  %2450 = vmatpush.msrb.mxu3 %v2357_v48  ;;  %v2334_v57 = vsel %vm1491_vm3, %v6637_v55, %v6596_v41  ;;  %v2335_v30 = vsel %vm1491_vm3, %v6596_v41, %v6597_v51 }
 0x70b   : > { %2405 = vmatpush.msra.mxu2 %v2354_v31  ;;  %2451 = vmatpush.msrb.mxu3 %v2355_v49 }
 0x70d   : > { %v6630_v44 = vpop.permute.xlu1 %6629  ;;  %v6675_v15 = vpop.permute.xlu2 %6674 }
 0x70e   : > { %v6632_v52 = vunpack.i.h.bf16 %v6630_v44  ;;  %v6631_v33 = vunpack.i.l.bf16 %v6630_v44  ;;  %v6600_v53 = vpop.permute.xlu0 %6599  ;;  %v6676_v48 = vunpack.i.l.bf16 %v6675_v15  ;;  %v6677_v41 = vunpack.i.h.bf16 %v6675_v15  ;;  %s9732_s23 = smov %s9731_s15 }
 0x70f   : > { %v6602_v60 = vunpack.i.h.bf16 %v6600_v53  ;;  %v6601_v61 = vunpack.i.l.bf16 %v6600_v53 }
 0x710   : > { %v2336_v40 = vsel %vm1491_vm3, %v6631_v33, %v6632_v52  ;;  %v2337_v56 = vsel %vm1491_vm3, %v6632_v52, %v6636_v50  ;;  %vm3782_vm3 = vcmask 261120  }
 0x711   : > { %2406 = vmatpush.msra.mxu2 %v2336_v40  ;;  %2452 = vmatpush.msrb.mxu3 %v2337_v56  ;;  %v2314_v6 = vsel %vm1480_vm4, %v6647_v1, %v6601_v61  ;;  %v2315_v7 = vsel %vm1480_vm4, %v6601_v61, %v6602_v60 }
 0x713   : > { %2407 = vmatpush.msra.mxu2 %v2334_v57  ;;  %2453 = vmatpush.msrb.mxu3 %v2335_v30 }
 0x715   : > { %v6640_v58 = vpop.permute.xlu1 %6639  ;;  %v6685_v52 = vpop.permute.xlu2 %6684 }
 0x716   : > { %v6642_v62 = vunpack.i.h.bf16 %v6640_v58  ;;  %v6641_v63 = vunpack.i.l.bf16 %v6640_v58  ;;  %v6605_v0 = vpop.permute.xlu0 %6604  ;;  %v6686_v32 = vunpack.i.l.bf16 %v6685_v52  ;;  %v6687_v61 = vunpack.i.h.bf16 %v6685_v52 }
 0x717   : > { %v6607_v11 = vunpack.i.h.bf16 %v6605_v0  ;;  %v6606_v13 = vunpack.i.l.bf16 %v6605_v0 }
 0x718   : > { %v2316_v3 = vsel %vm1480_vm4, %v6641_v63, %v6642_v62  ;;  %v2317_v4 = vsel %vm1480_vm4, %v6642_v62, %v6646_v54  ;;  %vm4619_vm4 = vcmask 195584  }
 0x719   : > { %2408 = vmatpush.msra.mxu2 %v2316_v3  ;;  %2454 = vmatpush.msrb.mxu3 %v2317_v4  ;;  %v2294_v24 = vsel %vm1469_vm5, %v6657_v20, %v6606_v13  ;;  %v2295_v10 = vsel %vm1469_vm5, %v6606_v13, %v6607_v11 }
 0x71b   : > { %2409 = vmatpush.msra.mxu2 %v2314_v6  ;;  %2455 = vmatpush.msrb.mxu3 %v2315_v7 }
 0x71d   : > { %v6650_v8 = vpop.permute.xlu1 %6649  ;;  %v6700_v0 = vpop.permute.xlu2 %6699 }
 0x71e   : > { %v6652_v14 = vunpack.i.h.bf16 %v6650_v8  ;;  %v6651_v17 = vunpack.i.l.bf16 %v6650_v8  ;;  %v6610_v18 = vpop.permute.xlu0 %6609  ;;  %v6701_v6 = vunpack.i.l.bf16 %v6700_v0 }
 0x71f   : > { %v6612_v27 = vunpack.i.h.bf16 %v6610_v18  ;;  %v6611_v28 = vunpack.i.l.bf16 %v6610_v18 }
 0x720   : > { %v2296_v5 = vsel %vm1469_vm5, %v6651_v17, %v6652_v14  ;;  %v2297_v23 = vsel %vm1469_vm5, %v6652_v14, %v6656_v2  ;;  %v6702_v14 = vunpack.i.h.bf16 %v6700_v0  ;;  %v2383_v17 = vld [vmem:[%s9729_s11 + $0x8] sm:$0xff]  ;;  %v2563_v0 = vld [vmem:[%s9730_s28 + $0x38] sm:$0xff]  ;;  %vm4992_vm5 = vcmask 392192  }
 0x721   : > { %2410 = vmatpush.msra.mxu2 %v2296_v5  ;;  %2456 = vmatpush.msrb.mxu3 %v2297_v23  ;;  %v2274_v46 = vsel %vm1458_vm6, %v6667_v42, %v6611_v28  ;;  %v2275_v47 = vsel %vm1458_vm6, %v6611_v28, %v6612_v27 }
 0x723   : > { %2411 = vmatpush.msra.mxu2 %v2294_v24  ;;  %2457 = vmatpush.msrb.mxu3 %v2295_v10 }
 0x725   : > { %v6660_v26 = vpop.permute.xlu1 %6659 }
 0x726   : > { %v6662_v34 = vunpack.i.h.bf16 %v6660_v26  ;;  %v6661_v39 = vunpack.i.l.bf16 %v6660_v26  ;;  %v6615_v35 = vpop.permute.xlu0 %6614 }
 0x727   : > { %v6617_v49 = vunpack.i.h.bf16 %v6615_v35  ;;  %v6616_v50 = vunpack.i.l.bf16 %v6615_v35 }
 0x728   : > { %v2276_v43 = vsel %vm1458_vm6, %v6661_v39, %v6662_v34  ;;  %v2277_v45 = vsel %vm1458_vm6, %v6662_v34, %v6666_v19  ;;  %v2396_v39 = vpop.permute.xlu2 %2395  ;;  %vm5175_vm6 = vcmask 408576  }
 0x729   : > { %2412 = vmatpush.msra.mxu2 %v2276_v43  ;;  %2458 = vmatpush.msrb.mxu3 %v2277_v45  ;;  %v2254_v40 = vsel %vm1447_vm7, %v6677_v41, %v6616_v50  ;;  %v2255_v56 = vsel %vm1447_vm7, %v6616_v50, %v6617_v49 }
 0x72b   : > { %2413 = vmatpush.msra.mxu2 %v2274_v46  ;;  %2459 = vmatpush.msrb.mxu3 %v2275_v47 }
 0x72d   : > { %v6670_v31 = vpop.permute.xlu1 %6669 }
 0x72e   : > { %v6672_v44 = vunpack.i.h.bf16 %v6670_v31  ;;  %v6671_v51 = vunpack.i.l.bf16 %v6670_v31  ;;  %v6690_v55 = vpop.permute.xlu0 %6689 }
 0x72f   : > { %v6692_v30 = vunpack.i.h.bf16 %v6690_v55  ;;  %v6691_v54 = vunpack.i.l.bf16 %v6690_v55  ;;  %v2570_v55 = vld [vmem:[%s9730_s28 + $0x70] sm:$0xff] }
 0x730   : > { %v2256_v33 = vsel %vm1447_vm7, %v6671_v51, %v6672_v44  ;;  %v2257_v53 = vsel %vm1447_vm7, %v6672_v44, %v6676_v48 }
 0x731   : > { %2414 = vmatpush.msra.mxu2 %v2256_v33  ;;  %2460 = vmatpush.msrb.mxu3 %v2257_v53  ;;  %v2234_v1 = vsel %vm1436_vm8, %v6687_v61, %v6691_v54  ;;  %v2235_v3 = vsel %vm1436_vm8, %v6691_v54, %v6692_v30  ;;  %v2571_v33 = vld [vmem:[%s9730_s28 + $0x78] sm:$0xff]  ;;  %v2566_v54 = vld [vmem:[%s9730_s28 + $0x50] sm:$0xff]  ;;  %v2581_v61 = vld [vmem:[%s9730_s28 + $0xc8] sm:$0xff] }
 0x732   : > { %v2587_v53 = vld [vmem:[%s9730_s28 + $0xf8] sm:$0xff] }
 0x733   : > { %2415 = vmatpush.msra.mxu2 %v2254_v40  ;;  %2461 = vmatpush.msrb.mxu3 %v2255_v56  ;;  %v2586_v40 = vld [vmem:[%s9730_s28 + $0xf0] sm:$0xff]  ;;  %v2585_v56 = vld [vmem:[%s9730_s28 + $0xe8] sm:$0xff]  ;;  %v2583_v30 = vld [vmem:[%s9730_s28 + $0xd8] sm:$0xff] }
 0x735   : > { %v6680_v57 = vpop.permute.xlu1 %6679 }
 0x736   : > { %v6682_v58 = vunpack.i.h.bf16 %v6680_v57  ;;  %v6681_v60 = vunpack.i.l.bf16 %v6680_v57  ;;  %v6705_v4 = vpop.permute.xlu0 %6704  ;;  %v2567_v57 = vld [vmem:[%s9730_s28 + $0x58] sm:$0xff] }
 0x737   : > { %v6707_v2 = vunpack.i.h.bf16 %v6705_v4  ;;  %v6706_v8 = vunpack.i.l.bf16 %v6705_v4  ;;  %v2562_v4 = vld [vmem:[%s9730_s28 + $0x30] sm:$0xff] }
 0x738   : > { %v2236_v62 = vsel %vm1436_vm8, %v6681_v60, %v6682_v58  ;;  %v2237_v63 = vsel %vm1436_vm8, %v6682_v58, %v6686_v32  ;;  %v2584_v32 = vld [vmem:[%s9730_s28 + $0xe0] sm:$0xff]  ;;  %v2582_v58 = vld [vmem:[%s9730_s28 + $0xd0] sm:$0xff]  ;;  %v2565_v60 = vld [vmem:[%s9730_s28 + $0x48] sm:$0xff] }
 0x739   : > { %2416 = vmatpush.msra.mxu2 %v2236_v62  ;;  %2462 = vmatpush.msrb.mxu3 %v2237_v63  ;;  %v2374_v18 = vsel %vm1513_vm1, %v6702_v14, %v6706_v8  ;;  %v2375_v20 = vsel %vm1513_vm1, %v6706_v8, %v6707_v2  ;;  %v2564_v62 = vld [vmem:[%s9730_s28 + $0x40] sm:$0xff]  ;;  %v2561_v2 = vld [vmem:[%s9730_s28 + $0x28] sm:$0xff] }
 0x73a   : > { %v2580_v63 = vld [vmem:[%s9730_s28 + $0xc0] sm:$0xff]  ;;  %v2577_v8 = vld [vmem:[%s9730_s28 + $0xa8] sm:$0xff] }
 0x73b   : > { %2417 = vmatpush.msra.mxu2 %v2234_v1  ;;  %2463 = vmatpush.msrb.mxu3 %v2235_v3  ;;  %v2579_v1 = vld [vmem:[%s9730_s28 + $0xb8] sm:$0xff] }
 0x73d   : > { %v6695_v7 = vpop.permute.xlu1 %6694  ;;  %5937 = vmatpush.msk.msra.mxu2 %vm8317_vm9, %v8594_v21  ;;  %2464 = vmatpush.msrb.mxu3 %v8598_v22 }
 0x73e   : > { %v6697_v11 = vunpack.i.h.bf16 %v6695_v7  ;;  %v6696_v13 = vunpack.i.l.bf16 %v6695_v7 }
 0x73f   : > { %5939 = vmatpush.msk.msra.mxu2 %vm8317_vm9, %v8581_v12  ;;  %2465 = vmatpush.msrb.mxu3 %v8587_v16  ;;  %v2385_v12 = vld [vmem:[%s9729_s11 + $0x18] sm:$0xff] }
 0x740   : > { %2420 = vmatmul.f32.vlgmr.msra.gmra.mxu2 %v2382_v9  ;;  %2466 = vmatmul.f32.vlgmr.msrb.gmra.mxu3 %v2382_v9  ;;  %v2376_v21 = vsel %vm1513_vm1, %v6696_v13, %v6697_v11  ;;  %v2377_v22 = vsel %vm1513_vm1, %v6697_v11, %v6701_v6  ;;  %v2578_v6 = vld [vmem:[%s9730_s28 + $0xb0] sm:$0xff]  ;;  %vm3390_vm1 = vcmask 523264  }
 0x741   : > { %2441 = vmatpush.msra.mxu1 %v2376_v21  ;;  %2487 = vmatpush.msrb.mxu0 %v2377_v22  ;;  %v2560_v22 = vld [vmem:[%s9730_s28 + $0x20] sm:$0xff] }
 0x742   : > { %2611 = vmatpush.msrb.mxu2 %v2587_v53 }
 0x743   : > { %2442 = vmatpush.msra.mxu1 %v2374_v18  ;;  %2488 = vmatpush.msrb.mxu0 %v2375_v20  ;;  %v2559_v20 = vld [vmem:[%s9730_s28 + $0x18] sm:$0xff] }
 0x744   : > { %5940 = vmatmul.msk.f32.vlgmr.msra.gmra.mxu1 %vm1789_vm11, %v2383_v17  ;;  %5942 = vmatmul.msk.f32.vlgmr.msrb.gmra.mxu0 %vm1789_vm11, %v2383_v17  ;;  %v2576_v17 = vld [vmem:[%s9730_s28 + $0xa0] sm:$0xff] }
 0x745   : > { %v2391_v23 = vpop.permute.xlu1 %2390  ;;  %2588 = vmatpush.msrb.mxu1 %v2571_v33  ;;  %2612 = vmatpush.msrb.mxu2 %v2586_v40 }
 0x747   : > { %2589 = vmatpush.msrb.mxu1 %v2570_v55  ;;  %2613 = vmatpush.msrb.mxu2 %v2585_v56 }
 0x748   : > { %2423 = vmatmul.f32.gmra.mxu2 %v2384_v59  ;;  %2469 = vmatmul.f32.gmra.mxu3 %v2384_v59  ;;  %v2575_v59 = vld [vmem:[%s9730_s28 + $0x98] sm:$0xff] }
 0x749   : > { %2614 = vmatpush.msrb.mxu2 %v2584_v32 }
 0x74b   : > { %2615 = vmatpush.msrb.mxu2 %v2583_v30 }
 0x74c   : > { %5941 = vmatmul.msk.f32.gmra.mxu1 %vm1789_vm11, %v2385_v12  ;;  %5943 = vmatmul.msk.f32.gmra.mxu0 %vm1789_vm11, %v2385_v12 }
 0x74d   : > { %2616 = vmatpush.msrb.mxu2 %v2582_v58 }
 0x74f   : > { %2617 = vmatpush.msrb.mxu2 %v2581_v61  ;;  %v2704_v61 = vld [vmem:[%s9732_s23 + $0x8] sm:$0xff] }
 0x751   : > { %2618 = vmatpush.msrb.mxu2 %v2580_v63 }
 0x753   : > { %2619 = vmatpush.msrb.mxu2 %v2579_v1 }
 0x755   : > { %2620 = vmatpush.msrb.mxu2 %v2578_v6 }
 0x757   : > { %2621 = vmatpush.msrb.mxu2 %v2577_v8 }
 0x759   : > { %2622 = vmatpush.msrb.mxu2 %v2576_v17 }
 0x75b   : > { %2623 = vmatpush.msrb.mxu2 %v2575_v59 }
 0x7c1   : > { %v2444_v16 = vpop.f32.mrf.mxu1  ;;  %v2490_v5 = vpop.f32.mrf.mxu0 }
 0x7c3   : > { %v2421_v24 = vpop.f32.mrf.mxu2  ;;  %v2467_v10 = vpop.f32.mrf.mxu3 }
 0x7c4   : > { %v2422_v19 = vadd.f32 %v2421_v24, %v2391_v23  ;;  %v2468_v26 = vadd.f32 %v2467_v10, %v2391_v23 }
 0x7c6   : > { %v2445_v15 = vadd.f32 %v2444_v16, %v2422_v19  ;;  %v2491_v27 = vadd.f32 %v2490_v5, %v2468_v26 }
 0x7c8   : > { %v2496_v28 = vmax.f32 %v2445_v15, 0.0  ;;  %v2497_v34 = vmax.f32 %v2491_v27, 0.0  ;;  %v2558_v15 = vld [vmem:[%s9730_s28 + $0x10] sm:$0xff] }
 0x7c9   : > { %v2447_v43 = vpop.f32.mrf.mxu1  ;;  %v2493_v45 = vpop.f32.mrf.mxu0  ;;  %v2574_v27 = vld [vmem:[%s9730_s28 + $0x90] sm:$0xff] }
 0x7ca   : > { %v8676_v35 = vadd.f32 %v2496_v28, %v8469_v25  ;;  %v8679_v42 = vadd.f32 %v2497_v34, %v8475_v36  ;;  %v2557_v28 = vld [vmem:[%s9730_s28 + $0x8] sm:$0xff]  ;;  %2624 = vmatpush.msrb.mxu2 %v2574_v27 }
 0x7cb   : > { %v2424_v46 = vpop.f32.mrf.mxu2  ;;  %v2470_v47 = vpop.f32.mrf.mxu3  ;;  %v2573_v34 = vld [vmem:[%s9730_s28 + $0x88] sm:$0xff] }
 0x7cc   : > { %v2425_v48 = vadd.f32 %v2424_v46, %v2396_v39  ;;  %v2471_v31 = vadd.f32 %v2470_v47, %v2396_v39  ;;  %v6708_v49 = vpack.i.bf16 %v8679_v42, %v8676_v35  ;;  %v2556_v39 = vld [vmem:[%s9730_s28] sm:$0xff]  ;;  %2625 = vmatpush.msrb.mxu2 %v2573_v34 }
 0x7ce   : > { %v2448_v50 = vadd.f32 %v2447_v43, %v2425_v48  ;;  %v2494_v25 = vadd.f32 %v2493_v45, %v2471_v31  ;;  %6709 = vrot.lane.b32.xlu0 %v6708_v49, %s9637_s22 }
 0x7d0   : > { %v2498_v36 = vmax.f32 %v2448_v50, 0.0  ;;  %v2499_v44 = vmax.f32 %v2494_v25, 0.0 }
 0x7d2   : > { %v8685_v51 = vadd.f32 %v2498_v36, %v8473_v29  ;;  %v8688_v41 = vadd.f32 %v2499_v44, %v8477_v37  ;;  %v2569_v29 = vld [vmem:[%s9730_s28 + $0x68] sm:$0xff]  ;;  %v2568_v37 = vld [vmem:[%s9730_s28 + $0x60] sm:$0xff] }
 0x7d3   : > { %2590 = vmatpush.msrb.mxu1 %v2569_v29 }
 0x7d4   : > { %v6713_v52 = vpack.i.bf16 %v8688_v41, %v8685_v51 }
 0x7d5   : > { %2591 = vmatpush.msrb.mxu1 %v2568_v37 }
 0x7d6   : > { %6714 = vrot.lane.b32.xlu1 %v6713_v52, %s9637_s22 }
 0x7d7   : > { %2592 = vmatpush.msrb.mxu1 %v2567_v57 }
 0x7d9   : > { %2593 = vmatpush.msrb.mxu1 %v2566_v54 }
 0x7db   : > { %2594 = vmatpush.msrb.mxu1 %v2565_v60  ;;  %v2703_v60 = vld [vmem:[%s9731_s15] sm:$0xff]  ;;  %s9734_s15 = sld [smem:[#allocation29_spill]] }
 0x7dd   : > { %2595 = vmatpush.msrb.mxu1 %v2564_v62  ;;  %v2705_v62 = vld [vmem:[%s9732_s23 + $0x10] sm:$0xff] }
 0x7df   : > { %2596 = vmatpush.msrb.mxu1 %v2563_v0 }
 0x7e1   : > { %2597 = vmatpush.msrb.mxu1 %v2562_v4  ;;  %v2698_v59 = vld [vmem:[%s9734_s15 + $0x8] sm:$0xff] }
 0x7e3   : > { %2598 = vmatpush.msrb.mxu1 %v2561_v2 }
 0x7e5   : > { %2599 = vmatpush.msrb.mxu1 %v2560_v22 }
 0x7e7   : > { %2600 = vmatpush.msrb.mxu1 %v2559_v20 }
 0x7e9   : > { %2601 = vmatpush.msrb.mxu1 %v2558_v15 }
 0x7eb   : > { %2602 = vmatpush.msrb.mxu1 %v2557_v28 }
 0x7ed   : > { %2603 = vmatpush.msrb.mxu1 %v2556_v39 }
 0x840   : > { %v6710_v3 = vpop.permute.xlu0 %6709 }
 0x841   : > { %v6712_v7 = vunpack.i.h.bf16 %v6710_v3  ;;  %v6711_v9 = vunpack.i.l.bf16 %v6710_v3 }
 0x843   : > { %v2516_v11 = vsel %vm1436_vm8, %v6711_v9, %v6712_v7  ;;  %v2524_v13 = vsel %vm1436_vm8, %v6712_v7, %v6711_v9 }
 0x844   : > { %v2526_v14 = vmax.f32 %v8676_v35, %v2516_v11  ;;  %v2527_v21 = vmax.f32 %v8679_v42, %v2524_v13  ;;  %v2572_v35 = vld [vmem:[%s9730_s28 + $0x80] sm:$0xff] }
 0x845   : > { %2626 = vmatpush.msrb.mxu2 %v2572_v35 }
 0x846   : > { %v6718_v18 = vpack.i.bf16 %v2527_v21, %v2526_v14 }
 0x848   : > { %v6715_v12 = vpop.permute.xlu1 %6714  ;;  %6719 = vrot.lane.b32.xlu2 %v6718_v18, %s9650_s2 }
 0x849   : > { %v6717_v16 = vunpack.i.h.bf16 %v6715_v12  ;;  %v6716_v5 = vunpack.i.l.bf16 %v6715_v12 }
 0x84b   : > { %v2517_v23 = vsel %vm1436_vm8, %v6716_v5, %v6717_v16  ;;  %v2525_v24 = vsel %vm1436_vm8, %v6717_v16, %v6716_v5 }
 0x84c   : > { %v2528_v10 = vmax.f32 %v8685_v51, %v2517_v23  ;;  %v2529_v19 = vmax.f32 %v8688_v41, %v2525_v24 }
 0x84e   : > { %v6723_v26 = vpack.i.bf16 %v2529_v19, %v2528_v10 }
 0x850   : > { %6724 = vrot.lane.b32.xlu0 %v6723_v26, %s9650_s2 }
 0x8a2   : > { %v6720_v42 = vpop.permute.xlu2 %6719 }
 0x8a3   : > { %v6722_v43 = vunpack.i.h.bf16 %v6720_v42  ;;  %v6721_v45 = vunpack.i.l.bf16 %v6720_v42 }
 0x8a5   : > { %v2542_v46 = vsel %vm1447_vm7, %v6721_v45, %v6722_v43  ;;  %v2550_v47 = vsel %vm1447_vm7, %v6722_v43, %v6721_v45 }
 0x8a6   : > { %v2552_v48 = vmax.f32 %v2526_v14, %v2542_v46  ;;  %v2553_v31 = vmax.f32 %v2527_v21, %v2550_v47 }
 0x8a8   : > { %2604 = vmatmul.f32.vlgmr.msrb.gmra.mxu1 %v2552_v48  ;;  %2627 = vmatmul.f32.vlgmr.msrb.gmra.mxu2 %v2553_v31 }
 0x8c2   : > { %v6725_v49 = vpop.permute.xlu0 %6724 }
 0x8c3   : > { %v6727_v50 = vunpack.i.h.bf16 %v6725_v49  ;;  %v6726_v25 = vunpack.i.l.bf16 %v6725_v49 }
 0x8c5   : > { %v2543_v36 = vsel %vm1447_vm7, %v6726_v25, %v6727_v50  ;;  %v2551_v44 = vsel %vm1447_vm7, %v6727_v50, %v6726_v25  ;;  %vm5180_vm7 = vcmask 539648  }
 0x8c6   : > { %v2554_v51 = vmax.f32 %v2528_v10, %v2543_v36  ;;  %v2555_v41 = vmax.f32 %v2529_v19, %v2551_v44 }
 0x8c8   : > { %2607 = vmatmul.f32.gmra.mxu1 %v2554_v51  ;;  %2630 = vmatmul.f32.gmra.mxu2 %v2555_v41 }
 0x925   : > { %v2605_v52 = vpop.f32.mrf.mxu1 }
 0x92b   : > { %v2628_v33 = vpop.f32.mrf.mxu2 }
 0x92c   : > { %v2629_v53 = vadd.f32 %v2628_v33, %v2605_v52 }
 0x92e   : > { %2636 = vrot.lane.b32.xlu2 %v2629_v53, %s9633_s16 }
 0x945   : > { %v2608_v55 = vpop.f32.mrf.mxu1 }
 0x94b   : > { %v2631_v40 = vpop.f32.mrf.mxu2 }
 0x94c   : > { %v2632_v29 = vadd.f32 %v2631_v40, %v2608_v55 }
 0x94e   : > { %2638 = vrot.lane.b32.xlu1 %v2632_v29, %s9633_s16  ;;  %s9733_s16 = smov 120  }
 0x988   : > { %v2637_v56 = vpop.permute.xlu2 %2636 }
 0x989   : > { %v8742_v37 = vsel %vm1421_vm0, 0.0, %v2637_v56 }
 0x98a   : > { %v2645_v30 = vsel %vm2644_vm12, %v8742_v37, 0.0 }
 0x9c0   : > { %v2639_v32 = vpop.permute.xlu1 %2638 }
 0x9c1   : > { %v2643_v57 = vsel %vm1421_vm0, 0.0, %v2639_v32 }
 0x9c2   : > { %v2646_v54 = vsel %vm2644_vm12, %v2643_v57, 0.0 }
 0x9c3   : > { %v6738_v58 = vpack.i.bf16 %v2645_v30, %v2646_v54 }
 0x9c5   : > { %6739 = vrot.lane.b32.xlu2 %v6738_v58, %s9641_s18  ;;  %6734 = vrot.lane.b32.xlu1 %v6738_v58, %s9639_s1 }
 0x9c6   : > { %6729 = vrot.lane.b32.xlu0 %v6738_v58, %s9635_s12  ;;  %s9735_s12 = smov %s9734_s15  ;;  %s9736_s15 = smov 4  }
 0x9c7   : > { %v2700_v10 = vld [vmem:[%s9735_s12 + $0x18] sm:$0xff]  ;;  %v2697_v26 = vld [vmem:[%s9735_s12] sm:$0xff]  ;;  %v2702_v15 = vld [vmem:[%s9735_s12 + $0x28] sm:$0xff] }
 0x9c8   : > { %v2699_v27 = vld [vmem:[%s9735_s12 + $0x10] sm:$0xff]  ;;  %v2701_v28 = vld [vmem:[%s9735_s12 + $0x20] sm:$0xff] }
 0x9cd   : > { %6754 = vrot.lane.b32.xlu2 %v6738_v58, %s9650_s2  ;;  %6749 = vrot.lane.b32.xlu1 %v6738_v58, %s9647_s26 }
 0x9ce   : > { %6744 = vrot.lane.b32.xlu0 %v6738_v58, %s9645_s7 }
 0x9d5   : > { %2708 = vperm.xlu2 %6582, %v2703_v60   ;;  %6764 = vrot.lane.b32.xlu1 %v6738_v58, %s9733_s16 }
 0x9d6   : > { %6759 = vrot.lane.b32.xlu0 %v6738_v58, %s9637_s22  ;;  %s9737_s22 = sld [smem:[#allocation31_spill]] }
 0x9dc   : > { %s9738_s1 = smov %s9737_s22  ;;  %v2883_v32 = vld [vmem:[%s9737_s22 + $0x10] sm:$0xff]  ;;  %s9743_s22 = smov 124  }
 0x9dd   : > { %2713 = vperm.xlu1 %6331, %v2704_v61   ;;  %v2881_v30 = vld [vmem:[%s9738_s1] sm:$0xff] }
 0x9de   : > { %2718 = vperm.xlu0 %6330, %v2705_v62  }
 0xa1f   : > { %v6740_v6 = vpop.permute.xlu2 %6739 }
 0xa20   : > { %v6741_v2 = vunpack.i.l.bf16 %v6740_v6  ;;  %v6742_v11 = vunpack.i.h.bf16 %v6740_v6 }
 0xa27   : > { %v6755_v18 = vpop.permute.xlu2 %6754 }
 0xa28   : > { %v6756_v16 = vunpack.i.l.bf16 %v6755_v18  ;;  %v6757_v23 = vunpack.i.h.bf16 %v6755_v18 }
 0xa2f   : > { %v2709_v39 = vpop.permute.xlu2 %2708 }
 0xa37   : > { %v6735_v63 = vpop.permute.xlu1 %6734 }
 0xa38   : > { %v6730_v0 = vpop.permute.xlu0 %6729  ;;  %v6736_v4 = vunpack.i.l.bf16 %v6735_v63  ;;  %v6737_v7 = vunpack.i.h.bf16 %v6735_v63 }
 0xa39   : > { %v6731_v1 = vunpack.i.l.bf16 %v6730_v0  ;;  %v6732_v3 = vunpack.i.h.bf16 %v6730_v0 }
 0xa3b   : > { %2730 = vmatpush.msra.mxu0 %v6731_v1 }
 0xa3d   : > { %2731 = vmatpush.msra.mxu0 %v6732_v3 }
 0xa3f   : > { %2732 = vmatpush.msra.mxu0 %v6736_v4  ;;  %v6750_v9 = vpop.permute.xlu1 %6749 }
 0xa40   : > { %v6745_v8 = vpop.permute.xlu0 %6744  ;;  %v6751_v17 = vunpack.i.l.bf16 %v6750_v9  ;;  %v6752_v12 = vunpack.i.h.bf16 %v6750_v9 }
 0xa41   : > { %2733 = vmatpush.msra.mxu0 %v6737_v7  ;;  %v6746_v13 = vunpack.i.l.bf16 %v6745_v8  ;;  %v6747_v14 = vunpack.i.h.bf16 %v6745_v8 }
 0xa43   : > { %2734 = vmatpush.msra.mxu0 %v6741_v2 }
 0xa45   : > { %2735 = vmatpush.msra.mxu0 %v6742_v11 }
 0xa47   : > { %2736 = vmatpush.msra.mxu0 %v6746_v13  ;;  %v6765_v21 = vpop.permute.xlu1 %6764 }
 0xa48   : > { %v6766_v22 = vunpack.i.l.bf16 %v6765_v21  ;;  %v6767_v20 = vunpack.i.h.bf16 %v6765_v21  ;;  %v6760_v5 = vpop.permute.xlu0 %6759 }
 0xa49   : > { %2737 = vmatpush.msra.mxu0 %v6747_v14  ;;  %v6761_v24 = vunpack.i.l.bf16 %v6760_v5  ;;  %v6762_v19 = vunpack.i.h.bf16 %v6760_v5 }
 0xa4a   : > { %2770 = vmatpush.msra.mxu3 %v6766_v22 }
 0xa4b   : > { %2738 = vmatpush.msra.mxu0 %v6751_v17 }
 0xa4c   : > { %2771 = vmatpush.msra.mxu3 %v6767_v20 }
 0xa4d   : > { %2739 = vmatpush.msra.mxu0 %v6752_v12  ;;  %5946 = vmatmul.msk.f32.vlgmr.msra.gmra.mxu3 %vm1789_vm11, %v2698_v59 }
 0xa4f   : > { %2740 = vmatpush.msra.mxu0 %v6756_v16  ;;  %v2714_v46 = vpop.permute.xlu1 %2713 }
 0xa50   : > { %v2719_v49 = vpop.permute.xlu0 %2718 }
 0xa51   : > { %2741 = vmatpush.msra.mxu0 %v6757_v23 }
 0xa53   : > { %2742 = vmatpush.msra.mxu0 %v6761_v24 }
 0xa55   : > { %2743 = vmatpush.msra.mxu0 %v6762_v19  ;;  %5947 = vmatmul.msk.f32.gmra.mxu3 %vm1789_vm11, %v2700_v10 }
 0xa57   : > { %5944 = vmatpush.msk.msra.mxu0 %vm2644_vm12, %v2643_v57  ;;  %v2882_v57 = vld [vmem:[%s9738_s1 + $0x8] sm:$0xff]  ;;  %s9745_s1 = smov 125  }
 0xa59   : > { %5945 = vmatpush.msk.msra.mxu0 %vm2644_vm12, %v8742_v37 }
 0xa5a   : > { %2746 = vmatmul.f32.vlgmr.msra.gmra.mxu0 %v2697_v26 }
 0xa5d   : > { %5948 = vmatmul.msk.f32.gmra.mxu3 %vm1789_vm11, %v2702_v15  ;;  %v2875_v15 = vld [vmem:[#allocation2] sm:$0xff] }
 0xa62   : > { %2749 = vmatmul.f32.gmra.mxu0 %v2699_v27  ;;  %v2876_v27 = vld [vmem:[#allocation2 + $0x8] sm:$0xff] }
 0xa6a   : > { %2752 = vmatmul.f32.gmra.mxu0 %v2701_v28  ;;  %v2877_v28 = vld [vmem:[#allocation2 + $0x10] sm:$0xff] }
 0xad0   : > { %v2773_v34 = vpop.f32.mrf.mxu3 }
 0xad7   : > { %v2747_v35 = vpop.f32.mrf.mxu0 }
 0xad8   : > { %v2748_v42 = vadd.f32 %v2747_v35, %v2709_v39  ;;  %v2776_v45 = vpop.f32.mrf.mxu3  ;;  %v2879_v39 = vld [vmem:[#allocation2 + $0x20] sm:$0xff]  ;;  %v2880_v35 = vld [vmem:[#allocation2 + $0x28] sm:$0xff] }
 0xada   : > { %v2774_v43 = vadd.f32 %v2773_v34, %v2748_v42  ;;  %v2878_v34 = vld [vmem:[#allocation2 + $0x18] sm:$0xff] }
 0xadc   : > { %2785 = vrot.lane.b32.xlu2 %v2774_v43, %s9736_s15 }
 0xadf   : > { %v2750_v47 = vpop.f32.mrf.mxu0 }
 0xae0   : > { %v2751_v48 = vadd.f32 %v2750_v47, %v2714_v46  ;;  %v2779_v25 = vpop.f32.mrf.mxu3 }
 0xae2   : > { %v2777_v31 = vadd.f32 %v2776_v45, %v2751_v48 }
 0xae4   : > { %2787 = vrot.lane.b32.xlu1 %v2777_v31, %s9736_s15 }
 0xae7   : > { %v2753_v50 = vpop.f32.mrf.mxu0 }
 0xae8   : > { %v2754_v36 = vadd.f32 %v2753_v50, %v2719_v49 }
 0xaea   : > { %v2780_v44 = vadd.f32 %v2779_v25, %v2754_v36 }
 0xaec   : > { %2789 = vrot.lane.b32.xlu0 %v2780_v44, %s9736_s15 }
 0xb36   : > { %v2786_v51 = vpop.permute.xlu2 %2785 }
 0xb37   : > { %v8775_v41 = vsel %vm1421_vm0, 0.0, %v2786_v51 }
 0xb38   : > { %v2797_v52 = vsel %vm2644_vm12, %v8775_v41, 0.0 }
 0xb39   : > { %2830 = vrot.lane.b32.xlu1 %v2797_v52, %s9645_s7  ;;  %2839 = vrot.lane.b32.xlu2 %v2797_v52, %s9641_s18  ;;  %s9739_s18 = smov 122  }
 0xb41   : > { %2866 = vrot.lane.b32.xlu1 %v2797_v52, %s9733_s16  ;;  %2821 = vrot.lane.b32.xlu2 %v2797_v52, %s9647_s26 }
 0xb56   : > { %v2788_v33 = vpop.permute.xlu1 %2787 }
 0xb57   : > { %v8784_v53 = vsel %vm1421_vm0, 0.0, %v2788_v33 }
 0xb58   : > { %v2798_v29 = vsel %vm2644_vm12, %v8784_v53, 0.0 }
 0xb5e   : > { %v2790_v55 = vpop.permute.xlu0 %2789 }
 0xb5f   : > { %v8787_v40 = vsel %vm1421_vm0, 0.0, %v2790_v55 }
 0xb60   : > { %v2799_v56 = vsel %vm2644_vm12, %v8787_v40, 0.0 }
 0xb61   : > { %v6768_v37 = vpack.i.bf16 %v2798_v29, %v2799_v56 }
 0xb63   : > { %6769 = vrot.lane.b32.xlu0 %v6768_v37, %s9645_s7  ;;  %6789 = vrot.lane.b32.xlu1 %v6768_v37, %s9650_s2  ;;  %s9742_s7 = smov 123  }
 0xb64   : > { %6774 = vrot.lane.b32.xlu2 %v6768_v37, %s9733_s16 }
 0xb6b   : > { %6779 = vrot.lane.b32.xlu0 %v6768_v37, %s9647_s26  ;;  %6794 = vrot.lane.b32.xlu1 %v6768_v37, %s9739_s18  ;;  %s9744_s26 = sld [smem:[#allocation33_spill]] }
 0xb6c   : > { %2857 = vrot.lane.b32.xlu2 %v2797_v52, %s9740_s3 }
 0xb73   : > { %6784 = vrot.lane.b32.xlu0 %v6768_v37, %s9740_s3  ;;  %2803 = vrot.lane.b32.xlu1 %v2797_v52, %s9741_s4 }
 0xb74   : > { %6799 = vrot.lane.b32.xlu2 %v6768_v37, %s9741_s4 }
 0xb7b   : > { %2812 = vrot.lane.b32.xlu0 %v2797_v52, %s9650_s2  ;;  %2896 = vperm.xlu1 %6331, %v2883_v32  }
 0xb7c   : > { %6804 = vrot.lane.b32.xlu2 %v6768_v37, %s9742_s7 }
 0xb83   : > { %2848 = vrot.lane.b32.xlu0 %v2797_v52, %s9739_s18 }
 0xb84   : > { %2891 = vperm.xlu2 %6582, %v2882_v57  }
 0xb8b   : > { %2886 = vperm.xlu0 %6330, %v2881_v30  }
 0xb93   : > { %v2840_v54 = vpop.permute.xlu2 %2839 }
 0xb94   : > { %2909 = vmatpush.msra.mxu1 %v2840_v54  ;;  %v3062_v54 = vld [vmem:[%s9744_s26 + $0x10] sm:$0xff] }
 0xb9b   : > { %v2822_v58 = vpop.permute.xlu2 %2821 }
 0xbab   : > { %v2831_v60 = vpop.permute.xlu1 %2830 }
 0xbb3   : > { %v2867_v0 = vpop.permute.xlu1 %2866 }
 0xbbe   : > { %v6775_v61 = vpop.permute.xlu2 %6774 }
 0xbbf   : > { %v6776_v62 = vunpack.i.l.bf16 %v6775_v61  ;;  %v6777_v63 = vunpack.i.h.bf16 %v6775_v61 }
 0xbc1   : > { %2940 = vmatpush.msrb.mxu3 %v6776_v62 }
 0xbc3   : > { %2941 = vmatpush.msrb.mxu3 %v6777_v63 }
 0xbc5   : > { %2942 = vmatpush.msrb.mxu3 %v2867_v0 }
 0xbc6   : > { %v2858_v9 = vpop.permute.xlu2 %2857 }
 0xbce   : > { %v6800_v17 = vpop.permute.xlu2 %6799 }
 0xbcf   : > { %v6801_v12 = vunpack.i.l.bf16 %v6800_v17  ;;  %v6802_v5 = vunpack.i.h.bf16 %v6800_v17 }
 0xbd5   : > { %v6770_v1 = vpop.permute.xlu0 %6769  ;;  %v6790_v2 = vpop.permute.xlu1 %6789 }
 0xbd6   : > { %v6771_v3 = vunpack.i.l.bf16 %v6770_v1  ;;  %v6772_v4 = vunpack.i.h.bf16 %v6770_v1  ;;  %v6791_v11 = vunpack.i.l.bf16 %v6790_v2  ;;  %v6792_v14 = vunpack.i.h.bf16 %v6790_v2  ;;  %v6805_v23 = vpop.permute.xlu2 %6804 }
 0xbd7   : > { %v6806_v19 = vunpack.i.l.bf16 %v6805_v23  ;;  %v6807_v26 = vunpack.i.h.bf16 %v6805_v23 }
 0xbd8   : > { %2910 = vmatpush.msra.mxu1 %v6771_v3 }
 0xbda   : > { %2911 = vmatpush.msra.mxu1 %v6772_v4 }
 0xbdc   : > { %2912 = vmatpush.msra.mxu1 %v2831_v60  ;;  %v3061_v60 = vld [vmem:[%s9744_s26 + $0x8] sm:$0xff] }
 0xbdd   : > { %v6780_v6 = vpop.permute.xlu0 %6779  ;;  %v6795_v18 = vpop.permute.xlu1 %6794 }
 0xbde   : > { %v6781_v7 = vunpack.i.l.bf16 %v6780_v6  ;;  %v6782_v8 = vunpack.i.h.bf16 %v6780_v6  ;;  %v6796_v20 = vunpack.i.l.bf16 %v6795_v18  ;;  %v6797_v16 = vunpack.i.h.bf16 %v6795_v18  ;;  %v2892_v31 = vpop.permute.xlu2 %2891 }
 0xbe0   : > { %2913 = vmatpush.msra.mxu1 %v6781_v7 }
 0xbe2   : > { %2914 = vmatpush.msra.mxu1 %v6782_v8 }
 0xbe4   : > { %2915 = vmatpush.msra.mxu1 %v2822_v58  ;;  %v3060_v58 = vld [vmem:[%s9744_s26] sm:$0xff] }
 0xbe5   : > { %v6785_v13 = vpop.permute.xlu0 %6784  ;;  %v2804_v24 = vpop.permute.xlu1 %2803 }
 0xbe6   : > { %v6786_v21 = vunpack.i.l.bf16 %v6785_v13  ;;  %2916 = vmatpush.msra.mxu1 %v6791_v11  ;;  %v6787_v22 = vunpack.i.h.bf16 %v6785_v13 }
 0xbe8   : > { %2917 = vmatpush.msra.mxu1 %v6792_v14  ;;  %2943 = vmatpush.msrb.mxu3 %v6786_v21 }
 0xbea   : > { %2944 = vmatpush.msrb.mxu3 %v6787_v22 }
 0xbec   : > { %2945 = vmatpush.msrb.mxu3 %v2858_v9 }
 0xbed   : > { %v2813_v59 = vpop.permute.xlu0 %2812  ;;  %v2897_v44 = vpop.permute.xlu1 %2896 }
 0xbee   : > { %2918 = vmatpush.msra.mxu1 %v2813_v59  ;;  %2946 = vmatpush.msrb.mxu3 %v6796_v20 }
 0xbf0   : > { %2919 = vmatpush.msra.mxu1 %v6801_v12  ;;  %2947 = vmatpush.msrb.mxu3 %v6797_v16 }
 0xbf2   : > { %2920 = vmatpush.msra.mxu1 %v6802_v5 }
 0xbf4   : > { %2921 = vmatpush.msra.mxu1 %v2804_v24  ;;  %v3054_v24 = vld [vmem:[#allocation5] sm:$0xff] }
 0xbf5   : > { %v2849_v10 = vpop.permute.xlu0 %2848 }
 0xbf6   : > { %5949 = vmatpush.msk.msra.mxu1 %vm2644_vm12, %v8787_v40  ;;  %2948 = vmatpush.msrb.mxu3 %v2849_v10 }
 0xbf8   : > { %5950 = vmatpush.msk.msra.mxu1 %vm2644_vm12, %v8784_v53  ;;  %2949 = vmatpush.msrb.mxu3 %v6806_v19 }
 0xbfa   : > { %5951 = vmatpush.msk.msra.mxu1 %vm2644_vm12, %v8775_v41  ;;  %2950 = vmatpush.msrb.mxu3 %v6807_v26 }
 0xbfb   : > { %2925 = vmatmul.f32.vlgmr.msra.gmra.mxu1 %v2875_v15  ;;  %5952 = vmatmul.msk.f32.vlgmr.msrb.gmra.mxu3 %vm2899_vm13, %v2876_v27  ;;  %v3056_v27 = vld [vmem:[#allocation5 + $0x10] sm:$0xff] }
 0xbfd   : > { %v2887_v43 = vpop.permute.xlu0 %2886 }
 0xc03   : > { %2928 = vmatmul.f32.gmra.mxu1 %v2877_v28  ;;  %5953 = vmatmul.msk.f32.gmra.mxu3 %vm2899_vm13, %v2878_v34 }
 0xc0b   : > { %2931 = vmatmul.f32.gmra.mxu1 %v2879_v39  ;;  %5954 = vmatmul.msk.f32.gmra.mxu3 %vm2899_vm13, %v2880_v35  ;;  %v3055_v35 = vld [vmem:[#allocation5 + $0x8] sm:$0xff] }
 0xc78   : > { %v2926_v42 = vpop.f32.mrf.mxu1 }
 0xc79   : > { %v2927_v45 = vadd.f32 %v2926_v42, %v2887_v43  ;;  %v3058_v42 = vld [vmem:[#allocation5 + $0x20] sm:$0xff]  ;;  %v3057_v43 = vld [vmem:[#allocation5 + $0x18] sm:$0xff] }
 0xc7e   : > { %v2952_v46 = vpop.f32.mrf.mxu3 }
 0xc7f   : > { %v8817_v47 = vadd.f32 %v2952_v46, %v2927_v45  ;;  %v3059_v45 = vld [vmem:[#allocation5 + $0x28] sm:$0xff] }
 0xc80   : > { %v2929_v48 = vpop.f32.mrf.mxu1 }
 0xc81   : > { %2964 = vrot.lane.b32.xlu0 %v8817_v47, %s9736_s15  ;;  %v2930_v49 = vadd.f32 %v2929_v48, %v2892_v31 }
 0xc86   : > { %v2955_v50 = vpop.f32.mrf.mxu3 }
 0xc87   : > { %v8821_v25 = vadd.f32 %v2955_v50, %v2930_v49 }
 0xc88   : > { %v2932_v36 = vpop.f32.mrf.mxu1 }
 0xc89   : > { %2966 = vrot.lane.b32.xlu2 %v8821_v25, %s9736_s15  ;;  %v2933_v51 = vadd.f32 %v2932_v36, %v2897_v44 }
 0xc8e   : > { %v2958_v41 = vpop.f32.mrf.mxu3 }
 0xc8f   : > { %v8825_v52 = vadd.f32 %v2958_v41, %v2933_v51 }
 0xc91   : > { %2968 = vrot.lane.b32.xlu1 %v8825_v52, %s9736_s15 }
 0xce3   : > { %v2967_v40 = vpop.permute.xlu2 %2966 }
 0xce4   : > { %v8837_v29 = vsel %vm1421_vm0, 0.0, %v2967_v40 }
 0xce5   : > { %v2977_v32 = vsel %vm2644_vm12, %v8837_v29, 0.0 }
 0xcf3   : > { %v2965_v33 = vpop.permute.xlu0 %2964 }
 0xcf4   : > { %v8830_v53 = vsel %vm1421_vm0, 0.0, %v2965_v33 }
 0xcf5   : > { %v2976_v55 = vsel %vm2644_vm12, %v8830_v53, 0.0 }
 0xcf6   : > { %3009 = vrot.lane.b32.xlu2 %v2976_v55, %s9743_s22  ;;  %3018 = vrot.lane.b32.xlu0 %v2976_v55, %s9742_s7 }
 0xd03   : > { %v2969_v56 = vpop.permute.xlu1 %2968 }
 0xd04   : > { %v8840_v37 = vsel %vm1421_vm0, 0.0, %v2969_v56 }
 0xd05   : > { %v2978_v57 = vsel %vm2644_vm12, %v8840_v37, 0.0 }
 0xd06   : > { %v6808_v30 = vpack.i.bf16 %v2977_v32, %v2978_v57 }
 0xd08   : > { %6809 = vrot.lane.b32.xlu1 %v6808_v30, %s9743_s22  ;;  %6819 = vrot.lane.b32.xlu2 %v6808_v30, %s9650_s2 }
 0xd09   : > { %6814 = vrot.lane.b32.xlu0 %v6808_v30, %s9745_s1 }
 0xd10   : > { %3000 = vrot.lane.b32.xlu1 %v2976_v55, %s9745_s1  ;;  %6829 = vrot.lane.b32.xlu2 %v6808_v30, %s9741_s4 }
 0xd11   : > { %2991 = vrot.lane.b32.xlu0 %v2976_v55, %s9650_s2  ;;  %s9746_s2 = sld [smem:[#allocation34_spill]] }
 0xd18   : > { %6824 = vrot.lane.b32.xlu1 %v6808_v30, %s9733_s16  ;;  %6834 = vrot.lane.b32.xlu2 %v6808_v30, %s9740_s3 }
 0xd19   : > { %3045 = vrot.lane.b32.xlu0 %v2976_v55, %s9733_s16 }
 0xd20   : > { %2982 = vrot.lane.b32.xlu1 %v2976_v55, %s9741_s4  ;;  %3027 = vrot.lane.b32.xlu2 %v2976_v55, %s9739_s18 }
 0xd21   : > { %3036 = vrot.lane.b32.xlu0 %v2976_v55, %s9740_s3 }
 0xd28   : > { %6839 = vrot.lane.b32.xlu1 %v6808_v30, %s9739_s18  ;;  %3075 = vperm.xlu2 %6582, %v3062_v54  }
 0xd29   : > { %6844 = vrot.lane.b32.xlu0 %v6808_v30, %s9742_s7 }
 0xd30   : > { %3065 = vperm.xlu1 %6331, %v3060_v58  }
 0xd31   : > { %3070 = vperm.xlu0 %6330, %v3061_v60  }
 0xd50   : > { %v3010_v62 = vpop.permute.xlu2 %3009 }
 0xd62   : > { %v6820_v63 = vpop.permute.xlu2 %6819 }
 0xd63   : > { %v6821_v11 = vunpack.i.l.bf16 %v6820_v63  ;;  %v6822_v13 = vunpack.i.h.bf16 %v6820_v63 }
 0xd68   : > { %v3019_v61 = vpop.permute.xlu0 %3018 }
 0xd69   : > { %3087 = vmatpush.msra.mxu2 %v3019_v61 }
 0xd6a   : > { %v6830_v8 = vpop.permute.xlu2 %6829 }
 0xd6b   : > { %v6831_v17 = vunpack.i.l.bf16 %v6830_v8  ;;  %v6832_v59 = vunpack.i.h.bf16 %v6830_v8 }
 0xd72   : > { %v6835_v20 = vpop.permute.xlu2 %6834 }
 0xd73   : > { %v6836_v12 = vunpack.i.l.bf16 %v6835_v20  ;;  %v6837_v5 = vunpack.i.h.bf16 %v6835_v20 }
 0xd7a   : > { %v6810_v0 = vpop.permute.xlu1 %6809  ;;  %v3028_v28 = vpop.permute.xlu2 %3027 }
 0xd7b   : > { %v6811_v1 = vunpack.i.l.bf16 %v6810_v0  ;;  %v6815_v3 = vpop.permute.xlu0 %6814  ;;  %v6812_v4 = vunpack.i.h.bf16 %v6810_v0 }
 0xd7c   : > { %v6816_v6 = vunpack.i.l.bf16 %v6815_v3  ;;  %v6817_v9 = vunpack.i.h.bf16 %v6815_v3 }
 0xd7d   : > { %3088 = vmatpush.msra.mxu2 %v6811_v1 }
 0xd7f   : > { %3089 = vmatpush.msra.mxu2 %v6812_v4  ;;  %v3242_v4 = vld [vmem:[%s9746_s2 + $0x8] sm:$0xff] }
 0xd81   : > { %3090 = vmatpush.msra.mxu2 %v3010_v62 }
 0xd82   : > { %v3001_v7 = vpop.permute.xlu1 %3000 }
 0xd83   : > { %v2992_v2 = vpop.permute.xlu0 %2991  ;;  %3091 = vmatpush.msra.mxu2 %v6816_v6  ;;  %v3241_v6 = vld [vmem:[%s9746_s2] sm:$0xff] }
 0xd85   : > { %3092 = vmatpush.msra.mxu2 %v6817_v9 }
 0xd87   : > { %3093 = vmatpush.msra.mxu2 %v3001_v7  ;;  %v3243_v7 = vld [vmem:[%s9746_s2 + $0x10] sm:$0xff]  ;;  %s7824_s2 = smov 63  }
 0xd89   : > { %3094 = vmatpush.msra.mxu2 %v6821_v11 }
 0xd8a   : > { %v6825_v14 = vpop.permute.xlu1 %6824 }
 0xd8b   : > { %v6826_v21 = vunpack.i.l.bf16 %v6825_v14  ;;  %v3046_v22 = vpop.permute.xlu0 %3045  ;;  %3095 = vmatpush.msra.mxu2 %v6822_v13  ;;  %v6827_v18 = vunpack.i.h.bf16 %v6825_v14 }
 0xd8d   : > { %3096 = vmatpush.msra.mxu2 %v2992_v2  ;;  %3118 = vmatpush.msrb.mxu0 %v6826_v21 }
 0xd8f   : > { %3097 = vmatpush.msra.mxu2 %v6831_v17  ;;  %3119 = vmatpush.msrb.mxu0 %v6827_v18 }
 0xd91   : > { %3098 = vmatpush.msra.mxu2 %v6832_v59  ;;  %3120 = vmatpush.msrb.mxu0 %v3046_v22 }
 0xd92   : > { %v2983_v16 = vpop.permute.xlu1 %2982 }
 0xd93   : > { %3099 = vmatpush.msra.mxu2 %v2983_v16  ;;  %3121 = vmatpush.msrb.mxu0 %v6836_v12  ;;  %v3037_v23 = vpop.permute.xlu0 %3036 }
 0xd95   : > { %5955 = vmatpush.msk.msra.mxu2 %vm2644_vm12, %v8840_v37  ;;  %3122 = vmatpush.msrb.mxu0 %v6837_v5 }
 0xd97   : > { %5956 = vmatpush.msk.msra.mxu2 %vm2644_vm12, %v8837_v29  ;;  %3123 = vmatpush.msrb.mxu0 %v3037_v23  ;;  %v3076_v29 = vpop.permute.xlu2 %3075 }
 0xd99   : > { %5957 = vmatpush.msk.msra.mxu2 %vm2644_vm12, %v8830_v53 }
 0xd9a   : > { %v6840_v10 = vpop.permute.xlu1 %6839  ;;  %3103 = vmatmul.f32.vlgmr.msra.gmra.mxu2 %v3054_v24 }
 0xd9b   : > { %v6841_v19 = vunpack.i.l.bf16 %v6840_v10  ;;  %v6842_v26 = vunpack.i.h.bf16 %v6840_v10  ;;  %v6845_v15 = vpop.permute.xlu0 %6844 }
 0xd9c   : > { %v6846_v34 = vunpack.i.l.bf16 %v6845_v15  ;;  %v6847_v39 = vunpack.i.h.bf16 %v6845_v15 }
 0xd9d   : > { %3124 = vmatpush.msrb.mxu0 %v6841_v19 }
 0xd9f   : > { %3125 = vmatpush.msrb.mxu0 %v6842_v26 }
 0xda1   : > { %3126 = vmatpush.msrb.mxu0 %v3028_v28 }
 0xda2   : > { %3106 = vmatmul.f32.gmra.mxu2 %v3056_v27  ;;  %v3066_v48 = vpop.permute.xlu1 %3065 }
 0xda3   : > { %3127 = vmatpush.msrb.mxu0 %v6846_v34  ;;  %v3071_v51 = vpop.permute.xlu0 %3070 }
 0xda5   : > { %3128 = vmatpush.msrb.mxu0 %v6847_v39 }
 0xda6   : > { %5958 = vmatmul.msk.f32.vlgmr.msrb.gmra.mxu0 %vm2899_vm13, %v3055_v35  ;;  %v3235_v35 = vld [vmem:[#allocation7] sm:$0xff] }
 0xdaa   : > { %3109 = vmatmul.f32.gmra.mxu2 %v3058_v42 }
 0xdae   : > { %5959 = vmatmul.msk.f32.gmra.mxu0 %vm2899_vm13, %v3057_v43 }
 0xdb6   : > { %5960 = vmatmul.msk.f32.gmra.mxu0 %vm2899_vm13, %v3059_v45 }
 0xe1d   : > { %v3104_v46 = vpop.f32.mrf.mxu2 }
 0xe1e   : > { %v3105_v31 = vadd.f32 %v3104_v46, %v3066_v48  ;;  %v3237_v48 = vld [vmem:[#allocation7 + $0x10] sm:$0xff] }
 0xe23   : > { %v3130_v49 = vpop.f32.mrf.mxu0 }
 0xe24   : > { %v3131_v50 = vadd.f32 %v3130_v49, %v3105_v31 }
 0xe25   : > { %v3107_v36 = vpop.f32.mrf.mxu2 }
 0xe26   : > { %v3139_v44 = vmax.f32 %v3131_v50, 0.0  ;;  %v3108_v41 = vadd.f32 %v3107_v36, %v3071_v51  ;;  %v3236_v36 = vld [vmem:[#allocation7 + $0x8] sm:$0xff]  ;;  %v3238_v51 = vld [vmem:[#allocation7 + $0x18] sm:$0xff] }
 0xe28   : > { %3145 = vrot.lane.b32.xlu1 %v3139_v44, %s9736_s15  ;;  %v3239_v44 = vld [vmem:[#allocation7 + $0x20] sm:$0xff] }
 0xe2b   : > { %v3133_v33 = vpop.f32.mrf.mxu0 }
 0xe2c   : > { %v3134_v53 = vadd.f32 %v3133_v33, %v3108_v41  ;;  %v3240_v41 = vld [vmem:[#allocation7 + $0x28] sm:$0xff] }
 0xe2d   : > { %v3110_v40 = vpop.f32.mrf.mxu2 }
 0xe2e   : > { %v3140_v55 = vmax.f32 %v3134_v53, 0.0  ;;  %v3111_v56 = vadd.f32 %v3110_v40, %v3076_v29 }
 0xe30   : > { %3147 = vrot.lane.b32.xlu0 %v3140_v55, %s9736_s15 }
 0xe33   : > { %v3136_v37 = vpop.f32.mrf.mxu0 }
 0xe34   : > { %v3137_v32 = vadd.f32 %v3136_v37, %v3111_v56 }
 0xe36   : > { %v3141_v57 = vmax.f32 %v3137_v32, 0.0 }
 0xe38   : > { %3149 = vrot.lane.b32.xlu2 %v3141_v57, %s9736_s15 }
 0xe92   : > { %v3150_v60 = vpop.permute.xlu2 %3149 }
 0xe93   : > { %v8883_v61 = vsel %vm1421_vm0, 0.0, %v3150_v60 }
 0xe94   : > { %v3159_v0 = vsel %vm2644_vm12, %v8883_v61, 0.0 }
 0xe9a   : > { %v3146_v30 = vpop.permute.xlu1 %3145 }
 0xe9b   : > { %v8876_v54 = vsel %vm1421_vm0, 0.0, %v3146_v30 }
 0xe9c   : > { %v3157_v58 = vsel %vm2644_vm12, %v8876_v54, 0.0 }
 0xe9d   : > { %3190 = vrot.lane.b32.xlu0 %v3157_v58, %s9743_s22  ;;  %3199 = vrot.lane.b32.xlu1 %v3157_v58, %s9742_s7 }
 0xea2   : > { %v3148_v62 = vpop.permute.xlu0 %3147 }
 0xea3   : > { %v8886_v63 = vsel %vm1421_vm0, 0.0, %v3148_v62 }
 0xea4   : > { %v3158_v1 = vsel %vm2644_vm12, %v8886_v63, 0.0 }
 0xea5   : > { %v6848_v3 = vpack.i.bf16 %v3158_v1, %v3159_v0 }
 0xea7   : > { %6849 = vrot.lane.b32.xlu2 %v6848_v3, %s9743_s22  ;;  %6859 = vrot.lane.b32.xlu0 %v6848_v3, %s9747_s5 }
 0xea8   : > { %6854 = vrot.lane.b32.xlu1 %v6848_v3, %s9745_s1 }
 0xeaf   : > { %3181 = vrot.lane.b32.xlu2 %v3157_v58, %s9745_s1  ;;  %6869 = vrot.lane.b32.xlu0 %v6848_v3, %s9741_s4 }
 0xeb0   : > { %3172 = vrot.lane.b32.xlu1 %v3157_v58, %s9747_s5 }
 0xeb7   : > { %6864 = vrot.lane.b32.xlu2 %v6848_v3, %s9733_s16  ;;  %6874 = vrot.lane.b32.xlu0 %v6848_v3, %s9740_s3 }
 0xeb8   : > { %3226 = vrot.lane.b32.xlu1 %v3157_v58, %s9733_s16 }
 0xebf   : > { %3163 = vrot.lane.b32.xlu2 %v3157_v58, %s9741_s4  ;;  %3208 = vrot.lane.b32.xlu0 %v3157_v58, %s9739_s18 }
 0xec0   : > { %3217 = vrot.lane.b32.xlu1 %v3157_v58, %s9740_s3 }
 0xec7   : > { %6879 = vrot.lane.b32.xlu2 %v6848_v3, %s9739_s18  ;;  %3251 = vperm.xlu0 %6330, %v3242_v4  }
 0xec8   : > { %6884 = vrot.lane.b32.xlu1 %v6848_v3, %s9742_s7 }
 0xecf   : > { %3246 = vperm.xlu2 %6582, %v3241_v6  }
 0xed0   : > { %3256 = vperm.xlu1 %6331, %v3243_v7  }
 0xf01   : > { %v6850_v9 = vpop.permute.xlu2 %6849 }
 0xf02   : > { %v6851_v11 = vunpack.i.l.bf16 %v6850_v9  ;;  %v6852_v21 = vunpack.i.h.bf16 %v6850_v9 }
 0xf09   : > { %v3182_v2 = vpop.permute.xlu2 %3181 }
 0xf0f   : > { %v3200_v8 = vpop.permute.xlu1 %3199  ;;  %v3191_v13 = vpop.permute.xlu0 %3190 }
 0xf10   : > { %3268 = vmatpush.msra.mxu3 %v3200_v8 }
 0xf11   : > { %v6865_v14 = vpop.permute.xlu2 %6864 }
 0xf12   : > { %v6866_v22 = vunpack.i.l.bf16 %v6865_v14  ;;  %3269 = vmatpush.msra.mxu3 %v6851_v11  ;;  %v6867_v17 = vunpack.i.h.bf16 %v6865_v14 }
 0xf14   : > { %3270 = vmatpush.msra.mxu3 %v6852_v21  ;;  %3299 = vmatpush.msrb.mxu1 %v6866_v22 }
 0xf16   : > { %3271 = vmatpush.msra.mxu3 %v3191_v13  ;;  %3300 = vmatpush.msrb.mxu1 %v6867_v17  ;;  %v3389_v17 = vld [vmem:[%s9748_s6 + $0x38] sm:$0xff] }
 0xf17   : > { %3408 = vmatpush.msra.mxu0 %v3389_v17 }
 0xf19   : > { %v6860_v18 = vpop.permute.xlu0 %6859  ;;  %v3164_v10 = vpop.permute.xlu2 %3163 }
 0xf1a   : > { %v6855_v20 = vpop.permute.xlu1 %6854  ;;  %v6861_v16 = vunpack.i.l.bf16 %v6860_v18  ;;  %v6862_v24 = vunpack.i.h.bf16 %v6860_v18  ;;  %v3388_v18 = vld [vmem:[%s9748_s6 + $0x30] sm:$0xff] }
 0xf1b   : > { %v6856_v59 = vunpack.i.l.bf16 %v6855_v20  ;;  %v6857_v12 = vunpack.i.h.bf16 %v6855_v20  ;;  %v3387_v20 = vld [vmem:[%s9748_s6 + $0x28] sm:$0xff]  ;;  %3409 = vmatpush.msra.mxu0 %v3388_v18 }
 0xf1d   : > { %3272 = vmatpush.msra.mxu3 %v6856_v59  ;;  %v3386_v59 = vld [vmem:[%s9748_s6 + $0x20] sm:$0xff]  ;;  %3410 = vmatpush.msra.mxu0 %v3387_v20 }
 0xf1f   : > { %3273 = vmatpush.msra.mxu3 %v6857_v12  ;;  %v3385_v12 = vld [vmem:[%s9748_s6 + $0x18] sm:$0xff]  ;;  %3411 = vmatpush.msra.mxu0 %v3386_v59 }
 0xf21   : > { %3274 = vmatpush.msra.mxu3 %v3182_v2  ;;  %v6870_v5 = vpop.permute.xlu0 %6869  ;;  %v6880_v39 = vpop.permute.xlu2 %6879  ;;  %3412 = vmatpush.msra.mxu0 %v3385_v12 }
 0xf22   : > { %v3173_v23 = vpop.permute.xlu1 %3172  ;;  %v6871_v19 = vunpack.i.l.bf16 %v6870_v5  ;;  %v6872_v26 = vunpack.i.h.bf16 %v6870_v5  ;;  %v6881_v43 = vunpack.i.l.bf16 %v6880_v39  ;;  %v6882_v45 = vunpack.i.h.bf16 %v6880_v39  ;;  %v3383_v5 = vld [vmem:[%s9748_s6 + $0x8] sm:$0xff] }
 0xf23   : > { %3275 = vmatpush.msra.mxu3 %v6861_v16  ;;  %v3384_v16 = vld [vmem:[%s9748_s6 + $0x10] sm:$0xff] }
 0xf24   : > { %3413 = vmatpush.msra.mxu0 %v3384_v16 }
 0xf25   : > { %3276 = vmatpush.msra.mxu3 %v6862_v24 }
 0xf26   : > { %3414 = vmatpush.msra.mxu0 %v3383_v5 }
 0xf27   : > { %3277 = vmatpush.msra.mxu3 %v3173_v23  ;;  %v3382_v23 = vld [vmem:[%s9748_s6] sm:$0xff] }
 0xf28   : > { %3415 = vmatpush.msra.mxu0 %v3382_v23 }
 0xf29   : > { %3278 = vmatpush.msra.mxu3 %v6871_v19  ;;  %v6875_v15 = vpop.permute.xlu0 %6874  ;;  %v3247_v53 = vpop.permute.xlu2 %3246 }
 0xf2a   : > { %v6876_v27 = vunpack.i.l.bf16 %v6875_v15  ;;  %v3227_v28 = vpop.permute.xlu1 %3226  ;;  %v6877_v34 = vunpack.i.h.bf16 %v6875_v15 }
 0xf2b   : > { %3279 = vmatpush.msra.mxu3 %v6872_v26  ;;  %3301 = vmatpush.msrb.mxu1 %v3227_v28 }
 0xf2d   : > { %3280 = vmatpush.msra.mxu3 %v3164_v10  ;;  %3302 = vmatpush.msrb.mxu1 %v6876_v27 }
 0xf2f   : > { %5961 = vmatpush.msk.msra.mxu3 %vm2644_vm12, %v8883_v61  ;;  %3303 = vmatpush.msrb.mxu1 %v6877_v34 }
 0xf31   : > { %5962 = vmatpush.msk.msra.mxu3 %vm2644_vm12, %v8886_v63  ;;  %v3209_v46 = vpop.permute.xlu0 %3208 }
 0xf32   : > { %v3218_v42 = vpop.permute.xlu1 %3217 }
 0xf33   : > { %5963 = vmatpush.msk.msra.mxu3 %vm2644_vm12, %v8876_v54  ;;  %3304 = vmatpush.msrb.mxu1 %v3218_v42 }
 0xf34   : > { %3284 = vmatmul.f32.vlgmr.msra.gmra.mxu3 %v3235_v35 }
 0xf35   : > { %3305 = vmatpush.msrb.mxu1 %v6881_v43 }
 0xf37   : > { %3306 = vmatpush.msrb.mxu1 %v6882_v45 }
 0xf39   : > { %3307 = vmatpush.msrb.mxu1 %v3209_v46  ;;  %v3252_v57 = vpop.permute.xlu0 %3251 }
 0xf3a   : > { %v6885_v31 = vpop.permute.xlu1 %6884 }
 0xf3b   : > { %v6886_v49 = vunpack.i.l.bf16 %v6885_v31  ;;  %v6887_v50 = vunpack.i.h.bf16 %v6885_v31 }
 0xf3c   : > { %3287 = vmatmul.f32.gmra.mxu3 %v3237_v48 }
 0xf3d   : > { %3308 = vmatpush.msrb.mxu1 %v6886_v49 }
 0xf3f   : > { %3309 = vmatpush.msrb.mxu1 %v6887_v50 }
 0xf40   : > { %5964 = vmatmul.msk.f32.vlgmr.msrb.gmra.mxu1 %vm2899_vm13, %v3236_v36 }
 0xf42   : > { %v3257_v63 = vpop.permute.xlu1 %3256 }
 0xf44   : > { %3290 = vmatmul.f32.gmra.mxu3 %v3239_v44 }
 0xf48   : > { %5965 = vmatmul.msk.f32.gmra.mxu1 %vm2899_vm13, %v3238_v51 }
 0xf50   : > { %5966 = vmatmul.msk.f32.gmra.mxu1 %vm2899_vm13, %v3240_v41 }
 0xfb7   : > { %v3285_v33 = vpop.f32.mrf.mxu3 }
 0xfb8   : > { %v3286_v55 = vadd.f32 %v3285_v33, %v3247_v53 }
 0xfbd   : > { %v3311_v40 = vpop.f32.mrf.mxu1 }
 0xfbe   : > { %v3312_v29 = vadd.f32 %v3311_v40, %v3286_v55 }
 0xfbf   : > { %v3288_v56 = vpop.f32.mrf.mxu3 }
 0xfc0   : > { %v3320_v37 = vmax.f32 %v3312_v29, 0.0  ;;  %v3289_v30 = vadd.f32 %v3288_v56, %v3252_v57 }
 0xfc2   : > { %v3323_v32 = vadd.f32 %v3320_v37, %v8817_v47 }
 0xfc4   : > { %3338 = vrot.lane.b32.xlu0 %v3323_v32, %s7824_s2  ;;  %3329 = vrot.lane.b32.xlu2 %v3323_v32, %s9741_s4 }
 0xfc5   : > { %v3314_v54 = vpop.f32.mrf.mxu1 }
 0xfc6   : > { %v3315_v58 = vadd.f32 %v3314_v54, %v3289_v30 }
 0xfc7   : > { %v3291_v61 = vpop.f32.mrf.mxu3 }
 0xfc8   : > { %v3321_v60 = vmax.f32 %v3315_v58, 0.0  ;;  %v3292_v0 = vadd.f32 %v3291_v61, %v3257_v63 }
 0xfca   : > { %v3324_v62 = vadd.f32 %v3321_v60, %v8821_v25 }
 0xfcc   : > { %3331 = vrot.lane.b32.xlu1 %v3324_v62, %s9741_s4  ;;  %3340 = vrot.lane.b32.xlu2 %v3324_v62, %s7824_s2 }
 0xfcd   : > { %v3317_v1 = vpop.f32.mrf.mxu1 }
 0xfce   : > { %v3318_v3 = vadd.f32 %v3317_v1, %v3292_v0 }
 0xfd0   : > { %v3322_v47 = vmax.f32 %v3318_v3, 0.0 }
 0xfd2   : > { %v3325_v4 = vadd.f32 %v3322_v47, %v8825_v52 }
 0xfd4   : > { %3342 = vrot.lane.b32.xlu1 %v3325_v4, %s7824_s2  ;;  %3333 = vrot.lane.b32.xlu0 %v3325_v4, %s9741_s4  ;;  %s9750_s2 = sld [smem:[#allocation35_spill]] }
 0xfda   : > { %v3522_v12 = vld [vmem:[%s9750_s2 + $0x10] sm:$0xff] }
0x101e   : > { %v3330_v6 = vpop.permute.xlu2 %3329 }
0x1026   : > { %v3341_v25 = vpop.permute.xlu2 %3340 }
0x1036   : > { %v3339_v7 = vpop.permute.xlu0 %3338 }
0x1037   : > { %v3348_v9 = vsel %vm3347_vm14, %v3330_v6, %v3339_v7 }
0x1038   : > { %v3351_v2 = vmax.f32 %v3323_v32, %v3348_v9 }
0x103a   : > { %3366 = vrot.lane.b32.xlu0 %v3351_v2, %s7825_s9  ;;  %3357 = vrot.lane.b32.xlu2 %v3351_v2, %s9747_s5 }
0x103e   : > { %v3332_v8 = vpop.permute.xlu1 %3331 }
0x103f   : > { %v3349_v11 = vsel %vm3347_vm14, %v3332_v8, %v3341_v25 }
0x1040   : > { %v3352_v52 = vmax.f32 %v3324_v62, %v3349_v11 }
0x1042   : > { %3368 = vrot.lane.b32.xlu2 %v3352_v52, %s7825_s9  ;;  %3359 = vrot.lane.b32.xlu1 %v3352_v52, %s9747_s5 }
0x1046   : > { %v3343_v13 = vpop.permute.xlu1 %3342  ;;  %v3334_v14 = vpop.permute.xlu0 %3333 }
0x1047   : > { %v3350_v21 = vsel %vm3347_vm14, %v3334_v14, %v3343_v13 }
0x1048   : > { %v3353_v22 = vmax.f32 %v3325_v4, %v3350_v21 }
0x104a   : > { %3361 = vrot.lane.b32.xlu0 %v3353_v22, %s9747_s5  ;;  %3370 = vrot.lane.b32.xlu1 %v3353_v22, %s7825_s9  ;;  %s9749_s9 = sld [smem:[#allocation36_spill]] }
0x1050   : > { %v3530_v40 = vld [vmem:[%s9749_s9 + $0x10] sm:$0xff]  ;;  %v3531_v29 = vld [vmem:[%s9749_s9 + $0x18] sm:$0xff]  ;;  %v3529_v56 = vld [vmem:[%s9749_s9 + $0x8] sm:$0xff] }
0x1051   : > { %v3528_v37 = vld [vmem:[%s9749_s9] sm:$0xff] }
0x1094   : > { %v3358_v24 = vpop.permute.xlu2 %3357 }
0x109c   : > { %v3369_v15 = vpop.permute.xlu2 %3368 }
0x10ac   : > { %v3367_v10 = vpop.permute.xlu0 %3366 }
0x10ad   : > { %v3376_v19 = vsel %vm3375_vm15, %v3358_v24, %v3367_v10  ;;  %v3521_v24 = vld [vmem:[%s9750_s2 + $0x8] sm:$0xff]  ;;  %v3524_v10 = vld [vmem:[%s9750_s2 + $0x20] sm:$0xff] }
0x10ae   : > { %v3379_v26 = vmax.f32 %v3351_v2, %v3376_v19  ;;  %v3523_v19 = vld [vmem:[%s9750_s2 + $0x18] sm:$0xff] }
0x10b0   : > { %5967 = vmatmul.msk.f32.vlgmr.msra.gmra.mxu0 %vm3390_vm1, %v3379_v26  ;;  %v3526_v26 = vld [vmem:[%s9750_s2 + $0x30] sm:$0xff] }
0x10b4   : > { %v3360_v27 = vpop.permute.xlu1 %3359 }
0x10b5   : > { %v3377_v28 = vsel %vm3375_vm15, %v3360_v27, %v3369_v15  ;;  %v3525_v15 = vld [vmem:[%s9750_s2 + $0x28] sm:$0xff]  ;;  %v3527_v27 = vld [vmem:[%s9750_s2 + $0x38] sm:$0xff] }
0x10b6   : > { %v3380_v34 = vmax.f32 %v3352_v52, %v3377_v28 }
0x10b8   : > { %5968 = vmatmul.msk.f32.gmra.mxu0 %vm3390_vm1, %v3380_v34 }
0x10bc   : > { %v3362_v39 = vpop.permute.xlu0 %3361  ;;  %v3371_v35 = vpop.permute.xlu1 %3370 }
0x10bd   : > { %v3378_v42 = vsel %vm3375_vm15, %v3362_v39, %v3371_v35 }
0x10be   : > { %v3381_v43 = vmax.f32 %v3353_v22, %v3378_v42  ;;  %v3520_v22 = vld [vmem:[%s9750_s2] sm:$0xff]  ;;  %s9751_s2 = sld [smem:[#allocation38_spill]] }
0x10c0   : > { %5969 = vmatmul.msk.f32.gmra.mxu0 %vm3390_vm1, %v3381_v43 }
0x112d   : > { %v3417_v45 = vpop.f32.mrf.mxu0 }
0x112e   : > { %3429 = vrot.lane.b32.xlu2 %v3417_v45, %s9736_s15 }
0x1135   : > { %v3420_v46 = vpop.f32.mrf.mxu0 }
0x1136   : > { %3431 = vrot.lane.b32.xlu1 %v3420_v46, %s9736_s15 }
0x113d   : > { %v3423_v48 = vpop.f32.mrf.mxu0 }
0x113e   : > { %3433 = vrot.lane.b32.xlu0 %v3423_v48, %s9736_s15 }
0x1188   : > { %v3430_v31 = vpop.permute.xlu2 %3429 }
0x1189   : > { %v8939_v49 = vsel %vm1421_vm0, 0.0, %v3430_v31 }
0x118a   : > { %v3442_v50 = vsel %vm3441_vm2, %v8939_v49, 0.0 }
0x118b   : > { %3475 = vrot.lane.b32.xlu1 %v3442_v50, %s9743_s22  ;;  %3484 = vrot.lane.b32.xlu2 %v3442_v50, %s9742_s7 }
0x11a8   : > { %v3432_v36 = vpop.permute.xlu1 %3431 }
0x11a9   : > { %v8946_v44 = vsel %vm1421_vm0, 0.0, %v3432_v36 }
0x11aa   : > { %v3443_v33 = vsel %vm3441_vm2, %v8946_v44, 0.0 }
0x11b0   : > { %v3434_v51 = vpop.permute.xlu0 %3433 }
0x11b1   : > { %v8949_v41 = vsel %vm1421_vm0, 0.0, %v3434_v51 }
0x11b2   : > { %v3444_v53 = vsel %vm3441_vm2, %v8949_v41, 0.0 }
0x11b3   : > { %v6888_v55 = vpack.i.bf16 %v3443_v33, %v3444_v53 }
0x11b5   : > { %6889 = vrot.lane.b32.xlu0 %v6888_v55, %s9743_s22  ;;  %6899 = vrot.lane.b32.xlu1 %v6888_v55, %s9747_s5 }
0x11b6   : > { %6894 = vrot.lane.b32.xlu2 %v6888_v55, %s9745_s1 }
0x11bd   : > { %3466 = vrot.lane.b32.xlu0 %v3442_v50, %s9745_s1  ;;  %6909 = vrot.lane.b32.xlu1 %v6888_v55, %s9741_s4 }
0x11be   : > { %3457 = vrot.lane.b32.xlu2 %v3442_v50, %s9747_s5 }
0x11c5   : > { %6904 = vrot.lane.b32.xlu0 %v6888_v55, %s9733_s16  ;;  %6914 = vrot.lane.b32.xlu1 %v6888_v55, %s9740_s3 }
0x11c6   : > { %3511 = vrot.lane.b32.xlu2 %v3442_v50, %s9733_s16 }
0x11cd   : > { %3448 = vrot.lane.b32.xlu0 %v3442_v50, %s9741_s4  ;;  %3493 = vrot.lane.b32.xlu1 %v3442_v50, %s9739_s18 }
0x11ce   : > { %3502 = vrot.lane.b32.xlu2 %v3442_v50, %s9740_s3 }
0x11d5   : > { %6919 = vrot.lane.b32.xlu0 %v6888_v55, %s9739_s18  ;;  %3544 = vperm.xlu1 %6331, %v3530_v40  }
0x11d6   : > { %6924 = vrot.lane.b32.xlu2 %v6888_v55, %s9742_s7 }
0x11dd   : > { %3549 = vperm.xlu0 %6330, %v3531_v29  }
0x11de   : > { %3539 = vperm.xlu2 %6582, %v3529_v56  }
0x11e5   : > { %3534 = vperm.xlu0 %6330, %v3528_v37   ;;  %v3485_v32 = vpop.permute.xlu2 %3484 }
0x11e6   : > { %3564 = vmatpush.msrb.mxu2 %v3485_v32 }
0x11fd   : > { %v3476_v57 = vpop.permute.xlu1 %3475 }
0x1210   : > { %v6895_v30 = vpop.permute.xlu2 %6894 }
0x1211   : > { %v6896_v63 = vunpack.i.l.bf16 %v6895_v30  ;;  %v6897_v1 = vunpack.i.h.bf16 %v6895_v30 }
0x1218   : > { %v3458_v62 = vpop.permute.xlu2 %3457 }
0x1220   : > { %v3512_v6 = vpop.permute.xlu2 %3511 }
0x1227   : > { %v6890_v54 = vpop.permute.xlu0 %6889  ;;  %v6900_v58 = vpop.permute.xlu1 %6899 }
0x1228   : > { %v6891_v60 = vunpack.i.l.bf16 %v6890_v54  ;;  %v6892_v61 = vunpack.i.h.bf16 %v6890_v54  ;;  %v6901_v47 = vunpack.i.l.bf16 %v6900_v58  ;;  %v6902_v4 = vunpack.i.h.bf16 %v6900_v58  ;;  %v3503_v21 = vpop.permute.xlu2 %3502 }
0x122a   : > { %3565 = vmatpush.msrb.mxu2 %v6891_v60 }
0x122c   : > { %3566 = vmatpush.msrb.mxu2 %v6892_v61 }
0x122e   : > { %3567 = vmatpush.msrb.mxu2 %v3476_v57 }
0x122f   : > { %v3467_v0 = vpop.permute.xlu0 %3466  ;;  %v6910_v3 = vpop.permute.xlu1 %6909 }
0x1230   : > { %3568 = vmatpush.msrb.mxu2 %v6896_v63  ;;  %v6911_v2 = vunpack.i.l.bf16 %v6910_v3  ;;  %v6912_v11 = vunpack.i.h.bf16 %v6910_v3  ;;  %v6925_v59 = vpop.permute.xlu2 %6924  ;;  %v3759_v3 = vld [vmem:[%s9751_s2 + $0x8] sm:$0xff] }
0x1231   : > { %v6926_v5 = vunpack.i.l.bf16 %v6925_v59  ;;  %v6927_v23 = vunpack.i.h.bf16 %v6925_v59 }
0x1232   : > { %3569 = vmatpush.msrb.mxu2 %v6897_v1 }
0x1234   : > { %3570 = vmatpush.msrb.mxu2 %v3467_v0 }
0x1236   : > { %3571 = vmatpush.msrb.mxu2 %v6901_v47  ;;  %v3760_v47 = vld [vmem:[%s9751_s2 + $0x10] sm:$0xff] }
0x1237   : > { %v6905_v7 = vpop.permute.xlu0 %6904  ;;  %v6915_v8 = vpop.permute.xlu1 %6914 }
0x1238   : > { %v6906_v9 = vunpack.i.l.bf16 %v6905_v7  ;;  %3572 = vmatpush.msrb.mxu2 %v6902_v4  ;;  %v6907_v25 = vunpack.i.h.bf16 %v6905_v7  ;;  %v6916_v52 = vunpack.i.l.bf16 %v6915_v8  ;;  %v6917_v14 = vunpack.i.h.bf16 %v6915_v8  ;;  %v3540_v35 = vpop.permute.xlu2 %3539  ;;  %v3761_v4 = vld [vmem:[%s9751_s2 + $0x18] sm:$0xff] }
0x123a   : > { %3573 = vmatpush.msrb.mxu2 %v3458_v62  ;;  %3598 = vmatpush.msra.mxu1 %v6906_v9 }
0x123c   : > { %3574 = vmatpush.msrb.mxu2 %v6911_v2  ;;  %3599 = vmatpush.msra.mxu1 %v6907_v25 }
0x123e   : > { %3575 = vmatpush.msrb.mxu2 %v6912_v11  ;;  %3600 = vmatpush.msra.mxu1 %v3512_v6  ;;  %v3758_v6 = vld [vmem:[%s9751_s2] sm:$0xff]  ;;  %s9752_s2 = sld [smem:[#allocation37_spill]] }
0x123f   : > { %v3449_v13 = vpop.permute.xlu0 %3448  ;;  %v3494_v16 = vpop.permute.xlu1 %3493 }
0x1240   : > { %3576 = vmatpush.msrb.mxu2 %v3449_v13  ;;  %3601 = vmatpush.msra.mxu1 %v6916_v52 }
0x1242   : > { %5970 = vmatpush.msk.msrb.mxu2 %vm3441_vm2, %v8949_v41  ;;  %3602 = vmatpush.msra.mxu1 %v6917_v14 }
0x1244   : > { %5971 = vmatpush.msk.msrb.mxu2 %vm3441_vm2, %v8946_v44  ;;  %3603 = vmatpush.msra.mxu1 %v3503_v21 }
0x1246   : > { %5972 = vmatpush.msk.msrb.mxu2 %vm3441_vm2, %v8939_v49 }
0x1247   : > { %v6920_v17 = vpop.permute.xlu0 %6919  ;;  %3580 = vmatmul.f32.vlgmr.msrb.gmra.mxu2 %v3520_v22  ;;  %v3545_v48 = vpop.permute.xlu1 %3544 }
0x1248   : > { %v6921_v18 = vunpack.i.l.bf16 %v6920_v17  ;;  %v6922_v20 = vunpack.i.h.bf16 %v6920_v17 }
0x124a   : > { %3604 = vmatpush.msra.mxu1 %v6921_v18 }
0x124c   : > { %3605 = vmatpush.msra.mxu1 %v6922_v20 }
0x124e   : > { %3606 = vmatpush.msra.mxu1 %v3494_v16 }
0x124f   : > { %3583 = vmatmul.f32.gmra.mxu2 %v3522_v12  ;;  %v3550_v36 = vpop.permute.xlu0 %3549 }
0x1250   : > { %3607 = vmatpush.msra.mxu1 %v6926_v5 }
0x1252   : > { %3608 = vmatpush.msra.mxu1 %v6927_v23 }
0x1253   : > { %5973 = vmatmul.msk.f32.vlgmr.msra.gmra.mxu1 %vm2899_vm13, %v3521_v24 }
0x1257   : > { %3586 = vmatmul.f32.gmra.mxu2 %v3524_v10  ;;  %v3535_v53 = vpop.permute.xlu0 %3534 }
0x125b   : > { %5974 = vmatmul.msk.f32.gmra.mxu1 %vm2899_vm13, %v3523_v19 }
0x125f   : > { %3589 = vmatmul.f32.gmra.mxu2 %v3526_v26 }
0x1263   : > { %5975 = vmatmul.msk.f32.gmra.mxu1 %vm2899_vm13, %v3525_v15 }
0x126b   : > { %5976 = vmatmul.msk.f32.gmra.mxu1 %vm2899_vm13, %v3527_v27 }
0x12ca   : > { %v3581_v28 = vpop.f32.mrf.mxu2 }
0x12cb   : > { %v3582_v55 = vadd.f32 %v3581_v28, %v3535_v53 }
0x12d0   : > { %v3610_v34 = vpop.f32.mrf.mxu1 }
0x12d1   : > { %v3611_v40 = vadd.f32 %v3610_v34, %v3582_v55 }
0x12d2   : > { %v3584_v39 = vpop.f32.mrf.mxu2 }
0x12d3   : > { %v3585_v42 = vadd.f32 %v3584_v39, %v3540_v35 }
0x12d8   : > { %v3613_v43 = vpop.f32.mrf.mxu1 }
0x12d9   : > { %v3614_v45 = vadd.f32 %v3613_v43, %v3585_v42 }
0x12da   : > { %v3587_v46 = vpop.f32.mrf.mxu2 }
0x12db   : > { %3628 = vrot.lane.b32.xlu0 %v3614_v45, %s9736_s15  ;;  %v3588_v31 = vadd.f32 %v3587_v46, %v3545_v48 }
0x12e0   : > { %v3616_v49 = vpop.f32.mrf.mxu1 }
0x12e1   : > { %v3617_v50 = vadd.f32 %v3616_v49, %v3588_v31 }
0x12e2   : > { %v3590_v44 = vpop.f32.mrf.mxu2 }
0x12e3   : > { %3630 = vrot.lane.b32.xlu2 %v3617_v50, %s9736_s15  ;;  %v3591_v51 = vadd.f32 %v3590_v44, %v3550_v36  ;;  %v3746_v44 = vld [vmem:[%s9752_s2] sm:$0xff] }
0x12e8   : > { %v3619_v41 = vpop.f32.mrf.mxu1 }
0x12e9   : > { %v3620_v33 = vadd.f32 %v3619_v41, %v3591_v51 }
0x12eb   : > { %3632 = vrot.lane.b32.xlu1 %v3620_v33, %s9736_s15 }
0x12f3   : > { %3626 = vrot.lane.b32.xlu1 %v3611_v40, %s9736_s15 }
0x133d   : > { %v3631_v29 = vpop.permute.xlu2 %3630 }
0x133e   : > { %v8996_v56 = vsel %vm1421_vm0, 0.0, %v3631_v29 }
0x133f   : > { %v3644_v57 = vsel %vm3441_vm2, %v8996_v56, 0.0 }
0x134d   : > { %v3629_v58 = vpop.permute.xlu0 %3628 }
0x134e   : > { %v9007_v60 = vsel %vm1421_vm0, 0.0, %v3629_v58  ;;  %v3751_v58 = vld [vmem:[%s9752_s2 + $0x28] sm:$0xff] }
0x134f   : > { %v3643_v63 = vsel %vm3441_vm2, %v9007_v60, 0.0 }
0x135d   : > { %v3633_v37 = vpop.permute.xlu1 %3632 }
0x135e   : > { %v8999_v32 = vsel %vm1421_vm0, 0.0, %v3633_v37 }
0x135f   : > { %v3645_v30 = vsel %vm3441_vm2, %v8999_v32, 0.0 }
0x1360   : > { %v6943_v54 = vpack.i.bf16 %v3644_v57, %v3645_v30  ;;  %v3749_v57 = vld [vmem:[%s9752_s2 + $0x18] sm:$0xff] }
0x1362   : > { %6944 = vrot.lane.b32.xlu2 %v6943_v54, %s9745_s1 }
0x1365   : > { %v3627_v61 = vpop.permute.xlu1 %3626 }
0x1366   : > { %v9010_v62 = vsel %vm1421_vm0, 0.0, %v3627_v61  ;;  %v3750_v61 = vld [vmem:[%s9752_s2 + $0x20] sm:$0xff] }
0x1367   : > { %v3642_v0 = vsel %vm3441_vm2, %v9010_v62, 0.0 }
0x1368   : > { %v6938_v1 = vpack.i.bf16 %v3642_v0, %v3643_v63  ;;  %v3755_v63 = vld [vmem:[%s9752_s2 + $0x48] sm:$0xff]  ;;  %v3753_v0 = vld [vmem:[%s9752_s2 + $0x38] sm:$0xff] }
0x136a   : > { %6959 = vrot.lane.b32.xlu2 %v6943_v54, %s9740_s3  ;;  %6939 = vrot.lane.b32.xlu1 %v6938_v1, %s9740_s3 }
0x136b   : > { %6929 = vrot.lane.b32.xlu0 %v6938_v1, %s9745_s1 }
0x1372   : > { %6964 = vrot.lane.b32.xlu2 %v6943_v54, %s9741_s4  ;;  %6949 = vrot.lane.b32.xlu1 %v6943_v54, %s9747_s5 }
0x1373   : > { %6934 = vrot.lane.b32.xlu0 %v6938_v1, %s9747_s5 }
0x137a   : > { %6969 = vrot.lane.b32.xlu2 %v6938_v1, %s9739_s18  ;;  %6954 = vrot.lane.b32.xlu1 %v6938_v1, %s9741_s4 }
0x137b   : > { %6979 = vrot.lane.b32.xlu0 %v6943_v54, %s9739_s18 }
0x1382   : > { %6989 = vrot.lane.b32.xlu2 %v6943_v54, %s9733_s16  ;;  %6974 = vrot.lane.b32.xlu1 %v6938_v1, %s9742_s7 }
0x1383   : > { %6984 = vrot.lane.b32.xlu0 %v6943_v54, %s9742_s7 }
0x138a   : > { %7004 = vrot.lane.b32.xlu2 %v6938_v1, %s9743_s22  ;;  %6999 = vrot.lane.b32.xlu1 %v6938_v1, %s9733_s16  ;;  %v3757_v1 = vld [vmem:[%s9752_s2 + $0x58] sm:$0xff] }
0x138b   : > { %6994 = vrot.lane.b32.xlu0 %v6943_v54, %s9743_s22  ;;  %v3747_v54 = vld [vmem:[%s9752_s2 + $0x8] sm:$0xff] }
0x1392   : > { %3769 = vperm.xlu2 %6582, %v3759_v3   ;;  %3774 = vperm.xlu1 %6331, %v3760_v47   ;;  %v3756_v3 = vld [vmem:[%s9752_s2 + $0x50] sm:$0xff] }
0x1393   : > { %3779 = vperm.xlu0 %6330, %v3761_v4  }
0x139b   : > { %3764 = vperm.xlu0 %6330, %v3758_v6  }
0x13bc   : > { %v6945_v7 = vpop.permute.xlu2 %6944 }
0x13bd   : > { %v6946_v9 = vunpack.i.l.bf16 %v6945_v7  ;;  %v6947_v2 = vunpack.i.h.bf16 %v6945_v7 }
0x13bf   : > { %3795 = vmatpush.msrb.mxu3 %v6946_v9 }
0x13c1   : > { %3796 = vmatpush.msrb.mxu3 %v6947_v2 }
0x13c4   : > { %v6960_v25 = vpop.permute.xlu2 %6959 }
0x13c5   : > { %v6961_v8 = vunpack.i.l.bf16 %v6960_v25  ;;  %v6962_v11 = vunpack.i.h.bf16 %v6960_v25 }
0x13c7   : > { %3824 = vmatpush.msrb.mxu0 %v6961_v8 }
0x13c9   : > { %3825 = vmatpush.msrb.mxu0 %v6962_v11 }
0x13cc   : > { %v6965_v52 = vpop.permute.xlu2 %6964 }
0x13cd   : > { %v6966_v27 = vunpack.i.l.bf16 %v6965_v52  ;;  %v6967_v39 = vunpack.i.h.bf16 %v6965_v52 }
0x13d4   : > { %v6970_v13 = vpop.permute.xlu2 %6969 }
0x13d5   : > { %v6971_v43 = vunpack.i.l.bf16 %v6970_v13  ;;  %v6972_v46 = vunpack.i.h.bf16 %v6970_v13 }
0x13dc   : > { %v6990_v14 = vpop.permute.xlu2 %6989  ;;  %v6940_v21 = vpop.permute.xlu1 %6939 }
0x13dd   : > { %v6991_v22 = vunpack.i.l.bf16 %v6990_v14  ;;  %v6941_v17 = vunpack.i.l.bf16 %v6940_v21  ;;  %v6930_v18 = vpop.permute.xlu0 %6929  ;;  %v6992_v59 = vunpack.i.h.bf16 %v6990_v14  ;;  %v6942_v12 = vunpack.i.h.bf16 %v6940_v21 }
0x13de   : > { %v6931_v20 = vunpack.i.l.bf16 %v6930_v18  ;;  %v6932_v16 = vunpack.i.h.bf16 %v6930_v18 }
0x13df   : > { %3826 = vmatpush.msrb.mxu0 %v6941_v17  ;;  %3865 = vmatpush.msra.mxu2 %v6991_v22 }
0x13e0   : > { %3797 = vmatpush.msrb.mxu3 %v6931_v20 }
0x13e1   : > { %3827 = vmatpush.msrb.mxu0 %v6942_v12  ;;  %3866 = vmatpush.msra.mxu2 %v6992_v59 }
0x13e2   : > { %3798 = vmatpush.msrb.mxu3 %v6932_v16 }
0x13e4   : > { %v6950_v5 = vpop.permute.xlu1 %6949  ;;  %v7005_v40 = vpop.permute.xlu2 %7004 }
0x13e5   : > { %v6951_v23 = vunpack.i.l.bf16 %v6950_v5  ;;  %v6935_v24 = vpop.permute.xlu0 %6934  ;;  %v6952_v10 = vunpack.i.h.bf16 %v6950_v5  ;;  %v7007_v30 = vunpack.i.h.bf16 %v7005_v40 }
0x13e6   : > { %v6936_v19 = vunpack.i.l.bf16 %v6935_v24  ;;  %v6937_v26 = vunpack.i.h.bf16 %v6935_v24 }
0x13e7   : > { %3799 = vmatpush.msrb.mxu3 %v6951_v23 }
0x13e9   : > { %3800 = vmatpush.msrb.mxu3 %v6952_v10 }
0x13eb   : > { %3801 = vmatpush.msrb.mxu3 %v6936_v19 }
0x13ec   : > { %v6955_v15 = vpop.permute.xlu1 %6954  ;;  %v3770_v7 = vpop.permute.xlu2 %3769 }
0x13ed   : > { %v6980_v28 = vpop.permute.xlu0 %6979  ;;  %3802 = vmatpush.msrb.mxu3 %v6937_v26  ;;  %v6956_v42 = vunpack.i.l.bf16 %v6955_v15  ;;  %v6957_v45 = vunpack.i.h.bf16 %v6955_v15 }
0x13ee   : > { %v6981_v34 = vunpack.i.l.bf16 %v6980_v28  ;;  %v6982_v35 = vunpack.i.h.bf16 %v6980_v28 }
0x13ef   : > { %3803 = vmatpush.msrb.mxu3 %v6966_v27 }
0x13f0   : > { %3828 = vmatpush.msrb.mxu0 %v6981_v34 }
0x13f1   : > { %3804 = vmatpush.msrb.mxu3 %v6967_v39 }
0x13f2   : > { %3829 = vmatpush.msrb.mxu0 %v6982_v35 }
0x13f3   : > { %3805 = vmatpush.msrb.mxu3 %v6956_v42 }
0x13f4   : > { %3830 = vmatpush.msrb.mxu0 %v6971_v43  ;;  %v6975_v48 = vpop.permute.xlu1 %6974 }
0x13f5   : > { %v6985_v31 = vpop.permute.xlu0 %6984  ;;  %3806 = vmatpush.msrb.mxu3 %v6957_v45  ;;  %v6976_v36 = vunpack.i.l.bf16 %v6975_v48  ;;  %v6977_v51 = vunpack.i.h.bf16 %v6975_v48 }
0x13f6   : > { %v6986_v49 = vunpack.i.l.bf16 %v6985_v31  ;;  %3831 = vmatpush.msrb.mxu0 %v6972_v46  ;;  %v6987_v50 = vunpack.i.h.bf16 %v6985_v31 }
0x13f7   : > { %5977 = vmatpush.msk.msrb.mxu3 %vm3441_vm2, %v8999_v32  ;;  %v7006_v32 = vunpack.i.l.bf16 %v7005_v40 }
0x13f8   : > { %3832 = vmatpush.msrb.mxu0 %v6986_v49 }
0x13f9   : > { %5978 = vmatpush.msk.msrb.mxu3 %vm3441_vm2, %v8996_v56  ;;  %v3748_v56 = vld [vmem:[%s9752_s2 + $0x10] sm:$0xff] }
0x13fa   : > { %3833 = vmatpush.msrb.mxu0 %v6987_v50 }
0x13fb   : > { %5979 = vmatpush.msk.msrb.mxu3 %vm3441_vm2, %v9007_v60  ;;  %v3752_v60 = vld [vmem:[%s9752_s2 + $0x30] sm:$0xff] }
0x13fc   : > { %3834 = vmatpush.msrb.mxu0 %v6976_v36  ;;  %v7000_v41 = vpop.permute.xlu1 %6999 }
0x13fd   : > { %v7001_v33 = vunpack.i.l.bf16 %v7000_v41  ;;  %v6995_v53 = vpop.permute.xlu0 %6994  ;;  %5980 = vmatpush.msk.msrb.mxu3 %vm3441_vm2, %v9010_v62  ;;  %v7002_v29 = vunpack.i.h.bf16 %v7000_v41  ;;  %v3754_v62 = vld [vmem:[%s9752_s2 + $0x40] sm:$0xff]  ;;  %s9753_s2 = sld [smem:[#allocation40_spill]] }
0x13fe   : > { %v6996_v55 = vunpack.i.l.bf16 %v6995_v53  ;;  %3835 = vmatpush.msrb.mxu0 %v6977_v51  ;;  %3811 = vmatmul.f32.vlgmr.msrb.gmra.mxu3 %v3746_v44  ;;  %v6997_v37 = vunpack.i.h.bf16 %v6995_v53 }
0x13ff   : > { %3867 = vmatpush.msra.mxu2 %v7001_v33 }
0x1400   : > { %3836 = vmatpush.msrb.mxu0 %v6996_v55 }
0x1401   : > { %3868 = vmatpush.msra.mxu2 %v7002_v29 }
0x1402   : > { %3837 = vmatpush.msrb.mxu0 %v6997_v37  ;;  %5981 = vmatmul.msk.f32.vlgmr.msra.gmra.mxu2 %vm3782_vm3, %v3748_v56 }
0x1403   : > { %v4021_v51 = vld [vmem:[%s9753_s2 + $0x18] sm:$0xff]  ;;  %v4018_v41 = vld [vmem:[%s9753_s2] sm:$0xff]  ;;  %v4020_v33 = vld [vmem:[%s9753_s2 + $0x10] sm:$0xff] }
0x1404   : > { %3838 = vmatpush.msrb.mxu0 %v7006_v32  ;;  %v3775_v13 = vpop.permute.xlu1 %3774  ;;  %v4019_v53 = vld [vmem:[%s9753_s2 + $0x8] sm:$0xff]  ;;  %s9754_s2 = sld [smem:[#allocation39_spill]] }
0x1405   : > { %v3780_v22 = vpop.permute.xlu0 %3779 }
0x1406   : > { %3839 = vmatpush.msrb.mxu0 %v7007_v30  ;;  %3814 = vmatmul.f32.gmra.mxu3 %v3749_v57 }
0x1407   : > { %3840 = vmatmul.f32.vlgmr.msrb.gmra.mxu0 %v3747_v54 }
0x140a   : > { %5982 = vmatmul.msk.f32.gmra.mxu2 %vm3782_vm3, %v3751_v58 }
0x140d   : > { %v3765_v10 = vpop.permute.xlu0 %3764 }
0x140e   : > { %3817 = vmatmul.f32.gmra.mxu3 %v3752_v60 }
0x140f   : > { %3843 = vmatmul.f32.gmra.mxu0 %v3750_v61 }
0x1412   : > { %5983 = vmatmul.msk.f32.gmra.mxu2 %vm3782_vm3, %v3754_v62 }
0x1416   : > { %3820 = vmatmul.f32.gmra.mxu3 %v3755_v63 }
0x1417   : > { %3846 = vmatmul.f32.gmra.mxu0 %v3753_v0 }
0x141a   : > { %5984 = vmatmul.msk.f32.gmra.mxu2 %vm3782_vm3, %v3757_v1 }
0x141f   : > { %3849 = vmatmul.f32.gmra.mxu0 %v3756_v3 }
0x1481   : > { %v3812_v47 = vpop.f32.mrf.mxu3 }
0x1482   : > { %v3813_v19 = vadd.f32 %v3812_v47, %v3765_v10 }
0x1484   : > { %v3841_v4 = vpop.f32.mrf.mxu0 }
0x1485   : > { %v3870_v6 = vpop.f32.mrf.mxu2  ;;  %v3842_v15 = vadd.f32 %v3841_v4, %v3813_v19 }
0x1487   : > { %v9071_v27 = vadd.f32 %v3870_v6, %v3842_v15 }
0x1489   : > { %v3815_v9 = vpop.f32.mrf.mxu3 }
0x148a   : > { %v3816_v2 = vadd.f32 %v3815_v9, %v3770_v7 }
0x148c   : > { %v3844_v25 = vpop.f32.mrf.mxu0 }
0x148d   : > { %v3845_v8 = vadd.f32 %v3844_v25, %v3816_v2  ;;  %v3873_v11 = vpop.f32.mrf.mxu2 }
0x148f   : > { %v9059_v52 = vadd.f32 %v3873_v11, %v3845_v8 }
0x1491   : > { %3888 = vrot.lane.b32.xlu0 %v9059_v52, %s9736_s15  ;;  %v3818_v14 = vpop.f32.mrf.mxu3 }
0x1492   : > { %v3819_v21 = vadd.f32 %v3818_v14, %v3775_v13 }
0x1494   : > { %v3847_v17 = vpop.f32.mrf.mxu0 }
0x1495   : > { %v3848_v18 = vadd.f32 %v3847_v17, %v3819_v21  ;;  %v3876_v20 = vpop.f32.mrf.mxu2 }
0x1497   : > { %v9063_v59 = vadd.f32 %v3876_v20, %v3848_v18 }
0x1499   : > { %3890 = vrot.lane.b32.xlu2 %v9063_v59, %s9736_s15  ;;  %v3821_v12 = vpop.f32.mrf.mxu3 }
0x149a   : > { %v3822_v16 = vadd.f32 %v3821_v12, %v3780_v22 }
0x149c   : > { %v3850_v5 = vpop.f32.mrf.mxu0 }
0x149d   : > { %v3851_v23 = vadd.f32 %v3850_v5, %v3822_v16  ;;  %v3879_v24 = vpop.f32.mrf.mxu2 }
0x149f   : > { %v9067_v26 = vadd.f32 %v3879_v24, %v3851_v23 }
0x14a1   : > { %3892 = vrot.lane.b32.xlu1 %v9067_v26, %s9736_s15 }
0x14a9   : > { %3886 = vrot.lane.b32.xlu1 %v9071_v27, %s9736_s15 }
0x14f3   : > { %v3891_v28 = vpop.permute.xlu2 %3890 }
0x14f4   : > { %v9076_v34 = vsel %vm1421_vm0, 0.0, %v3891_v28 }
0x14f5   : > { %v3904_v42 = vsel %vm3441_vm2, %v9076_v34, 0.0 }
0x1503   : > { %v3889_v46 = vpop.permute.xlu0 %3888 }
0x1504   : > { %v9087_v48 = vsel %vm1421_vm0, 0.0, %v3889_v46 }
0x1505   : > { %v3903_v50 = vsel %vm3441_vm2, %v9087_v48, 0.0 }
0x1513   : > { %v3893_v39 = vpop.permute.xlu1 %3892 }
0x1514   : > { %v9079_v35 = vsel %vm1421_vm0, 0.0, %v3893_v39  ;;  %v4007_v39 = vld [vmem:[%s9754_s2 + $0x8] sm:$0xff] }
0x1515   : > { %v3905_v43 = vsel %vm3441_vm2, %v9079_v35, 0.0 }
0x1516   : > { %v7028_v45 = vpack.i.bf16 %v3904_v42, %v3905_v43 }
0x1518   : > { %7029 = vrot.lane.b32.xlu0 %v7028_v45, %s9745_s1 }
0x151b   : > { %v3887_v31 = vpop.permute.xlu1 %3886 }
0x151c   : > { %v9090_v49 = vsel %vm1421_vm0, 0.0, %v3887_v31 }
0x151d   : > { %v3902_v36 = vsel %vm3441_vm2, %v9090_v49, 0.0 }
0x151e   : > { %v7013_v44 = vpack.i.bf16 %v3902_v36, %v3903_v50  ;;  %v4010_v50 = vld [vmem:[%s9754_s2 + $0x20] sm:$0xff]  ;;  %v4008_v36 = vld [vmem:[%s9754_s2 + $0x10] sm:$0xff] }
0x1520   : > { %7034 = vrot.lane.b32.xlu0 %v7028_v45, %s9739_s18  ;;  %7014 = vrot.lane.b32.xlu2 %v7013_v44, %s9745_s1 }
0x1521   : > { %7009 = vrot.lane.b32.xlu1 %v7013_v44, %s9740_s3 }
0x1528   : > { %7039 = vrot.lane.b32.xlu0 %v7013_v44, %s9747_s5  ;;  %7019 = vrot.lane.b32.xlu2 %v7028_v45, %s9740_s3 }
0x1529   : > { %7049 = vrot.lane.b32.xlu1 %v7028_v45, %s9747_s5 }
0x1530   : > { %7044 = vrot.lane.b32.xlu0 %v7013_v44, %s9742_s7  ;;  %7024 = vrot.lane.b32.xlu2 %v7013_v44, %s9739_s18 }
0x1531   : > { %7054 = vrot.lane.b32.xlu1 %v7028_v45, %s9742_s7 }
0x1538   : > { %7074 = vrot.lane.b32.xlu0 %v7013_v44, %s9743_s22  ;;  %7064 = vrot.lane.b32.xlu2 %v7028_v45, %s9741_s4 }
0x1539   : > { %7059 = vrot.lane.b32.xlu1 %v7013_v44, %s9741_s4 }
0x1540   : > { %4039 = vperm.xlu0 %6330, %v4021_v51   ;;  %7069 = vrot.lane.b32.xlu2 %v7028_v45, %s9743_s22  ;;  %v4011_v51 = vld [vmem:[%s9754_s2 + $0x28] sm:$0xff] }
0x1541   : > { %7079 = vrot.lane.b32.xlu1 %v7028_v45, %s9733_s16 }
0x1548   : > { %4024 = vperm.xlu0 %6330, %v4018_v41   ;;  %7084 = vrot.lane.b32.xlu2 %v7013_v44, %s9733_s16  ;;  %v4013_v44 = vld [vmem:[%s9754_s2 + $0x38] sm:$0xff]  ;;  %v4016_v41 = vld [vmem:[%s9754_s2 + $0x50] sm:$0xff] }
0x1549   : > { %4034 = vperm.xlu1 %6331, %v4020_v33   ;;  %v4014_v33 = vld [vmem:[%s9754_s2 + $0x40] sm:$0xff] }
0x1550   : > { %4029 = vperm.xlu2 %6582, %v4019_v53   ;;  %v4015_v53 = vld [vmem:[%s9754_s2 + $0x48] sm:$0xff] }
0x157a   : > { %v7015_v55 = vpop.permute.xlu2 %7014 }
0x157b   : > { %v7016_v30 = vunpack.i.l.bf16 %v7015_v55  ;;  %v7017_v54 = vunpack.i.h.bf16 %v7015_v55  ;;  %v4017_v55 = vld [vmem:[%s9754_s2 + $0x58] sm:$0xff] }
0x1582   : > { %v7020_v40 = vpop.permute.xlu2 %7019 }
0x1583   : > { %v7021_v29 = vunpack.i.l.bf16 %v7020_v40  ;;  %v7022_v56 = vunpack.i.h.bf16 %v7020_v40 }
0x1585   : > { %4083 = vmatpush.msra.mxu3 %v7021_v29 }
0x1587   : > { %4084 = vmatpush.msra.mxu3 %v7022_v56 }
0x158a   : > { %v7030_v37 = vpop.permute.xlu0 %7029  ;;  %v7025_v62 = vpop.permute.xlu2 %7024 }
0x158b   : > { %v7031_v32 = vunpack.i.l.bf16 %v7030_v37  ;;  %v7032_v57 = vunpack.i.h.bf16 %v7030_v37  ;;  %v7026_v4 = vunpack.i.l.bf16 %v7025_v62  ;;  %v7027_v7 = vunpack.i.h.bf16 %v7025_v62 }
0x158d   : > { %4054 = vmatpush.msrb.mxu1 %v7031_v32 }
0x158f   : > { %4055 = vmatpush.msrb.mxu1 %v7032_v57 }
0x1591   : > { %4056 = vmatpush.msrb.mxu1 %v7016_v30 }
0x1592   : > { %v7035_v58 = vpop.permute.xlu0 %7034  ;;  %v7065_v2 = vpop.permute.xlu2 %7064 }
0x1593   : > { %v7010_v60 = vpop.permute.xlu1 %7009  ;;  %4057 = vmatpush.msrb.mxu1 %v7017_v54  ;;  %v7036_v0 = vunpack.i.l.bf16 %v7035_v58  ;;  %v7037_v1 = vunpack.i.h.bf16 %v7035_v58  ;;  %v7066_v14 = vunpack.i.l.bf16 %v7065_v2  ;;  %v7067_v22 = vunpack.i.h.bf16 %v7065_v2 }
0x1594   : > { %v7011_v61 = vunpack.i.l.bf16 %v7010_v60  ;;  %v7012_v63 = vunpack.i.h.bf16 %v7010_v60 }
0x1596   : > { %4085 = vmatpush.msra.mxu3 %v7011_v61 }
0x1598   : > { %4086 = vmatpush.msra.mxu3 %v7012_v63 }
0x159a   : > { %4087 = vmatpush.msra.mxu3 %v7036_v0  ;;  %v7040_v3 = vpop.permute.xlu0 %7039  ;;  %v7070_v20 = vpop.permute.xlu2 %7069 }
0x159b   : > { %v7050_v47 = vpop.permute.xlu1 %7049  ;;  %v7041_v25 = vunpack.i.l.bf16 %v7040_v3  ;;  %v7042_v8 = vunpack.i.h.bf16 %v7040_v3  ;;  %v7071_v5 = vunpack.i.l.bf16 %v7070_v20  ;;  %v7072_v10 = vunpack.i.h.bf16 %v7070_v20 }
0x159c   : > { %v7051_v6 = vunpack.i.l.bf16 %v7050_v47  ;;  %4088 = vmatpush.msra.mxu3 %v7037_v1  ;;  %v7052_v9 = vunpack.i.h.bf16 %v7050_v47 }
0x159e   : > { %4058 = vmatpush.msrb.mxu1 %v7051_v6  ;;  %4089 = vmatpush.msra.mxu3 %v7026_v4 }
0x15a0   : > { %4059 = vmatpush.msrb.mxu1 %v7052_v9  ;;  %4090 = vmatpush.msra.mxu3 %v7027_v7 }
0x15a2   : > { %4060 = vmatpush.msrb.mxu1 %v7041_v25  ;;  %v7045_v11 = vpop.permute.xlu0 %7044  ;;  %v7085_v45 = vpop.permute.xlu2 %7084 }
0x15a3   : > { %v7055_v13 = vpop.permute.xlu1 %7054  ;;  %v7046_v18 = vunpack.i.l.bf16 %v7045_v11  ;;  %v7047_v12 = vunpack.i.h.bf16 %v7045_v11  ;;  %v7086_v31 = vunpack.i.l.bf16 %v7085_v45 }
0x15a4   : > { %v7056_v21 = vunpack.i.l.bf16 %v7055_v13  ;;  %4061 = vmatpush.msrb.mxu1 %v7042_v8  ;;  %v7057_v17 = vunpack.i.h.bf16 %v7055_v13 }
0x15a6   : > { %4062 = vmatpush.msrb.mxu1 %v7066_v14  ;;  %4091 = vmatpush.msra.mxu3 %v7056_v21 }
0x15a8   : > { %4063 = vmatpush.msrb.mxu1 %v7067_v22  ;;  %4092 = vmatpush.msra.mxu3 %v7057_v17 }
0x15aa   : > { %4093 = vmatpush.msra.mxu3 %v7046_v18  ;;  %v7075_v24 = vpop.permute.xlu0 %7074  ;;  %v4030_v37 = vpop.permute.xlu2 %4029 }
0x15ab   : > { %v7060_v16 = vpop.permute.xlu1 %7059  ;;  %v7076_v15 = vunpack.i.l.bf16 %v7075_v24  ;;  %v7077_v28 = vunpack.i.h.bf16 %v7075_v24 }
0x15ac   : > { %v7061_v23 = vunpack.i.l.bf16 %v7060_v16  ;;  %4094 = vmatpush.msra.mxu3 %v7047_v12  ;;  %v7062_v19 = vunpack.i.h.bf16 %v7060_v16 }
0x15ae   : > { %4064 = vmatpush.msrb.mxu1 %v7061_v23  ;;  %4095 = vmatpush.msra.mxu3 %v7071_v5 }
0x15b0   : > { %4065 = vmatpush.msrb.mxu1 %v7062_v19  ;;  %4096 = vmatpush.msra.mxu3 %v7072_v10 }
0x15b2   : > { %5985 = vmatpush.msk.msrb.mxu1 %vm3441_vm2, %v9079_v35  ;;  %4097 = vmatpush.msra.mxu3 %v7076_v15  ;;  %v4006_v35 = vld [vmem:[%s9754_s2] sm:$0xff]  ;;  %v4040_v61 = vpop.permute.xlu0 %4039 }
0x15b3   : > { %v7080_v42 = vpop.permute.xlu1 %7079 }
0x15b4   : > { %v7081_v43 = vunpack.i.l.bf16 %v7080_v42  ;;  %5986 = vmatpush.msk.msrb.mxu1 %vm3441_vm2, %v9076_v34  ;;  %4098 = vmatpush.msra.mxu3 %v7077_v28  ;;  %v7082_v46 = vunpack.i.h.bf16 %v7080_v42  ;;  %v7087_v34 = vunpack.i.h.bf16 %v7085_v45 }
0x15b5   : > { %4099 = vmatmul.f32.vlgmr.msra.gmra.mxu3 %v4007_v39 }
0x15b6   : > { %5987 = vmatpush.msk.msrb.mxu1 %vm3441_vm2, %v9087_v48  ;;  %4124 = vmatpush.msra.mxu0 %v7081_v43  ;;  %v4009_v48 = vld [vmem:[%s9754_s2 + $0x18] sm:$0xff] }
0x15b8   : > { %5988 = vmatpush.msk.msrb.mxu1 %vm3441_vm2, %v9090_v49  ;;  %4125 = vmatpush.msra.mxu0 %v7082_v46  ;;  %v4012_v49 = vld [vmem:[%s9754_s2 + $0x30] sm:$0xff]  ;;  %s9755_s2 = sld [smem:[#allocation41_spill]] }
0x15b9   : > { %4070 = vmatmul.f32.vlgmr.msrb.gmra.mxu1 %v4006_v35 }
0x15ba   : > { %4126 = vmatpush.msra.mxu0 %v7086_v31  ;;  %v4025_v25 = vpop.permute.xlu0 %4024 }
0x15bb   : > { %v4035_v63 = vpop.permute.xlu1 %4034 }
0x15bc   : > { %4127 = vmatpush.msra.mxu0 %v7087_v34 }
0x15bd   : > { %4102 = vmatmul.f32.gmra.mxu3 %v4010_v50  ;;  %5989 = vmatmul.msk.f32.vlgmr.msra.gmra.mxu0 %vm3782_vm3, %v4008_v36 }
0x15be   : > { %v4282_v35 = vld [vmem:[%s9755_s2 + $0x8] sm:$0xff]  ;;  %v4283_v31 = vld [vmem:[%s9755_s2 + $0x10] sm:$0xff]  ;;  %v4284_v34 = vld [vmem:[%s9755_s2 + $0x18] sm:$0xff] }
0x15bf   : > { %v4281_v50 = vld [vmem:[%s9755_s2] sm:$0xff] }
0x15c1   : > { %4073 = vmatmul.f32.gmra.mxu1 %v4009_v48 }
0x15c5   : > { %4105 = vmatmul.f32.gmra.mxu3 %v4013_v44  ;;  %5990 = vmatmul.msk.f32.gmra.mxu0 %vm3782_vm3, %v4011_v51 }
0x15c9   : > { %4076 = vmatmul.f32.gmra.mxu1 %v4012_v49 }
0x15cd   : > { %4108 = vmatmul.f32.gmra.mxu3 %v4016_v41  ;;  %5991 = vmatmul.msk.f32.gmra.mxu0 %vm3782_vm3, %v4014_v33 }
0x15d1   : > { %4079 = vmatmul.f32.gmra.mxu1 %v4015_v53 }
0x15d5   : > { %5992 = vmatmul.msk.f32.gmra.mxu0 %vm3782_vm3, %v4017_v55 }
0x1636   : > { %v4071_v40 = vpop.f32.mrf.mxu1 }
0x1637   : > { %v4072_v11 = vadd.f32 %v4071_v40, %v4025_v25 }
0x1638   : > { %v4100_v29 = vpop.f32.mrf.mxu3 }
0x1639   : > { %v4101_v22 = vadd.f32 %v4100_v29, %v4072_v11 }
0x163a   : > { %v4129_v56 = vpop.f32.mrf.mxu0 }
0x163b   : > { %v4130_v18 = vadd.f32 %v4129_v56, %v4101_v22 }
0x163d   : > { %v4141_v20 = vmax.f32 %v4130_v18, 0.0 }
0x163e   : > { %v4074_v32 = vpop.f32.mrf.mxu1 }
0x163f   : > { %v4075_v57 = vadd.f32 %v4074_v32, %v4030_v37 }
0x1640   : > { %v4103_v30 = vpop.f32.mrf.mxu3 }
0x1641   : > { %v4104_v54 = vadd.f32 %v4103_v30, %v4075_v57 }
0x1642   : > { %v4132_v58 = vpop.f32.mrf.mxu0 }
0x1643   : > { %v4133_v60 = vadd.f32 %v4132_v58, %v4104_v54 }
0x1645   : > { %v4142_v62 = vmax.f32 %v4133_v60, 0.0 }
0x1646   : > { %v4077_v0 = vpop.f32.mrf.mxu1 }
0x1647   : > { %v4078_v1 = vadd.f32 %v4077_v0, %v4035_v63  ;;  %4151 = vrot.lane.b32.xlu0 %v4142_v62, %s9736_s15 }
0x1648   : > { %v4106_v3 = vpop.f32.mrf.mxu3 }
0x1649   : > { %v4107_v47 = vadd.f32 %v4106_v3, %v4078_v1 }
0x164a   : > { %v4135_v4 = vpop.f32.mrf.mxu0 }
0x164b   : > { %v4136_v6 = vadd.f32 %v4135_v4, %v4107_v47 }
0x164d   : > { %v4143_v7 = vmax.f32 %v4136_v6, 0.0 }
0x164e   : > { %v4080_v9 = vpop.f32.mrf.mxu1 }
0x164f   : > { %v4081_v2 = vadd.f32 %v4080_v9, %v4040_v61  ;;  %4153 = vrot.lane.b32.xlu2 %v4143_v7, %s9736_s15 }
0x1650   : > { %v4109_v8 = vpop.f32.mrf.mxu3 }
0x1651   : > { %v4110_v13 = vadd.f32 %v4109_v8, %v4081_v2 }
0x1652   : > { %v4138_v14 = vpop.f32.mrf.mxu0 }
0x1653   : > { %v4139_v21 = vadd.f32 %v4138_v14, %v4110_v13 }
0x1655   : > { %v4144_v17 = vmax.f32 %v4139_v21, 0.0 }
0x1657   : > { %4155 = vrot.lane.b32.xlu1 %v4144_v17, %s9736_s15  ;;  %v4269_v17 = vld [vmem:[#allocation8] sm:$0xff] }
0x165f   : > { %4149 = vrot.lane.b32.xlu1 %v4141_v20, %s9736_s15 }
0x16a9   : > { %v4154_v12 = vpop.permute.xlu2 %4153 }
0x16aa   : > { %v9144_v16 = vsel %vm1421_vm0, 0.0, %v4154_v12 }
0x16ab   : > { %v4167_v24 = vsel %vm3441_vm2, %v9144_v16, 0.0 }
0x16b9   : > { %v4152_v15 = vpop.permute.xlu0 %4151 }
0x16ba   : > { %v9155_v28 = vsel %vm1421_vm0, 0.0, %v4152_v15 }
0x16bb   : > { %v4166_v43 = vsel %vm3441_vm2, %v9155_v28, 0.0 }
0x16c9   : > { %v4156_v5 = vpop.permute.xlu1 %4155 }
0x16ca   : > { %v9147_v23 = vsel %vm1421_vm0, 0.0, %v4156_v5 }
0x16cb   : > { %v4168_v10 = vsel %vm3441_vm2, %v9147_v23, 0.0 }
0x16cc   : > { %v7103_v19 = vpack.i.bf16 %v4167_v24, %v4168_v10 }
0x16ce   : > { %7104 = vrot.lane.b32.xlu2 %v7103_v19, %s9745_s1 }
0x16d1   : > { %v4150_v39 = vpop.permute.xlu1 %4149 }
0x16d2   : > { %v9158_v42 = vsel %vm1421_vm0, 0.0, %v4150_v39 }
0x16d3   : > { %v4165_v45 = vsel %vm3441_vm2, %v9158_v42, 0.0 }
0x16d4   : > { %v7098_v46 = vpack.i.bf16 %v4165_v45, %v4166_v43  ;;  %v4270_v43 = vld [vmem:[#allocation8 + $0x8] sm:$0xff]  ;;  %v4275_v45 = vld [vmem:[#allocation8 + $0x30] sm:$0xff] }
0x16d6   : > { %7119 = vrot.lane.b32.xlu2 %v7103_v19, %s9740_s3  ;;  %7099 = vrot.lane.b32.xlu1 %v7098_v46, %s9740_s3  ;;  %s9756_s3 = sld [smem:[#allocation43_spill]] }
0x16d7   : > { %7089 = vrot.lane.b32.xlu0 %v7098_v46, %s9745_s1  ;;  %s9758_s1 = sld [smem:[#allocation44_spill]] }
0x16de   : > { %7124 = vrot.lane.b32.xlu2 %v7103_v19, %s9741_s4  ;;  %7109 = vrot.lane.b32.xlu1 %v7103_v19, %s9747_s5 }
0x16df   : > { %7094 = vrot.lane.b32.xlu0 %v7098_v46, %s9747_s5 }
0x16e6   : > { %7129 = vrot.lane.b32.xlu2 %v7098_v46, %s9739_s18  ;;  %7114 = vrot.lane.b32.xlu1 %v7098_v46, %s9741_s4  ;;  %s7826_s4 = smov 8  }
0x16e7   : > { %7139 = vrot.lane.b32.xlu0 %v7103_v19, %s9739_s18 }
0x16ee   : > { %7149 = vrot.lane.b32.xlu2 %v7103_v19, %s9733_s16  ;;  %7134 = vrot.lane.b32.xlu1 %v7098_v46, %s9742_s7 }
0x16ef   : > { %7144 = vrot.lane.b32.xlu0 %v7103_v19, %s9742_s7  ;;  %s9660_s7 = smov 112  }
0x16f6   : > { %7164 = vrot.lane.b32.xlu2 %v7098_v46, %s9743_s22  ;;  %7159 = vrot.lane.b32.xlu1 %v7098_v46, %s9733_s16  ;;  %v4273_v46 = vld [vmem:[#allocation8 + $0x20] sm:$0xff] }
0x16f7   : > { %7154 = vrot.lane.b32.xlu0 %v7103_v19, %s9743_s22 }
0x16fe   : > { %4292 = vperm.xlu2 %6582, %v4282_v35   ;;  %4297 = vperm.xlu1 %6331, %v4283_v31   ;;  %v4277_v35 = vld [vmem:[#allocation8 + $0x40] sm:$0xff]  ;;  %v4278_v31 = vld [vmem:[#allocation8 + $0x48] sm:$0xff] }
0x16ff   : > { %4302 = vperm.xlu0 %6330, %v4284_v34   ;;  %v4276_v34 = vld [vmem:[#allocation8 + $0x38] sm:$0xff] }
0x1707   : > { %4287 = vperm.xlu0 %6330, %v4281_v50   ;;  %v4280_v50 = vld [vmem:[#allocation8 + $0x58] sm:$0xff] }
0x1728   : > { %v7105_v36 = vpop.permute.xlu2 %7104 }
0x1729   : > { %v7106_v48 = vunpack.i.l.bf16 %v7105_v36  ;;  %v7107_v44 = vunpack.i.h.bf16 %v7105_v36  ;;  %v4279_v36 = vld [vmem:[#allocation8 + $0x50] sm:$0xff] }
0x172b   : > { %4317 = vmatpush.msrb.mxu2 %v7106_v48 }
0x172d   : > { %4318 = vmatpush.msrb.mxu2 %v7107_v44 }
0x1730   : > { %v7120_v51 = vpop.permute.xlu2 %7119 }
0x1731   : > { %v7121_v49 = vunpack.i.l.bf16 %v7120_v51  ;;  %v7122_v41 = vunpack.i.h.bf16 %v7120_v51 }
0x1733   : > { %4346 = vmatpush.msra.mxu1 %v7121_v49 }
0x1735   : > { %4347 = vmatpush.msra.mxu1 %v7122_v41 }
0x1738   : > { %v7125_v33 = vpop.permute.xlu2 %7124 }
0x1739   : > { %v7126_v3 = vunpack.i.l.bf16 %v7125_v33  ;;  %v7127_v6 = vunpack.i.h.bf16 %v7125_v33 }
0x1740   : > { %v7130_v53 = vpop.permute.xlu2 %7129 }
0x1741   : > { %v7131_v2 = vunpack.i.l.bf16 %v7130_v53  ;;  %v7132_v8 = vunpack.i.h.bf16 %v7130_v53 }
0x1748   : > { %v7150_v55 = vpop.permute.xlu2 %7149  ;;  %v7100_v40 = vpop.permute.xlu1 %7099 }
0x1749   : > { %v7151_v29 = vunpack.i.l.bf16 %v7150_v55  ;;  %v7101_v56 = vunpack.i.l.bf16 %v7100_v40  ;;  %v7090_v37 = vpop.permute.xlu0 %7089  ;;  %v7152_v57 = vunpack.i.h.bf16 %v7150_v55  ;;  %v7102_v30 = vunpack.i.h.bf16 %v7100_v40 }
0x174a   : > { %v7091_v32 = vunpack.i.l.bf16 %v7090_v37  ;;  %v7092_v54 = vunpack.i.h.bf16 %v7090_v37 }
0x174b   : > { %4348 = vmatpush.msra.mxu1 %v7101_v56  ;;  %4387 = vmatpush.msrb.mxu3 %v7151_v29 }
0x174c   : > { %4319 = vmatpush.msrb.mxu2 %v7091_v32 }
0x174d   : > { %4349 = vmatpush.msra.mxu1 %v7102_v30  ;;  %4388 = vmatpush.msrb.mxu3 %v7152_v57 }
0x174e   : > { %4320 = vmatpush.msrb.mxu2 %v7092_v54 }
0x1750   : > { %v7110_v58 = vpop.permute.xlu1 %7109  ;;  %v7165_v24 = vpop.permute.xlu2 %7164 }
0x1751   : > { %v7111_v60 = vunpack.i.l.bf16 %v7110_v58  ;;  %v7095_v61 = vpop.permute.xlu0 %7094  ;;  %v7112_v62 = vunpack.i.h.bf16 %v7110_v58  ;;  %v7166_v15 = vunpack.i.l.bf16 %v7165_v24  ;;  %v7167_v39 = vunpack.i.h.bf16 %v7165_v24 }
0x1752   : > { %v7096_v63 = vunpack.i.l.bf16 %v7095_v61  ;;  %v7097_v0 = vunpack.i.h.bf16 %v7095_v61 }
0x1753   : > { %4321 = vmatpush.msrb.mxu2 %v7111_v60 }
0x1755   : > { %4322 = vmatpush.msrb.mxu2 %v7112_v62 }
0x1757   : > { %4323 = vmatpush.msrb.mxu2 %v7096_v63 }
0x1758   : > { %v7115_v1 = vpop.permute.xlu1 %7114  ;;  %v4293_v49 = vpop.permute.xlu2 %4292 }
0x1759   : > { %v7140_v47 = vpop.permute.xlu0 %7139  ;;  %4324 = vmatpush.msrb.mxu2 %v7097_v0  ;;  %v7116_v9 = vunpack.i.l.bf16 %v7115_v1  ;;  %v7117_v25 = vunpack.i.h.bf16 %v7115_v1 }
0x175a   : > { %v7141_v4 = vunpack.i.l.bf16 %v7140_v47  ;;  %v7142_v7 = vunpack.i.h.bf16 %v7140_v47 }
0x175b   : > { %4325 = vmatpush.msrb.mxu2 %v7126_v3 }
0x175c   : > { %4350 = vmatpush.msra.mxu1 %v7141_v4 }
0x175d   : > { %4326 = vmatpush.msrb.mxu2 %v7127_v6 }
0x175e   : > { %4351 = vmatpush.msra.mxu1 %v7142_v7 }
0x175f   : > { %4327 = vmatpush.msrb.mxu2 %v7116_v9 }
0x1760   : > { %4352 = vmatpush.msra.mxu1 %v7131_v2  ;;  %v7135_v11 = vpop.permute.xlu1 %7134 }
0x1761   : > { %v7145_v13 = vpop.permute.xlu0 %7144  ;;  %4328 = vmatpush.msrb.mxu2 %v7117_v25  ;;  %v7136_v22 = vunpack.i.l.bf16 %v7135_v11  ;;  %v7137_v18 = vunpack.i.h.bf16 %v7135_v11 }
0x1762   : > { %v7146_v14 = vunpack.i.l.bf16 %v7145_v13  ;;  %4353 = vmatpush.msra.mxu1 %v7132_v8  ;;  %v7147_v21 = vunpack.i.h.bf16 %v7145_v13 }
0x1763   : > { %5993 = vmatpush.msk.msrb.mxu2 %vm3441_vm2, %v9147_v23 }
0x1764   : > { %4354 = vmatpush.msra.mxu1 %v7146_v14 }
0x1765   : > { %5994 = vmatpush.msk.msrb.mxu2 %vm3441_vm2, %v9144_v16  ;;  %v4271_v16 = vld [vmem:[#allocation8 + $0x10] sm:$0xff] }
0x1766   : > { %4355 = vmatpush.msra.mxu1 %v7147_v21 }
0x1767   : > { %5995 = vmatpush.msk.msrb.mxu2 %vm3441_vm2, %v9155_v28  ;;  %v4272_v28 = vld [vmem:[#allocation8 + $0x18] sm:$0xff] }
0x1768   : > { %4356 = vmatpush.msra.mxu1 %v7136_v22  ;;  %v7160_v20 = vpop.permute.xlu1 %7159 }
0x1769   : > { %v7161_v12 = vunpack.i.l.bf16 %v7160_v20  ;;  %v7155_v5 = vpop.permute.xlu0 %7154  ;;  %5996 = vmatpush.msk.msrb.mxu2 %vm3441_vm2, %v9158_v42  ;;  %v7162_v10 = vunpack.i.h.bf16 %v7160_v20  ;;  %v4274_v42 = vld [vmem:[#allocation8 + $0x28] sm:$0xff] }
0x176a   : > { %v7156_v23 = vunpack.i.l.bf16 %v7155_v5  ;;  %4357 = vmatpush.msra.mxu1 %v7137_v18  ;;  %4333 = vmatmul.f32.vlgmr.msrb.gmra.mxu2 %v4269_v17  ;;  %v7157_v19 = vunpack.i.h.bf16 %v7155_v5 }
0x176b   : > { %4389 = vmatpush.msrb.mxu3 %v7161_v12 }
0x176c   : > { %4358 = vmatpush.msra.mxu1 %v7156_v23 }
0x176d   : > { %4390 = vmatpush.msrb.mxu3 %v7162_v10 }
0x176e   : > { %4359 = vmatpush.msra.mxu1 %v7157_v19  ;;  %5997 = vmatmul.msk.f32.vlgmr.msrb.gmra.mxu3 %vm3782_vm3, %v4271_v16  ;;  %v4499_v19 = vld [vmem:[%s9756_s3 + $0x18] sm:$0xff] }
0x1770   : > { %4360 = vmatpush.msra.mxu1 %v7166_v15  ;;  %v4298_v37 = vpop.permute.xlu1 %4297  ;;  %v4496_v15 = vld [vmem:[%s9756_s3] sm:$0xff] }
0x1771   : > { %v4303_v56 = vpop.permute.xlu0 %4302 }
0x1772   : > { %4361 = vmatpush.msra.mxu1 %v7167_v39  ;;  %4336 = vmatmul.f32.gmra.mxu2 %v4272_v28  ;;  %v4498_v28 = vld [vmem:[%s9756_s3 + $0x10] sm:$0xff]  ;;  %v4497_v39 = vld [vmem:[%s9756_s3 + $0x8] sm:$0xff] }
0x1773   : > { %4362 = vmatmul.f32.vlgmr.msra.gmra.mxu1 %v4270_v43 }
0x1776   : > { %5998 = vmatmul.msk.f32.gmra.mxu3 %vm3782_vm3, %v4274_v42 }
0x1779   : > { %v4288_v1 = vpop.permute.xlu0 %4287 }
0x177a   : > { %4339 = vmatmul.f32.gmra.mxu2 %v4275_v45 }
0x177b   : > { %4365 = vmatmul.f32.gmra.mxu1 %v4273_v46 }
0x177e   : > { %5999 = vmatmul.msk.f32.gmra.mxu3 %vm3782_vm3, %v4277_v35 }
0x1782   : > { %4342 = vmatmul.f32.gmra.mxu2 %v4278_v31 }
0x1783   : > { %4368 = vmatmul.f32.gmra.mxu1 %v4276_v34 }
0x1786   : > { %6000 = vmatmul.msk.f32.gmra.mxu3 %vm3782_vm3, %v4280_v50 }
0x178b   : > { %4371 = vmatmul.f32.gmra.mxu1 %v4279_v36 }
0x17ed   : > { %v4334_v48 = vpop.f32.mrf.mxu2 }
0x17ee   : > { %v4335_v47 = vadd.f32 %v4334_v48, %v4288_v1 }
0x17f0   : > { %v4363_v44 = vpop.f32.mrf.mxu1 }
0x17f1   : > { %v4392_v51 = vpop.f32.mrf.mxu3  ;;  %v4364_v9 = vadd.f32 %v4363_v44, %v4335_v47 }
0x17f3   : > { %v9212_v8 = vadd.f32 %v4392_v51, %v4364_v9 }
0x17f5   : > { %v4337_v41 = vpop.f32.mrf.mxu2 }
0x17f6   : > { %v4338_v33 = vadd.f32 %v4337_v41, %v4293_v49 }
0x17f8   : > { %v4366_v53 = vpop.f32.mrf.mxu1 }
0x17f9   : > { %v4367_v55 = vadd.f32 %v4366_v53, %v4338_v33  ;;  %v4395_v40 = vpop.f32.mrf.mxu3 }
0x17fb   : > { %v9195_v29 = vadd.f32 %v4395_v40, %v4367_v55 }
0x17fd   : > { %v4405_v32 = vmax.f32 %v9195_v29, 0.0  ;;  %v4340_v57 = vpop.f32.mrf.mxu2 }
0x17fe   : > { %v4341_v30 = vadd.f32 %v4340_v57, %v4298_v37 }
0x17ff   : > { %v4409_v54 = vadd.f32 %v4405_v32, %v9059_v52 }
0x1800   : > { %v4369_v58 = vpop.f32.mrf.mxu1 }
0x1801   : > { %v4370_v60 = vadd.f32 %v4369_v58, %v4341_v30  ;;  %4418 = vrot.lane.b32.xlu0 %v4409_v54, %s9736_s15  ;;  %v4398_v61 = vpop.f32.mrf.mxu3 }
0x1803   : > { %v9202_v62 = vadd.f32 %v4398_v61, %v4370_v60 }
0x1805   : > { %v4406_v63 = vmax.f32 %v9202_v62, 0.0  ;;  %v4343_v0 = vpop.f32.mrf.mxu2 }
0x1806   : > { %v4344_v3 = vadd.f32 %v4343_v0, %v4303_v56 }
0x1807   : > { %v4410_v4 = vadd.f32 %v4406_v63, %v9063_v59  ;;  %v4404_v59 = vmax.f32 %v9212_v8, 0.0 }
0x1808   : > { %v4372_v6 = vpop.f32.mrf.mxu1 }
0x1809   : > { %v4373_v7 = vadd.f32 %v4372_v6, %v4344_v3  ;;  %4420 = vrot.lane.b32.xlu2 %v4410_v4, %s9736_s15  ;;  %v4401_v52 = vpop.f32.mrf.mxu3  ;;  %v4408_v13 = vadd.f32 %v4404_v59, %v9071_v27 }
0x180b   : > { %v9209_v2 = vadd.f32 %v4401_v52, %v4373_v7 }
0x180d   : > { %v4407_v25 = vmax.f32 %v9209_v2, 0.0 }
0x180f   : > { %v4411_v11 = vadd.f32 %v4407_v25, %v9067_v26 }
0x1811   : > { %4422 = vrot.lane.b32.xlu1 %v4411_v11, %s9736_s15 }
0x1819   : > { %4416 = vrot.lane.b32.xlu1 %v4408_v13, %s9736_s15  ;;  %s7829_s15 = smov 16  }
0x1863   : > { %v4421_v14 = vpop.permute.xlu2 %4420 }
0x1864   : > { %v9224_v21 = vsel %vm1421_vm0, 0.0, %v4421_v14 }
0x1865   : > { %v4434_v26 = vsel %vm3441_vm2, %v9224_v21, 0.0 }
0x1873   : > { %v4419_v12 = vpop.permute.xlu0 %4418 }
0x1874   : > { %v9236_v27 = vsel %vm1421_vm0, 0.0, %v4419_v12 }
0x1875   : > { %v4433_v24 = vsel %vm3441_vm2, %v9236_v27, 0.0 }
0x1883   : > { %v4423_v22 = vpop.permute.xlu1 %4422 }
0x1884   : > { %v9227_v17 = vsel %vm1421_vm0, 0.0, %v4423_v22 }
0x1885   : > { %v4435_v18 = vsel %vm3441_vm2, %v9227_v17, 0.0 }
0x1886   : > { %v7178_v20 = vpack.i.bf16 %v4434_v26, %v4435_v18 }
0x1888   : > { %7169 = vrot.lane.b32.xlu2 %v7178_v20, %s9739_s18  ;;  %7179 = vrot.lane.b32.xlu1 %v7178_v20, %s9743_s22 }
0x188b   : > { %v4417_v5 = vpop.permute.xlu1 %4416 }
0x188c   : > { %v9239_v23 = vsel %vm1421_vm0, 0.0, %v4417_v5  ;;  %vm4614_vm0 = vcmask 64512  }
0x188d   : > { %v4432_v10 = vsel %vm3441_vm2, %v9239_v23, 0.0 }
0x188e   : > { %v7188_v16 = vpack.i.bf16 %v4432_v10, %v4433_v24 }
0x1890   : > { %7189 = vrot.lane.b32.xlu1 %v7188_v16, %s9747_s5  ;;  %7184 = vrot.lane.b32.xlu2 %v7188_v16, %s9743_s22 }
0x1891   : > { %7174 = vrot.lane.b32.xlu0 %v7188_v16, %s9739_s18  ;;  %s7827_s18 = smov 116  }
0x1898   : > { %4517 = vperm.xlu1 %6331, %v4499_v19   ;;  %7199 = vrot.lane.b32.xlu2 %v7178_v20, %s9733_s16 }
0x1899   : > { %7194 = vrot.lane.b32.xlu0 %v7178_v20, %s9747_s5  ;;  %s9757_s5 = sld [smem:[#allocation42_spill]] }
0x189f   : > { %v4489_v60 = vld [vmem:[%s9757_s5 + $0x8] sm:$0xff]  ;;  %v4488_v61 = vld [vmem:[%s9757_s5] sm:$0xff]  ;;  %v4491_v0 = vld [vmem:[%s9757_s5 + $0x18] sm:$0xff] }
0x18a0   : > { %4502 = vperm.xlu1 %6331, %v4496_v15   ;;  %4512 = vperm.xlu2 %6582, %v4498_v28   ;;  %v4490_v1 = vld [vmem:[%s9757_s5 + $0x10] sm:$0xff]  ;;  %v4493_v3 = vld [vmem:[%s9757_s5 + $0x28] sm:$0xff]  ;;  %v4492_v47 = vld [vmem:[%s9757_s5 + $0x20] sm:$0xff] }
0x18a1   : > { %7204 = vrot.lane.b32.xlu0 %v7188_v16, %s9733_s16  ;;  %v4495_v4 = vld [vmem:[%s9757_s5 + $0x38] sm:$0xff]  ;;  %v4494_v6 = vld [vmem:[%s9757_s5 + $0x30] sm:$0xff] }
0x18a9   : > { %4507 = vperm.xlu0 %6330, %v4497_v39  }
0x18e2   : > { %v7170_v43 = vpop.permute.xlu2 %7169 }
0x18e3   : > { %v7171_v42 = vunpack.i.l.bf16 %v7170_v43  ;;  %v7172_v45 = vunpack.i.h.bf16 %v7170_v43 }
0x18e5   : > { %4532 = vmatpush.msrb.mxu0 %v7171_v42 }
0x18e7   : > { %4533 = vmatpush.msrb.mxu0 %v7172_v45 }
0x18ea   : > { %v7185_v46 = vpop.permute.xlu2 %7184 }
0x18eb   : > { %v7186_v33 = vunpack.i.l.bf16 %v7185_v46  ;;  %v7187_v53 = vunpack.i.h.bf16 %v7185_v46 }
0x18f2   : > { %v7200_v35 = vpop.permute.xlu2 %7199 }
0x18f3   : > { %v7201_v31 = vunpack.i.l.bf16 %v7200_v35  ;;  %v7202_v34 = vunpack.i.h.bf16 %v7200_v35 }
0x18f5   : > { %4573 = vmatpush.msra.mxu2 %v7201_v31 }
0x18f7   : > { %4574 = vmatpush.msra.mxu2 %v7202_v34 }
0x18fa   : > { %v7180_v48 = vpop.permute.xlu1 %7179  ;;  %v4513_v26 = vpop.permute.xlu2 %4512 }
0x18fb   : > { %v7181_v51 = vunpack.i.l.bf16 %v7180_v48  ;;  %v7182_v49 = vunpack.i.h.bf16 %v7180_v48 }
0x1902   : > { %v7190_v40 = vpop.permute.xlu1 %7189 }
0x1903   : > { %v7175_v50 = vpop.permute.xlu0 %7174  ;;  %v7191_v57 = vunpack.i.l.bf16 %v7190_v40  ;;  %v7192_v54 = vunpack.i.h.bf16 %v7190_v40 }
0x1904   : > { %v7176_v36 = vunpack.i.l.bf16 %v7175_v50  ;;  %v7177_v44 = vunpack.i.h.bf16 %v7175_v50 }
0x1906   : > { %4534 = vmatpush.msrb.mxu0 %v7176_v36 }
0x1908   : > { %4535 = vmatpush.msrb.mxu0 %v7177_v44 }
0x190a   : > { %4536 = vmatpush.msrb.mxu0 %v7181_v51  ;;  %v4518_v20 = vpop.permute.xlu1 %4517  ;;  %v4687_v51 = vld [vmem:[%s9758_s1 + $0x18] sm:$0xff] }
0x190b   : > { %v7195_v41 = vpop.permute.xlu0 %7194 }
0x190c   : > { %4537 = vmatpush.msrb.mxu0 %v7182_v49  ;;  %v7196_v55 = vunpack.i.l.bf16 %v7195_v41  ;;  %v7197_v56 = vunpack.i.h.bf16 %v7195_v41  ;;  %v4685_v49 = vld [vmem:[%s9758_s1 + $0x8] sm:$0xff]  ;;  %v4684_v41 = vld [vmem:[%s9758_s1] sm:$0xff] }
0x190e   : > { %4538 = vmatpush.msrb.mxu0 %v7186_v33  ;;  %v4686_v33 = vld [vmem:[%s9758_s1 + $0x10] sm:$0xff]  ;;  %s7834_s1 = smov 64  }
0x1910   : > { %4539 = vmatpush.msrb.mxu0 %v7187_v53 }
0x1912   : > { %4540 = vmatpush.msrb.mxu0 %v7196_v55  ;;  %v4503_v29 = vpop.permute.xlu1 %4502 }
0x1913   : > { %v7205_v37 = vpop.permute.xlu0 %7204 }
0x1914   : > { %v7206_v30 = vunpack.i.l.bf16 %v7205_v37  ;;  %4541 = vmatpush.msrb.mxu0 %v7197_v56  ;;  %v7207_v58 = vunpack.i.h.bf16 %v7205_v37 }
0x1916   : > { %4542 = vmatpush.msrb.mxu0 %v7191_v57  ;;  %4575 = vmatpush.msra.mxu2 %v7206_v30 }
0x1918   : > { %4543 = vmatpush.msrb.mxu0 %v7192_v54  ;;  %4576 = vmatpush.msra.mxu2 %v7207_v58 }
0x1919   : > { %6005 = vmatmul.msk.f32.vlgmr.msra.gmra.mxu2 %vm3782_vm3, %v4489_v60 }
0x191a   : > { %6001 = vmatpush.msk.msrb.mxu0 %vm3441_vm2, %v9227_v17 }
0x191b   : > { %v4508_v11 = vpop.permute.xlu0 %4507 }
0x191c   : > { %6002 = vmatpush.msk.msrb.mxu0 %vm3441_vm2, %v9224_v21 }
0x191e   : > { %6003 = vmatpush.msk.msrb.mxu0 %vm3441_vm2, %v9236_v27 }
0x1920   : > { %6004 = vmatpush.msk.msrb.mxu0 %vm3441_vm2, %v9239_v23 }
0x1921   : > { %4548 = vmatmul.f32.vlgmr.msrb.gmra.mxu0 %v4488_v61  ;;  %6006 = vmatmul.msk.f32.gmra.mxu2 %vm3782_vm3, %v4491_v0 }
0x1929   : > { %4551 = vmatmul.f32.gmra.mxu0 %v4490_v1  ;;  %6007 = vmatmul.msk.f32.gmra.mxu2 %vm3782_vm3, %v4493_v3 }
0x1931   : > { %4554 = vmatmul.f32.gmra.mxu0 %v4492_v47  ;;  %6008 = vmatmul.msk.f32.gmra.mxu2 %vm3782_vm3, %v4495_v4 }
0x1939   : > { %4557 = vmatmul.f32.gmra.mxu0 %v4494_v6 }
0x199c   : > { %v4578_v7 = vpop.f32.mrf.mxu2 }
0x199e   : > { %v4549_v52 = vpop.f32.mrf.mxu0 }
0x19a4   : > { %v4581_v9 = vpop.f32.mrf.mxu2 }
0x19a6   : > { %v4552_v13 = vpop.f32.mrf.mxu0 }
0x19a7   : > { %v4553_v14 = vadd.f32 %v4552_v13, %v4508_v11 }
0x19a9   : > { %v4582_v21 = vadd.f32 %v4581_v9, %v4553_v14 }
0x19ab   : > { %v4591_v22 = vmax.f32 %v4582_v21, 0.0 }
0x19ac   : > { %v4584_v17 = vpop.f32.mrf.mxu2 }
0x19ad   : > { %v9277_v18 = vadd.f32 %v4591_v22, %v4405_v32  ;;  %v4550_v32 = vadd.f32 %v4549_v52, %v4503_v29  ;;  %v4677_v22 = vld [vmem:[#allocation10 + $0x8] sm:$0xff] }
0x19ae   : > { %v4555_v12 = vpop.f32.mrf.mxu0 }
0x19af   : > { %v4556_v27 = vadd.f32 %v4555_v12, %v4513_v26  ;;  %4604 = vrot.lane.b32.xlu1 %v9277_v18, %s7826_s4  ;;  %v4579_v39 = vadd.f32 %v4578_v7, %v4550_v32  ;;  %v4679_v26 = vld [vmem:[#allocation10 + $0x18] sm:$0xff]  ;;  %v4681_v12 = vld [vmem:[#allocation10 + $0x28] sm:$0xff] }
0x19b1   : > { %v4585_v5 = vadd.f32 %v4584_v17, %v4556_v27  ;;  %v4590_v42 = vmax.f32 %v4579_v39, 0.0  ;;  %v4676_v17 = vld [vmem:[#allocation10] sm:$0xff] }
0x19b2   : > { %v4680_v27 = vld [vmem:[#allocation10 + $0x20] sm:$0xff] }
0x19b3   : > { %v4592_v23 = vmax.f32 %v4585_v5, 0.0  ;;  %v9292_v62 = vadd.f32 %v4590_v42, %v4404_v59  ;;  %v4683_v5 = vld [vmem:[#allocation10 + $0x38] sm:$0xff] }
0x19b4   : > { %v4587_v16 = vpop.f32.mrf.mxu2 }
0x19b5   : > { %v9282_v24 = vadd.f32 %v4592_v23, %v4406_v63  ;;  %v4682_v23 = vld [vmem:[#allocation10 + $0x30] sm:$0xff] }
0x19b6   : > { %v4558_v10 = vpop.f32.mrf.mxu0 }
0x19b7   : > { %v4559_v19 = vadd.f32 %v4558_v10, %v4518_v20  ;;  %4606 = vrot.lane.b32.xlu0 %v9282_v24, %s7826_s4  ;;  %v4678_v20 = vld [vmem:[#allocation10 + $0x10] sm:$0xff] }
0x19b9   : > { %v4588_v15 = vadd.f32 %v4587_v16, %v4559_v19 }
0x19bb   : > { %v4593_v28 = vmax.f32 %v4588_v15, 0.0 }
0x19bd   : > { %v9287_v43 = vadd.f32 %v4593_v28, %v4407_v25 }
0x19bf   : > { %4608 = vrot.lane.b32.xlu2 %v9287_v43, %s7826_s4 }
0x19c7   : > { %4602 = vrot.lane.b32.xlu2 %v9292_v62, %s7826_s4 }
0x1a19   : > { %v4609_v63 = vpop.permute.xlu2 %4608 }
0x1a1a   : > { %v9303_v59 = vsel %vm4614_vm0, 0.0, %v4609_v63 }
0x1a1b   : > { %v4623_v36 = vsel %vm4619_vm4, %v9303_v59, 0.0 }
0x1a21   : > { %v4605_v45 = vpop.permute.xlu1 %4604  ;;  %v4603_v46 = vpop.permute.xlu2 %4602 }
0x1a22   : > { %v9295_v35 = vsel %vm4614_vm0, 0.0, %v4605_v45  ;;  %v9297_v31 = vsel %vm4614_vm0, 0.0, %v4603_v46 }
0x1a23   : > { %v4621_v2 = vsel %vm4619_vm4, %v9295_v35, 0.0  ;;  %v4620_v25 = vsel %vm4619_vm4, %v9297_v31, 0.0 }
0x1a24   : > { %v7213_v8 = vpack.i.bf16 %v4620_v25, %v4621_v2 }
0x1a26   : > { %7214 = vrot.lane.b32.xlu1 %v7213_v8, %s7827_s18 }
0x1a29   : > { %v4607_v34 = vpop.permute.xlu0 %4606 }
0x1a2a   : > { %v9305_v50 = vsel %vm4614_vm0, 0.0, %v4607_v34 }
0x1a2b   : > { %v4622_v48 = vsel %vm4619_vm4, %v9305_v50, 0.0 }
0x1a2c   : > { %v7233_v44 = vpack.i.bf16 %v4622_v48, %v4623_v36 }
0x1a2e   : > { %7209 = vrot.lane.b32.xlu0 %v7233_v44, %s7827_s18  ;;  %7219 = vrot.lane.b32.xlu2 %v7233_v44, %s9733_s16  ;;  %s7830_s18 = smov 104  }
0x1a2f   : > { %7234 = vrot.lane.b32.xlu1 %v7233_v44, %s9743_s22 }
0x1a36   : > { %7229 = vrot.lane.b32.xlu2 %v7213_v8, %s9743_s22  ;;  %7224 = vrot.lane.b32.xlu0 %v7213_v8, %s9733_s16  ;;  %s9759_s22 = sld [smem:[#allocation46_spill]] }
0x1a37   : > { %7244 = vrot.lane.b32.xlu1 %v7213_v8, %s9660_s7 }
0x1a3c   : > { %s9760_s4 = smov %s9759_s22 }
0x1a3e   : > { %4705 = vperm.xlu2 %6582, %v4687_v51   ;;  %7239 = vrot.lane.b32.xlu0 %v7233_v44, %s9660_s7 }
0x1a3f   : > { %4695 = vperm.xlu1 %6331, %v4685_v49  }
0x1a46   : > { %4690 = vperm.xlu2 %6582, %v4684_v41   ;;  %4700 = vperm.xlu0 %6330, %v4686_v33  }
0x1a88   : > { %v7220_v57 = vpop.permute.xlu2 %7219 }
0x1a89   : > { %v7221_v60 = vunpack.i.l.bf16 %v7220_v57  ;;  %v7222_v61 = vunpack.i.h.bf16 %v7220_v57 }
0x1a90   : > { %v7230_v6 = vpop.permute.xlu2 %7229 }
0x1a91   : > { %v7231_v11 = vunpack.i.l.bf16 %v7230_v6  ;;  %v7232_v14 = vunpack.i.h.bf16 %v7230_v6 }
0x1a98   : > { %v7215_v53 = vpop.permute.xlu1 %7214  ;;  %v4706_v63 = vpop.permute.xlu2 %4705 }
0x1a99   : > { %v7216_v37 = vunpack.i.l.bf16 %v7215_v53  ;;  %v7217_v30 = vunpack.i.h.bf16 %v7215_v53 }
0x1aa0   : > { %v7210_v55 = vpop.permute.xlu0 %7209  ;;  %v4691_v36 = vpop.permute.xlu2 %4690 }
0x1aa1   : > { %v7211_v40 = vunpack.i.l.bf16 %v7210_v55  ;;  %v7212_v56 = vunpack.i.h.bf16 %v7210_v55  ;;  %v7235_v54 = vpop.permute.xlu1 %7234 }
0x1aa2   : > { %v7236_v47 = vunpack.i.l.bf16 %v7235_v54  ;;  %v7237_v52 = vunpack.i.h.bf16 %v7235_v54 }
0x1aa3   : > { %4720 = vmatpush.msrb.mxu1 %v7211_v40 }
0x1aa5   : > { %4721 = vmatpush.msrb.mxu1 %v7212_v56 }
0x1aa7   : > { %4722 = vmatpush.msrb.mxu1 %v7216_v37 }
0x1aa8   : > { %v7225_v58 = vpop.permute.xlu0 %7224 }
0x1aa9   : > { %4723 = vmatpush.msrb.mxu1 %v7217_v30  ;;  %v7226_v0 = vunpack.i.l.bf16 %v7225_v58  ;;  %v7227_v1 = vunpack.i.h.bf16 %v7225_v58  ;;  %v7245_v7 = vpop.permute.xlu1 %7244 }
0x1aaa   : > { %v7246_v13 = vunpack.i.l.bf16 %v7245_v7  ;;  %v7247_v21 = vunpack.i.h.bf16 %v7245_v7 }
0x1aab   : > { %4724 = vmatpush.msrb.mxu1 %v7221_v60 }
0x1aad   : > { %4725 = vmatpush.msrb.mxu1 %v7222_v61 }
0x1aaf   : > { %4726 = vmatpush.msrb.mxu1 %v7226_v0  ;;  %v4873_v0 = vld [vmem:[%s9759_s22 + $0x18] sm:$0xff]  ;;  %s9761_s22 = sld [smem:[#allocation47_spill]] }
0x1ab0   : > { %v7240_v3 = vpop.permute.xlu0 %7239 }
0x1ab1   : > { %v7241_v4 = vunpack.i.l.bf16 %v7240_v3  ;;  %4727 = vmatpush.msrb.mxu1 %v7227_v1  ;;  %v7242_v9 = vunpack.i.h.bf16 %v7240_v3  ;;  %v4696_v29 = vpop.permute.xlu1 %4695  ;;  %v4870_v1 = vld [vmem:[%s9760_s4] sm:$0xff]  ;;  %v4872_v3 = vld [vmem:[%s9760_s4 + $0x10] sm:$0xff] }
0x1ab3   : > { %4728 = vmatpush.msrb.mxu1 %v7236_v47  ;;  %4761 = vmatpush.msra.mxu3 %v7241_v4  ;;  %v4871_v47 = vld [vmem:[%s9760_s4 + $0x8] sm:$0xff] }
0x1ab5   : > { %4729 = vmatpush.msrb.mxu1 %v7237_v52  ;;  %4762 = vmatpush.msra.mxu3 %v7242_v9 }
0x1ab7   : > { %4730 = vmatpush.msrb.mxu1 %v7231_v11  ;;  %4763 = vmatpush.msra.mxu3 %v7246_v13 }
0x1ab8   : > { %v4701_v46 = vpop.permute.xlu0 %4700 }
0x1ab9   : > { %4731 = vmatpush.msrb.mxu1 %v7232_v14  ;;  %4764 = vmatpush.msra.mxu3 %v7247_v21 }
0x1aba   : > { %6013 = vmatmul.msk.f32.vlgmr.msra.gmra.mxu3 %vm3782_vm3, %v4677_v22 }
0x1abb   : > { %6009 = vmatpush.msk.msrb.mxu1 %vm4619_vm4, %v9303_v59 }
0x1abd   : > { %6010 = vmatpush.msk.msrb.mxu1 %vm4619_vm4, %v9305_v50 }
0x1abf   : > { %6011 = vmatpush.msk.msrb.mxu1 %vm4619_vm4, %v9295_v35 }
0x1ac1   : > { %6012 = vmatpush.msk.msrb.mxu1 %vm4619_vm4, %v9297_v31 }
0x1ac2   : > { %4736 = vmatmul.f32.vlgmr.msrb.gmra.mxu1 %v4676_v17  ;;  %6014 = vmatmul.msk.f32.gmra.mxu3 %vm3782_vm3, %v4679_v26 }
0x1aca   : > { %4739 = vmatmul.f32.gmra.mxu1 %v4678_v20  ;;  %6015 = vmatmul.msk.f32.gmra.mxu3 %vm3782_vm3, %v4681_v12 }
0x1ad2   : > { %4742 = vmatmul.f32.gmra.mxu1 %v4680_v27  ;;  %6016 = vmatmul.msk.f32.gmra.mxu3 %vm3782_vm3, %v4683_v5 }
0x1ada   : > { %4745 = vmatmul.f32.gmra.mxu1 %v4682_v23 }
0x1b3d   : > { %v4766_v10 = vpop.f32.mrf.mxu3 }
0x1b3f   : > { %v4737_v16 = vpop.f32.mrf.mxu1 }
0x1b40   : > { %v4738_v48 = vadd.f32 %v4737_v16, %v4691_v36 }
0x1b42   : > { %v4767_v51 = vadd.f32 %v4766_v10, %v4738_v48 }
0x1b44   : > { %v4778_v41 = vmax.f32 %v4767_v51, 0.0 }
0x1b45   : > { %v4769_v19 = vpop.f32.mrf.mxu3 }
0x1b46   : > { %v9346_v33 = vadd.f32 %v4778_v41, %v9292_v62 }
0x1b47   : > { %v4740_v32 = vpop.f32.mrf.mxu1 }
0x1b48   : > { %v4741_v15 = vadd.f32 %v4740_v32, %v4696_v29 }
0x1b4a   : > { %v4770_v28 = vadd.f32 %v4769_v19, %v4741_v15 }
0x1b4c   : > { %v4779_v39 = vmax.f32 %v4770_v28, 0.0 }
0x1b4d   : > { %v4772_v42 = vpop.f32.mrf.mxu3 }
0x1b4e   : > { %v9334_v45 = vadd.f32 %v4779_v39, %v9277_v18  ;;  %v4863_v39 = vld [vmem:[#allocation11 + $0x8] sm:$0xff] }
0x1b4f   : > { %v4743_v35 = vpop.f32.mrf.mxu1 }
0x1b50   : > { %v4744_v31 = vadd.f32 %v4743_v35, %v4701_v46  ;;  %4792 = vrot.lane.b32.xlu2 %v9334_v45, %s7829_s15  ;;  %v4864_v46 = vld [vmem:[#allocation11 + $0x10] sm:$0xff]  ;;  %v4867_v35 = vld [vmem:[#allocation11 + $0x28] sm:$0xff] }
0x1b52   : > { %v4773_v2 = vadd.f32 %v4772_v42, %v4744_v31  ;;  %v4862_v42 = vld [vmem:[#allocation11] sm:$0xff] }
0x1b53   : > { %v4866_v31 = vld [vmem:[#allocation11 + $0x20] sm:$0xff] }
0x1b54   : > { %v4780_v25 = vmax.f32 %v4773_v2, 0.0  ;;  %v4869_v2 = vld [vmem:[#allocation11 + $0x38] sm:$0xff] }
0x1b55   : > { %v4775_v34 = vpop.f32.mrf.mxu3 }
0x1b56   : > { %v9338_v8 = vadd.f32 %v4780_v25, %v9282_v24  ;;  %v4868_v25 = vld [vmem:[#allocation11 + $0x30] sm:$0xff] }
0x1b57   : > { %v4746_v59 = vpop.f32.mrf.mxu1 }
0x1b58   : > { %v4747_v50 = vadd.f32 %v4746_v59, %v4706_v63  ;;  %4794 = vrot.lane.b32.xlu1 %v9338_v8, %s7829_s15  ;;  %v4865_v63 = vld [vmem:[#allocation11 + $0x18] sm:$0xff] }
0x1b5a   : > { %v4776_v18 = vadd.f32 %v4775_v34, %v4747_v50 }
0x1b5c   : > { %v4781_v44 = vmax.f32 %v4776_v18, 0.0 }
0x1b5e   : > { %v9342_v49 = vadd.f32 %v4781_v44, %v9287_v43 }
0x1b60   : > { %4796 = vrot.lane.b32.xlu0 %v9342_v49, %s7829_s15 }
0x1b68   : > { %4790 = vrot.lane.b32.xlu0 %v9346_v33, %s7829_s15  ;;  %s7831_s15 = smov 96  }
0x1baa   : > { %v4793_v62 = vpop.permute.xlu2 %4792 }
0x1bab   : > { %v9361_v57 = vsel %vm1789_vm11, 0.0, %v4793_v62 }
0x1bac   : > { %v4807_v58 = vsel %vm3782_vm3, %v9361_v57, 0.0 }
0x1bca   : > { %v4795_v24 = vpop.permute.xlu1 %4794 }
0x1bcb   : > { %v9350_v53 = vsel %vm1789_vm11, 0.0, %v4795_v24 }
0x1bcc   : > { %v4808_v43 = vsel %vm3782_vm3, %v9350_v53, 0.0 }
0x1bd2   : > { %v4797_v55 = vpop.permute.xlu0 %4796 }
0x1bd3   : > { %v9353_v40 = vsel %vm1789_vm11, 0.0, %v4797_v55 }
0x1bd4   : > { %v4809_v56 = vsel %vm3782_vm3, %v9353_v40, 0.0 }
0x1bd5   : > { %v7258_v37 = vpack.i.bf16 %v4808_v43, %v4809_v56 }
0x1bd7   : > { %7249 = vrot.lane.b32.xlu1 %v7258_v37, %s7830_s18  ;;  %7259 = vrot.lane.b32.xlu0 %v7258_v37, %s9660_s7 }
0x1bda   : > { %v4791_v30 = vpop.permute.xlu0 %4790 }
0x1bdb   : > { %v9364_v54 = vsel %vm1789_vm11, 0.0, %v4791_v30 }
0x1bdc   : > { %v4806_v60 = vsel %vm3782_vm3, %v9364_v54, 0.0 }
0x1bdd   : > { %v7268_v61 = vpack.i.bf16 %v4806_v60, %v4807_v58 }
0x1bdf   : > { %7269 = vrot.lane.b32.xlu0 %v7268_v61, %s9733_s16  ;;  %7264 = vrot.lane.b32.xlu1 %v7268_v61, %s9660_s7  ;;  %s9762_s7 = smov %s9761_s22 }
0x1be0   : > { %7254 = vrot.lane.b32.xlu2 %v7268_v61, %s7830_s18  ;;  %s7833_s18 = smov 80  }
0x1be7   : > { %4891 = vperm.xlu0 %6330, %v4873_v0   ;;  %7279 = vrot.lane.b32.xlu1 %v7258_v37, %s7831_s15 }
0x1be8   : > { %7274 = vrot.lane.b32.xlu2 %v7258_v37, %s9733_s16  ;;  %s7832_s16 = smov 32  }
0x1bef   : > { %4876 = vperm.xlu0 %6330, %v4870_v1   ;;  %4886 = vperm.xlu1 %6331, %v4872_v3  }
0x1bf0   : > { %7284 = vrot.lane.b32.xlu2 %v7268_v61, %s7831_s15 }
0x1bf8   : > { %4881 = vperm.xlu2 %6582, %v4871_v47  }
0x1c3a   : > { %v7255_v4 = vpop.permute.xlu2 %7254 }
0x1c3b   : > { %v7256_v9 = vunpack.i.l.bf16 %v7255_v4  ;;  %v7257_v13 = vunpack.i.h.bf16 %v7255_v4 }
0x1c42   : > { %v7275_v14 = vpop.permute.xlu2 %7274 }
0x1c43   : > { %v7276_v27 = vunpack.i.l.bf16 %v7275_v14  ;;  %v7277_v16 = vunpack.i.h.bf16 %v7275_v14 }
0x1c49   : > { %v7250_v6 = vpop.permute.xlu1 %7249  ;;  %v7260_v11 = vpop.permute.xlu0 %7259 }
0x1c4a   : > { %v7251_v7 = vunpack.i.l.bf16 %v7250_v6  ;;  %v7252_v52 = vunpack.i.h.bf16 %v7250_v6  ;;  %v7261_v22 = vunpack.i.l.bf16 %v7260_v11  ;;  %v7262_v17 = vunpack.i.h.bf16 %v7260_v11  ;;  %v7285_v23 = vpop.permute.xlu2 %7284 }
0x1c4b   : > { %v7286_v29 = vunpack.i.l.bf16 %v7285_v23  ;;  %v7287_v15 = vunpack.i.h.bf16 %v7285_v23 }
0x1c4c   : > { %4906 = vmatpush.msra.mxu0 %v7251_v7 }
0x1c4e   : > { %4907 = vmatpush.msra.mxu0 %v7252_v52 }
0x1c50   : > { %4908 = vmatpush.msra.mxu0 %v7256_v9 }
0x1c51   : > { %v7265_v21 = vpop.permute.xlu1 %7264  ;;  %v7270_v10 = vpop.permute.xlu0 %7269 }
0x1c52   : > { %4909 = vmatpush.msra.mxu0 %v7257_v13  ;;  %v7266_v26 = vunpack.i.l.bf16 %v7265_v21  ;;  %v7267_v20 = vunpack.i.h.bf16 %v7265_v21  ;;  %v7271_v32 = vunpack.i.l.bf16 %v7270_v10  ;;  %v7272_v28 = vunpack.i.h.bf16 %v7270_v10  ;;  %v4882_v36 = vpop.permute.xlu2 %4881 }
0x1c54   : > { %4910 = vmatpush.msra.mxu0 %v7261_v22 }
0x1c56   : > { %4911 = vmatpush.msra.mxu0 %v7262_v17 }
0x1c58   : > { %4912 = vmatpush.msra.mxu0 %v7266_v26  ;;  %v5060_v26 = vld [vmem:[%s9761_s22 + $0x18] sm:$0xff]  ;;  %s9764_s22 = sld [smem:[#allocation49_spill]] }
0x1c59   : > { %v7280_v12 = vpop.permute.xlu1 %7279  ;;  %v4892_v24 = vpop.permute.xlu0 %4891 }
0x1c5a   : > { %v7281_v5 = vunpack.i.l.bf16 %v7280_v12  ;;  %4913 = vmatpush.msra.mxu0 %v7267_v20  ;;  %v7282_v19 = vunpack.i.h.bf16 %v7280_v12  ;;  %v5057_v20 = vld [vmem:[%s9762_s7] sm:$0xff]  ;;  %v5059_v12 = vld [vmem:[%s9762_s7 + $0x10] sm:$0xff] }
0x1c5c   : > { %4914 = vmatpush.msra.mxu0 %v7276_v27  ;;  %4947 = vmatpush.msrb.mxu2 %v7281_v5  ;;  %v5058_v27 = vld [vmem:[%s9762_s7 + $0x8] sm:$0xff] }
0x1c5e   : > { %4915 = vmatpush.msra.mxu0 %v7277_v16  ;;  %4948 = vmatpush.msrb.mxu2 %v7282_v19  ;;  %s9765_s2 = smov %s9764_s22 }
0x1c60   : > { %4916 = vmatpush.msra.mxu0 %v7271_v32  ;;  %4949 = vmatpush.msrb.mxu2 %v7286_v29 }
0x1c61   : > { %v4887_v55 = vpop.permute.xlu1 %4886  ;;  %v4877_v58 = vpop.permute.xlu0 %4876 }
0x1c62   : > { %4917 = vmatpush.msra.mxu0 %v7272_v28  ;;  %4950 = vmatpush.msrb.mxu2 %v7287_v15 }
0x1c63   : > { %6021 = vmatmul.msk.f32.vlgmr.msrb.gmra.mxu2 %vm3782_vm3, %v4863_v39 }
0x1c64   : > { %6017 = vmatpush.msk.msra.mxu0 %vm3782_vm3, %v9353_v40 }
0x1c66   : > { %6018 = vmatpush.msk.msra.mxu0 %vm3782_vm3, %v9350_v53 }
0x1c68   : > { %6019 = vmatpush.msk.msra.mxu0 %vm3782_vm3, %v9361_v57 }
0x1c6a   : > { %6020 = vmatpush.msk.msra.mxu0 %vm3782_vm3, %v9364_v54 }
0x1c6b   : > { %4922 = vmatmul.f32.vlgmr.msra.gmra.mxu0 %v4862_v42  ;;  %6022 = vmatmul.msk.f32.gmra.mxu2 %vm3782_vm3, %v4865_v63 }
0x1c73   : > { %4925 = vmatmul.f32.gmra.mxu0 %v4864_v46  ;;  %6023 = vmatmul.msk.f32.gmra.mxu2 %vm3782_vm3, %v4867_v35 }
0x1c7b   : > { %4928 = vmatmul.f32.gmra.mxu0 %v4866_v31  ;;  %6024 = vmatmul.msk.f32.gmra.mxu2 %vm3782_vm3, %v4869_v2 }
0x1c83   : > { %4931 = vmatmul.f32.gmra.mxu0 %v4868_v25 }
0x1ce6   : > { %v4952_v59 = vpop.f32.mrf.mxu2 }
0x1ce8   : > { %v4923_v34 = vpop.f32.mrf.mxu0 }
0x1ce9   : > { %v4924_v60 = vadd.f32 %v4923_v34, %v4877_v58 }
0x1ceb   : > { %v4953_v0 = vadd.f32 %v4952_v59, %v4924_v60 }
0x1ced   : > { %v4964_v3 = vmax.f32 %v4953_v0, 0.0 }
0x1cee   : > { %v4955_v50 = vpop.f32.mrf.mxu2 }
0x1cef   : > { %v9404_v47 = vadd.f32 %v4964_v3, %v9346_v33 }
0x1cf0   : > { %v4926_v48 = vpop.f32.mrf.mxu0 }
0x1cf1   : > { %v4927_v18 = vadd.f32 %v4926_v48, %v4882_v36 }
0x1cf3   : > { %v4956_v44 = vadd.f32 %v4955_v50, %v4927_v18 }
0x1cf5   : > { %v4965_v51 = vmax.f32 %v4956_v44, 0.0 }
0x1cf6   : > { %v4958_v41 = vpop.f32.mrf.mxu2 }
0x1cf7   : > { %v9392_v53 = vadd.f32 %v4965_v51, %v9334_v45  ;;  %v5050_v51 = vld [vmem:[#allocation13 + $0x8] sm:$0xff] }
0x1cf8   : > { %v4929_v40 = vpop.f32.mrf.mxu0 }
0x1cf9   : > { %v4930_v43 = vadd.f32 %v4929_v40, %v4887_v55  ;;  %4978 = vrot.lane.b32.xlu0 %v9392_v53, %s7832_s16  ;;  %v5051_v55 = vld [vmem:[#allocation13 + $0x10] sm:$0xff]  ;;  %v5054_v40 = vld [vmem:[#allocation13 + $0x28] sm:$0xff] }
0x1cfb   : > { %v4959_v56 = vadd.f32 %v4958_v41, %v4930_v43  ;;  %v5049_v41 = vld [vmem:[#allocation13] sm:$0xff] }
0x1cfc   : > { %v5053_v43 = vld [vmem:[#allocation13 + $0x20] sm:$0xff] }
0x1cfd   : > { %v4966_v37 = vmax.f32 %v4959_v56, 0.0  ;;  %v5056_v56 = vld [vmem:[#allocation13 + $0x38] sm:$0xff] }
0x1cfe   : > { %v4961_v30 = vpop.f32.mrf.mxu2 }
0x1cff   : > { %v9396_v62 = vadd.f32 %v4966_v37, %v9338_v8  ;;  %v5055_v37 = vld [vmem:[#allocation13 + $0x30] sm:$0xff] }
0x1d00   : > { %v4932_v57 = vpop.f32.mrf.mxu0 }
0x1d01   : > { %v4933_v54 = vadd.f32 %v4932_v57, %v4892_v24  ;;  %4980 = vrot.lane.b32.xlu2 %v9396_v62, %s7832_s16  ;;  %v5052_v24 = vld [vmem:[#allocation13 + $0x18] sm:$0xff] }
0x1d03   : > { %v4962_v45 = vadd.f32 %v4961_v30, %v4933_v54 }
0x1d05   : > { %v4967_v61 = vmax.f32 %v4962_v45, 0.0 }
0x1d07   : > { %v9400_v1 = vadd.f32 %v4967_v61, %v9342_v49 }
0x1d09   : > { %4982 = vrot.lane.b32.xlu1 %v9400_v1, %s7832_s16 }
0x1d11   : > { %4976 = vrot.lane.b32.xlu1 %v9404_v47, %s7832_s16  ;;  %s9763_s16 = smov 112  }
0x1d5b   : > { %v4981_v8 = vpop.permute.xlu2 %4980 }
0x1d5c   : > { %v9408_v4 = vsel %vm3782_vm3, 0.0, %v4981_v8 }
0x1d5d   : > { %v4995_v49 = vsel %vm4992_vm5, %v9408_v4, 0.0 }
0x1d6b   : > { %v4979_v9 = vpop.permute.xlu0 %4978 }
0x1d6c   : > { %v9419_v11 = vsel %vm3782_vm3, 0.0, %v4979_v9 }
0x1d6d   : > { %v4994_v21 = vsel %vm4992_vm5, %v9419_v11, 0.0 }
0x1d7b   : > { %v4983_v6 = vpop.permute.xlu1 %4982 }
0x1d7c   : > { %v9411_v7 = vsel %vm3782_vm3, 0.0, %v4983_v6 }
0x1d7d   : > { %v4996_v52 = vsel %vm4992_vm5, %v9411_v7, 0.0 }
0x1d7e   : > { %v7298_v33 = vpack.i.bf16 %v4995_v49, %v4996_v52 }
0x1d80   : > { %7289 = vrot.lane.b32.xlu2 %v7298_v33, %s7833_s18  ;;  %7299 = vrot.lane.b32.xlu1 %v7298_v33, %s7831_s15 }
0x1d83   : > { %v4977_v13 = vpop.permute.xlu1 %4976 }
0x1d84   : > { %v9422_v14 = vsel %vm3782_vm3, 0.0, %v4977_v13 }
0x1d85   : > { %v4993_v22 = vsel %vm4992_vm5, %v9422_v14, 0.0 }
0x1d86   : > { %v7308_v17 = vpack.i.bf16 %v4993_v22, %v4994_v21 }
0x1d88   : > { %7309 = vrot.lane.b32.xlu1 %v7308_v17, %s9763_s16  ;;  %7304 = vrot.lane.b32.xlu2 %v7308_v17, %s7831_s15  ;;  %s7836_s15 = smov 53  }
0x1d89   : > { %7294 = vrot.lane.b32.xlu0 %v7308_v17, %s7833_s18  ;;  %s7837_s18 = smov 78  }
0x1d90   : > { %5078 = vperm.xlu1 %6331, %v5060_v26   ;;  %7319 = vrot.lane.b32.xlu2 %v7298_v33, %s7834_s1 }
0x1d91   : > { %7314 = vrot.lane.b32.xlu0 %v7298_v33, %s9763_s16  ;;  %s7838_s16 = smov 103  }
0x1d98   : > { %5063 = vperm.xlu1 %6331, %v5057_v20   ;;  %5073 = vperm.xlu2 %6582, %v5059_v12  }
0x1d99   : > { %7324 = vrot.lane.b32.xlu0 %v7308_v17, %s7834_s1  ;;  %s7835_s1 = smov 50  }
0x1da1   : > { %5068 = vperm.xlu0 %6330, %v5058_v27  }
0x1dda   : > { %v7290_v5 = vpop.permute.xlu2 %7289 }
0x1ddb   : > { %v7291_v23 = vunpack.i.l.bf16 %v7290_v5  ;;  %v7292_v10 = vunpack.i.h.bf16 %v7290_v5 }
0x1ddd   : > { %5093 = vmatpush.msra.mxu1 %v7291_v23 }
0x1ddf   : > { %5094 = vmatpush.msra.mxu1 %v7292_v10 }
0x1de2   : > { %v7305_v16 = vpop.permute.xlu2 %7304 }
0x1de3   : > { %v7306_v31 = vunpack.i.l.bf16 %v7305_v16  ;;  %v7307_v2 = vunpack.i.h.bf16 %v7305_v16 }
0x1dea   : > { %v7320_v19 = vpop.permute.xlu2 %7319 }
0x1deb   : > { %v7321_v29 = vunpack.i.l.bf16 %v7320_v19  ;;  %v7322_v32 = vunpack.i.h.bf16 %v7320_v19 }
0x1ded   : > { %5134 = vmatpush.msrb.mxu3 %v7321_v29 }
0x1def   : > { %5135 = vmatpush.msrb.mxu3 %v7322_v32 }
0x1df2   : > { %v7300_v39 = vpop.permute.xlu1 %7299  ;;  %v5074_v8 = vpop.permute.xlu2 %5073 }
0x1df3   : > { %v7301_v63 = vunpack.i.l.bf16 %v7300_v39  ;;  %v7302_v46 = vunpack.i.h.bf16 %v7300_v39 }
0x1dfa   : > { %v7310_v59 = vpop.permute.xlu1 %7309 }
0x1dfb   : > { %v7295_v15 = vpop.permute.xlu0 %7294  ;;  %v7311_v36 = vunpack.i.l.bf16 %v7310_v59  ;;  %v7312_v18 = vunpack.i.h.bf16 %v7310_v59 }
0x1dfc   : > { %v7296_v28 = vunpack.i.l.bf16 %v7295_v15  ;;  %v7297_v42 = vunpack.i.h.bf16 %v7295_v15 }
0x1dfe   : > { %5095 = vmatpush.msra.mxu1 %v7296_v28 }
0x1e00   : > { %5096 = vmatpush.msra.mxu1 %v7297_v42 }
0x1e02   : > { %5097 = vmatpush.msra.mxu1 %v7301_v63  ;;  %v5079_v6 = vpop.permute.xlu1 %5078  ;;  %v5246_v63 = vld [vmem:[%s9764_s22 + $0x8] sm:$0xff]  ;;  %s9768_s22 = sld [smem:[#allocation53_spill]] }
0x1e03   : > { %v7315_v35 = vpop.permute.xlu0 %7314 }
0x1e04   : > { %5098 = vmatpush.msra.mxu1 %v7302_v46  ;;  %v7316_v25 = vunpack.i.l.bf16 %v7315_v35  ;;  %v7317_v34 = vunpack.i.h.bf16 %v7315_v35  ;;  %v5245_v46 = vld [vmem:[%s9765_s2] sm:$0xff]  ;;  %v5248_v35 = vld [vmem:[%s9765_s2 + $0x18] sm:$0xff] }
0x1e06   : > { %5099 = vmatpush.msra.mxu1 %v7306_v31  ;;  %v5247_v31 = vld [vmem:[%s9765_s2 + $0x10] sm:$0xff] }
0x1e08   : > { %5100 = vmatpush.msra.mxu1 %v7307_v2 }
0x1e0a   : > { %5101 = vmatpush.msra.mxu1 %v7316_v25  ;;  %v5064_v21 = vpop.permute.xlu1 %5063 }
0x1e0b   : > { %v7325_v50 = vpop.permute.xlu0 %7324 }
0x1e0c   : > { %v7326_v48 = vunpack.i.l.bf16 %v7325_v50  ;;  %5102 = vmatpush.msra.mxu1 %v7317_v34  ;;  %v7327_v44 = vunpack.i.h.bf16 %v7325_v50 }
0x1e0e   : > { %5103 = vmatpush.msra.mxu1 %v7311_v36  ;;  %5136 = vmatpush.msrb.mxu3 %v7326_v48 }
0x1e10   : > { %5104 = vmatpush.msra.mxu1 %v7312_v18  ;;  %5137 = vmatpush.msrb.mxu3 %v7327_v44 }
0x1e11   : > { %6029 = vmatmul.msk.f32.vlgmr.msrb.gmra.mxu3 %vm3782_vm3, %v5050_v51 }
0x1e12   : > { %6025 = vmatpush.msk.msra.mxu1 %vm4992_vm5, %v9411_v7 }
0x1e13   : > { %v5069_v58 = vpop.permute.xlu0 %5068 }
0x1e14   : > { %6026 = vmatpush.msk.msra.mxu1 %vm4992_vm5, %v9408_v4 }
0x1e16   : > { %6027 = vmatpush.msk.msra.mxu1 %vm4992_vm5, %v9419_v11 }
0x1e18   : > { %6028 = vmatpush.msk.msra.mxu1 %vm4992_vm5, %v9422_v14 }
0x1e19   : > { %5109 = vmatmul.f32.vlgmr.msra.gmra.mxu1 %v5049_v41  ;;  %6030 = vmatmul.msk.f32.gmra.mxu3 %vm3782_vm3, %v5052_v24 }
0x1e21   : > { %5112 = vmatmul.f32.gmra.mxu1 %v5051_v55  ;;  %6031 = vmatmul.msk.f32.gmra.mxu3 %vm3782_vm3, %v5054_v40 }
0x1e29   : > { %5115 = vmatmul.f32.gmra.mxu1 %v5053_v43  ;;  %6032 = vmatmul.msk.f32.gmra.mxu3 %vm3782_vm3, %v5056_v56 }
0x1e31   : > { %5118 = vmatmul.f32.gmra.mxu1 %v5055_v37 }
0x1e94   : > { %v5139_v57 = vpop.f32.mrf.mxu3 }
0x1e96   : > { %v5110_v30 = vpop.f32.mrf.mxu1 }
0x1e97   : > { %v5111_v22 = vadd.f32 %v5110_v30, %v5064_v21 }
0x1e99   : > { %v5140_v26 = vadd.f32 %v5139_v57, %v5111_v22 }
0x1e9b   : > { %v5151_v12 = vmax.f32 %v5140_v26, 0.0  ;;  %v7841_v26 = vmov 2  }
0x1e9c   : > { %v5142_v54 = vpop.f32.mrf.mxu3 }
0x1e9d   : > { %v9460_v27 = vadd.f32 %v5151_v12, %v9404_v47 }
0x1e9e   : > { %v5113_v60 = vpop.f32.mrf.mxu1 }
0x1e9f   : > { %v5114_v45 = vadd.f32 %v5113_v60, %v5069_v58 }
0x1ea1   : > { %v5143_v61 = vadd.f32 %v5142_v54, %v5114_v45 }
0x1ea3   : > { %v5152_v0 = vmax.f32 %v5143_v61, 0.0 }
0x1ea4   : > { %v5145_v3 = vpop.f32.mrf.mxu3 }
0x1ea5   : > { %v9448_v4 = vadd.f32 %v5152_v0, %v9392_v53  ;;  %v5238_v0 = vld [vmem:[#allocation14 + $0x8] sm:$0xff] }
0x1ea6   : > { %v5116_v7 = vpop.f32.mrf.mxu1 }
0x1ea7   : > { %v5117_v49 = vadd.f32 %v5116_v7, %v5074_v8  ;;  %5165 = vrot.lane.b32.xlu1 %v9448_v4, %s7835_s1  ;;  %v5240_v8 = vld [vmem:[#allocation14 + $0x18] sm:$0xff]  ;;  %v5242_v7 = vld [vmem:[#allocation14 + $0x28] sm:$0xff] }
0x1ea9   : > { %v5146_v52 = vadd.f32 %v5145_v3, %v5117_v49  ;;  %v5237_v3 = vld [vmem:[#allocation14] sm:$0xff] }
0x1eaa   : > { %v5241_v49 = vld [vmem:[#allocation14 + $0x20] sm:$0xff] }
0x1eab   : > { %v5153_v33 = vmax.f32 %v5146_v52, 0.0  ;;  %v5244_v52 = vld [vmem:[#allocation14 + $0x38] sm:$0xff] }
0x1eac   : > { %v5148_v13 = vpop.f32.mrf.mxu3 }
0x1ead   : > { %v9452_v9 = vadd.f32 %v5153_v33, %v9396_v62  ;;  %v5243_v33 = vld [vmem:[#allocation14 + $0x30] sm:$0xff] }
0x1eae   : > { %v5119_v11 = vpop.f32.mrf.mxu1 }
0x1eaf   : > { %v5120_v14 = vadd.f32 %v5119_v11, %v5079_v6  ;;  %5167 = vrot.lane.b32.xlu0 %v9452_v9, %s7835_s1  ;;  %v5239_v6 = vld [vmem:[#allocation14 + $0x10] sm:$0xff] }
0x1eb1   : > { %v5149_v53 = vadd.f32 %v5148_v13, %v5120_v14 }
0x1eb3   : > { %v5154_v17 = vmax.f32 %v5149_v53, 0.0 }
0x1eb5   : > { %v9456_v20 = vadd.f32 %v5154_v17, %v9400_v1  ;;  %v7840_v17 = vmov 1  }
0x1eb7   : > { %5169 = vrot.lane.b32.xlu2 %v9456_v20, %s7835_s1 }
0x1ebf   : > { %5163 = vrot.lane.b32.xlu2 %v9460_v27, %s7835_s1  ;;  %s7839_s1 = smov 28  }
0x1f11   : > { %v5170_v62 = vpop.permute.xlu2 %5169 }
0x1f12   : > { %v9471_v47 = vsel %vm5175_vm6, 0.0, %v5170_v62 }
0x1f13   : > { %v5184_v28 = vsel %vm5180_vm7, %v9471_v47, 0.0 }
0x1f19   : > { %v5166_v5 = vpop.permute.xlu1 %5165  ;;  %v5164_v23 = vpop.permute.xlu2 %5163 }
0x1f1a   : > { %v9463_v10 = vsel %vm5175_vm6, 0.0, %v5166_v5  ;;  %v9465_v16 = vsel %vm5175_vm6, 0.0, %v5164_v23 }
0x1f1b   : > { %v5182_v1 = vsel %vm5180_vm7, %v9463_v10, 0.0  ;;  %v5181_v19 = vsel %vm5180_vm7, %v9465_v16, 0.0 }
0x1f1c   : > { %v7333_v29 = vpack.i.bf16 %v5181_v19, %v5182_v1 }
0x1f1e   : > { %7334 = vrot.lane.b32.xlu1 %v7333_v29, %s7836_s15 }
0x1f21   : > { %v5168_v32 = vpop.permute.xlu0 %5167 }
0x1f22   : > { %v9473_v15 = vsel %vm5175_vm6, 0.0, %v5168_v32 }
0x1f23   : > { %v5183_v39 = vsel %vm5180_vm7, %v9473_v15, 0.0 }
0x1f24   : > { %v7353_v42 = vpack.i.bf16 %v5183_v39, %v5184_v28 }
0x1f26   : > { %7329 = vrot.lane.b32.xlu0 %v7353_v42, %s7836_s15  ;;  %7339 = vrot.lane.b32.xlu2 %v7353_v42, %s7837_s18  ;;  %s9766_s15 = sld [smem:[#allocation52_spill]] }
0x1f27   : > { %7354 = vrot.lane.b32.xlu1 %v7353_v42, %s7838_s16 }
0x1f2c   : > { %v5348_v11 = vld [vmem:[%s9766_s15 + $0x8] sm:$0xff] }
0x1f2d   : > { %6077 = vmatpush.msrb.mxu1 %v5348_v11 }
0x1f2e   : > { %7349 = vrot.lane.b32.xlu2 %v7333_v29, %s7838_s16  ;;  %7344 = vrot.lane.b32.xlu0 %v7333_v29, %s7837_s18  ;;  %s9771_s18 = sld [smem:[#allocation57_spill]] }
0x1f2f   : > { %7364 = vrot.lane.b32.xlu1 %v7333_v29, %s7839_s1  ;;  %s9772_s16 = sld [smem:[#allocation55_spill]] }
0x1f36   : > { %5256 = vperm.xlu2 %6582, %v5246_v63   ;;  %7359 = vrot.lane.b32.xlu0 %v7353_v42, %s7839_s1  ;;  %s9767_s1 = smov %s9766_s15  ;;  %s1406_s15 = sand.u32 1, %s9771_s18  }
0x1f37   : > { %5251 = vperm.xlu1 %6331, %v5245_v46   ;;  %v5347_v13 = vld [vmem:[%s9767_s1] sm:$0xff]  ;;  %s9769_s1 = smov %s9768_s22  ;;  %s1407_s2 = scalar_lea.vmem [#allocation17], %s1406_s15 }
0x1f38   : > { %6078 = vmatpush.msrb.mxu1 %v5347_v13  ;;  %s5703_s3 = sshll.u32 %s1407_s2, 4  ;;  %s5704_s3 = int_to_ptr.vmem [resolvable:$true] %s5703_s3 }
0x1f3e   : > { %5266 = vperm.xlu2 %6582, %v5248_v35   ;;  %5261 = vperm.xlu0 %6330, %v5247_v31  }
0x1f3f   : > { %7369 = vset.pattern.permute.xlu1 %v7841_v26 }
0x1f46   : > { %7368 = vset.pattern.permute.xlu2 %v7840_v17 }
0x1f80   : > { %v7340_v36 = vpop.permute.xlu2 %7339 }
0x1f81   : > { %v7341_v51 = vunpack.i.l.bf16 %v7340_v36  ;;  %v7342_v41 = vunpack.i.h.bf16 %v7340_v36  ;;  %v7843_v36 = vmov 4  }
0x1f88   : > { %v7350_v37 = vpop.permute.xlu2 %7349 }
0x1f89   : > { %v7351_v58 = vunpack.i.l.bf16 %v7350_v37  ;;  %v7352_v45 = vunpack.i.h.bf16 %v7350_v37 }
0x1f90   : > { %v7335_v2 = vpop.permute.xlu1 %7334 }
0x1f91   : > { %v7336_v50 = vunpack.i.l.bf16 %v7335_v2  ;;  %v7337_v48 = vunpack.i.h.bf16 %v7335_v2 }
0x1f98   : > { %v7330_v25 = vpop.permute.xlu0 %7329 }
0x1f99   : > { %v7331_v59 = vunpack.i.l.bf16 %v7330_v25  ;;  %v7332_v34 = vunpack.i.h.bf16 %v7330_v25  ;;  %v7355_v18 = vpop.permute.xlu1 %7354 }
0x1f9a   : > { %v7356_v43 = vunpack.i.l.bf16 %v7355_v18  ;;  %v7357_v30 = vunpack.i.h.bf16 %v7355_v18 }
0x1f9b   : > { %5281 = vmatpush.msrb.mxu0 %v7331_v59 }
0x1f9d   : > { %5282 = vmatpush.msrb.mxu0 %v7332_v34 }
0x1f9f   : > { %5283 = vmatpush.msrb.mxu0 %v7336_v50  ;;  %v7842_v50 = vmov 3  }
0x1fa0   : > { %v7345_v44 = vpop.permute.xlu0 %7344 }
0x1fa1   : > { %5284 = vmatpush.msrb.mxu0 %v7337_v48  ;;  %v7346_v24 = vunpack.i.l.bf16 %v7345_v44  ;;  %v7347_v55 = vunpack.i.h.bf16 %v7345_v44  ;;  %v7365_v57 = vpop.permute.xlu1 %7364  ;;  %v7845_v48 = vmov 5   ;;  %v7846_v44 = vmov 7  }
0x1fa2   : > { %v7366_v60 = vunpack.i.l.bf16 %v7365_v57  ;;  %v7367_v61 = vunpack.i.h.bf16 %v7365_v57 }
0x1fa3   : > { %5285 = vmatpush.msrb.mxu0 %v7341_v51 }
0x1fa5   : > { %5286 = vmatpush.msrb.mxu0 %v7342_v41  ;;  %v6045_v41 = vld [vmem:[%s9768_s22 + $0x20] sm:$0xff]  ;;  %s5701_s22 = scalar_lea.hbm %s9772_s16, %s8088_s0  ;;  %s5693_s0 = scalar_lea.sflag [#allocation4], %s1406_s15 }
0x1fa6   : > { %s5705_s4 = sshll.u32 %s5701_s22, 4  ;;  %s5706_s4 = int_to_ptr.hbm [resolvable:$true] %s5705_s4 }
0x1fa7   : > { %5287 = vmatpush.msrb.mxu0 %v7346_v24  ;;  %v5390_v24 = vld [vmem:[%s9769_s1] sm:$0xff]  ;;  %s7687_s18 = sshra.s32 %s5706_s4, 4  ;;  %s7688_s18 = int_to_ptr.hbm [resolvable:$true] %s7687_s18 }
0x1fa8   : > { %v7360_v40 = vpop.permute.xlu0 %7359 }
0x1fa9   : > { %v7361_v56 = vunpack.i.l.bf16 %v7360_v40  ;;  %5288 = vmatpush.msrb.mxu0 %v7347_v55  ;;  %v7362_v54 = vunpack.i.h.bf16 %v7360_v40  ;;  %v5252_v21 = vpop.permute.xlu1 %5251 }
0x1fab   : > { %5289 = vmatpush.msrb.mxu0 %v7356_v43  ;;  %5322 = vmatpush.msra.mxu2 %v7361_v56  ;;  %v6049_v43 = vld [vmem:[%s9769_s1 + $0x40] sm:$0xff] }
0x1fad   : > { %5290 = vmatpush.msrb.mxu0 %v7357_v30  ;;  %5323 = vmatpush.msra.mxu2 %v7362_v54 }
0x1faf   : > { %5291 = vmatpush.msrb.mxu0 %v7351_v58  ;;  %5324 = vmatpush.msra.mxu2 %v7366_v60  ;;  %v6053_v60 = vld [vmem:[%s9769_s1 + $0x60] sm:$0xff] }
0x1fb1   : > { %5292 = vmatpush.msrb.mxu0 %v7352_v45  ;;  %5325 = vmatpush.msra.mxu2 %v7367_v61  ;;  %v6057_v45 = vld [vmem:[%s9769_s1 + $0x80] sm:$0xff] }
0x1fb2   : > { %6037 = vmatmul.msk.f32.vlgmr.msra.gmra.mxu2 %vm3782_vm3, %v5238_v0 }
0x1fb3   : > { %6033 = vmatpush.msk.msrb.mxu0 %vm5180_vm7, %v9471_v47 }
0x1fb5   : > { %6034 = vmatpush.msk.msrb.mxu0 %vm5180_vm7, %v9473_v15  ;;  %v5262_v15 = vpop.permute.xlu0 %5261 }
0x1fb7   : > { %6035 = vmatpush.msk.msrb.mxu0 %vm5180_vm7, %v9463_v10  ;;  %v5257_v10 = vpop.permute.xlu2 %5256 }
0x1fb9   : > { %6036 = vmatpush.msk.msrb.mxu0 %vm5180_vm7, %v9465_v16 }
0x1fba   : > { %5297 = vmatmul.f32.vlgmr.msrb.gmra.mxu0 %v5237_v3  ;;  %6038 = vmatmul.msk.f32.gmra.mxu2 %vm3782_vm3, %v5240_v8 }
0x1fbb   : > { %5375 = vmatpush.msra.mxu0 %v5348_v11 }
0x1fbd   : > { %5376 = vmatpush.msra.mxu0 %v5347_v13 }
0x1fbf   : > { %v5267_v46 = vpop.permute.xlu2 %5266 }
0x1fc2   : > { %5300 = vmatmul.f32.gmra.mxu0 %v5239_v6  ;;  %6039 = vmatmul.msk.f32.gmra.mxu2 %vm3782_vm3, %v5242_v7 }
0x1fca   : > { %5303 = vmatmul.f32.gmra.mxu0 %v5241_v49  ;;  %6040 = vmatmul.msk.f32.gmra.mxu2 %vm3782_vm3, %v5244_v52  ;;  %v6061_v49 = vld [vmem:[%s9769_s1 + $0xa0] sm:$0xff] }
0x1fcb   : > { %v6065_v52 = vld [vmem:[%s9769_s1 + $0xc0] sm:$0xff] }
0x1fd2   : > { %5306 = vmatmul.f32.gmra.mxu0 %v5243_v33 }
0x2035   : > { %v5327_v14 = vpop.f32.mrf.mxu2 }
0x2037   : > { %v5298_v22 = vpop.f32.mrf.mxu0 }
0x2038   : > { %v5299_v53 = vadd.f32 %v5298_v22, %v5252_v21 }
0x203a   : > { %v5328_v12 = vadd.f32 %v5327_v14, %v5299_v53  ;;  %v6069_v14 = vld [vmem:[%s9769_s1 + $0xe0] sm:$0xff] }
0x203c   : > { %v5339_v62 = vmax.f32 %v5328_v12, 0.0 }
0x203d   : > { %v5330_v5 = vpop.f32.mrf.mxu2 }
0x203e   : > { %v5343_v23 = vadd.f32 %v5339_v62, %v9460_v27 }
0x203f   : > { %v5301_v16 = vpop.f32.mrf.mxu0 }
0x2040   : > { %v5302_v1 = vadd.f32 %v5301_v16, %v5257_v10  ;;  %6041 = vmatmul.msk.f32.vlgmr.msra.gmra.mxu0 %vm1789_vm11, %v5343_v23 }
0x2042   : > { %v5331_v19 = vadd.f32 %v5330_v5, %v5302_v1 }
0x2044   : > { %v5340_v29 = vmax.f32 %v5331_v19, 0.0 }
0x2045   : > { %v5333_v47 = vpop.f32.mrf.mxu2 }
0x2046   : > { %v5344_v32 = vadd.f32 %v5340_v29, %v9448_v4 }
0x2047   : > { %v5304_v28 = vpop.f32.mrf.mxu0 }
0x2048   : > { %v5305_v39 = vadd.f32 %v5304_v28, %v5262_v15  ;;  %6042 = vmatmul.msk.f32.vlgmr.msrb.gmra.mxu1 %vm1789_vm11, %v5344_v32 }
0x204a   : > { %v5334_v42 = vadd.f32 %v5333_v47, %v5305_v39 }
0x204c   : > { %v5341_v63 = vmax.f32 %v5334_v42, 0.0 }
0x204d   : > { %v5336_v31 = vpop.f32.mrf.mxu2 }
0x204e   : > { %v5345_v27 = vadd.f32 %v5341_v63, %v9452_v9  ;;  %v7844_v9 = vmov 6   ;;  %v5391_v63 = vld [vmem:[%s9769_s1 + $0x8] sm:$0xff] }
0x204f   : > { %v5307_v35 = vpop.f32.mrf.mxu0 }
0x2050   : > { %v5308_v2 = vadd.f32 %v5307_v35, %v5267_v46  ;;  %6043 = vmatmul.msk.f32.gmra.mxu1 %vm1789_vm11, %v5345_v27  ;;  %v5392_v46 = vld [vmem:[%s9769_s1 + $0x10] sm:$0xff]  ;;  %v6046_v35 = vld [vmem:[%s9769_s1 + $0x28] sm:$0xff] }
0x2052   : > { %v5337_v25 = vadd.f32 %v5336_v31, %v5308_v2  ;;  %v6047_v2 = vld [vmem:[%s9769_s1 + $0x30] sm:$0xff] }
0x2054   : > { %v5342_v59 = vmax.f32 %v5337_v25, 0.0 }
0x2056   : > { %v5346_v34 = vadd.f32 %v5342_v59, %v9456_v20 }
0x2058   : > { %6044 = vmatmul.msk.f32.gmra.mxu1 %vm1789_vm11, %v5346_v34  ;;  %vm5690_vm11 = vcmask 385024  }
0x20bd   : > { %v5378_v4 = vpop.f32.mrf.mxu0 }
0x20be   : > { %5457 = vperm.xlu1 %7369, %v5378_v4   ;;  %5428 = vperm.xlu2 %7368, %v5378_v4  }
0x20bf   : > { %5396 = vperm.xlu0 %6330, %v5378_v4  }
0x20c5   : > { %v5381_v18 = vpop.f32.mrf.mxu1 }
0x20c6   : > { %7370 = vset.pattern.permute.xlu1 %v7842_v50  ;;  %7371 = vset.pattern.permute.xlu2 %v7843_v36 }
0x20c7   : > { %7373 = vset.pattern.permute.xlu0 %v7844_v9  ;;  %5486 = vperm.xlu1 %7370, %v5378_v4  }
0x20c8   : > { %5515 = vperm.xlu2 %7371, %v5378_v4   ;;  %5573 = vperm.xlu0 %7373, %v5378_v4  }
0x20cd   : > { %v5384_v20 = vpop.f32.mrf.mxu1 }
0x20cf   : > { %7372 = vset.pattern.permute.xlu1 %v7845_v48 }
0x20d0   : > { %7374 = vset.pattern.permute.xlu2 %v7846_v44  ;;  %7376 = vset.pattern.permute.xlu0 %v7840_v17 }
0x20d1   : > { %5544 = vperm.xlu1 %7372, %v5378_v4   ;;  %5602 = vperm.xlu2 %7374, %v5378_v4   ;;  %v6050_v4 = vld [vmem:[%s9769_s1 + $0x48] sm:$0xff] }
0x20d2   : > { %5432 = vperm.xlu0 %7376, %v5381_v18  }
0x20d5   : > { %v5387_v51 = vpop.f32.mrf.mxu1 }
0x20d9   : > { %7375 = vset.pattern.permute.xlu1 %v7823_v38  ;;  %7377 = vset.pattern.permute.xlu2 %v7841_v26 }
0x20da   : > { %7386 = vset.pattern.permute.xlu0 %v7843_v36  ;;  %5401 = vperm.xlu1 %7375, %v5381_v18  }
0x20db   : > { %5461 = vperm.xlu2 %7377, %v5381_v18   ;;  %5523 = vperm.xlu0 %7386, %v5384_v20  }
0x20e2   : > { %7379 = vset.pattern.permute.xlu1 %v7843_v36 }
0x20e3   : > { %7378 = vset.pattern.permute.xlu2 %v7842_v50  ;;  %7389 = vset.pattern.permute.xlu0 %v7823_v38 }
0x20e4   : > { %5519 = vperm.xlu1 %7379, %v5381_v18   ;;  %5490 = vperm.xlu2 %7378, %v5381_v18  }
0x20e5   : > { %5411 = vperm.xlu0 %7389, %v5387_v51  }
0x20ec   : > { %7381 = vset.pattern.permute.xlu1 %v7844_v9  ;;  %7380 = vset.pattern.permute.xlu2 %v7845_v48 }
0x20ed   : > { %7391 = vset.pattern.permute.xlu0 %v7841_v26  ;;  %5577 = vperm.xlu1 %7381, %v5381_v18  }
0x20ee   : > { %5548 = vperm.xlu2 %7380, %v5381_v18   ;;  %5469 = vperm.xlu0 %7391, %v5387_v51  }
0x20f5   : > { %7382 = vset.pattern.permute.xlu1 %v7823_v38 }
0x20f6   : > { %7383 = vset.pattern.permute.xlu2 %v7840_v17  ;;  %7395 = vset.pattern.permute.xlu0 %v7846_v44 }
0x20f7   : > { %5406 = vperm.xlu1 %7382, %v5384_v20   ;;  %5436 = vperm.xlu2 %7383, %v5384_v20  }
0x20f8   : > { %5606 = vperm.xlu0 %7395, %v5381_v18  }
0x20ff   : > { %7385 = vset.pattern.permute.xlu1 %v7842_v50  ;;  %7384 = vset.pattern.permute.xlu2 %v7841_v26 }
0x2100   : > { %5494 = vperm.xlu1 %7385, %v5384_v20   ;;  %5465 = vperm.xlu2 %7384, %v5384_v20  }
0x2108   : > { %7388 = vset.pattern.permute.xlu1 %v7844_v9  ;;  %7387 = vset.pattern.permute.xlu2 %v7845_v48 }
0x2109   : > { %5581 = vperm.xlu1 %7388, %v5384_v20   ;;  %5552 = vperm.xlu2 %7387, %v5384_v20  }
0x2111   : > { %7390 = vset.pattern.permute.xlu1 %v7840_v17  ;;  %7392 = vset.pattern.permute.xlu2 %v7842_v50 }
0x2112   : > { %5440 = vperm.xlu1 %7390, %v5387_v51   ;;  %5498 = vperm.xlu2 %7392, %v5387_v51  }
0x2118   : > { %v5429_v38 = vpop.permute.xlu2 %5428 }
0x2119   : > { %v5443_v37 = vmul.f32 %v6045_v41, %v5429_v38  ;;  %v6054_v38 = vld [vmem:[%s9769_s1 + $0x68] sm:$0xff] }
0x211a   : > { %7393 = vset.pattern.permute.xlu1 %v7843_v36  ;;  %7394 = vset.pattern.permute.xlu2 %v7845_v48  ;;  %v6055_v48 = vld [vmem:[%s9769_s1 + $0x70] sm:$0xff]  ;;  %v6058_v41 = vld [vmem:[%s9769_s1 + $0x88] sm:$0xff] }
0x211b   : > { %5527 = vperm.xlu1 %7393, %v5387_v51   ;;  %5556 = vperm.xlu2 %7394, %v5387_v51  }
0x2122   : > { %v5516_v40 = vpop.permute.xlu2 %5515 }
0x2123   : > { %7396 = vset.pattern.permute.xlu1 %v7844_v9  ;;  %7397 = vset.pattern.permute.xlu2 %v7846_v44  ;;  %v5530_v8 = vmul.f32 %v6057_v45, %v5516_v40  ;;  %v6051_v9 = vld [vmem:[%s9769_s1 + $0x50] sm:$0xff] }
0x2124   : > { %5585 = vperm.xlu1 %7396, %v5387_v51   ;;  %5610 = vperm.xlu2 %7397, %v5384_v20  }
0x212b   : > { %v5603_v3 = vpop.permute.xlu2 %5602 }
0x212c   : > { %7398 = vset.pattern.permute.xlu1 %v7846_v44  ;;  %v5617_v17 = vmul.f32 %v6069_v14, %v5603_v3  ;;  %v5645_v3 = vld [vmem:[#allocation16 + $0x20] sm:$0xff] }
0x212d   : > { %5614 = vperm.xlu1 %7398, %v5387_v51   ;;  %v6048_v51 = vld [vmem:[%s9769_s1 + $0x38] sm:$0xff]  ;;  %v6063_v14 = vld [vmem:[%s9769_s1 + $0xb0] sm:$0xff] }
0x2130   : > { %v5458_v55 = vpop.permute.xlu1 %5457 }
0x2131   : > { %v5397_v56 = vpop.permute.xlu0 %5396  ;;  %v5472_v30 = vmul.f32 %v6049_v43, %v5458_v55  ;;  %v5393_v43 = vld [vmem:[%s9769_s1 + $0x18] sm:$0xff] }
0x2132   : > { %v5414_v57 = vmul.f32 %v5397_v56, %v5390_v24 }
0x2134   : > { %v5447_v54 = vadd.f32 %v5443_v37, %v5414_v57 }
0x2135   : > { %v5462_v21 = vpop.permute.xlu2 %5461 }
0x2136   : > { %v5476_v58 = vadd.f32 %v5472_v30, %v5447_v54  ;;  %v5473_v44 = vmul.f32 %v6050_v4, %v5462_v21  ;;  %v5646_v30 = vld [vmem:[#allocation16 + $0x28] sm:$0xff]  ;;  %v6067_v21 = vld [vmem:[%s9769_s1 + $0xd0] sm:$0xff] }
0x2137   : > { %5661 = vmatpush.msra.mxu3 %v5646_v30  ;;  %v6064_v4 = vld [vmem:[%s9769_s1 + $0xb8] sm:$0xff] }
0x2139   : > { %v5487_v61 = vpop.permute.xlu1 %5486  ;;  %5662 = vmatpush.msra.mxu3 %v5645_v3 }
0x213a   : > { %v5501_v0 = vmul.f32 %v6053_v60, %v5487_v61  ;;  %v5574_v33 = vpop.permute.xlu0 %5573 }
0x213b   : > { %v5588_v22 = vmul.f32 %v6065_v52, %v5574_v33  ;;  %v5644_v33 = vld [vmem:[#allocation16 + $0x18] sm:$0xff] }
0x213c   : > { %v5505_v6 = vadd.f32 %v5501_v0, %v5476_v58  ;;  %v6059_v58 = vld [vmem:[%s9769_s1 + $0x90] sm:$0xff]  ;;  %5663 = vmatpush.msra.mxu3 %v5644_v33 }
0x213e   : > { %v5534_v7 = vadd.f32 %v5530_v8, %v5505_v6  ;;  %v5491_v5 = vpop.permute.xlu2 %5490  ;;  %v6052_v6 = vld [vmem:[%s9769_s1 + $0x58] sm:$0xff] }
0x213f   : > { %v5502_v54 = vmul.f32 %v6054_v38, %v5491_v5 }
0x2143   : > { %v5545_v11 = vpop.permute.xlu1 %5544 }
0x2144   : > { %v5559_v13 = vmul.f32 %v6061_v49, %v5545_v11  ;;  %v5433_v29 = vpop.permute.xlu0 %5432 }
0x2145   : > { %v5444_v34 = vmul.f32 %v6046_v35, %v5433_v29  ;;  %v5641_v35 = vld [vmem:[#allocation16] sm:$0xff] }
0x2146   : > { %v5563_v53 = vadd.f32 %v5559_v13, %v5534_v7  ;;  %v6062_v7 = vld [vmem:[%s9769_s1 + $0xa8] sm:$0xff] }
0x2147   : > { %v6066_v13 = vld [vmem:[%s9769_s1 + $0xc8] sm:$0xff] }
0x2148   : > { %v5592_v26 = vadd.f32 %v5588_v22, %v5563_v53  ;;  %v5549_v10 = vpop.permute.xlu2 %5548 }
0x214a   : > { %v9524_v12 = vadd.f32 %v5617_v17, %v5592_v26  ;;  %v5643_v17 = vld [vmem:[#allocation16 + $0x10] sm:$0xff]  ;;  %v5560_v26 = vmul.f32 %v6062_v7, %v5549_v10 }
0x214b   : > { %5664 = vmatpush.msra.mxu3 %v5643_v17 }
0x214c   : > { %v5402_v62 = vpop.permute.xlu1 %5401 }
0x214d   : > { %v5524_v15 = vpop.permute.xlu0 %5523  ;;  %v5415_v31 = vmul.f32 %v5402_v62, %v5391_v63  ;;  %v6070_v62 = vld [vmem:[%s9769_s1 + $0xe8] sm:$0xff]  ;;  %v6071_v63 = vld [vmem:[%s9769_s1 + $0xf0] sm:$0xff] }
0x214e   : > { %v5532_v49 = vmul.f32 %v6059_v58, %v5524_v15  ;;  %v5642_v15 = vld [vmem:[#allocation16 + $0x8] sm:$0xff] }
0x214f   : > { %v5448_v36 = vadd.f32 %v5444_v34, %v5415_v31  ;;  %5665 = vmatpush.msra.mxu3 %v5642_v15 }
0x2151   : > { %v5437_v1 = vpop.permute.xlu2 %5436  ;;  %v5477_v40 = vadd.f32 %v5473_v44, %v5448_v36  ;;  %5666 = vmatpush.msra.mxu3 %v5641_v35 }
0x2152   : > { %v5445_v50 = vmul.f32 %v6047_v2, %v5437_v1  ;;  %v6060_v1 = vld [vmem:[%s9769_s1 + $0x98] sm:$0xff] }
0x2153   : > { %v5506_v8 = vadd.f32 %v5502_v54, %v5477_v40 }
0x2156   : > { %v5520_v23 = vpop.permute.xlu1 %5519 }
0x2157   : > { %v5412_v42 = vpop.permute.xlu0 %5411  ;;  %v5531_v60 = vmul.f32 %v6058_v41, %v5520_v23  ;;  %v6056_v23 = vld [vmem:[%s9769_s1 + $0x78] sm:$0xff]  ;;  %v5625_v41 = vsel %vm4992_vm5, %v9524_v12, 0.0 }
0x2158   : > { %v5417_v61 = vmul.f32 %v5412_v42, %v5393_v43 }
0x2159   : > { %v5535_v11 = vadd.f32 %v5531_v60, %v5506_v8 }
0x215a   : > { %v5466_v47 = vpop.permute.xlu2 %5465 }
0x215b   : > { %v5474_v24 = vmul.f32 %v6051_v9, %v5466_v47  ;;  %v5564_v42 = vadd.f32 %v5560_v26, %v5535_v11 }
0x215f   : > { %v9526_v16 = vpop.permute.xlu1 %5577 }
0x2160   : > { %v5470_v20 = vpop.permute.xlu0 %5469 }
0x2161   : > { %v5475_v22 = vmul.f32 %v6052_v6, %v5470_v20  ;;  %v6072_v20 = vld [vmem:[%s9769_s1 + $0xf8] sm:$0xff]  ;;  %v5647_v6 = vld [vmem:[%s8060_s25] sm:$0x1] }
0x2163   : > { %v5553_v28 = vpop.permute.xlu2 %5552 }
0x2164   : > { %v5561_v29 = vmul.f32 %v6063_v14, %v5553_v28 }
0x2169   : > { %v5407_v19 = vpop.permute.xlu1 %5406 }
0x216a   : > { %v5416_v25 = vmul.f32 %v5407_v19, %v5392_v46  ;;  %v5607_v5 = vpop.permute.xlu0 %5606  ;;  %v5589_v19 = vmul.f32 %v6066_v13, %v9526_v16 }
0x216b   : > { %v5618_v31 = vmul.f32 %v6070_v62, %v5607_v5 }
0x216c   : > { %v9530_v27 = vpop.permute.xlu2 %5498  ;;  %v5449_v18 = vadd.f32 %v5445_v50, %v5416_v25  ;;  %v5593_v16 = vadd.f32 %v5589_v19, %v5564_v42  ;;  %v6068_v50 = vld [vmem:[%s9769_s1 + $0xd8] sm:$0xff]  ;;  %s9773_s1 = smov %s9772_s16  ;;  %s7689_s16 = scalar_lea.hbm %s7688_s18, 1 }
0x216d   : > { %v5504_v10 = vmul.f32 %v6056_v23, %v9530_v27  ;;  %p7690_p9 = scmp.ne.s32.totalorder %s7688_s18, %s7689_s16  ;;  %s7693_s22 = scalar_lea.hbm %s9773_s1, 2 }
0x216e   : > { %v5478_v37 = vadd.f32 %v5474_v24, %v5449_v18  ;;  %v5622_v36 = vadd.f32 %v5618_v31, %v5593_v16  ;;  %p7694_p11 = scmp.lt.s32.totalorder %s7688_s18, %s9773_s1  ;;  %p7695_p13 = scmp.lt.s32.totalorder %s7693_s22, %s7689_s16 }
0x216f   : > { %p7691_p12 = pnand %p7690_p9, %p8105_p5 }
0x2170   : > { %p7696_p1 = por %p7695_p13, %p7694_p11 }
0x2171   : > { %p7692_p0 = pneg %p7691_p12 }
0x2172   : > { %v5495_v32 = vpop.permute.xlu1 %5494 }
0x2173   : > { %v5503_v55 = vmul.f32 %v6055_v48, %v5495_v32  ;;  %p7697_p2 = pnand %p7696_p1, %p7692_p0 }
0x2175   : > { %v5557_v56 = vpop.permute.xlu2 %5556  ;;  %v5507_v0 = vadd.f32 %v5503_v55, %v5478_v37 }
0x2176   : > { %v5562_v48 = vmul.f32 %v6064_v4, %v5557_v56 }
0x2177   : > { %v5536_v53 = vadd.f32 %v5532_v49, %v5507_v0  ;;  %v5638_v0 = vld [vmem:[%s9770_s8] sm:$0x1] }
0x2179   : > { %v5565_v2 = vadd.f32 %v5561_v29, %v5536_v53 }
0x217b   : > { %v5582_v39 = vpop.permute.xlu1 %5581 }
0x217c   : > { %v5590_v47 = vmul.f32 %v6067_v21, %v5582_v39 }
0x217e   : > { %v5611_v46 = vpop.permute.xlu2 %5610  ;;  %v5594_v28 = vadd.f32 %v5590_v47, %v5565_v2 }
0x217f   : > { %v5619_v39 = vmul.f32 %v6071_v63, %v5611_v46 }
0x2181   : > { %v5623_v18 = vadd.f32 %v5619_v39, %v5594_v28 }
0x2183   : > { %v5628_v24 = vsel %vm4992_vm5, %v5623_v18, 0.0 }
0x2184   : > { %v5441_v59 = vpop.permute.xlu1 %5440 }
0x2185   : > { %v5446_v57 = vmul.f32 %v6048_v51, %v5441_v59  ;;  %v5626_v51 = vsel %vm4992_vm5, %v5622_v36, 0.0 }
0x2186   : > { %v5627_v43 = vadd.f32 %v5626_v51, %v5625_v41 }
0x2187   : > { %v5450_v52 = vadd.f32 %v5446_v57, %v5417_v61 }
0x2188   : > { %v5629_v57 = vadd.f32 %v5628_v24, %v5627_v43 }
0x2189   : > { %v5479_v32 = vadd.f32 %v5475_v22, %v5450_v52 }
0x218b   : > { %v5508_v34 = vadd.f32 %v5504_v10, %v5479_v32 }
0x218d   : > { %v5528_v45 = vpop.permute.xlu1 %5527 }
0x218e   : > { %v5533_v25 = vmul.f32 %v6060_v1, %v5528_v45 }
0x2190   : > { %v5537_v9 = vadd.f32 %v5533_v25, %v5508_v34 }
0x2192   : > { %v5566_v27 = vadd.f32 %v5562_v48, %v5537_v9 }
0x2196   : > { %v5586_v59 = vpop.permute.xlu1 %5585 }
0x2197   : > { %v5591_v44 = vmul.f32 %v6068_v50, %v5586_v59 }
0x2199   : > { %v5595_v55 = vadd.f32 %v5591_v44, %v5566_v27 }
0x219f   : > { %v5615_v38 = vpop.permute.xlu1 %5614 }
0x21a0   : > { %v5620_v40 = vmul.f32 %v6072_v20, %v5615_v38 }
0x21a2   : > { %v5624_v37 = vadd.f32 %v5620_v40, %v5595_v55 }
0x21a4   : > { %v5630_v56 = vsel %vm4992_vm5, %v5624_v37, 0.0 }
0x21a5   : > { %v5631_v30 = vadd.f32 %v5630_v56, %v5629_v57 }
0x21a7   : > { %v5632_v54 = vrot.slane %v5631_v30, 4 }
0x21a9   : > { %v5633_v58 = vadd.f32 %v5632_v54, %v5631_v30 }
0x21ab   : > { %v5634_v60 = vrot.slane %v5633_v58, 2 }
0x21ad   : > { %v5635_v45 = vadd.f32 %v5634_v60, %v5633_v58 }
0x21af   : > { %v5636_v61 = vrot.slane %v5635_v45, 1 }
0x21b1   : > { %v5637_v3 = vadd.f32 %v5636_v61, %v5635_v45 }
0x21b3   : > { %v5639_v12 = vadd.f32 %v5638_v0, %v5637_v3 }
0x21b5   : > { %v5640_v8 = vmax.f32 %v5639_v12, 0.0 }
0x21b7   : > { %6073 = vmatmul.msk.f32.vlgmr.msra.gmra.mxu3 %vm4992_vm5, %v5640_v8 }
0x223a   : > { %v5668_v7 = vpop.f32.mrf.mxu3 }
0x223b   : > { %v5669_v49 = vadd.f32 %v5668_v7, %v5647_v6 }
0x223d   : > { %v5671_v52 = vsub.f32 0.0, %v5669_v49 }
0x223f   : > { %v5672_v33 = vmul.f32 1.442695, %v5671_v52 }
0x2241   : > { %7399 = vpow2.f32 %v5672_v33 }
0x2247   : > { %v7400_v11 = vpop.eup %7399 }
0x2248   : > { %v5674_v13 = vadd.f32 1.0, %v7400_v11 }
0x224a   : > { %7401 = vrcp.f32 %v5674_v13  ;;  %v5686_v53 = vand.u32 2147483648, %v5674_v13  ;;  %v5684_v26 = vand.u32 2147483647, %v5674_v13  ;;  %vm5680_vm9 = vweird.f32 %v5674_v13 }
0x224c   : > { %v5687_v5 = vor.u32 1.1754944e-38, %v5686_v53  ;;  %vm5685_vm12 = vcmp.eq.f32.partialorder %v5684_v26, 8.507059e+37 }
0x2250   : > { %v7402_v14 = vpop.eup %7401 }
0x2251   : > { %v5676_v21 = vmul.f32 %v7402_v14, %v5674_v13  ;;  %vm5681_vm8 = vweird.f32 %v7402_v14 }
0x2252   : > { %vm5682_vm10 = vmor %vm5680_vm9, %vm5681_vm8 }
0x2253   : > { %v5677_v22 = vsub.f32 1.0, %v5676_v21 }
0x2255   : > { %v5678_v17 = vmul.f32 %v7402_v14, %v5677_v22 }
0x2257   : > { %v5679_v62 = vadd.f32 %v7402_v14, %v5678_v17 }
0x2259   : > { %v5683_v23 = vsel %vm5682_vm10, %v7402_v14, %v5679_v62 }
0x225a   : > { %v5688_v1 = vsel %vm5685_vm12, %v5687_v5, %v5683_v23 }
0x225b   : > { %5691 = vst.msk [vmem:[%s1407_s2] sm:$0x1] %vm5690_vm11, %v5688_v1 }
0x225c   : > { %7700 = shalt.err (!%p7697_p2)
}
0x225d   : > { %6115 = dma.vmem_to_hbm [thread:$0]  (%p8105_p5), %s5704_s3, 16, %s5706_s4, %s5693_s0  }
0x225e PF: > { %s9775_s6 = sld [smem:[#allocation59_spill]] }
0x225f   : > { %s9776_s2 = sld [smem:[#allocation56_spill]] }
0x2264   : > { %p6167_p3 = scmp.ge.s32.totalorder %s9775_s6, 2 }
0x2265   : > { %s5717_s7 = sand.u32 1, %s9776_s2  }
0x2266   : > { %p6146_p4 = pnand %p6167_p3, %p8109_p6  ;;  %s5718_s8 = scalar_lea.sflag [#allocation4], %s5717_s7 }
0x2268   : > { %p6147_p7 = pneg %p6146_p4 }
0x226a   : > { %7738 = dma.done.wait (%p6147_p7), %s5718_s8, 16  }
0x226b   : > { %7740 = vsyncadd (%p6147_p7), %s5718_s8, 4294967280  ;;  %s9778_s22 = sld [smem:[#allocation60_spill]] }
0x226c   : > { %s9779_s15 = sld [smem:[#allocation57_spill]] }
0x226d   : > { %s9780_s16 = sld [smem:[#allocation58_spill]] }
0x226e   : > { %s9781_s18 = sld [smem:[#allocation61_spill]] }
0x2271   : > { %p100_p8 = scmp.ge.s32.totalorder %s9778_s22, 4  }
0x2273   :  { %102 = sbr.rel (!%p100_p8) target bundleno = 90 (0x5a), region = 309 }
0x2278   :  { %5723 = vsyncpa [#allocation3], 1 }
0x2279   :  { %5725 = vsyncpa [#allocation3 + $0x1], 1 }
0x227a   :  { %5726 = vsyncpa [#allocation6], 1 }
0x227b   :  { %5727 = vsyncpa [#allocation9], 1 }
0x227c   :  { %5728 = vsyncpa [#allocation12], 1 }
0x227d   :  { %5729 = vsyncpa [#allocation15], 1 }
0x227e   :  { %5730 = vsyncpa [#allocation4], 1 }
0x227f   :  { %5732 = vsyncpa [#allocation4 + $0x1], 1 }

</bundles_post_ra>
